<compile_context>
chip_gen: v5e
topology: v5e:2x2
jax: 0.10.0
libtpu: 0.0.40
codegen_flags: <defaults>
</compile_context>

<pallas_src>
import functools
import math

import jax
import jax.numpy as jnp
from jax.experimental import pallas as pl
from jax.experimental.pallas import tpu as pltpu

LN_EPS = 1e-5
CPAD = 128            # lane-width channel padding used by the convs / flatten / Predit-1 weight

PARAM_KEYS = (
    "wq", "wk", "wv", "bq", "bk", "bv", "wo", "bo",
    "ln1g", "ln1b", "wff1", "bff1", "wff2", "bff2", "ln2g", "ln2b",
    "wout", "bout", "gw1", "gb1", "gw2", "gb2",
    "cw1", "cs1", "cw2", "cs2",
    "pw1", "pb1", "pw2", "pb2", "pw3", "pb3", "pw4e", "pb4e", "pw4o", "pb4o",
)
_NP = len(PARAM_KEYS)


# ----------------------------- small helpers -----------------------------

def _layer_norm(x, g, b, eps):
    mu = jnp.mean(x, axis=-1, keepdims=True)
    var = jnp.mean(jnp.square(x - mu), axis=-1, keepdims=True)
    return (x - mu) * jax.lax.rsqrt(var + eps) * g + b


def _elu(x):
    return jnp.where(x > 0, x, jnp.exp(jnp.minimum(x, 0.0)) - 1.0)


def _mm(a_f32, w_bf16):
    # weight-bearing matmul: bf16 operands, f32 accumulation
    return jnp.dot(a_f32.astype(jnp.bfloat16), w_bf16, preferred_element_type=jnp.float32)


def _batch_spec(shape):
    n = len(shape)
    return pl.BlockSpec((1,) + tuple(shape[1:]), lambda b, _n=n: (b,) + (0,) * (_n - 1))


def _const_spec(shape):
    n = len(shape)
    return pl.BlockSpec(tuple(shape), lambda b, _n=n: (0,) * _n)


# ----------------------------- the fused kernel -----------------------------

def fused_model_kernel(*refs, num_layer, nhead):
    x_ref, adj_ref, mask_ref = refs[:3]
    w = dict(zip(PARAM_KEYS, refs[3:3 + _NP]))
    out0_ref, out1_ref = refs[3 + _NP:5 + _NP]
    xp1_ref, cols1_ref, xp2_ref, cols2_ref, attn_ref, flat_ref = refs[5 + _NP:]

    L = x_ref.shape[1]
    D = x_ref.shape[2]
    H = nhead
    Dh = D // H
    scale = 1.0 / math.sqrt(Dh)
    R0 = 8                              # sublane-aligned row offset of the conv interiors

    # additive key-padding bias built in-kernel from the int32 mask (kept in f32)
    bias_row = jnp.where(mask_ref[0] != 0, jnp.float32(-1e9), jnp.float32(0.0))   # (1, L)

    h = x_ref[0]                        # (L, D) f32

    # -------- transformer encoder stack (post-norm), per-head weights --------
    # static python loop is fine for a tiny stack; switch to lax.fori_loop over the stacked
    # leading axis if num_layer is ever scaled up.
    for l in range(num_layer):
        hb = h.astype(jnp.bfloat16)
        for hd in range(H):
            i = l * H + hd
            q = jnp.dot(hb, w["wq"][i], preferred_element_type=jnp.float32) + w["bq"][i]
            k = jnp.dot(hb, w["wk"][i], preferred_element_type=jnp.float32) + w["bk"][i]
            v = jnp.dot(hb, w["wv"][i], preferred_element_type=jnp.float32) + w["bv"][i]
            # q @ k^T (activation-activation: keep f32), softmax stats in f32
            s = jax.lax.dot_general(q, k, (((1,), (1,)), ((), ())),
                                    preferred_element_type=jnp.float32) * scale
            s = s + bias_row
            s = s - jnp.max(s, axis=-1, keepdims=True)
            p = jnp.exp(s)
            p = p * pl.reciprocal(jnp.sum(p, axis=-1, keepdims=True), approx=True)
            head = jnp.dot(p, v, preferred_element_type=jnp.float32)           # (L, Dh)
            attn_ref[:, hd * Dh:(hd + 1) * Dh] = head                          # head concat
        attn = _mm(attn_ref[...], w["wo"][l]) + w["bo"][l]                     # one Wo matmul
        h = _layer_norm(h + attn, w["ln1g"][l], w["ln1b"][l], LN_EPS)
        ff = jnp.maximum(_mm(h, w["wff1"][l]) + w["bff1"][l], 0.0)
        ff = _mm(ff, w["wff2"][l]) + w["bff2"][l]
        h = _layer_norm(h + ff, w["ln2g"][l], w["ln2b"][l], LN_EPS)

    # -------- final encoder projection d_model -> 12*d_model --------
    att = _mm(h, w["wout"][...]) + w["bout"][...]                              # (L, D12)
    D12 = att.shape[1]

    # -------- 2-layer GCN:  relu(A (X W1 + b1)) -> A (H W2 + b2) --------
    adj_b = adj_ref[0]                                                         # (L, L) f32
    g1 = _mm(att, w["gw1"][...]) + w["gb1"][...]
    g1 = jnp.maximum(jnp.dot(adj_b, g1, preferred_element_type=jnp.float32), 0.0)   # (L, 32)
    g2 = _mm(g1, w["gw2"][...]) + w["gb2"][...]
    g2 = jnp.dot(adj_b, g2, preferred_element_type=jnp.float32)                # (L, 16)
    C2 = g2.shape[1]

    # -------- Conv1d(9, pad 4) + BN(folded) + ELU as ONE im2col matmul --------
    # xp1: (R0*2 + L, 128) zero-padded input, interior at sublane-aligned rows [R0, R0+L).
    # Full memset is one aligned store and guarantees halo rows AND the 112:128 channel-pad
    # columns are exact zeros (NaN hygiene for the zero weight rows).
    K1 = w["cw1"].shape[0] // CPAD
    pad1 = (K1 - 1) // 2
    xp1_ref[...] = jnp.zeros_like(xp1_ref)
    xp1_ref[R0:R0 + L, 0:D12] = att
    xp1_ref[R0:R0 + L, D12:D12 + C2] = g2
    for k in range(K1):                 # im2col slab: 128-lane-aligned column writes
        cols1_ref[:, k * CPAD:(k + 1) * CPAD] = xp1_ref[R0 - pad1 + k:R0 - pad1 + k + L, :]
    y1 = _elu(_mm(cols1_ref[...], w["cw1"][...]) + w["cs1"][...])              # (L, 96)

    # -------- Conv1d(3, pad 1) + BN(folded) + ELU as ONE im2col matmul --------
    # conv2 output channels are zero-padded 48->128 inside the weight so the flatten below
    # stays lane-aligned (pad channels hit zero rows of the first Predit weight).
    K2 = w["cw2"].shape[0] // CPAD
    pad2 = (K2 - 1) // 2
    xp2_ref[...] = jnp.zeros_like(xp2_ref)
    xp2_ref[R0:R0 + L, 0:y1.shape[1]] = y1
    for k in range(K2):
        cols2_ref[:, k * CPAD:(k + 1) * CPAD] = xp2_ref[R0 - pad2 + k:R0 - pad2 + k + L, :]
    y2 = _elu(_mm(cols2_ref[...], w["cw2"][...]) + w["cs2"][...])              # (L, 128)

    # -------- lane-aligned flatten (1, L*128) feeding the Predit chain --------
    # torch's channel-major flatten of the NCL conv output is reproduced by the row
    # permutation + zero-row padding baked into pw1 (see prepare_params).
    for l in range(L):
        flat_ref[:, l * CPAD:(l + 1) * CPAD] = y2[l:l + 1, :]
    f = flat_ref[...]                                                          # (1, L*128)

    # -------- Predit MLP (BN folded) + per-position 2-way softmax --------
    z = jnp.maximum(_mm(f, w["pw1"][...]) + w["pb1"][...], 0.0)                # (1, 32L)
    z = jnp.maximum(_mm(z, w["pw2"][...]) + w["pb2"][...], 0.0)                # (1, 16L)
    z = jnp.maximum(_mm(z, w["pw3"][...]) + w["pb3"][...], 0.0)                # (1, 8L)
    # last linear split into even/odd output columns == class 0 / class 1 of view(B, -1, 2);
    # the reference Predit_layer ends with BatchNorm+ReLU, so the ReLU is kept.
    ze = jnp.maximum(_mm(z, w["pw4e"][...]) + w["pb4e"][...], 0.0)             # (1, L)
    zo = jnp.maximum(_mm(z, w["pw4o"][...]) + w["pb4o"][...], 0.0)             # (1, L)
    m = jnp.maximum(ze, zo)
    ee = jnp.exp(ze - m)
    eo = jnp.exp(zo - m)
    inv = pl.reciprocal(ee + eo, approx=True)
    out0_ref[0] = ee * inv
    out1_ref[0] = eo * inv


def fused_forward_call(x, adj, mask_i32, params, nhead, num_layer):
    B, L, D = x.shape
    K1 = params["cw1"].shape[0] // CPAD
    K2 = params["cw2"].shape[0] // CPAD
    operands = [x, adj, mask_i32] + [params[k] for k in PARAM_KEYS]
    in_specs = ([_batch_spec(x.shape), _batch_spec(adj.shape), _batch_spec(mask_i32.shape)]
                + [_const_spec(params[k].shape) for k in PARAM_KEYS])
    out_shape = (jax.ShapeDtypeStruct((B, 1, L), jnp.float32),
                 jax.ShapeDtypeStruct((B, 1, L), jnp.float32))
    out_specs = (pl.BlockSpec((1, 1, L), lambda b: (b, 0, 0)),
                 pl.BlockSpec((1, 1, L), lambda b: (b, 0, 0)))
    return pl.pallas_call(
        functools.partial(fused_model_kernel, num_layer=num_layer, nhead=nhead),
        out_shape=out_shape,
        grid=(B,),
        in_specs=in_specs,
        out_specs=out_specs,
        scratch_shapes=[
            pltpu.VMEM((L + 16, CPAD), jnp.float32),     # zero-padded conv1 input
            pltpu.VMEM((L, K1 * CPAD), jnp.float32),     # conv1 im2col slab
            pltpu.VMEM((L + 16, CPAD), jnp.float32),     # zero-padded conv2 input
            pltpu.VMEM((L, K2 * CPAD), jnp.float32),     # conv2 im2col slab
            pltpu.VMEM((L, D), jnp.float32),             # concatenated attention heads
            pltpu.VMEM((1, L * CPAD), jnp.float32),      # lane-aligned flattened conv output
        ],
        compiler_params=pltpu.CompilerParams(dimension_semantics=("parallel",)),
    )(*operands)


def model_forward(x, adj, src_padding_mask, params, nhead, num_layer):
    B, L, _ = x.shape
    mask_i32 = src_padding_mask.astype(jnp.int32)[:, None, :]          # (B, 1, L)
    p0, p1 = fused_forward_call(x, adj, mask_i32, params, nhead, num_layer)
    return jnp.stack([p0[:, 0, :], p1[:, 0, :]], axis=-1)              # (B, L, 2)


# ----------------------------- deterministic raw init + folding -----------------------------

def init_raw_params(key, d_model, nhead, num_layer, length):
    D = d_model
    D12 = 12 * D
    Dff = 4 * D
    keys = iter(jax.random.split(key, 256))

    def nk():
        return next(keys)

    def W(shape):
        return (jax.random.normal(nk(), shape, jnp.float32) / math.sqrt(shape[0])).astype(jnp.float32)

    def bias(n):
        return (0.01 * jax.random.normal(nk(), (n,), jnp.float32)).astype(jnp.float32)

    def bn(n):
        gamma = 1.0 + 0.1 * jax.random.normal(nk(), (n,), jnp.float32)
        beta = 0.05 * jax.random.normal(nk(), (n,), jnp.float32)
        mean = 0.02 * jax.random.normal(nk(), (n,), jnp.float32)
        var = 1.0 + 0.1 * jnp.abs(jax.random.normal(nk(), (n,), jnp.float32))
        scale = gamma / jnp.sqrt(var + 1e-5)
        shift = beta - mean * scale
        return scale.astype(jnp.float32), shift.astype(jnp.float32)

    enc_layers = []
    for _ in range(num_layer):
        enc_layers.append(dict(
            Wq=W((D, D)), bq=bias(D), Wk=W((D, D)), bk=bias(D),
            Wv=W((D, D)), bv=bias(D), Wo=W((D, D)), bo=bias(D),
            ln1_g=jnp.ones((D,), jnp.float32), ln1_b=jnp.zeros((D,), jnp.float32),
            Wff1=W((D, Dff)), bff1=bias(Dff), Wff2=W((Dff, D)), bff2=bias(D),
            ln2_g=jnp.ones((D,), jnp.float32), ln2_b=jnp.zeros((D,), jnp.float32)))

    raw = dict(enc_layers=enc_layers,
               Wout=W((D, D12)), bout=bias(D12),
               gnn_W1=W((D12, 32)), gnn_b1=bias(32),
               gnn_W2=W((32, 16)), gnn_b2=bias(16))

    cin1 = D12 + 16
    raw["conv1_w"] = (jax.random.normal(nk(), (9, D12, cin1), jnp.float32)
                      / math.sqrt(9 * cin1)).astype(jnp.float32)   # (K, Cout, Cin)
    raw["conv1_b"] = bias(D12)
    raw["bn1_s"], raw["bn1_t"] = bn(D12)

    raw["conv2_w"] = (jax.random.normal(nk(), (3, 48, D12), jnp.float32)
                      / math.sqrt(3 * D12)).astype(jnp.float32)    # (K, Cout, Cin)
    raw["conv2_b"] = bias(48)
    raw["bn2_s"], raw["bn2_t"] = bn(48)

    predit = []
    dims = [length * 48, length * 32, length * 16, length * 8, length * 2]
    for i in range(4):
        Wl = W((dims[i], dims[i + 1]))
        bl = bias(dims[i + 1])
        sl, tl = bn(dims[i + 1])
        predit.append((Wl, bl, sl, tl))
    raw["predit"] = predit
    return raw


def prepare_params(raw, d_model, nhead, num_layer, length):
    """Split in-projections per head, fold eval-BatchNorm affines into the weights, build
    channel-padded im2col conv weights, permute + zero-pad the first Predit weight so the
    kernel can consume its lane-aligned (1, L*128) flatten, split the last Predit layer into
    even/odd (class 0 / class 1) columns, and cast all matmul weights to bf16."""
    D = d_model
    H = nhead
    Dh = D // H
    bf = jnp.bfloat16
    enc = raw["enc_layers"]

    def heads_w(name):
        return jnp.stack([p[name][:, hd * Dh:(hd + 1) * Dh]
                          for p in enc for hd in range(H)]).astype(bf)

    def heads_b(name):
        return jnp.stack([p[name][hd * Dh:(hd + 1) * Dh][None, :]
                          for p in enc for hd in range(H)])

    out = dict(
        wq=heads_w("Wq"), wk=heads_w("Wk"), wv=heads_w("Wv"),
        bq=heads_b("bq"), bk=heads_b("bk"), bv=heads_b("bv"),
        wo=jnp.stack([p["Wo"] for p in enc]).astype(bf),
        bo=jnp.stack([p["bo"][None, :] for p in enc]),
        ln1g=jnp.stack([p["ln1_g"][None, :] for p in enc]),
        ln1b=jnp.stack([p["ln1_b"][None, :] for p in enc]),
        wff1=jnp.stack([p["Wff1"] for p in enc]).astype(bf),
        bff1=jnp.stack([p["bff1"][None, :] for p in enc]),
        wff2=jnp.stack([p["Wff2"] for p in enc]).astype(bf),
        bff2=jnp.stack([p["bff2"][None, :] for p in enc]),
        ln2g=jnp.stack([p["ln2_g"][None, :] for p in enc]),
        ln2b=jnp.stack([p["ln2_b"][None, :] for p in enc]),
        wout=raw["Wout"].astype(bf), bout=raw["bout"][None, :],
        gw1=raw["gnn_W1"].astype(bf), gb1=raw["gnn_b1"][None, :],
        gw2=raw["gnn_W2"].astype(bf), gb2=raw["gnn_b2"][None, :],
    )

    def fold_conv(w_kco_ci, cb, s, t, cout_pad):
        # ELU((conv(x)+cb)*s + t) == ELU(conv_{W*s}(x) + (cb*s+t)); im2col layout (K*128, Cout)
        K, Cout, Cin = w_kco_ci.shape
        wt = jnp.transpose(w_kco_ci, (0, 2, 1)) * s[None, None, :]          # (K, Cin, Cout)
        wt = jnp.concatenate([wt, jnp.zeros((K, CPAD - Cin, Cout), jnp.float32)], axis=1)
        shift = cb * s + t
        if cout_pad > Cout:
            wt = jnp.concatenate([wt, jnp.zeros((K, CPAD, cout_pad - Cout), jnp.float32)], axis=2)
            shift = jnp.concatenate([shift, jnp.zeros((cout_pad - Cout,), jnp.float32)])
        return wt.reshape(K * CPAD, cout_pad).astype(bf), shift[None, :].astype(jnp.float32)

    out["cw1"], out["cs1"] = fold_conv(raw["conv1_w"], raw["conv1_b"],
                                       raw["bn1_s"], raw["bn1_t"], cout_pad=12 * D)
    out["cw2"], out["cs2"] = fold_conv(raw["conv2_w"], raw["conv2_b"],
                                       raw["bn2_s"], raw["bn2_t"], cout_pad=CPAD)

    (W1, b1, s1, t1), (W2, b2, s2, t2), (W3, b3, s3, t3), (W4, b4, s4, t4) = raw["predit"]
    L, C = length, 48
    N1 = W1.shape[1]
    # torch flattens the NCL conv output channel-major: f[c*L + l] = y[c, l].
    # The kernel flattens its channel-padded NLC output lane-aligned: f'[l*128 + c] = y[l, c]
    # (c >= 48 are dead pad channels).  Permute + zero-pad W1's rows so f @ W1 == f' @ pw1.
    # TODO(synk): for realistic lengths pw1 is O(L^2) -- K-tile it over a grid axis there.
    W1f = jnp.transpose((W1 * s1[None, :]).reshape(C, L, N1), (1, 0, 2))    # [l, c, n]
    W1f = jnp.concatenate([W1f, jnp.zeros((L, CPAD - C, N1), jnp.float32)], axis=1)
    out["pw1"] = W1f.reshape(L * CPAD, N1).astype(bf)
    out["pb1"] = (b1 * s1 + t1)[None, :]
    out["pw2"] = (W2 * s2[None, :]).astype(bf)
    out["pb2"] = (b2 * s2 + t2)[None, :]
    out["pw3"] = (W3 * s3[None, :]).astype(bf)
    out["pb3"] = (b3 * s3 + t3)[None, :]
    W4f = W4 * s4[None, :]
    b4f = b4 * s4 + t4
    out["pw4e"] = W4f[:, 0::2].astype(bf)
    out["pb4e"] = b4f[0::2][None, :]
    out["pw4o"] = W4f[:, 1::2].astype(bf)
    out["pb4o"] = b4f[1::2][None, :]

    # weights -> bf16, biases / shifts / LayerNorm params -> f32
    return {k: (v if v.dtype == jnp.bfloat16 else v.astype(jnp.float32)) for k, v in out.items()}


# ----------------------------- main -----------------------------

if __name__ == "__main__":
    d_model = 8
    nhead = 2
    num_layer = 2
    batch_size = 2
    length = 16

    key = jax.random.PRNGKey(0)
    kx, kadj, kp = jax.random.split(key, 3)

    x = jax.random.normal(kx, (batch_size, length, d_model), jnp.float32)

    # random symmetric adjacency with self-loops, row-normalized
    a = jax.random.uniform(kadj, (batch_size, length, length), jnp.float32)
    a = (a + jnp.transpose(a, (0, 2, 1))) * 0.5
    a = jnp.where(a > 0.6, 1.0, 0.0) + jnp.eye(length, dtype=jnp.float32)[None]
    adj = a / jnp.sum(a, axis=-1, keepdims=True)

    src_padding_mask = jnp.zeros((batch_size, length), dtype=bool)
    src_padding_mask = src_padding_mask.at[1, length - 2:].set(True)

    raw_params = init_raw_params(kp, d_model, nhead, num_layer, length)
    params = prepare_params(raw_params, d_model, nhead, num_layer, length)

    fwd = jax.jit(functools.partial(model_forward, nhead=nhead, num_layer=num_layer))
    out = fwd(x, adj, src_padding_mask, params)
    out = jax.block_until_ready(out)

    assert out.shape == (batch_size, length, 2)
    assert bool(jnp.all(jnp.isfinite(out)))
    # rows of the 2-class softmax must sum to ~1 (approx-reciprocal tolerance)
    assert bool(jnp.allclose(jnp.sum(out, axis=-1), 1.0, atol=1e-2))
    print("KERNEL_OK")
</pallas_src>

<mosaic_0001>
module attributes {stable_mosaic.version = 11 : i64} {
  func.func @fused_model_kernel(%arg0: i32, %arg1: memref<1x16x8xf32, #tpu.memory_space<vmem>>, %arg2: memref<1x16x16xf32, #tpu.memory_space<vmem>>, %arg3: memref<1x1x16xi32, #tpu.memory_space<vmem>>, %arg4: memref<4x8x4xbf16, #tpu.memory_space<vmem>>, %arg5: memref<4x8x4xbf16, #tpu.memory_space<vmem>>, %arg6: memref<4x8x4xbf16, #tpu.memory_space<vmem>>, %arg7: memref<4x1x4xf32, #tpu.memory_space<vmem>>, %arg8: memref<4x1x4xf32, #tpu.memory_space<vmem>>, %arg9: memref<4x1x4xf32, #tpu.memory_space<vmem>>, %arg10: memref<2x8x8xbf16, #tpu.memory_space<vmem>>, %arg11: memref<2x1x8xf32, #tpu.memory_space<vmem>>, %arg12: memref<2x1x8xf32, #tpu.memory_space<vmem>>, %arg13: memref<2x1x8xf32, #tpu.memory_space<vmem>>, %arg14: memref<2x8x32xbf16, #tpu.memory_space<vmem>>, %arg15: memref<2x1x32xf32, #tpu.memory_space<vmem>>, %arg16: memref<2x32x8xbf16, #tpu.memory_space<vmem>>, %arg17: memref<2x1x8xf32, #tpu.memory_space<vmem>>, %arg18: memref<2x1x8xf32, #tpu.memory_space<vmem>>, %arg19: memref<2x1x8xf32, #tpu.memory_space<vmem>>, %arg20: memref<8x96xbf16, #tpu.memory_space<vmem>>, %arg21: memref<1x96xf32, #tpu.memory_space<vmem>>, %arg22: memref<96x32xbf16, #tpu.memory_space<vmem>>, %arg23: memref<1x32xf32, #tpu.memory_space<vmem>>, %arg24: memref<32x16xbf16, #tpu.memory_space<vmem>>, %arg25: memref<1x16xf32, #tpu.memory_space<vmem>>, %arg26: memref<1152x96xbf16, #tpu.memory_space<vmem>>, %arg27: memref<1x96xf32, #tpu.memory_space<vmem>>, %arg28: memref<384x128xbf16, #tpu.memory_space<vmem>>, %arg29: memref<1x128xf32, #tpu.memory_space<vmem>>, %arg30: memref<2048x512xbf16, #tpu.memory_space<vmem>>, %arg31: memref<1x512xf32, #tpu.memory_space<vmem>>, %arg32: memref<512x256xbf16, #tpu.memory_space<vmem>>, %arg33: memref<1x256xf32, #tpu.memory_space<vmem>>, %arg34: memref<256x128xbf16, #tpu.memory_space<vmem>>, %arg35: memref<1x128xf32, #tpu.memory_space<vmem>>, %arg36: memref<128x16xbf16, #tpu.memory_space<vmem>>, %arg37: memref<1x16xf32, #tpu.memory_space<vmem>>, %arg38: memref<128x16xbf16, #tpu.memory_space<vmem>>, %arg39: memref<1x16xf32, #tpu.memory_space<vmem>>, %arg40: memref<1x1x16xf32, #tpu.memory_space<vmem>>, %arg41: memref<1x1x16xf32, #tpu.memory_space<vmem>>, %arg42: memref<32x128xf32, #tpu.memory_space<vmem>>, %arg43: memref<16x1152xf32, #tpu.memory_space<vmem>>, %arg44: memref<32x128xf32, #tpu.memory_space<vmem>>, %arg45: memref<16x384xf32, #tpu.memory_space<vmem>>, %arg46: memref<16x8xf32, #tpu.memory_space<vmem>>, %arg47: memref<1x2048xf32, #tpu.memory_space<vmem>>) attributes {dimension_semantics = [#tpu.dimension_semantics<parallel>], iteration_bounds = array<i64: 2>, scalar_prefetch = 0 : i64, scratch_operands = 6 : i64, tpu.core_type = #tpu.core_type<tc>, window_params = [{transform_indices = @transform_0, window_bounds = array<i64: 1, 16, 8>}, {transform_indices = @transform_1, window_bounds = array<i64: 1, 16, 16>}, {transform_indices = @transform_2, window_bounds = array<i64: 1, 1, 16>}, {pipeline_mode = #tpu.pipeline_mode<synchronous>, transform_indices = @transform_3, window_bounds = array<i64: 4, 8, 4>}, {pipeline_mode = #tpu.pipeline_mode<synchronous>, transform_indices = @transform_4, window_bounds = array<i64: 4, 8, 4>}, {pipeline_mode = #tpu.pipeline_mode<synchronous>, transform_indices = @transform_5, window_bounds = array<i64: 4, 8, 4>}, {pipeline_mode = #tpu.pipeline_mode<synchronous>, transform_indices = @transform_6, window_bounds = array<i64: 4, 1, 4>}, {pipeline_mode = #tpu.pipeline_mode<synchronous>, transform_indices = @transform_7, window_bounds = array<i64: 4, 1, 4>}, {pipeline_mode = #tpu.pipeline_mode<synchronous>, transform_indices = @transform_8, window_bounds = array<i64: 4, 1, 4>}, {pipeline_mode = #tpu.pipeline_mode<synchronous>, transform_indices = @transform_9, window_bounds = array<i64: 2, 8, 8>}, {pipeline_mode = #tpu.pipeline_mode<synchronous>, transform_indices = @transform_10, window_bounds = array<i64: 2, 1, 8>}, {pipeline_mode = #tpu.pipeline_mode<synchronous>, transform_indices = @transform_11, window_bounds = array<i64: 2, 1, 8>}, {pipeline_mode = #tpu.pipeline_mode<synchronous>, transform_indices = @transform_12, window_bounds = array<i64: 2, 1, 8>}, {pipeline_mode = #tpu.pipeline_mode<synchronous>, transform_indices = @transform_13, window_bounds = array<i64: 2, 8, 32>}, {pipeline_mode = #tpu.pipeline_mode<synchronous>, transform_indices = @transform_14, window_bounds = array<i64: 2, 1, 32>}, {pipeline_mode = #tpu.pipeline_mode<synchronous>, transform_indices = @transform_15, window_bounds = array<i64: 2, 32, 8>}, {pipeline_mode = #tpu.pipeline_mode<synchronous>, transform_indices = @transform_16, window_bounds = array<i64: 2, 1, 8>}, {pipeline_mode = #tpu.pipeline_mode<synchronous>, transform_indices = @transform_17, window_bounds = array<i64: 2, 1, 8>}, {pipeline_mode = #tpu.pipeline_mode<synchronous>, transform_indices = @transform_18, window_bounds = array<i64: 2, 1, 8>}, {pipeline_mode = #tpu.pipeline_mode<synchronous>, transform_indices = @transform_19, window_bounds = array<i64: 8, 96>}, {pipeline_mode = #tpu.pipeline_mode<synchronous>, transform_indices = @transform_20, window_bounds = array<i64: 1, 96>}, {pipeline_mode = #tpu.pipeline_mode<synchronous>, transform_indices = @transform_21, window_bounds = array<i64: 96, 32>}, {pipeline_mode = #tpu.pipeline_mode<synchronous>, transform_indices = @transform_22, window_bounds = array<i64: 1, 32>}, {pipeline_mode = #tpu.pipeline_mode<synchronous>, transform_indices = @transform_23, window_bounds = array<i64: 32, 16>}, {pipeline_mode = #tpu.pipeline_mode<synchronous>, transform_indices = @transform_24, window_bounds = array<i64: 1, 16>}, {pipeline_mode = #tpu.pipeline_mode<synchronous>, transform_indices = @transform_25, window_bounds = array<i64: 1152, 96>}, {pipeline_mode = #tpu.pipeline_mode<synchronous>, transform_indices = @transform_26, window_bounds = array<i64: 1, 96>}, {pipeline_mode = #tpu.pipeline_mode<synchronous>, transform_indices = @transform_27, window_bounds = array<i64: 384, 128>}, {pipeline_mode = #tpu.pipeline_mode<synchronous>, transform_indices = @transform_28, window_bounds = array<i64: 1, 128>}, {pipeline_mode = #tpu.pipeline_mode<synchronous>, transform_indices = @transform_29, window_bounds = array<i64: 2048, 512>}, {pipeline_mode = #tpu.pipeline_mode<synchronous>, transform_indices = @transform_30, window_bounds = array<i64: 1, 512>}, {pipeline_mode = #tpu.pipeline_mode<synchronous>, transform_indices = @transform_31, window_bounds = array<i64: 512, 256>}, {pipeline_mode = #tpu.pipeline_mode<synchronous>, transform_indices = @transform_32, window_bounds = array<i64: 1, 256>}, {pipeline_mode = #tpu.pipeline_mode<synchronous>, transform_indices = @transform_33, window_bounds = array<i64: 256, 128>}, {pipeline_mode = #tpu.pipeline_mode<synchronous>, transform_indices = @transform_34, window_bounds = array<i64: 1, 128>}, {pipeline_mode = #tpu.pipeline_mode<synchronous>, transform_indices = @transform_35, window_bounds = array<i64: 128, 16>}, {pipeline_mode = #tpu.pipeline_mode<synchronous>, transform_indices = @transform_36, window_bounds = array<i64: 1, 16>}, {pipeline_mode = #tpu.pipeline_mode<synchronous>, transform_indices = @transform_37, window_bounds = array<i64: 128, 16>}, {pipeline_mode = #tpu.pipeline_mode<synchronous>, transform_indices = @transform_38, window_bounds = array<i64: 1, 16>}, {transform_indices = @transform_39, window_bounds = array<i64: 1, 1, 16>}, {transform_indices = @transform_40, window_bounds = array<i64: 1, 1, 16>}]} {
    %c0 = arith.constant 0 : index
    %c0_0 = arith.constant 0 : index
    %c0_1 = arith.constant 0 : index
    %0 = vector.load %arg3[%c0, %c0_0, %c0_1] : memref<1x1x16xi32, #tpu.memory_space<vmem>>, vector<1x1x16xi32>
    %1 = vector.shape_cast %0 : vector<1x1x16xi32> to vector<1x16xi32>
    %c0_i32 = arith.constant 0 : i32
    %2 = vector.broadcast %c0_i32 : i32 to vector<1x16xi32>
    %3 = arith.cmpi ne, %1, %2 : vector<1x16xi32>
    %cst = arith.constant -1.000000e+09 : f32
    %cst_2 = arith.constant 0.000000e+00 : f32
    %4 = vector.broadcast %cst : f32 to vector<1x16xf32>
    %5 = vector.broadcast %cst_2 : f32 to vector<1x16xf32>
    %6 = arith.select %3, %4, %5 : vector<1x16xi1>, vector<1x16xf32>
    %c0_3 = arith.constant 0 : index
    %c0_4 = arith.constant 0 : index
    %c0_5 = arith.constant 0 : index
    %7 = vector.load %arg1[%c0_3, %c0_4, %c0_5] : memref<1x16x8xf32, #tpu.memory_space<vmem>>, vector<1x16x8xf32>
    %8 = vector.shape_cast %7 : vector<1x16x8xf32> to vector<16x8xf32>
    %9 = arith.truncf %8 : vector<16x8xf32> to vector<16x8xbf16>
    %c0_6 = arith.constant 0 : index
    %c0_7 = arith.constant 0 : index
    %c0_8 = arith.constant 0 : index
    %10 = vector.load %arg4[%c0_6, %c0_7, %c0_8] : memref<4x8x4xbf16, #tpu.memory_space<vmem>>, vector<1x8x4xbf16>
    %11 = vector.shape_cast %10 : vector<1x8x4xbf16> to vector<8x4xbf16>
    %cst_9 = arith.constant dense<0.000000e+00> : vector<16x4xf32>
    %12 = tpu.matmul %9, %11, %cst_9 {dimension_numbers = #tpu.dot_dimension_numbers<[1], [0], [0], [1], [0, 0, 1, 1], [], []>} : vector<16x8xbf16>, vector<8x4xbf16>, vector<16x4xf32> -> vector<16x4xf32>
    %c0_10 = arith.constant 0 : index
    %c0_11 = arith.constant 0 : index
    %c0_12 = arith.constant 0 : index
    %13 = vector.load %arg7[%c0_10, %c0_11, %c0_12] : memref<4x1x4xf32, #tpu.memory_space<vmem>>, vector<1x1x4xf32>
    %14 = vector.shape_cast %13 : vector<1x1x4xf32> to vector<1x4xf32>
    %15 = vector.broadcast %14 : vector<1x4xf32> to vector<16x4xf32>
    %16 = arith.addf %12, %15 : vector<16x4xf32>
    %c0_13 = arith.constant 0 : index
    %c0_14 = arith.constant 0 : index
    %c0_15 = arith.constant 0 : index
    %17 = vector.load %arg5[%c0_13, %c0_14, %c0_15] : memref<4x8x4xbf16, #tpu.memory_space<vmem>>, vector<1x8x4xbf16>
    %18 = vector.shape_cast %17 : vector<1x8x4xbf16> to vector<8x4xbf16>
    %cst_16 = arith.constant dense<0.000000e+00> : vector<16x4xf32>
    %19 = tpu.matmul %9, %18, %cst_16 {dimension_numbers = #tpu.dot_dimension_numbers<[1], [0], [0], [1], [0, 0, 1, 1], [], []>} : vector<16x8xbf16>, vector<8x4xbf16>, vector<16x4xf32> -> vector<16x4xf32>
    %c0_17 = arith.constant 0 : index
    %c0_18 = arith.constant 0 : index
    %c0_19 = arith.constant 0 : index
    %20 = vector.load %arg8[%c0_17, %c0_18, %c0_19] : memref<4x1x4xf32, #tpu.memory_space<vmem>>, vector<1x1x4xf32>
    %21 = vector.shape_cast %20 : vector<1x1x4xf32> to vector<1x4xf32>
    %22 = vector.broadcast %21 : vector<1x4xf32> to vector<16x4xf32>
    %23 = arith.addf %19, %22 : vector<16x4xf32>
    %c0_20 = arith.constant 0 : index
    %c0_21 = arith.constant 0 : index
    %c0_22 = arith.constant 0 : index
    %24 = vector.load %arg6[%c0_20, %c0_21, %c0_22] : memref<4x8x4xbf16, #tpu.memory_space<vmem>>, vector<1x8x4xbf16>
    %25 = vector.shape_cast %24 : vector<1x8x4xbf16> to vector<8x4xbf16>
    %cst_23 = arith.constant dense<0.000000e+00> : vector<16x4xf32>
    %26 = tpu.matmul %9, %25, %cst_23 {dimension_numbers = #tpu.dot_dimension_numbers<[1], [0], [0], [1], [0, 0, 1, 1], [], []>} : vector<16x8xbf16>, vector<8x4xbf16>, vector<16x4xf32> -> vector<16x4xf32>
    %c0_24 = arith.constant 0 : index
    %c0_25 = arith.constant 0 : index
    %c0_26 = arith.constant 0 : index
    %27 = vector.load %arg9[%c0_24, %c0_25, %c0_26] : memref<4x1x4xf32, #tpu.memory_space<vmem>>, vector<1x1x4xf32>
    %28 = vector.shape_cast %27 : vector<1x1x4xf32> to vector<1x4xf32>
    %29 = vector.broadcast %28 : vector<1x4xf32> to vector<16x4xf32>
    %30 = arith.addf %26, %29 : vector<16x4xf32>
    %cst_27 = arith.constant dense<0.000000e+00> : vector<16x16xf32>
    %31 = tpu.matmul %16, %23, %cst_27 {dimension_numbers = #tpu.dot_dimension_numbers<[1], [1], [0], [0], [0, 0, 1, 0], [], []>} : vector<16x4xf32>, vector<16x4xf32>, vector<16x16xf32> -> vector<16x16xf32>
    %cst_28 = arith.constant 5.000000e-01 : f32
    %32 = vector.broadcast %cst_28 : f32 to vector<16x16xf32>
    %33 = arith.mulf %31, %32 : vector<16x16xf32>
    %34 = vector.broadcast %6 : vector<1x16xf32> to vector<16x16xf32>
    %35 = arith.addf %33, %34 : vector<16x16xf32>
    %cst_29 = arith.constant dense<0xFF800000> : vector<16xf32>
    %36 = vector.multi_reduction <maximumf>, %35, %cst_29 [1] : vector<16x16xf32> to vector<16xf32>
    %37 = vector.shape_cast %36 : vector<16xf32> to vector<16x1xf32>
    %38 = vector.broadcast %37 : vector<16x1xf32> to vector<16x16xf32>
    %39 = arith.subf %35, %38 : vector<16x16xf32>
    %40 = math.exp %39 : vector<16x16xf32>
    %cst_30 = arith.constant dense<0.000000e+00> : vector<16xf32>
    %41 = vector.multi_reduction <add>, %40, %cst_30 [1] : vector<16x16xf32> to vector<16xf32>
    %42 = vector.shape_cast %41 : vector<16xf32> to vector<16x1xf32>
    %43 = tpu.reciprocal %42 {approx = true} : vector<16x1xf32> -> vector<16x1xf32>
    %44 = vector.broadcast %43 : vector<16x1xf32> to vector<16x16xf32>
    %45 = arith.mulf %40, %44 : vector<16x16xf32>
    %cst_31 = arith.constant dense<0.000000e+00> : vector<16x4xf32>
    %46 = tpu.matmul %45, %30, %cst_31 {dimension_numbers = #tpu.dot_dimension_numbers<[1], [0], [0], [1], [0, 0, 1, 1], [], []>} : vector<16x16xf32>, vector<16x4xf32>, vector<16x4xf32> -> vector<16x4xf32>
    %c0_32 = arith.constant 0 : index
    %c0_33 = arith.constant 0 : index
    %47 = vector.load %arg46[%c0_32, %c0_33] : memref<16x8xf32, #tpu.memory_space<vmem>>, vector<16x4xf32>
    tpu.vector_store %arg46[%c0_32, %c0_33], %46 {strides = array<i32>} : memref<16x8xf32, #tpu.memory_space<vmem>>, vector<16x4xf32>,
    %c1 = arith.constant 1 : index
    %c0_34 = arith.constant 0 : index
    %c0_35 = arith.constant 0 : index
    %48 = vector.load %arg4[%c1, %c0_34, %c0_35] : memref<4x8x4xbf16, #tpu.memory_space<vmem>>, vector<1x8x4xbf16>
    %49 = vector.shape_cast %48 : vector<1x8x4xbf16> to vector<8x4xbf16>
    %cst_36 = arith.constant dense<0.000000e+00> : vector<16x4xf32>
    %50 = tpu.matmul %9, %49, %cst_36 {dimension_numbers = #tpu.dot_dimension_numbers<[1], [0], [0], [1], [0, 0, 1, 1], [], []>} : vector<16x8xbf16>, vector<8x4xbf16>, vector<16x4xf32> -> vector<16x4xf32>
    %c1_37 = arith.constant 1 : index
    %c0_38 = arith.constant 0 : index
    %c0_39 = arith.constant 0 : index
    %51 = vector.load %arg7[%c1_37, %c0_38, %c0_39] : memref<4x1x4xf32, #tpu.memory_space<vmem>>, vector<1x1x4xf32>
    %52 = vector.shape_cast %51 : vector<1x1x4xf32> to vector<1x4xf32>
    %53 = vector.broadcast %52 : vector<1x4xf32> to vector<16x4xf32>
    %54 = arith.addf %50, %53 : vector<16x4xf32>
    %c1_40 = arith.constant 1 : index
    %c0_41 = arith.constant 0 : index
    %c0_42 = arith.constant 0 : index
    %55 = vector.load %arg5[%c1_40, %c0_41, %c0_42] : memref<4x8x4xbf16, #tpu.memory_space<vmem>>, vector<1x8x4xbf16>
    %56 = vector.shape_cast %55 : vector<1x8x4xbf16> to vector<8x4xbf16>
    %cst_43 = arith.constant dense<0.000000e+00> : vector<16x4xf32>
    %57 = tpu.matmul %9, %56, %cst_43 {dimension_numbers = #tpu.dot_dimension_numbers<[1], [0], [0], [1], [0, 0, 1, 1], [], []>} : vector<16x8xbf16>, vector<8x4xbf16>, vector<16x4xf32> -> vector<16x4xf32>
    %c1_44 = arith.constant 1 : index
    %c0_45 = arith.constant 0 : index
    %c0_46 = arith.constant 0 : index
    %58 = vector.load %arg8[%c1_44, %c0_45, %c0_46] : memref<4x1x4xf32, #tpu.memory_space<vmem>>, vector<1x1x4xf32>
    %59 = vector.shape_cast %58 : vector<1x1x4xf32> to vector<1x4xf32>
    %60 = vector.broadcast %59 : vector<1x4xf32> to vector<16x4xf32>
    %61 = arith.addf %57, %60 : vector<16x4xf32>
    %c1_47 = arith.constant 1 : index
    %c0_48 = arith.constant 0 : index
    %c0_49 = arith.constant 0 : index
    %62 = vector.load %arg6[%c1_47, %c0_48, %c0_49] : memref<4x8x4xbf16, #tpu.memory_space<vmem>>, vector<1x8x4xbf16>
    %63 = vector.shape_cast %62 : vector<1x8x4xbf16> to vector<8x4xbf16>
    %cst_50 = arith.constant dense<0.000000e+00> : vector<16x4xf32>
    %64 = tpu.matmul %9, %63, %cst_50 {dimension_numbers = #tpu.dot_dimension_numbers<[1], [0], [0], [1], [0, 0, 1, 1], [], []>} : vector<16x8xbf16>, vector<8x4xbf16>, vector<16x4xf32> -> vector<16x4xf32>
    %c1_51 = arith.constant 1 : index
    %c0_52 = arith.constant 0 : index
    %c0_53 = arith.constant 0 : index
    %65 = vector.load %arg9[%c1_51, %c0_52, %c0_53] : memref<4x1x4xf32, #tpu.memory_space<vmem>>, vector<1x1x4xf32>
    %66 = vector.shape_cast %65 : vector<1x1x4xf32> to vector<1x4xf32>
    %67 = vector.broadcast %66 : vector<1x4xf32> to vector<16x4xf32>
    %68 = arith.addf %64, %67 : vector<16x4xf32>
    %cst_54 = arith.constant dense<0.000000e+00> : vector<16x16xf32>
    %69 = tpu.matmul %54, %61, %cst_54 {dimension_numbers = #tpu.dot_dimension_numbers<[1], [1], [0], [0], [0, 0, 1, 0], [], []>} : vector<16x4xf32>, vector<16x4xf32>, vector<16x16xf32> -> vector<16x16xf32>
    %cst_55 = arith.constant 5.000000e-01 : f32
    %70 = vector.broadcast %cst_55 : f32 to vector<16x16xf32>
    %71 = arith.mulf %69, %70 : vector<16x16xf32>
    %72 = vector.broadcast %6 : vector<1x16xf32> to vector<16x16xf32>
    %73 = arith.addf %71, %72 : vector<16x16xf32>
    %cst_56 = arith.constant dense<0xFF800000> : vector<16xf32>
    %74 = vector.multi_reduction <maximumf>, %73, %cst_56 [1] : vector<16x16xf32> to vector<16xf32>
    %75 = vector.shape_cast %74 : vector<16xf32> to vector<16x1xf32>
    %76 = vector.broadcast %75 : vector<16x1xf32> to vector<16x16xf32>
    %77 = arith.subf %73, %76 : vector<16x16xf32>
    %78 = math.exp %77 : vector<16x16xf32>
    %cst_57 = arith.constant dense<0.000000e+00> : vector<16xf32>
    %79 = vector.multi_reduction <add>, %78, %cst_57 [1] : vector<16x16xf32> to vector<16xf32>
    %80 = vector.shape_cast %79 : vector<16xf32> to vector<16x1xf32>
    %81 = tpu.reciprocal %80 {approx = true} : vector<16x1xf32> -> vector<16x1xf32>
    %82 = vector.broadcast %81 : vector<16x1xf32> to vector<16x16xf32>
    %83 = arith.mulf %78, %82 : vector<16x16xf32>
    %cst_58 = arith.constant dense<0.000000e+00> : vector<16x4xf32>
    %84 = tpu.matmul %83, %68, %cst_58 {dimension_numbers = #tpu.dot_dimension_numbers<[1], [0], [0], [1], [0, 0, 1, 1], [], []>} : vector<16x16xf32>, vector<16x4xf32>, vector<16x4xf32> -> vector<16x4xf32>
    %c0_59 = arith.constant 0 : index
    %c4 = arith.constant 4 : index
    %85 = vector.load %arg46[%c0_59, %c4] : memref<16x8xf32, #tpu.memory_space<vmem>>, vector<16x4xf32>
    tpu.vector_store %arg46[%c0_59, %c4], %84 {strides = array<i32>} : memref<16x8xf32, #tpu.memory_space<vmem>>, vector<16x4xf32>,
    %c0_60 = arith.constant 0 : index
    %c0_61 = arith.constant 0 : index
    %86 = vector.load %arg46[%c0_60, %c0_61] : memref<16x8xf32, #tpu.memory_space<vmem>>, vector<16x8xf32>
    %c0_62 = arith.constant 0 : index
    %c0_63 = arith.constant 0 : index
    %c0_64 = arith.constant 0 : index
    %87 = vector.load %arg10[%c0_62, %c0_63, %c0_64] : memref<2x8x8xbf16, #tpu.memory_space<vmem>>, vector<1x8x8xbf16>
    %88 = vector.shape_cast %87 : vector<1x8x8xbf16> to vector<8x8xbf16>
    %89 = arith.truncf %86 : vector<16x8xf32> to vector<16x8xbf16>
    %cst_65 = arith.constant dense<0.000000e+00> : vector<16x8xf32>
    %90 = tpu.matmul %89, %88, %cst_65 {dimension_numbers = #tpu.dot_dimension_numbers<[1], [0], [0], [1], [0, 0, 1, 1], [], []>} : vector<16x8xbf16>, vector<8x8xbf16>, vector<16x8xf32> -> vector<16x8xf32>
    %c0_66 = arith.constant 0 : index
    %c0_67 = arith.constant 0 : index
    %c0_68 = arith.constant 0 : index
    %91 = vector.load %arg11[%c0_66, %c0_67, %c0_68] : memref<2x1x8xf32, #tpu.memory_space<vmem>>, vector<1x1x8xf32>
    %92 = vector.shape_cast %91 : vector<1x1x8xf32> to vector<1x8xf32>
    %93 = vector.broadcast %92 : vector<1x8xf32> to vector<16x8xf32>
    %94 = arith.addf %90, %93 : vector<16x8xf32>
    %95 = arith.addf %8, %94 : vector<16x8xf32>
    %c0_69 = arith.constant 0 : index
    %c0_70 = arith.constant 0 : index
    %c0_71 = arith.constant 0 : index
    %96 = vector.load %arg12[%c0_69, %c0_70, %c0_71] : memref<2x1x8xf32, #tpu.memory_space<vmem>>, vector<1x1x8xf32>
    %97 = vector.shape_cast %96 : vector<1x1x8xf32> to vector<1x8xf32>
    %c0_72 = arith.constant 0 : index
    %c0_73 = arith.constant 0 : index
    %c0_74 = arith.constant 0 : index
    %98 = vector.load %arg13[%c0_72, %c0_73, %c0_74] : memref<2x1x8xf32, #tpu.memory_space<vmem>>, vector<1x1x8xf32>
    %99 = vector.shape_cast %98 : vector<1x1x8xf32> to vector<1x8xf32>
    %cst_75 = arith.constant dense<0.000000e+00> : vector<16xf32>
    %100 = vector.multi_reduction <add>, %95, %cst_75 [1] : vector<16x8xf32> to vector<16xf32>
    %101 = vector.shape_cast %100 : vector<16xf32> to vector<16x1xf32>
    %cst_76 = arith.constant 8.000000e+00 : f32
    %102 = vector.broadcast %cst_76 : f32 to vector<16x1xf32>
    %103 = arith.divf %101, %102 : vector<16x1xf32>
    %104 = vector.broadcast %103 : vector<16x1xf32> to vector<16x8xf32>
    %105 = arith.subf %95, %104 : vector<16x8xf32>
    %106 = arith.mulf %105, %105 : vector<16x8xf32>
    %cst_77 = arith.constant dense<0.000000e+00> : vector<16xf32>
    %107 = vector.multi_reduction <add>, %106, %cst_77 [1] : vector<16x8xf32> to vector<16xf32>
    %108 = vector.shape_cast %107 : vector<16xf32> to vector<16x1xf32>
    %cst_78 = arith.constant 8.000000e+00 : f32
    %109 = vector.broadcast %cst_78 : f32 to vector<16x1xf32>
    %110 = arith.divf %108, %109 : vector<16x1xf32>
    %111 = vector.broadcast %103 : vector<16x1xf32> to vector<16x8xf32>
    %112 = arith.subf %95, %111 : vector<16x8xf32>
    %cst_79 = arith.constant 9.99999974E-6 : f32
    %113 = vector.broadcast %cst_79 : f32 to vector<16x1xf32>
    %114 = arith.addf %110, %113 : vector<16x1xf32>
    %115 = math.rsqrt %114 : vector<16x1xf32>
    %116 = vector.broadcast %115 : vector<16x1xf32> to vector<16x8xf32>
    %117 = arith.mulf %112, %116 : vector<16x8xf32>
    %118 = vector.broadcast %97 : vector<1x8xf32> to vector<16x8xf32>
    %119 = arith.mulf %117, %118 : vector<16x8xf32>
    %120 = vector.broadcast %99 : vector<1x8xf32> to vector<16x8xf32>
    %121 = arith.addf %119, %120 : vector<16x8xf32>
    %c0_80 = arith.constant 0 : index
    %c0_81 = arith.constant 0 : index
    %c0_82 = arith.constant 0 : index
    %122 = vector.load %arg14[%c0_80, %c0_81, %c0_82] : memref<2x8x32xbf16, #tpu.memory_space<vmem>>, vector<1x8x32xbf16>
    %123 = vector.shape_cast %122 : vector<1x8x32xbf16> to vector<8x32xbf16>
    %124 = arith.truncf %121 : vector<16x8xf32> to vector<16x8xbf16>
    %cst_83 = arith.constant dense<0.000000e+00> : vector<16x32xf32>
    %125 = tpu.matmul %124, %123, %cst_83 {dimension_numbers = #tpu.dot_dimension_numbers<[1], [0], [0], [1], [0, 0, 1, 1], [], []>} : vector<16x8xbf16>, vector<8x32xbf16>, vector<16x32xf32> -> vector<16x32xf32>
    %c0_84 = arith.constant 0 : index
    %c0_85 = arith.constant 0 : index
    %c0_86 = arith.constant 0 : index
    %126 = vector.load %arg15[%c0_84, %c0_85, %c0_86] : memref<2x1x32xf32, #tpu.memory_space<vmem>>, vector<1x1x32xf32>
    %127 = vector.shape_cast %126 : vector<1x1x32xf32> to vector<1x32xf32>
    %128 = vector.broadcast %127 : vector<1x32xf32> to vector<16x32xf32>
    %129 = arith.addf %125, %128 : vector<16x32xf32>
    %cst_87 = arith.constant 0.000000e+00 : f32
    %130 = vector.broadcast %cst_87 : f32 to vector<16x32xf32>
    %131 = arith.maximumf %129, %130 : vector<16x32xf32>
    %c0_88 = arith.constant 0 : index
    %c0_89 = arith.constant 0 : index
    %c0_90 = arith.constant 0 : index
    %132 = vector.load %arg16[%c0_88, %c0_89, %c0_90] : memref<2x32x8xbf16, #tpu.memory_space<vmem>>, vector<1x32x8xbf16>
    %133 = vector.shape_cast %132 : vector<1x32x8xbf16> to vector<32x8xbf16>
    %134 = arith.truncf %131 : vector<16x32xf32> to vector<16x32xbf16>
    %cst_91 = arith.constant dense<0.000000e+00> : vector<16x8xf32>
    %135 = tpu.matmul %134, %133, %cst_91 {dimension_numbers = #tpu.dot_dimension_numbers<[1], [0], [0], [1], [0, 0, 1, 1], [], []>} : vector<16x32xbf16>, vector<32x8xbf16>, vector<16x8xf32> -> vector<16x8xf32>
    %c0_92 = arith.constant 0 : index
    %c0_93 = arith.constant 0 : index
    %c0_94 = arith.constant 0 : index
    %136 = vector.load %arg17[%c0_92, %c0_93, %c0_94] : memref<2x1x8xf32, #tpu.memory_space<vmem>>, vector<1x1x8xf32>
    %137 = vector.shape_cast %136 : vector<1x1x8xf32> to vector<1x8xf32>
    %138 = vector.broadcast %137 : vector<1x8xf32> to vector<16x8xf32>
    %139 = arith.addf %135, %138 : vector<16x8xf32>
    %140 = arith.addf %121, %139 : vector<16x8xf32>
    %c0_95 = arith.constant 0 : index
    %c0_96 = arith.constant 0 : index
    %c0_97 = arith.constant 0 : index
    %141 = vector.load %arg18[%c0_95, %c0_96, %c0_97] : memref<2x1x8xf32, #tpu.memory_space<vmem>>, vector<1x1x8xf32>
    %142 = vector.shape_cast %141 : vector<1x1x8xf32> to vector<1x8xf32>
    %c0_98 = arith.constant 0 : index
    %c0_99 = arith.constant 0 : index
    %c0_100 = arith.constant 0 : index
    %143 = vector.load %arg19[%c0_98, %c0_99, %c0_100] : memref<2x1x8xf32, #tpu.memory_space<vmem>>, vector<1x1x8xf32>
    %144 = vector.shape_cast %143 : vector<1x1x8xf32> to vector<1x8xf32>
    %cst_101 = arith.constant dense<0.000000e+00> : vector<16xf32>
    %145 = vector.multi_reduction <add>, %140, %cst_101 [1] : vector<16x8xf32> to vector<16xf32>
    %146 = vector.shape_cast %145 : vector<16xf32> to vector<16x1xf32>
    %cst_102 = arith.constant 8.000000e+00 : f32
    %147 = vector.broadcast %cst_102 : f32 to vector<16x1xf32>
    %148 = arith.divf %146, %147 : vector<16x1xf32>
    %149 = vector.broadcast %148 : vector<16x1xf32> to vector<16x8xf32>
    %150 = arith.subf %140, %149 : vector<16x8xf32>
    %151 = arith.mulf %150, %150 : vector<16x8xf32>
    %cst_103 = arith.constant dense<0.000000e+00> : vector<16xf32>
    %152 = vector.multi_reduction <add>, %151, %cst_103 [1] : vector<16x8xf32> to vector<16xf32>
    %153 = vector.shape_cast %152 : vector<16xf32> to vector<16x1xf32>
    %cst_104 = arith.constant 8.000000e+00 : f32
    %154 = vector.broadcast %cst_104 : f32 to vector<16x1xf32>
    %155 = arith.divf %153, %154 : vector<16x1xf32>
    %156 = vector.broadcast %148 : vector<16x1xf32> to vector<16x8xf32>
    %157 = arith.subf %140, %156 : vector<16x8xf32>
    %cst_105 = arith.constant 9.99999974E-6 : f32
    %158 = vector.broadcast %cst_105 : f32 to vector<16x1xf32>
    %159 = arith.addf %155, %158 : vector<16x1xf32>
    %160 = math.rsqrt %159 : vector<16x1xf32>
    %161 = vector.broadcast %160 : vector<16x1xf32> to vector<16x8xf32>
    %162 = arith.mulf %157, %161 : vector<16x8xf32>
    %163 = vector.broadcast %142 : vector<1x8xf32> to vector<16x8xf32>
    %164 = arith.mulf %162, %163 : vector<16x8xf32>
    %165 = vector.broadcast %144 : vector<1x8xf32> to vector<16x8xf32>
    %166 = arith.addf %164, %165 : vector<16x8xf32>
    %167 = arith.truncf %166 : vector<16x8xf32> to vector<16x8xbf16>
    %c2 = arith.constant 2 : index
    %c0_106 = arith.constant 0 : index
    %c0_107 = arith.constant 0 : index
    %168 = vector.load %arg4[%c2, %c0_106, %c0_107] : memref<4x8x4xbf16, #tpu.memory_space<vmem>>, vector<1x8x4xbf16>
    %169 = vector.shape_cast %168 : vector<1x8x4xbf16> to vector<8x4xbf16>
    %cst_108 = arith.constant dense<0.000000e+00> : vector<16x4xf32>
    %170 = tpu.matmul %167, %169, %cst_108 {dimension_numbers = #tpu.dot_dimension_numbers<[1], [0], [0], [1], [0, 0, 1, 1], [], []>} : vector<16x8xbf16>, vector<8x4xbf16>, vector<16x4xf32> -> vector<16x4xf32>
    %c2_109 = arith.constant 2 : index
    %c0_110 = arith.constant 0 : index
    %c0_111 = arith.constant 0 : index
    %171 = vector.load %arg7[%c2_109, %c0_110, %c0_111] : memref<4x1x4xf32, #tpu.memory_space<vmem>>, vector<1x1x4xf32>
    %172 = vector.shape_cast %171 : vector<1x1x4xf32> to vector<1x4xf32>
    %173 = vector.broadcast %172 : vector<1x4xf32> to vector<16x4xf32>
    %174 = arith.addf %170, %173 : vector<16x4xf32>
    %c2_112 = arith.constant 2 : index
    %c0_113 = arith.constant 0 : index
    %c0_114 = arith.constant 0 : index
    %175 = vector.load %arg5[%c2_112, %c0_113, %c0_114] : memref<4x8x4xbf16, #tpu.memory_space<vmem>>, vector<1x8x4xbf16>
    %176 = vector.shape_cast %175 : vector<1x8x4xbf16> to vector<8x4xbf16>
    %cst_115 = arith.constant dense<0.000000e+00> : vector<16x4xf32>
    %177 = tpu.matmul %167, %176, %cst_115 {dimension_numbers = #tpu.dot_dimension_numbers<[1], [0], [0], [1], [0, 0, 1, 1], [], []>} : vector<16x8xbf16>, vector<8x4xbf16>, vector<16x4xf32> -> vector<16x4xf32>
    %c2_116 = arith.constant 2 : index
    %c0_117 = arith.constant 0 : index
    %c0_118 = arith.constant 0 : index
    %178 = vector.load %arg8[%c2_116, %c0_117, %c0_118] : memref<4x1x4xf32, #tpu.memory_space<vmem>>, vector<1x1x4xf32>
    %179 = vector.shape_cast %178 : vector<1x1x4xf32> to vector<1x4xf32>
    %180 = vector.broadcast %179 : vector<1x4xf32> to vector<16x4xf32>
    %181 = arith.addf %177, %180 : vector<16x4xf32>
    %c2_119 = arith.constant 2 : index
    %c0_120 = arith.constant 0 : index
    %c0_121 = arith.constant 0 : index
    %182 = vector.load %arg6[%c2_119, %c0_120, %c0_121] : memref<4x8x4xbf16, #tpu.memory_space<vmem>>, vector<1x8x4xbf16>
    %183 = vector.shape_cast %182 : vector<1x8x4xbf16> to vector<8x4xbf16>
    %cst_122 = arith.constant dense<0.000000e+00> : vector<16x4xf32>
    %184 = tpu.matmul %167, %183, %cst_122 {dimension_numbers = #tpu.dot_dimension_numbers<[1], [0], [0], [1], [0, 0, 1, 1], [], []>} : vector<16x8xbf16>, vector<8x4xbf16>, vector<16x4xf32> -> vector<16x4xf32>
    %c2_123 = arith.constant 2 : index
    %c0_124 = arith.constant 0 : index
    %c0_125 = arith.constant 0 : index
    %185 = vector.load %arg9[%c2_123, %c0_124, %c0_125] : memref<4x1x4xf32, #tpu.memory_space<vmem>>, vector<1x1x4xf32>
    %186 = vector.shape_cast %185 : vector<1x1x4xf32> to vector<1x4xf32>
    %187 = vector.broadcast %186 : vector<1x4xf32> to vector<16x4xf32>
    %188 = arith.addf %184, %187 : vector<16x4xf32>
    %cst_126 = arith.constant dense<0.000000e+00> : vector<16x16xf32>
    %189 = tpu.matmul %174, %181, %cst_126 {dimension_numbers = #tpu.dot_dimension_numbers<[1], [1], [0], [0], [0, 0, 1, 0], [], []>} : vector<16x4xf32>, vector<16x4xf32>, vector<16x16xf32> -> vector<16x16xf32>
    %cst_127 = arith.constant 5.000000e-01 : f32
    %190 = vector.broadcast %cst_127 : f32 to vector<16x16xf32>
    %191 = arith.mulf %189, %190 : vector<16x16xf32>
    %192 = vector.broadcast %6 : vector<1x16xf32> to vector<16x16xf32>
    %193 = arith.addf %191, %192 : vector<16x16xf32>
    %cst_128 = arith.constant dense<0xFF800000> : vector<16xf32>
    %194 = vector.multi_reduction <maximumf>, %193, %cst_128 [1] : vector<16x16xf32> to vector<16xf32>
    %195 = vector.shape_cast %194 : vector<16xf32> to vector<16x1xf32>
    %196 = vector.broadcast %195 : vector<16x1xf32> to vector<16x16xf32>
    %197 = arith.subf %193, %196 : vector<16x16xf32>
    %198 = math.exp %197 : vector<16x16xf32>
    %cst_129 = arith.constant dense<0.000000e+00> : vector<16xf32>
    %199 = vector.multi_reduction <add>, %198, %cst_129 [1] : vector<16x16xf32> to vector<16xf32>
    %200 = vector.shape_cast %199 : vector<16xf32> to vector<16x1xf32>
    %201 = tpu.reciprocal %200 {approx = true} : vector<16x1xf32> -> vector<16x1xf32>
    %202 = vector.broadcast %201 : vector<16x1xf32> to vector<16x16xf32>
    %203 = arith.mulf %198, %202 : vector<16x16xf32>
    %cst_130 = arith.constant dense<0.000000e+00> : vector<16x4xf32>
    %204 = tpu.matmul %203, %188, %cst_130 {dimension_numbers = #tpu.dot_dimension_numbers<[1], [0], [0], [1], [0, 0, 1, 1], [], []>} : vector<16x16xf32>, vector<16x4xf32>, vector<16x4xf32> -> vector<16x4xf32>
    %c0_131 = arith.constant 0 : index
    %c0_132 = arith.constant 0 : index
    %205 = vector.load %arg46[%c0_131, %c0_132] : memref<16x8xf32, #tpu.memory_space<vmem>>, vector<16x4xf32>
    tpu.vector_store %arg46[%c0_131, %c0_132], %204 {strides = array<i32>} : memref<16x8xf32, #tpu.memory_space<vmem>>, vector<16x4xf32>,
    %c3 = arith.constant 3 : index
    %c0_133 = arith.constant 0 : index
    %c0_134 = arith.constant 0 : index
    %206 = vector.load %arg4[%c3, %c0_133, %c0_134] : memref<4x8x4xbf16, #tpu.memory_space<vmem>>, vector<1x8x4xbf16>
    %207 = vector.shape_cast %206 : vector<1x8x4xbf16> to vector<8x4xbf16>
    %cst_135 = arith.constant dense<0.000000e+00> : vector<16x4xf32>
    %208 = tpu.matmul %167, %207, %cst_135 {dimension_numbers = #tpu.dot_dimension_numbers<[1], [0], [0], [1], [0, 0, 1, 1], [], []>} : vector<16x8xbf16>, vector<8x4xbf16>, vector<16x4xf32> -> vector<16x4xf32>
    %c3_136 = arith.constant 3 : index
    %c0_137 = arith.constant 0 : index
    %c0_138 = arith.constant 0 : index
    %209 = vector.load %arg7[%c3_136, %c0_137, %c0_138] : memref<4x1x4xf32, #tpu.memory_space<vmem>>, vector<1x1x4xf32>
    %210 = vector.shape_cast %209 : vector<1x1x4xf32> to vector<1x4xf32>
    %211 = vector.broadcast %210 : vector<1x4xf32> to vector<16x4xf32>
    %212 = arith.addf %208, %211 : vector<16x4xf32>
    %c3_139 = arith.constant 3 : index
    %c0_140 = arith.constant 0 : index
    %c0_141 = arith.constant 0 : index
    %213 = vector.load %arg5[%c3_139, %c0_140, %c0_141] : memref<4x8x4xbf16, #tpu.memory_space<vmem>>, vector<1x8x4xbf16>
    %214 = vector.shape_cast %213 : vector<1x8x4xbf16> to vector<8x4xbf16>
    %cst_142 = arith.constant dense<0.000000e+00> : vector<16x4xf32>
    %215 = tpu.matmul %167, %214, %cst_142 {dimension_numbers = #tpu.dot_dimension_numbers<[1], [0], [0], [1], [0, 0, 1, 1], [], []>} : vector<16x8xbf16>, vector<8x4xbf16>, vector<16x4xf32> -> vector<16x4xf32>
    %c3_143 = arith.constant 3 : index
    %c0_144 = arith.constant 0 : index
    %c0_145 = arith.constant 0 : index
    %216 = vector.load %arg8[%c3_143, %c0_144, %c0_145] : memref<4x1x4xf32, #tpu.memory_space<vmem>>, vector<1x1x4xf32>
    %217 = vector.shape_cast %216 : vector<1x1x4xf32> to vector<1x4xf32>
    %218 = vector.broadcast %217 : vector<1x4xf32> to vector<16x4xf32>
    %219 = arith.addf %215, %218 : vector<16x4xf32>
    %c3_146 = arith.constant 3 : index
    %c0_147 = arith.constant 0 : index
    %c0_148 = arith.constant 0 : index
    %220 = vector.load %arg6[%c3_146, %c0_147, %c0_148] : memref<4x8x4xbf16, #tpu.memory_space<vmem>>, vector<1x8x4xbf16>
    %221 = vector.shape_cast %220 : vector<1x8x4xbf16> to vector<8x4xbf16>
    %cst_149 = arith.constant dense<0.000000e+00> : vector<16x4xf32>
    %222 = tpu.matmul %167, %221, %cst_149 {dimension_numbers = #tpu.dot_dimension_numbers<[1], [0], [0], [1], [0, 0, 1, 1], [], []>} : vector<16x8xbf16>, vector<8x4xbf16>, vector<16x4xf32> -> vector<16x4xf32>
    %c3_150 = arith.constant 3 : index
    %c0_151 = arith.constant 0 : index
    %c0_152 = arith.constant 0 : index
    %223 = vector.load %arg9[%c3_150, %c0_151, %c0_152] : memref<4x1x4xf32, #tpu.memory_space<vmem>>, vector<1x1x4xf32>
    %224 = vector.shape_cast %223 : vector<1x1x4xf32> to vector<1x4xf32>
    %225 = vector.broadcast %224 : vector<1x4xf32> to vector<16x4xf32>
    %226 = arith.addf %222, %225 : vector<16x4xf32>
    %cst_153 = arith.constant dense<0.000000e+00> : vector<16x16xf32>
    %227 = tpu.matmul %212, %219, %cst_153 {dimension_numbers = #tpu.dot_dimension_numbers<[1], [1], [0], [0], [0, 0, 1, 0], [], []>} : vector<16x4xf32>, vector<16x4xf32>, vector<16x16xf32> -> vector<16x16xf32>
    %cst_154 = arith.constant 5.000000e-01 : f32
    %228 = vector.broadcast %cst_154 : f32 to vector<16x16xf32>
    %229 = arith.mulf %227, %228 : vector<16x16xf32>
    %230 = vector.broadcast %6 : vector<1x16xf32> to vector<16x16xf32>
    %231 = arith.addf %229, %230 : vector<16x16xf32>
    %cst_155 = arith.constant dense<0xFF800000> : vector<16xf32>
    %232 = vector.multi_reduction <maximumf>, %231, %cst_155 [1] : vector<16x16xf32> to vector<16xf32>
    %233 = vector.shape_cast %232 : vector<16xf32> to vector<16x1xf32>
    %234 = vector.broadcast %233 : vector<16x1xf32> to vector<16x16xf32>
    %235 = arith.subf %231, %234 : vector<16x16xf32>
    %236 = math.exp %235 : vector<16x16xf32>
    %cst_156 = arith.constant dense<0.000000e+00> : vector<16xf32>
    %237 = vector.multi_reduction <add>, %236, %cst_156 [1] : vector<16x16xf32> to vector<16xf32>
    %238 = vector.shape_cast %237 : vector<16xf32> to vector<16x1xf32>
    %239 = tpu.reciprocal %238 {approx = true} : vector<16x1xf32> -> vector<16x1xf32>
    %240 = vector.broadcast %239 : vector<16x1xf32> to vector<16x16xf32>
    %241 = arith.mulf %236, %240 : vector<16x16xf32>
    %cst_157 = arith.constant dense<0.000000e+00> : vector<16x4xf32>
    %242 = tpu.matmul %241, %226, %cst_157 {dimension_numbers = #tpu.dot_dimension_numbers<[1], [0], [0], [1], [0, 0, 1, 1], [], []>} : vector<16x16xf32>, vector<16x4xf32>, vector<16x4xf32> -> vector<16x4xf32>
    %c0_158 = arith.constant 0 : index
    %c4_159 = arith.constant 4 : index
    %243 = vector.load %arg46[%c0_158, %c4_159] : memref<16x8xf32, #tpu.memory_space<vmem>>, vector<16x4xf32>
    tpu.vector_store %arg46[%c0_158, %c4_159], %242 {strides = array<i32>} : memref<16x8xf32, #tpu.memory_space<vmem>>, vector<16x4xf32>,
    %c0_160 = arith.constant 0 : index
    %c0_161 = arith.constant 0 : index
    %244 = vector.load %arg46[%c0_160, %c0_161] : memref<16x8xf32, #tpu.memory_space<vmem>>, vector<16x8xf32>
    %c1_162 = arith.constant 1 : index
    %c0_163 = arith.constant 0 : index
    %c0_164 = arith.constant 0 : index
    %245 = vector.load %arg10[%c1_162, %c0_163, %c0_164] : memref<2x8x8xbf16, #tpu.memory_space<vmem>>, vector<1x8x8xbf16>
    %246 = vector.shape_cast %245 : vector<1x8x8xbf16> to vector<8x8xbf16>
    %247 = arith.truncf %244 : vector<16x8xf32> to vector<16x8xbf16>
    %cst_165 = arith.constant dense<0.000000e+00> : vector<16x8xf32>
    %248 = tpu.matmul %247, %246, %cst_165 {dimension_numbers = #tpu.dot_dimension_numbers<[1], [0], [0], [1], [0, 0, 1, 1], [], []>} : vector<16x8xbf16>, vector<8x8xbf16>, vector<16x8xf32> -> vector<16x8xf32>
    %c1_166 = arith.constant 1 : index
    %c0_167 = arith.constant 0 : index
    %c0_168 = arith.constant 0 : index
    %249 = vector.load %arg11[%c1_166, %c0_167, %c0_168] : memref<2x1x8xf32, #tpu.memory_space<vmem>>, vector<1x1x8xf32>
    %250 = vector.shape_cast %249 : vector<1x1x8xf32> to vector<1x8xf32>
    %251 = vector.broadcast %250 : vector<1x8xf32> to vector<16x8xf32>
    %252 = arith.addf %248, %251 : vector<16x8xf32>
    %253 = arith.addf %166, %252 : vector<16x8xf32>
    %c1_169 = arith.constant 1 : index
    %c0_170 = arith.constant 0 : index
    %c0_171 = arith.constant 0 : index
    %254 = vector.load %arg12[%c1_169, %c0_170, %c0_171] : memref<2x1x8xf32, #tpu.memory_space<vmem>>, vector<1x1x8xf32>
    %255 = vector.shape_cast %254 : vector<1x1x8xf32> to vector<1x8xf32>
    %c1_172 = arith.constant 1 : index
    %c0_173 = arith.constant 0 : index
    %c0_174 = arith.constant 0 : index
    %256 = vector.load %arg13[%c1_172, %c0_173, %c0_174] : memref<2x1x8xf32, #tpu.memory_space<vmem>>, vector<1x1x8xf32>
    %257 = vector.shape_cast %256 : vector<1x1x8xf32> to vector<1x8xf32>
    %cst_175 = arith.constant dense<0.000000e+00> : vector<16xf32>
    %258 = vector.multi_reduction <add>, %253, %cst_175 [1] : vector<16x8xf32> to vector<16xf32>
    %259 = vector.shape_cast %258 : vector<16xf32> to vector<16x1xf32>
    %cst_176 = arith.constant 8.000000e+00 : f32
    %260 = vector.broadcast %cst_176 : f32 to vector<16x1xf32>
    %261 = arith.divf %259, %260 : vector<16x1xf32>
    %262 = vector.broadcast %261 : vector<16x1xf32> to vector<16x8xf32>
    %263 = arith.subf %253, %262 : vector<16x8xf32>
    %264 = arith.mulf %263, %263 : vector<16x8xf32>
    %cst_177 = arith.constant dense<0.000000e+00> : vector<16xf32>
    %265 = vector.multi_reduction <add>, %264, %cst_177 [1] : vector<16x8xf32> to vector<16xf32>
    %266 = vector.shape_cast %265 : vector<16xf32> to vector<16x1xf32>
    %cst_178 = arith.constant 8.000000e+00 : f32
    %267 = vector.broadcast %cst_178 : f32 to vector<16x1xf32>
    %268 = arith.divf %266, %267 : vector<16x1xf32>
    %269 = vector.broadcast %261 : vector<16x1xf32> to vector<16x8xf32>
    %270 = arith.subf %253, %269 : vector<16x8xf32>
    %cst_179 = arith.constant 9.99999974E-6 : f32
    %271 = vector.broadcast %cst_179 : f32 to vector<16x1xf32>
    %272 = arith.addf %268, %271 : vector<16x1xf32>
    %273 = math.rsqrt %272 : vector<16x1xf32>
    %274 = vector.broadcast %273 : vector<16x1xf32> to vector<16x8xf32>
    %275 = arith.mulf %270, %274 : vector<16x8xf32>
    %276 = vector.broadcast %255 : vector<1x8xf32> to vector<16x8xf32>
    %277 = arith.mulf %275, %276 : vector<16x8xf32>
    %278 = vector.broadcast %257 : vector<1x8xf32> to vector<16x8xf32>
    %279 = arith.addf %277, %278 : vector<16x8xf32>
    %c1_180 = arith.constant 1 : index
    %c0_181 = arith.constant 0 : index
    %c0_182 = arith.constant 0 : index
    %280 = vector.load %arg14[%c1_180, %c0_181, %c0_182] : memref<2x8x32xbf16, #tpu.memory_space<vmem>>, vector<1x8x32xbf16>
    %281 = vector.shape_cast %280 : vector<1x8x32xbf16> to vector<8x32xbf16>
    %282 = arith.truncf %279 : vector<16x8xf32> to vector<16x8xbf16>
    %cst_183 = arith.constant dense<0.000000e+00> : vector<16x32xf32>
    %283 = tpu.matmul %282, %281, %cst_183 {dimension_numbers = #tpu.dot_dimension_numbers<[1], [0], [0], [1], [0, 0, 1, 1], [], []>} : vector<16x8xbf16>, vector<8x32xbf16>, vector<16x32xf32> -> vector<16x32xf32>
    %c1_184 = arith.constant 1 : index
    %c0_185 = arith.constant 0 : index
    %c0_186 = arith.constant 0 : index
    %284 = vector.load %arg15[%c1_184, %c0_185, %c0_186] : memref<2x1x32xf32, #tpu.memory_space<vmem>>, vector<1x1x32xf32>
    %285 = vector.shape_cast %284 : vector<1x1x32xf32> to vector<1x32xf32>
    %286 = vector.broadcast %285 : vector<1x32xf32> to vector<16x32xf32>
    %287 = arith.addf %283, %286 : vector<16x32xf32>
    %cst_187 = arith.constant 0.000000e+00 : f32
    %288 = vector.broadcast %cst_187 : f32 to vector<16x32xf32>
    %289 = arith.maximumf %287, %288 : vector<16x32xf32>
    %c1_188 = arith.constant 1 : index
    %c0_189 = arith.constant 0 : index
    %c0_190 = arith.constant 0 : index
    %290 = vector.load %arg16[%c1_188, %c0_189, %c0_190] : memref<2x32x8xbf16, #tpu.memory_space<vmem>>, vector<1x32x8xbf16>
    %291 = vector.shape_cast %290 : vector<1x32x8xbf16> to vector<32x8xbf16>
    %292 = arith.truncf %289 : vector<16x32xf32> to vector<16x32xbf16>
    %cst_191 = arith.constant dense<0.000000e+00> : vector<16x8xf32>
    %293 = tpu.matmul %292, %291, %cst_191 {dimension_numbers = #tpu.dot_dimension_numbers<[1], [0], [0], [1], [0, 0, 1, 1], [], []>} : vector<16x32xbf16>, vector<32x8xbf16>, vector<16x8xf32> -> vector<16x8xf32>
    %c1_192 = arith.constant 1 : index
    %c0_193 = arith.constant 0 : index
    %c0_194 = arith.constant 0 : index
    %294 = vector.load %arg17[%c1_192, %c0_193, %c0_194] : memref<2x1x8xf32, #tpu.memory_space<vmem>>, vector<1x1x8xf32>
    %295 = vector.shape_cast %294 : vector<1x1x8xf32> to vector<1x8xf32>
    %296 = vector.broadcast %295 : vector<1x8xf32> to vector<16x8xf32>
    %297 = arith.addf %293, %296 : vector<16x8xf32>
    %298 = arith.addf %279, %297 : vector<16x8xf32>
    %c1_195 = arith.constant 1 : index
    %c0_196 = arith.constant 0 : index
    %c0_197 = arith.constant 0 : index
    %299 = vector.load %arg18[%c1_195, %c0_196, %c0_197] : memref<2x1x8xf32, #tpu.memory_space<vmem>>, vector<1x1x8xf32>
    %300 = vector.shape_cast %299 : vector<1x1x8xf32> to vector<1x8xf32>
    %c1_198 = arith.constant 1 : index
    %c0_199 = arith.constant 0 : index
    %c0_200 = arith.constant 0 : index
    %301 = vector.load %arg19[%c1_198, %c0_199, %c0_200] : memref<2x1x8xf32, #tpu.memory_space<vmem>>, vector<1x1x8xf32>
    %302 = vector.shape_cast %301 : vector<1x1x8xf32> to vector<1x8xf32>
    %cst_201 = arith.constant dense<0.000000e+00> : vector<16xf32>
    %303 = vector.multi_reduction <add>, %298, %cst_201 [1] : vector<16x8xf32> to vector<16xf32>
    %304 = vector.shape_cast %303 : vector<16xf32> to vector<16x1xf32>
    %cst_202 = arith.constant 8.000000e+00 : f32
    %305 = vector.broadcast %cst_202 : f32 to vector<16x1xf32>
    %306 = arith.divf %304, %305 : vector<16x1xf32>
    %307 = vector.broadcast %306 : vector<16x1xf32> to vector<16x8xf32>
    %308 = arith.subf %298, %307 : vector<16x8xf32>
    %309 = arith.mulf %308, %308 : vector<16x8xf32>
    %cst_203 = arith.constant dense<0.000000e+00> : vector<16xf32>
    %310 = vector.multi_reduction <add>, %309, %cst_203 [1] : vector<16x8xf32> to vector<16xf32>
    %311 = vector.shape_cast %310 : vector<16xf32> to vector<16x1xf32>
    %cst_204 = arith.constant 8.000000e+00 : f32
    %312 = vector.broadcast %cst_204 : f32 to vector<16x1xf32>
    %313 = arith.divf %311, %312 : vector<16x1xf32>
    %314 = vector.broadcast %306 : vector<16x1xf32> to vector<16x8xf32>
    %315 = arith.subf %298, %314 : vector<16x8xf32>
    %cst_205 = arith.constant 9.99999974E-6 : f32
    %316 = vector.broadcast %cst_205 : f32 to vector<16x1xf32>
    %317 = arith.addf %313, %316 : vector<16x1xf32>
    %318 = math.rsqrt %317 : vector<16x1xf32>
    %319 = vector.broadcast %318 : vector<16x1xf32> to vector<16x8xf32>
    %320 = arith.mulf %315, %319 : vector<16x8xf32>
    %321 = vector.broadcast %300 : vector<1x8xf32> to vector<16x8xf32>
    %322 = arith.mulf %320, %321 : vector<16x8xf32>
    %323 = vector.broadcast %302 : vector<1x8xf32> to vector<16x8xf32>
    %324 = arith.addf %322, %323 : vector<16x8xf32>
    %c0_206 = arith.constant 0 : index
    %c0_207 = arith.constant 0 : index
    %325 = vector.load %arg20[%c0_206, %c0_207] : memref<8x96xbf16, #tpu.memory_space<vmem>>, vector<8x96xbf16>
    %326 = arith.truncf %324 : vector<16x8xf32> to vector<16x8xbf16>
    %cst_208 = arith.constant dense<0.000000e+00> : vector<16x96xf32>
    %327 = tpu.matmul %326, %325, %cst_208 {dimension_numbers = #tpu.dot_dimension_numbers<[1], [0], [0], [1], [0, 0, 1, 1], [], []>} : vector<16x8xbf16>, vector<8x96xbf16>, vector<16x96xf32> -> vector<16x96xf32>
    %c0_209 = arith.constant 0 : index
    %c0_210 = arith.constant 0 : index
    %328 = vector.load %arg21[%c0_209, %c0_210] : memref<1x96xf32, #tpu.memory_space<vmem>>, vector<1x96xf32>
    %329 = vector.broadcast %328 : vector<1x96xf32> to vector<16x96xf32>
    %330 = arith.addf %327, %329 : vector<16x96xf32>
    %c0_211 = arith.constant 0 : index
    %c0_212 = arith.constant 0 : index
    %c0_213 = arith.constant 0 : index
    %331 = vector.load %arg2[%c0_211, %c0_212, %c0_213] : memref<1x16x16xf32, #tpu.memory_space<vmem>>, vector<1x16x16xf32>
    %332 = vector.shape_cast %331 : vector<1x16x16xf32> to vector<16x16xf32>
    %c0_214 = arith.constant 0 : index
    %c0_215 = arith.constant 0 : index
    %333 = vector.load %arg22[%c0_214, %c0_215] : memref<96x32xbf16, #tpu.memory_space<vmem>>, vector<96x32xbf16>
    %334 = arith.truncf %330 : vector<16x96xf32> to vector<16x96xbf16>
    %cst_216 = arith.constant dense<0.000000e+00> : vector<16x32xf32>
    %335 = tpu.matmul %334, %333, %cst_216 {dimension_numbers = #tpu.dot_dimension_numbers<[1], [0], [0], [1], [0, 0, 1, 1], [], []>} : vector<16x96xbf16>, vector<96x32xbf16>, vector<16x32xf32> -> vector<16x32xf32>
    %c0_217 = arith.constant 0 : index
    %c0_218 = arith.constant 0 : index
    %336 = vector.load %arg23[%c0_217, %c0_218] : memref<1x32xf32, #tpu.memory_space<vmem>>, vector<1x32xf32>
    %337 = vector.broadcast %336 : vector<1x32xf32> to vector<16x32xf32>
    %338 = arith.addf %335, %337 : vector<16x32xf32>
    %cst_219 = arith.constant dense<0.000000e+00> : vector<16x32xf32>
    %339 = tpu.matmul %332, %338, %cst_219 {dimension_numbers = #tpu.dot_dimension_numbers<[1], [0], [0], [1], [0, 0, 1, 1], [], []>} : vector<16x16xf32>, vector<16x32xf32>, vector<16x32xf32> -> vector<16x32xf32>
    %cst_220 = arith.constant 0.000000e+00 : f32
    %340 = vector.broadcast %cst_220 : f32 to vector<16x32xf32>
    %341 = arith.maximumf %339, %340 : vector<16x32xf32>
    %c0_221 = arith.constant 0 : index
    %c0_222 = arith.constant 0 : index
    %342 = vector.load %arg24[%c0_221, %c0_222] : memref<32x16xbf16, #tpu.memory_space<vmem>>, vector<32x16xbf16>
    %343 = arith.truncf %341 : vector<16x32xf32> to vector<16x32xbf16>
    %cst_223 = arith.constant dense<0.000000e+00> : vector<16x16xf32>
    %344 = tpu.matmul %343, %342, %cst_223 {dimension_numbers = #tpu.dot_dimension_numbers<[1], [0], [0], [1], [0, 0, 1, 1], [], []>} : vector<16x32xbf16>, vector<32x16xbf16>, vector<16x16xf32> -> vector<16x16xf32>
    %c0_224 = arith.constant 0 : index
    %c0_225 = arith.constant 0 : index
    %345 = vector.load %arg25[%c0_224, %c0_225] : memref<1x16xf32, #tpu.memory_space<vmem>>, vector<1x16xf32>
    %346 = vector.broadcast %345 : vector<1x16xf32> to vector<16x16xf32>
    %347 = arith.addf %344, %346 : vector<16x16xf32>
    %cst_226 = arith.constant dense<0.000000e+00> : vector<16x16xf32>
    %348 = tpu.matmul %332, %347, %cst_226 {dimension_numbers = #tpu.dot_dimension_numbers<[1], [0], [0], [1], [0, 0, 1, 1], [], []>} : vector<16x16xf32>, vector<16x16xf32>, vector<16x16xf32> -> vector<16x16xf32>
    %cst_227 = arith.constant 0.000000e+00 : f32
    %349 = vector.broadcast %cst_227 : f32 to vector<32x128xf32>
    %c0_228 = arith.constant 0 : index
    %c0_229 = arith.constant 0 : index
    %350 = vector.load %arg42[%c0_228, %c0_229] : memref<32x128xf32, #tpu.memory_space<vmem>>, vector<32x128xf32>
    tpu.vector_store %arg42[%c0_228, %c0_229], %349 {strides = array<i32>} : memref<32x128xf32, #tpu.memory_space<vmem>>, vector<32x128xf32>,
    %c8 = arith.constant 8 : index
    %c0_230 = arith.constant 0 : index
    %351 = vector.load %arg42[%c8, %c0_230] : memref<32x128xf32, #tpu.memory_space<vmem>>, vector<16x96xf32>
    tpu.vector_store %arg42[%c8, %c0_230], %330 {strides = array<i32>} : memref<32x128xf32, #tpu.memory_space<vmem>>, vector<16x96xf32>,
    %c8_231 = arith.constant 8 : index
    %c96 = arith.constant 96 : index
    %352 = vector.load %arg42[%c8_231, %c96] : memref<32x128xf32, #tpu.memory_space<vmem>>, vector<16x16xf32>
    tpu.vector_store %arg42[%c8_231, %c96], %348 {strides = array<i32>} : memref<32x128xf32, #tpu.memory_space<vmem>>, vector<16x16xf32>,
    %c4_232 = arith.constant 4 : index
    %c0_233 = arith.constant 0 : index
    %353 = vector.load %arg42[%c4_232, %c0_233] : memref<32x128xf32, #tpu.memory_space<vmem>>, vector<16x128xf32>
    %c0_234 = arith.constant 0 : index
    %c0_235 = arith.constant 0 : index
    %354 = vector.load %arg43[%c0_234, %c0_235] : memref<16x1152xf32, #tpu.memory_space<vmem>>, vector<16x128xf32>
    tpu.vector_store %arg43[%c0_234, %c0_235], %353 {strides = array<i32>} : memref<16x1152xf32, #tpu.memory_space<vmem>>, vector<16x128xf32>,
    %c5 = arith.constant 5 : index
    %c0_236 = arith.constant 0 : index
    %355 = vector.load %arg42[%c5, %c0_236] : memref<32x128xf32, #tpu.memory_space<vmem>>, vector<16x128xf32>
    %c0_237 = arith.constant 0 : index
    %c128 = arith.constant 128 : index
    %356 = vector.load %arg43[%c0_237, %c128] : memref<16x1152xf32, #tpu.memory_space<vmem>>, vector<16x128xf32>
    tpu.vector_store %arg43[%c0_237, %c128], %355 {strides = array<i32>} : memref<16x1152xf32, #tpu.memory_space<vmem>>, vector<16x128xf32>,
    %c6 = arith.constant 6 : index
    %c0_238 = arith.constant 0 : index
    %357 = vector.load %arg42[%c6, %c0_238] : memref<32x128xf32, #tpu.memory_space<vmem>>, vector<16x128xf32>
    %c0_239 = arith.constant 0 : index
    %c256 = arith.constant 256 : index
    %358 = vector.load %arg43[%c0_239, %c256] : memref<16x1152xf32, #tpu.memory_space<vmem>>, vector<16x128xf32>
    tpu.vector_store %arg43[%c0_239, %c256], %357 {strides = array<i32>} : memref<16x1152xf32, #tpu.memory_space<vmem>>, vector<16x128xf32>,
    %c7 = arith.constant 7 : index
    %c0_240 = arith.constant 0 : index
    %359 = vector.load %arg42[%c7, %c0_240] : memref<32x128xf32, #tpu.memory_space<vmem>>, vector<16x128xf32>
    %c0_241 = arith.constant 0 : index
    %c384 = arith.constant 384 : index
    %360 = vector.load %arg43[%c0_241, %c384] : memref<16x1152xf32, #tpu.memory_space<vmem>>, vector<16x128xf32>
    tpu.vector_store %arg43[%c0_241, %c384], %359 {strides = array<i32>} : memref<16x1152xf32, #tpu.memory_space<vmem>>, vector<16x128xf32>,
    %c8_242 = arith.constant 8 : index
    %c0_243 = arith.constant 0 : index
    %361 = vector.load %arg42[%c8_242, %c0_243] : memref<32x128xf32, #tpu.memory_space<vmem>>, vector<16x128xf32>
    %c0_244 = arith.constant 0 : index
    %c512 = arith.constant 512 : index
    %362 = vector.load %arg43[%c0_244, %c512] : memref<16x1152xf32, #tpu.memory_space<vmem>>, vector<16x128xf32>
    tpu.vector_store %arg43[%c0_244, %c512], %361 {strides = array<i32>} : memref<16x1152xf32, #tpu.memory_space<vmem>>, vector<16x128xf32>,
    %c9 = arith.constant 9 : index
    %c0_245 = arith.constant 0 : index
    %363 = vector.load %arg42[%c9, %c0_245] : memref<32x128xf32, #tpu.memory_space<vmem>>, vector<16x128xf32>
    %c0_246 = arith.constant 0 : index
    %c640 = arith.constant 640 : index
    %364 = vector.load %arg43[%c0_246, %c640] : memref<16x1152xf32, #tpu.memory_space<vmem>>, vector<16x128xf32>
    tpu.vector_store %arg43[%c0_246, %c640], %363 {strides = array<i32>} : memref<16x1152xf32, #tpu.memory_space<vmem>>, vector<16x128xf32>,
    %c10 = arith.constant 10 : index
    %c0_247 = arith.constant 0 : index
    %365 = vector.load %arg42[%c10, %c0_247] : memref<32x128xf32, #tpu.memory_space<vmem>>, vector<16x128xf32>
    %c0_248 = arith.constant 0 : index
    %c768 = arith.constant 768 : index
    %366 = vector.load %arg43[%c0_248, %c768] : memref<16x1152xf32, #tpu.memory_space<vmem>>, vector<16x128xf32>
    tpu.vector_store %arg43[%c0_248, %c768], %365 {strides = array<i32>} : memref<16x1152xf32, #tpu.memory_space<vmem>>, vector<16x128xf32>,
    %c11 = arith.constant 11 : index
    %c0_249 = arith.constant 0 : index
    %367 = vector.load %arg42[%c11, %c0_249] : memref<32x128xf32, #tpu.memory_space<vmem>>, vector<16x128xf32>
    %c0_250 = arith.constant 0 : index
    %c896 = arith.constant 896 : index
    %368 = vector.load %arg43[%c0_250, %c896] : memref<16x1152xf32, #tpu.memory_space<vmem>>, vector<16x128xf32>
    tpu.vector_store %arg43[%c0_250, %c896], %367 {strides = array<i32>} : memref<16x1152xf32, #tpu.memory_space<vmem>>, vector<16x128xf32>,
    %c12 = arith.constant 12 : index
    %c0_251 = arith.constant 0 : index
    %369 = vector.load %arg42[%c12, %c0_251] : memref<32x128xf32, #tpu.memory_space<vmem>>, vector<16x128xf32>
    %c0_252 = arith.constant 0 : index
    %c1024 = arith.constant 1024 : index
    %370 = vector.load %arg43[%c0_252, %c1024] : memref<16x1152xf32, #tpu.memory_space<vmem>>, vector<16x128xf32>
    tpu.vector_store %arg43[%c0_252, %c1024], %369 {strides = array<i32>} : memref<16x1152xf32, #tpu.memory_space<vmem>>, vector<16x128xf32>,
    %c0_253 = arith.constant 0 : index
    %c0_254 = arith.constant 0 : index
    %371 = vector.load %arg43[%c0_253, %c0_254] : memref<16x1152xf32, #tpu.memory_space<vmem>>, vector<16x1152xf32>
    %c0_255 = arith.constant 0 : index
    %c0_256 = arith.constant 0 : index
    %372 = vector.load %arg26[%c0_255, %c0_256] : memref<1152x96xbf16, #tpu.memory_space<vmem>>, vector<1152x96xbf16>
    %373 = arith.truncf %371 : vector<16x1152xf32> to vector<16x1152xbf16>
    %cst_257 = arith.constant dense<0.000000e+00> : vector<16x96xf32>
    %374 = tpu.matmul %373, %372, %cst_257 {dimension_numbers = #tpu.dot_dimension_numbers<[1], [0], [0], [1], [0, 0, 1, 1], [], []>} : vector<16x1152xbf16>, vector<1152x96xbf16>, vector<16x96xf32> -> vector<16x96xf32>
    %c0_258 = arith.constant 0 : index
    %c0_259 = arith.constant 0 : index
    %375 = vector.load %arg27[%c0_258, %c0_259] : memref<1x96xf32, #tpu.memory_space<vmem>>, vector<1x96xf32>
    %376 = vector.broadcast %375 : vector<1x96xf32> to vector<16x96xf32>
    %377 = arith.addf %374, %376 : vector<16x96xf32>
    %cst_260 = arith.constant 0.000000e+00 : f32
    %378 = vector.broadcast %cst_260 : f32 to vector<16x96xf32>
    %379 = arith.cmpf ogt, %377, %378 : vector<16x96xf32>
    %cst_261 = arith.constant 0.000000e+00 : f32
    %380 = vector.broadcast %cst_261 : f32 to vector<16x96xf32>
    %381 = arith.minimumf %377, %380 : vector<16x96xf32>
    %382 = math.exp %381 : vector<16x96xf32>
    %cst_262 = arith.constant 1.000000e+00 : f32
    %383 = vector.broadcast %cst_262 : f32 to vector<16x96xf32>
    %384 = arith.subf %382, %383 : vector<16x96xf32>
    %385 = arith.select %379, %377, %384 : vector<16x96xi1>, vector<16x96xf32>
    %cst_263 = arith.constant 0.000000e+00 : f32
    %386 = vector.broadcast %cst_263 : f32 to vector<32x128xf32>
    %c0_264 = arith.constant 0 : index
    %c0_265 = arith.constant 0 : index
    %387 = vector.load %arg44[%c0_264, %c0_265] : memref<32x128xf32, #tpu.memory_space<vmem>>, vector<32x128xf32>
    tpu.vector_store %arg44[%c0_264, %c0_265], %386 {strides = array<i32>} : memref<32x128xf32, #tpu.memory_space<vmem>>, vector<32x128xf32>,
    %c8_266 = arith.constant 8 : index
    %c0_267 = arith.constant 0 : index
    %388 = vector.load %arg44[%c8_266, %c0_267] : memref<32x128xf32, #tpu.memory_space<vmem>>, vector<16x96xf32>
    tpu.vector_store %arg44[%c8_266, %c0_267], %385 {strides = array<i32>} : memref<32x128xf32, #tpu.memory_space<vmem>>, vector<16x96xf32>,
    %c7_268 = arith.constant 7 : index
    %c0_269 = arith.constant 0 : index
    %389 = vector.load %arg44[%c7_268, %c0_269] : memref<32x128xf32, #tpu.memory_space<vmem>>, vector<16x128xf32>
    %c0_270 = arith.constant 0 : index
    %c0_271 = arith.constant 0 : index
    %390 = vector.load %arg45[%c0_270, %c0_271] : memref<16x384xf32, #tpu.memory_space<vmem>>, vector<16x128xf32>
    tpu.vector_store %arg45[%c0_270, %c0_271], %389 {strides = array<i32>} : memref<16x384xf32, #tpu.memory_space<vmem>>, vector<16x128xf32>,
    %c8_272 = arith.constant 8 : index
    %c0_273 = arith.constant 0 : index
    %391 = vector.load %arg44[%c8_272, %c0_273] : memref<32x128xf32, #tpu.memory_space<vmem>>, vector<16x128xf32>
    %c0_274 = arith.constant 0 : index
    %c128_275 = arith.constant 128 : index
    %392 = vector.load %arg45[%c0_274, %c128_275] : memref<16x384xf32, #tpu.memory_space<vmem>>, vector<16x128xf32>
    tpu.vector_store %arg45[%c0_274, %c128_275], %391 {strides = array<i32>} : memref<16x384xf32, #tpu.memory_space<vmem>>, vector<16x128xf32>,
    %c9_276 = arith.constant 9 : index
    %c0_277 = arith.constant 0 : index
    %393 = vector.load %arg44[%c9_276, %c0_277] : memref<32x128xf32, #tpu.memory_space<vmem>>, vector<16x128xf32>
    %c0_278 = arith.constant 0 : index
    %c256_279 = arith.constant 256 : index
    %394 = vector.load %arg45[%c0_278, %c256_279] : memref<16x384xf32, #tpu.memory_space<vmem>>, vector<16x128xf32>
    tpu.vector_store %arg45[%c0_278, %c256_279], %393 {strides = array<i32>} : memref<16x384xf32, #tpu.memory_space<vmem>>, vector<16x128xf32>,
    %c0_280 = arith.constant 0 : index
    %c0_281 = arith.constant 0 : index
    %395 = vector.load %arg45[%c0_280, %c0_281] : memref<16x384xf32, #tpu.memory_space<vmem>>, vector<16x384xf32>
    %c0_282 = arith.constant 0 : index
    %c0_283 = arith.constant 0 : index
    %396 = vector.load %arg28[%c0_282, %c0_283] : memref<384x128xbf16, #tpu.memory_space<vmem>>, vector<384x128xbf16>
    %397 = arith.truncf %395 : vector<16x384xf32> to vector<16x384xbf16>
    %cst_284 = arith.constant dense<0.000000e+00> : vector<16x128xf32>
    %398 = tpu.matmul %397, %396, %cst_284 {dimension_numbers = #tpu.dot_dimension_numbers<[1], [0], [0], [1], [0, 0, 1, 1], [], []>} : vector<16x384xbf16>, vector<384x128xbf16>, vector<16x128xf32> -> vector<16x128xf32>
    %c0_285 = arith.constant 0 : index
    %c0_286 = arith.constant 0 : index
    %399 = vector.load %arg29[%c0_285, %c0_286] : memref<1x128xf32, #tpu.memory_space<vmem>>, vector<1x128xf32>
    %400 = vector.broadcast %399 : vector<1x128xf32> to vector<16x128xf32>
    %401 = arith.addf %398, %400 : vector<16x128xf32>
    %cst_287 = arith.constant 0.000000e+00 : f32
    %402 = vector.broadcast %cst_287 : f32 to vector<16x128xf32>
    %403 = arith.cmpf ogt, %401, %402 : vector<16x128xf32>
    %cst_288 = arith.constant 0.000000e+00 : f32
    %404 = vector.broadcast %cst_288 : f32 to vector<16x128xf32>
    %405 = arith.minimumf %401, %404 : vector<16x128xf32>
    %406 = math.exp %405 : vector<16x128xf32>
    %cst_289 = arith.constant 1.000000e+00 : f32
    %407 = vector.broadcast %cst_289 : f32 to vector<16x128xf32>
    %408 = arith.subf %406, %407 : vector<16x128xf32>
    %409 = arith.select %403, %401, %408 : vector<16x128xi1>, vector<16x128xf32>
    %410 = vector.extract_strided_slice %409 {offsets = [0, 0], sizes = [1, 128], strides = [1, 1]} : vector<16x128xf32> to vector<1x128xf32>
    %c0_290 = arith.constant 0 : index
    %c0_291 = arith.constant 0 : index
    %411 = vector.load %arg47[%c0_290, %c0_291] : memref<1x2048xf32, #tpu.memory_space<vmem>>, vector<1x128xf32>
    tpu.vector_store %arg47[%c0_290, %c0_291], %410 {strides = array<i32>} : memref<1x2048xf32, #tpu.memory_space<vmem>>, vector<1x128xf32>,
    %412 = vector.extract_strided_slice %409 {offsets = [1, 0], sizes = [1, 128], strides = [1, 1]} : vector<16x128xf32> to vector<1x128xf32>
    %c0_292 = arith.constant 0 : index
    %c128_293 = arith.constant 128 : index
    %413 = vector.load %arg47[%c0_292, %c128_293] : memref<1x2048xf32, #tpu.memory_space<vmem>>, vector<1x128xf32>
    tpu.vector_store %arg47[%c0_292, %c128_293], %412 {strides = array<i32>} : memref<1x2048xf32, #tpu.memory_space<vmem>>, vector<1x128xf32>,
    %414 = vector.extract_strided_slice %409 {offsets = [2, 0], sizes = [1, 128], strides = [1, 1]} : vector<16x128xf32> to vector<1x128xf32>
    %c0_294 = arith.constant 0 : index
    %c256_295 = arith.constant 256 : index
    %415 = vector.load %arg47[%c0_294, %c256_295] : memref<1x2048xf32, #tpu.memory_space<vmem>>, vector<1x128xf32>
    tpu.vector_store %arg47[%c0_294, %c256_295], %414 {strides = array<i32>} : memref<1x2048xf32, #tpu.memory_space<vmem>>, vector<1x128xf32>,
    %416 = vector.extract_strided_slice %409 {offsets = [3, 0], sizes = [1, 128], strides = [1, 1]} : vector<16x128xf32> to vector<1x128xf32>
    %c0_296 = arith.constant 0 : index
    %c384_297 = arith.constant 384 : index
    %417 = vector.load %arg47[%c0_296, %c384_297] : memref<1x2048xf32, #tpu.memory_space<vmem>>, vector<1x128xf32>
    tpu.vector_store %arg47[%c0_296, %c384_297], %416 {strides = array<i32>} : memref<1x2048xf32, #tpu.memory_space<vmem>>, vector<1x128xf32>,
    %418 = vector.extract_strided_slice %409 {offsets = [4, 0], sizes = [1, 128], strides = [1, 1]} : vector<16x128xf32> to vector<1x128xf32>
    %c0_298 = arith.constant 0 : index
    %c512_299 = arith.constant 512 : index
    %419 = vector.load %arg47[%c0_298, %c512_299] : memref<1x2048xf32, #tpu.memory_space<vmem>>, vector<1x128xf32>
    tpu.vector_store %arg47[%c0_298, %c512_299], %418 {strides = array<i32>} : memref<1x2048xf32, #tpu.memory_space<vmem>>, vector<1x128xf32>,
    %420 = vector.extract_strided_slice %409 {offsets = [5, 0], sizes = [1, 128], strides = [1, 1]} : vector<16x128xf32> to vector<1x128xf32>
    %c0_300 = arith.constant 0 : index
    %c640_301 = arith.constant 640 : index
    %421 = vector.load %arg47[%c0_300, %c640_301] : memref<1x2048xf32, #tpu.memory_space<vmem>>, vector<1x128xf32>
    tpu.vector_store %arg47[%c0_300, %c640_301], %420 {strides = array<i32>} : memref<1x2048xf32, #tpu.memory_space<vmem>>, vector<1x128xf32>,
    %422 = vector.extract_strided_slice %409 {offsets = [6, 0], sizes = [1, 128], strides = [1, 1]} : vector<16x128xf32> to vector<1x128xf32>
    %c0_302 = arith.constant 0 : index
    %c768_303 = arith.constant 768 : index
    %423 = vector.load %arg47[%c0_302, %c768_303] : memref<1x2048xf32, #tpu.memory_space<vmem>>, vector<1x128xf32>
    tpu.vector_store %arg47[%c0_302, %c768_303], %422 {strides = array<i32>} : memref<1x2048xf32, #tpu.memory_space<vmem>>, vector<1x128xf32>,
    %424 = vector.extract_strided_slice %409 {offsets = [7, 0], sizes = [1, 128], strides = [1, 1]} : vector<16x128xf32> to vector<1x128xf32>
    %c0_304 = arith.constant 0 : index
    %c896_305 = arith.constant 896 : index
    %425 = vector.load %arg47[%c0_304, %c896_305] : memref<1x2048xf32, #tpu.memory_space<vmem>>, vector<1x128xf32>
    tpu.vector_store %arg47[%c0_304, %c896_305], %424 {strides = array<i32>} : memref<1x2048xf32, #tpu.memory_space<vmem>>, vector<1x128xf32>,
    %426 = vector.extract_strided_slice %409 {offsets = [8, 0], sizes = [1, 128], strides = [1, 1]} : vector<16x128xf32> to vector<1x128xf32>
    %c0_306 = arith.constant 0 : index
    %c1024_307 = arith.constant 1024 : index
    %427 = vector.load %arg47[%c0_306, %c1024_307] : memref<1x2048xf32, #tpu.memory_space<vmem>>, vector<1x128xf32>
    tpu.vector_store %arg47[%c0_306, %c1024_307], %426 {strides = array<i32>} : memref<1x2048xf32, #tpu.memory_space<vmem>>, vector<1x128xf32>,
    %428 = vector.extract_strided_slice %409 {offsets = [9, 0], sizes = [1, 128], strides = [1, 1]} : vector<16x128xf32> to vector<1x128xf32>
    %c0_308 = arith.constant 0 : index
    %c1152 = arith.constant 1152 : index
    %429 = vector.load %arg47[%c0_308, %c1152] : memref<1x2048xf32, #tpu.memory_space<vmem>>, vector<1x128xf32>
    tpu.vector_store %arg47[%c0_308, %c1152], %428 {strides = array<i32>} : memref<1x2048xf32, #tpu.memory_space<vmem>>, vector<1x128xf32>,
    %430 = vector.extract_strided_slice %409 {offsets = [10, 0], sizes = [1, 128], strides = [1, 1]} : vector<16x128xf32> to vector<1x128xf32>
    %c0_309 = arith.constant 0 : index
    %c1280 = arith.constant 1280 : index
    %431 = vector.load %arg47[%c0_309, %c1280] : memref<1x2048xf32, #tpu.memory_space<vmem>>, vector<1x128xf32>
    tpu.vector_store %arg47[%c0_309, %c1280], %430 {strides = array<i32>} : memref<1x2048xf32, #tpu.memory_space<vmem>>, vector<1x128xf32>,
    %432 = vector.extract_strided_slice %409 {offsets = [11, 0], sizes = [1, 128], strides = [1, 1]} : vector<16x128xf32> to vector<1x128xf32>
    %c0_310 = arith.constant 0 : index
    %c1408 = arith.constant 1408 : index
    %433 = vector.load %arg47[%c0_310, %c1408] : memref<1x2048xf32, #tpu.memory_space<vmem>>, vector<1x128xf32>
    tpu.vector_store %arg47[%c0_310, %c1408], %432 {strides = array<i32>} : memref<1x2048xf32, #tpu.memory_space<vmem>>, vector<1x128xf32>,
    %434 = vector.extract_strided_slice %409 {offsets = [12, 0], sizes = [1, 128], strides = [1, 1]} : vector<16x128xf32> to vector<1x128xf32>
    %c0_311 = arith.constant 0 : index
    %c1536 = arith.constant 1536 : index
    %435 = vector.load %arg47[%c0_311, %c1536] : memref<1x2048xf32, #tpu.memory_space<vmem>>, vector<1x128xf32>
    tpu.vector_store %arg47[%c0_311, %c1536], %434 {strides = array<i32>} : memref<1x2048xf32, #tpu.memory_space<vmem>>, vector<1x128xf32>,
    %436 = vector.extract_strided_slice %409 {offsets = [13, 0], sizes = [1, 128], strides = [1, 1]} : vector<16x128xf32> to vector<1x128xf32>
    %c0_312 = arith.constant 0 : index
    %c1664 = arith.constant 1664 : index
    %437 = vector.load %arg47[%c0_312, %c1664] : memref<1x2048xf32, #tpu.memory_space<vmem>>, vector<1x128xf32>
    tpu.vector_store %arg47[%c0_312, %c1664], %436 {strides = array<i32>} : memref<1x2048xf32, #tpu.memory_space<vmem>>, vector<1x128xf32>,
    %438 = vector.extract_strided_slice %409 {offsets = [14, 0], sizes = [1, 128], strides = [1, 1]} : vector<16x128xf32> to vector<1x128xf32>
    %c0_313 = arith.constant 0 : index
    %c1792 = arith.constant 1792 : index
    %439 = vector.load %arg47[%c0_313, %c1792] : memref<1x2048xf32, #tpu.memory_space<vmem>>, vector<1x128xf32>
    tpu.vector_store %arg47[%c0_313, %c1792], %438 {strides = array<i32>} : memref<1x2048xf32, #tpu.memory_space<vmem>>, vector<1x128xf32>,
    %440 = vector.extract_strided_slice %409 {offsets = [15, 0], sizes = [1, 128], strides = [1, 1]} : vector<16x128xf32> to vector<1x128xf32>
    %c0_314 = arith.constant 0 : index
    %c1920 = arith.constant 1920 : index
    %441 = vector.load %arg47[%c0_314, %c1920] : memref<1x2048xf32, #tpu.memory_space<vmem>>, vector<1x128xf32>
    tpu.vector_store %arg47[%c0_314, %c1920], %440 {strides = array<i32>} : memref<1x2048xf32, #tpu.memory_space<vmem>>, vector<1x128xf32>,
    %c0_315 = arith.constant 0 : index
    %c0_316 = arith.constant 0 : index
    %442 = vector.load %arg47[%c0_315, %c0_316] : memref<1x2048xf32, #tpu.memory_space<vmem>>, vector<1x2048xf32>
    %c0_317 = arith.constant 0 : index
    %c0_318 = arith.constant 0 : index
    %443 = vector.load %arg30[%c0_317, %c0_318] : memref<2048x512xbf16, #tpu.memory_space<vmem>>, vector<2048x512xbf16>
    %444 = arith.truncf %442 : vector<1x2048xf32> to vector<1x2048xbf16>
    %cst_319 = arith.constant dense<0.000000e+00> : vector<1x512xf32>
    %445 = tpu.matmul %444, %443, %cst_319 {dimension_numbers = #tpu.dot_dimension_numbers<[1], [0], [0], [1], [0, 0, 1, 1], [], []>} : vector<1x2048xbf16>, vector<2048x512xbf16>, vector<1x512xf32> -> vector<1x512xf32>
    %c0_320 = arith.constant 0 : index
    %c0_321 = arith.constant 0 : index
    %446 = vector.load %arg31[%c0_320, %c0_321] : memref<1x512xf32, #tpu.memory_space<vmem>>, vector<1x512xf32>
    %447 = arith.addf %445, %446 : vector<1x512xf32>
    %cst_322 = arith.constant 0.000000e+00 : f32
    %448 = vector.broadcast %cst_322 : f32 to vector<1x512xf32>
    %449 = arith.maximumf %447, %448 : vector<1x512xf32>
    %c0_323 = arith.constant 0 : index
    %c0_324 = arith.constant 0 : index
    %450 = vector.load %arg32[%c0_323, %c0_324] : memref<512x256xbf16, #tpu.memory_space<vmem>>, vector<512x256xbf16>
    %451 = arith.truncf %449 : vector<1x512xf32> to vector<1x512xbf16>
    %cst_325 = arith.constant dense<0.000000e+00> : vector<1x256xf32>
    %452 = tpu.matmul %451, %450, %cst_325 {dimension_numbers = #tpu.dot_dimension_numbers<[1], [0], [0], [1], [0, 0, 1, 1], [], []>} : vector<1x512xbf16>, vector<512x256xbf16>, vector<1x256xf32> -> vector<1x256xf32>
    %c0_326 = arith.constant 0 : index
    %c0_327 = arith.constant 0 : index
    %453 = vector.load %arg33[%c0_326, %c0_327] : memref<1x256xf32, #tpu.memory_space<vmem>>, vector<1x256xf32>
    %454 = arith.addf %452, %453 : vector<1x256xf32>
    %cst_328 = arith.constant 0.000000e+00 : f32
    %455 = vector.broadcast %cst_328 : f32 to vector<1x256xf32>
    %456 = arith.maximumf %454, %455 : vector<1x256xf32>
    %c0_329 = arith.constant 0 : index
    %c0_330 = arith.constant 0 : index
    %457 = vector.load %arg34[%c0_329, %c0_330] : memref<256x128xbf16, #tpu.memory_space<vmem>>, vector<256x128xbf16>
    %458 = arith.truncf %456 : vector<1x256xf32> to vector<1x256xbf16>
    %cst_331 = arith.constant dense<0.000000e+00> : vector<1x128xf32>
    %459 = tpu.matmul %458, %457, %cst_331 {dimension_numbers = #tpu.dot_dimension_numbers<[1], [0], [0], [1], [0, 0, 1, 1], [], []>} : vector<1x256xbf16>, vector<256x128xbf16>, vector<1x128xf32> -> vector<1x128xf32>
    %c0_332 = arith.constant 0 : index
    %c0_333 = arith.constant 0 : index
    %460 = vector.load %arg35[%c0_332, %c0_333] : memref<1x128xf32, #tpu.memory_space<vmem>>, vector<1x128xf32>
    %461 = arith.addf %459, %460 : vector<1x128xf32>
    %cst_334 = arith.constant 0.000000e+00 : f32
    %462 = vector.broadcast %cst_334 : f32 to vector<1x128xf32>
    %463 = arith.maximumf %461, %462 : vector<1x128xf32>
    %c0_335 = arith.constant 0 : index
    %c0_336 = arith.constant 0 : index
    %464 = vector.load %arg36[%c0_335, %c0_336] : memref<128x16xbf16, #tpu.memory_space<vmem>>, vector<128x16xbf16>
    %465 = arith.truncf %463 : vector<1x128xf32> to vector<1x128xbf16>
    %cst_337 = arith.constant dense<0.000000e+00> : vector<1x16xf32>
    %466 = tpu.matmul %465, %464, %cst_337 {dimension_numbers = #tpu.dot_dimension_numbers<[1], [0], [0], [1], [0, 0, 1, 1], [], []>} : vector<1x128xbf16>, vector<128x16xbf16>, vector<1x16xf32> -> vector<1x16xf32>
    %c0_338 = arith.constant 0 : index
    %c0_339 = arith.constant 0 : index
    %467 = vector.load %arg37[%c0_338, %c0_339] : memref<1x16xf32, #tpu.memory_space<vmem>>, vector<1x16xf32>
    %468 = arith.addf %466, %467 : vector<1x16xf32>
    %cst_340 = arith.constant 0.000000e+00 : f32
    %469 = vector.broadcast %cst_340 : f32 to vector<1x16xf32>
    %470 = arith.maximumf %468, %469 : vector<1x16xf32>
    %c0_341 = arith.constant 0 : index
    %c0_342 = arith.constant 0 : index
    %471 = vector.load %arg38[%c0_341, %c0_342] : memref<128x16xbf16, #tpu.memory_space<vmem>>, vector<128x16xbf16>
    %472 = arith.truncf %463 : vector<1x128xf32> to vector<1x128xbf16>
    %cst_343 = arith.constant dense<0.000000e+00> : vector<1x16xf32>
    %473 = tpu.matmul %472, %471, %cst_343 {dimension_numbers = #tpu.dot_dimension_numbers<[1], [0], [0], [1], [0, 0, 1, 1], [], []>} : vector<1x128xbf16>, vector<128x16xbf16>, vector<1x16xf32> -> vector<1x16xf32>
    %c0_344 = arith.constant 0 : index
    %c0_345 = arith.constant 0 : index
    %474 = vector.load %arg39[%c0_344, %c0_345] : memref<1x16xf32, #tpu.memory_space<vmem>>, vector<1x16xf32>
    %475 = arith.addf %473, %474 : vector<1x16xf32>
    %cst_346 = arith.constant 0.000000e+00 : f32
    %476 = vector.broadcast %cst_346 : f32 to vector<1x16xf32>
    %477 = arith.maximumf %475, %476 : vector<1x16xf32>
    %478 = arith.maximumf %470, %477 : vector<1x16xf32>
    %479 = arith.subf %470, %478 : vector<1x16xf32>
    %480 = math.exp %479 : vector<1x16xf32>
    %481 = arith.subf %477, %478 : vector<1x16xf32>
    %482 = math.exp %481 : vector<1x16xf32>
    %483 = arith.addf %480, %482 : vector<1x16xf32>
    %484 = tpu.reciprocal %483 {approx = true} : vector<1x16xf32> -> vector<1x16xf32>
    %485 = arith.mulf %480, %484 : vector<1x16xf32>
    %c0_347 = arith.constant 0 : index
    %c0_348 = arith.constant 0 : index
    %c0_349 = arith.constant 0 : index
    %486 = vector.load %arg40[%c0_347, %c0_348, %c0_349] : memref<1x1x16xf32, #tpu.memory_space<vmem>>, vector<1x1x16xf32>
    %487 = vector.shape_cast %486 : vector<1x1x16xf32> to vector<1x16xf32>
    %488 = vector.shape_cast %485 : vector<1x16xf32> to vector<1x1x16xf32>
    tpu.vector_store %arg40[%c0_347, %c0_348, %c0_349], %488 {strides = array<i32>} : memref<1x1x16xf32, #tpu.memory_space<vmem>>, vector<1x1x16xf32>,
    %489 = arith.mulf %482, %484 : vector<1x16xf32>
    %c0_350 = arith.constant 0 : index
    %c0_351 = arith.constant 0 : index
    %c0_352 = arith.constant 0 : index
    %490 = vector.load %arg41[%c0_350, %c0_351, %c0_352] : memref<1x1x16xf32, #tpu.memory_space<vmem>>, vector<1x1x16xf32>
    %491 = vector.shape_cast %490 : vector<1x1x16xf32> to vector<1x16xf32>
    %492 = vector.shape_cast %489 : vector<1x16xf32> to vector<1x1x16xf32>
    tpu.vector_store %arg41[%c0_350, %c0_351, %c0_352], %492 {strides = array<i32>} : memref<1x1x16xf32, #tpu.memory_space<vmem>>, vector<1x1x16xf32>,
    return
  }
  func.func @transform_0(%arg0: i32) -> (i32, i32, i32) {
    %c0_i32 = arith.constant 0 : i32
    %c0_i32_0 = arith.constant 0 : i32
    %c0_i32_1 = arith.constant 0 : i32
    return %arg0, %c0_i32, %c0_i32_0 : i32, i32, i32
  }
  func.func @transform_1(%arg0: i32) -> (i32, i32, i32) {
    %c0_i32 = arith.constant 0 : i32
    %c0_i32_0 = arith.constant 0 : i32
    %c0_i32_1 = arith.constant 0 : i32
    return %arg0, %c0_i32, %c0_i32_0 : i32, i32, i32
  }
  func.func @transform_2(%arg0: i32) -> (i32, i32, i32) {
    %c0_i32 = arith.constant 0 : i32
    %c0_i32_0 = arith.constant 0 : i32
    %c0_i32_1 = arith.constant 0 : i32
    return %arg0, %c0_i32, %c0_i32_0 : i32, i32, i32
  }
  func.func @transform_3(%arg0: i32) -> (i32, i32, i32) {
    %c0_i32 = arith.constant 0 : i32
    %c0_i32_0 = arith.constant 0 : i32
    %c0_i32_1 = arith.constant 0 : i32
    %c0_i32_2 = arith.constant 0 : i32
    return %c0_i32, %c0_i32_0, %c0_i32_1 : i32, i32, i32
  }
  func.func @transform_4(%arg0: i32) -> (i32, i32, i32) {
    %c0_i32 = arith.constant 0 : i32
    %c0_i32_0 = arith.constant 0 : i32
    %c0_i32_1 = arith.constant 0 : i32
    %c0_i32_2 = arith.constant 0 : i32
    return %c0_i32, %c0_i32_0, %c0_i32_1 : i32, i32, i32
  }
  func.func @transform_5(%arg0: i32) -> (i32, i32, i32) {
    %c0_i32 = arith.constant 0 : i32
    %c0_i32_0 = arith.constant 0 : i32
    %c0_i32_1 = arith.constant 0 : i32
    %c0_i32_2 = arith.constant 0 : i32
    return %c0_i32, %c0_i32_0, %c0_i32_1 : i32, i32, i32
  }
  func.func @transform_6(%arg0: i32) -> (i32, i32, i32) {
    %c0_i32 = arith.constant 0 : i32
    %c0_i32_0 = arith.constant 0 : i32
    %c0_i32_1 = arith.constant 0 : i32
    %c0_i32_2 = arith.constant 0 : i32
    return %c0_i32, %c0_i32_0, %c0_i32_1 : i32, i32, i32
  }
  func.func @transform_7(%arg0: i32) -> (i32, i32, i32) {
    %c0_i32 = arith.constant 0 : i32
    %c0_i32_0 = arith.constant 0 : i32
    %c0_i32_1 = arith.constant 0 : i32
    %c0_i32_2 = arith.constant 0 : i32
    return %c0_i32, %c0_i32_0, %c0_i32_1 : i32, i32, i32
  }
  func.func @transform_8(%arg0: i32) -> (i32, i32, i32) {
    %c0_i32 = arith.constant 0 : i32
    %c0_i32_0 = arith.constant 0 : i32
    %c0_i32_1 = arith.constant 0 : i32
    %c0_i32_2 = arith.constant 0 : i32
    return %c0_i32, %c0_i32_0, %c0_i32_1 : i32, i32, i32
  }
  func.func @transform_9(%arg0: i32) -> (i32, i32, i32) {
    %c0_i32 = arith.constant 0 : i32
    %c0_i32_0 = arith.constant 0 : i32
    %c0_i32_1 = arith.constant 0 : i32
    %c0_i32_2 = arith.constant 0 : i32
    return %c0_i32, %c0_i32_0, %c0_i32_1 : i32, i32, i32
  }
  func.func @transform_10(%arg0: i32) -> (i32, i32, i32) {
    %c0_i32 = arith.constant 0 : i32
    %c0_i32_0 = arith.constant 0 : i32
    %c0_i32_1 = arith.constant 0 : i32
    %c0_i32_2 = arith.constant 0 : i32
    return %c0_i32, %c0_i32_0, %c0_i32_1 : i32, i32, i32
  }
  func.func @transform_11(%arg0: i32) -> (i32, i32, i32) {
    %c0_i32 = arith.constant 0 : i32
    %c0_i32_0 = arith.constant 0 : i32
    %c0_i32_1 = arith.constant 0 : i32
    %c0_i32_2 = arith.constant 0 : i32
    return %c0_i32, %c0_i32_0, %c0_i32_1 : i32, i32, i32
  }
  func.func @transform_12(%arg0: i32) -> (i32, i32, i32) {
    %c0_i32 = arith.constant 0 : i32
    %c0_i32_0 = arith.constant 0 : i32
    %c0_i32_1 = arith.constant 0 : i32
    %c0_i32_2 = arith.constant 0 : i32
    return %c0_i32, %c0_i32_0, %c0_i32_1 : i32, i32, i32
  }
  func.func @transform_13(%arg0: i32) -> (i32, i32, i32) {
    %c0_i32 = arith.constant 0 : i32
    %c0_i32_0 = arith.constant 0 : i32
    %c0_i32_1 = arith.constant 0 : i32
    %c0_i32_2 = arith.constant 0 : i32
    return %c0_i32, %c0_i32_0, %c0_i32_1 : i32, i32, i32
  }
  func.func @transform_14(%arg0: i32) -> (i32, i32, i32) {
    %c0_i32 = arith.constant 0 : i32
    %c0_i32_0 = arith.constant 0 : i32
    %c0_i32_1 = arith.constant 0 : i32
    %c0_i32_2 = arith.constant 0 : i32
    return %c0_i32, %c0_i32_0, %c0_i32_1 : i32, i32, i32
  }
  func.func @transform_15(%arg0: i32) -> (i32, i32, i32) {
    %c0_i32 = arith.constant 0 : i32
    %c0_i32_0 = arith.constant 0 : i32
    %c0_i32_1 = arith.constant 0 : i32
    %c0_i32_2 = arith.constant 0 : i32
    return %c0_i32, %c0_i32_0, %c0_i32_1 : i32, i32, i32
  }
  func.func @transform_16(%arg0: i32) -> (i32, i32, i32) {
    %c0_i32 = arith.constant 0 : i32
    %c0_i32_0 = arith.constant 0 : i32
    %c0_i32_1 = arith.constant 0 : i32
    %c0_i32_2 = arith.constant 0 : i32
    return %c0_i32, %c0_i32_0, %c0_i32_1 : i32, i32, i32
  }
  func.func @transform_17(%arg0: i32) -> (i32, i32, i32) {
    %c0_i32 = arith.constant 0 : i32
    %c0_i32_0 = arith.constant 0 : i32
    %c0_i32_1 = arith.constant 0 : i32
    %c0_i32_2 = arith.constant 0 : i32
    return %c0_i32, %c0_i32_0, %c0_i32_1 : i32, i32, i32
  }
  func.func @transform_18(%arg0: i32) -> (i32, i32, i32) {
    %c0_i32 = arith.constant 0 : i32
    %c0_i32_0 = arith.constant 0 : i32
    %c0_i32_1 = arith.constant 0 : i32
    %c0_i32_2 = arith.constant 0 : i32
    return %c0_i32, %c0_i32_0, %c0_i32_1 : i32, i32, i32
  }
  func.func @transform_19(%arg0: i32) -> (i32, i32) {
    %c0_i32 = arith.constant 0 : i32
    %c0_i32_0 = arith.constant 0 : i32
    %c0_i32_1 = arith.constant 0 : i32
    return %c0_i32, %c0_i32_0 : i32, i32
  }
  func.func @transform_20(%arg0: i32) -> (i32, i32) {
    %c0_i32 = arith.constant 0 : i32
    %c0_i32_0 = arith.constant 0 : i32
    %c0_i32_1 = arith.constant 0 : i32
    return %c0_i32, %c0_i32_0 : i32, i32
  }
  func.func @transform_21(%arg0: i32) -> (i32, i32) {
    %c0_i32 = arith.constant 0 : i32
    %c0_i32_0 = arith.constant 0 : i32
    %c0_i32_1 = arith.constant 0 : i32
    return %c0_i32, %c0_i32_0 : i32, i32
  }
  func.func @transform_22(%arg0: i32) -> (i32, i32) {
    %c0_i32 = arith.constant 0 : i32
    %c0_i32_0 = arith.constant 0 : i32
    %c0_i32_1 = arith.constant 0 : i32
    return %c0_i32, %c0_i32_0 : i32, i32
  }
  func.func @transform_23(%arg0: i32) -> (i32, i32) {
    %c0_i32 = arith.constant 0 : i32
    %c0_i32_0 = arith.constant 0 : i32
    %c0_i32_1 = arith.constant 0 : i32
    return %c0_i32, %c0_i32_0 : i32, i32
  }
  func.func @transform_24(%arg0: i32) -> (i32, i32) {
    %c0_i32 = arith.constant 0 : i32
    %c0_i32_0 = arith.constant 0 : i32
    %c0_i32_1 = arith.constant 0 : i32
    return %c0_i32, %c0_i32_0 : i32, i32
  }
  func.func @transform_25(%arg0: i32) -> (i32, i32) {
    %c0_i32 = arith.constant 0 : i32
    %c0_i32_0 = arith.constant 0 : i32
    %c0_i32_1 = arith.constant 0 : i32
    return %c0_i32, %c0_i32_0 : i32, i32
  }
  func.func @transform_26(%arg0: i32) -> (i32, i32) {
    %c0_i32 = arith.constant 0 : i32
    %c0_i32_0 = arith.constant 0 : i32
    %c0_i32_1 = arith.constant 0 : i32
    return %c0_i32, %c0_i32_0 : i32, i32
  }
  func.func @transform_27(%arg0: i32) -> (i32, i32) {
    %c0_i32 = arith.constant 0 : i32
    %c0_i32_0 = arith.constant 0 : i32
    %c0_i32_1 = arith.constant 0 : i32
    return %c0_i32, %c0_i32_0 : i32, i32
  }
  func.func @transform_28(%arg0: i32) -> (i32, i32) {
    %c0_i32 = arith.constant 0 : i32
    %c0_i32_0 = arith.constant 0 : i32
    %c0_i32_1 = arith.constant 0 : i32
    return %c0_i32, %c0_i32_0 : i32, i32
  }
  func.func @transform_29(%arg0: i32) -> (i32, i32) {
    %c0_i32 = arith.constant 0 : i32
    %c0_i32_0 = arith.constant 0 : i32
    %c0_i32_1 = arith.constant 0 : i32
    return %c0_i32, %c0_i32_0 : i32, i32
  }
  func.func @transform_30(%arg0: i32) -> (i32, i32) {
    %c0_i32 = arith.constant 0 : i32
    %c0_i32_0 = arith.constant 0 : i32
    %c0_i32_1 = arith.constant 0 : i32
    return %c0_i32, %c0_i32_0 : i32, i32
  }
  func.func @transform_31(%arg0: i32) -> (i32, i32) {
    %c0_i32 = arith.constant 0 : i32
    %c0_i32_0 = arith.constant 0 : i32
    %c0_i32_1 = arith.constant 0 : i32
    return %c0_i32, %c0_i32_0 : i32, i32
  }
  func.func @transform_32(%arg0: i32) -> (i32, i32) {
    %c0_i32 = arith.constant 0 : i32
    %c0_i32_0 = arith.constant 0 : i32
    %c0_i32_1 = arith.constant 0 : i32
    return %c0_i32, %c0_i32_0 : i32, i32
  }
  func.func @transform_33(%arg0: i32) -> (i32, i32) {
    %c0_i32 = arith.constant 0 : i32
    %c0_i32_0 = arith.constant 0 : i32
    %c0_i32_1 = arith.constant 0 : i32
    return %c0_i32, %c0_i32_0 : i32, i32
  }
  func.func @transform_34(%arg0: i32) -> (i32, i32) {
    %c0_i32 = arith.constant 0 : i32
    %c0_i32_0 = arith.constant 0 : i32
    %c0_i32_1 = arith.constant 0 : i32
    return %c0_i32, %c0_i32_0 : i32, i32
  }
  func.func @transform_35(%arg0: i32) -> (i32, i32) {
    %c0_i32 = arith.constant 0 : i32
    %c0_i32_0 = arith.constant 0 : i32
    %c0_i32_1 = arith.constant 0 : i32
    return %c0_i32, %c0_i32_0 : i32, i32
  }
  func.func @transform_36(%arg0: i32) -> (i32, i32) {
    %c0_i32 = arith.constant 0 : i32
    %c0_i32_0 = arith.constant 0 : i32
    %c0_i32_1 = arith.constant 0 : i32
    return %c0_i32, %c0_i32_0 : i32, i32
  }
  func.func @transform_37(%arg0: i32) -> (i32, i32) {
    %c0_i32 = arith.constant 0 : i32
    %c0_i32_0 = arith.constant 0 : i32
    %c0_i32_1 = arith.constant 0 : i32
    return %c0_i32, %c0_i32_0 : i32, i32
  }
  func.func @transform_38(%arg0: i32) -> (i32, i32) {
    %c0_i32 = arith.constant 0 : i32
    %c0_i32_0 = arith.constant 0 : i32
    %c0_i32_1 = arith.constant 0 : i32
    return %c0_i32, %c0_i32_0 : i32, i32
  }
  func.func @transform_39(%arg0: i32) -> (i32, i32, i32) {
    %c0_i32 = arith.constant 0 : i32
    %c0_i32_0 = arith.constant 0 : i32
    %c0_i32_1 = arith.constant 0 : i32
    return %arg0, %c0_i32, %c0_i32_0 : i32, i32, i32
  }
  func.func @transform_40(%arg0: i32) -> (i32, i32, i32) {
    %c0_i32 = arith.constant 0 : i32
    %c0_i32_0 = arith.constant 0 : i32
    %c0_i32_1 = arith.constant 0 : i32
    return %arg0, %c0_i32, %c0_i32_0 : i32, i32, i32
  }
}

</mosaic_0001>

<bundles_post_ra>
// kernel: model_forward.1
= control target key start
LH: loop header
LB: loop body
LE: loop exit
PB: predicated region body
PF: predicated region fallthrough
CT: control target
= control target key end

     0   :  { %s14339_s6 = smov 1   ;;  %s14340_s10 = smov 2   ;;  %s15626_s0 = inlined_call_operand.smem [shape: u32[41], index: -1, kind: input, shape index: {}] }
   0x1   :  { %s14427_s5 = sld [smem:[%s15626_s0]]   ;;  %s14341_s14 = smov 3  }
   0x2   :  { %s14432_s9 = sld [smem:[%s15626_s0 + %s14339_s6]]   ;;  %s14342_s18 = smov 4  }
   0x3   :  { %s14437_s13 = sld [smem:[%s15626_s0 + %s14340_s10]]   ;;  %s14343_s22 = smov 5  }
   0x4   :  { %s14442_s17 = sld [smem:[%s15626_s0 + %s14341_s14]]   ;;  %s14344_s26 = smov 6  }
   0x5   :  { %s14447_s21 = sld [smem:[%s15626_s0 + %s14342_s18]]   ;;  %s14345_s30 = smov 7  }
   0x6   :  { %s14452_s25 = sld [smem:[%s15626_s0 + %s14343_s22]]   ;;  %s14346_s4 = smov 8  }
   0x7   :  { %15676 = sst [smem:[#allocation66_spill]] %s14427_s5  ;;  %s14347_s10 = smov 9  }
   0x8   :  { %15677 = sst [smem:[#allocation67_spill]] %s14432_s9  ;;  %s14348_s15 = smov 10  }
   0x9   :  { %15678 = sst [smem:[#allocation68_spill]] %s14437_s13  ;;  %s14349_s20 = smov 11  }
   0xa   :  { %15679 = sst [smem:[#allocation69_spill]] %s14442_s17  ;;  %s14351_s1 = smov 13  }
   0xb   :  { %15680 = sst [smem:[#allocation70_spill]] %s14447_s21  ;;  %s14352_s7 = smov 14  }
   0xc   :  { %15681 = sst [smem:[#allocation71_spill]] %s14452_s25  ;;  %s14354_s22 = smov 16  }
   0xd   :  { %s14457_s29 = sld [smem:[%s15626_s0 + %s14344_s26]]   ;;  %s14350_s26 = smov 12  }
   0xe   :  { %s14462_s3 = sld [smem:[%s15626_s0 + %s14345_s30]]   ;;  %s14355_s28 = smov 17  }
   0xf   :  { %s14467_s8 = sld [smem:[%s15626_s0 + %s14346_s4]]  }
  0x10   :  { %s14472_s14 = sld [smem:[%s15626_s0 + %s14347_s10]]  }
  0x11   :  { %s14477_s19 = sld [smem:[%s15626_s0 + %s14348_s15]]   ;;  %s14353_s15 = smov 15  }
  0x12   :  { %s14482_s24 = sld [smem:[%s15626_s0 + %s14349_s20]]  }
  0x13   :  { %15682 = sst [smem:[#allocation72_spill]] %s14457_s29 }
  0x14   :  { %15683 = sst [smem:[#allocation73_spill]] %s14462_s3 }
  0x15   :  { %15684 = sst [smem:[#allocation74_spill]] %s14467_s8 }
  0x16   :  { %15685 = sst [smem:[#allocation75_spill]] %s14472_s14 }
  0x17   :  { %s14487_s30 = sld [smem:[%s15626_s0 + %s14350_s26]]  }
  0x18   :  { %15686 = sst [smem:[#allocation76_spill]] %s14482_s24 }
  0x19   :  { %s14492_s6 = sld [smem:[%s15626_s0 + %s14351_s1]]  }
  0x1a   :  { %s14497_s12 = sld [smem:[%s15626_s0 + %s14352_s7]]   ;;  %s14356_s7 = smov 18  }
  0x1b   :  { %s14502_s20 = sld [smem:[%s15626_s0 + %s14353_s15]]   ;;  %s14357_s15 = smov 19  }
  0x1c   :  { %s14507_s27 = sld [smem:[%s15626_s0 + %s14354_s22]]   ;;  %s14358_s22 = smov 20  }
  0x1d   :  { %s14512_s4 = sld [smem:[%s15626_s0 + %s14355_s28]]   ;;  %s14359_s28 = smov 21  }
  0x1e   :  { %s14517_s13 = sld [smem:[%s15626_s0 + %s14356_s7]]   ;;  %s14360_s7 = smov 22  }
  0x1f   :  { %15687 = sst [smem:[#allocation77_spill]] %s14492_s6 }
  0x20   :  { %15688 = sst [smem:[#allocation78_spill]] %s14497_s12 }
  0x21   :  { %15689 = sst [smem:[#allocation79_spill]] %s14502_s20 }
  0x22   :  { %15690 = sst [smem:[#allocation80_spill]] %s14507_s27 }
  0x23   :  { %15691 = sst [smem:[#allocation81_spill]] %s14512_s4 }
  0x24   :  { %15692 = sst [smem:[#allocation82_spill]] %s14517_s13 }
  0x25   :  { %s14522_s20 = sld [smem:[%s15626_s0 + %s14357_s15]]   ;;  %s14361_s15 = smov 23  }
  0x26   :  { %s14527_s25 = sld [smem:[%s15626_s0 + %s14358_s22]]   ;;  %s14362_s22 = smov 24  }
  0x27   :  { %s14532_s17 = sld [smem:[%s15626_s0 + %s14359_s28]]   ;;  %s14363_s28 = smov 25  }
  0x28   :  { %s14537_s21 = sld [smem:[%s15626_s0 + %s14360_s7]]   ;;  %s14364_s7 = smov 26  }
  0x29   :  { %s14542_s5 = sld [smem:[%s15626_s0 + %s14361_s15]]   ;;  %s14365_s15 = smov 27  }
  0x2a   :  { %s14547_s9 = sld [smem:[%s15626_s0 + %s14362_s22]]   ;;  %s14366_s22 = smov 28  }
  0x2c   :  { %15693 = sst [smem:[#allocation83_spill]] %s14527_s25 }
  0x2d   :  { %15694 = sst [smem:[#allocation84_spill]] %s14532_s17 }
  0x2e   :  { %s14552_s17 = sld [smem:[%s15626_s0 + %s14363_s28]]   ;;  %s14367_s28 = smov 29  }
  0x2f   :  { %15695 = sst [smem:[#allocation85_spill]] %s14542_s5 }
  0x30   :  { %15696 = sst [smem:[#allocation86_spill]] %s14547_s9 }
  0x31   :  { %s14557_s25 = sld [smem:[%s15626_s0 + %s14364_s7]]   ;;  %s14368_s7 = smov 30  }
  0x32   :  { %s14562_s5 = sld [smem:[%s15626_s0 + %s14365_s15]]   ;;  %s14369_s15 = smov 31  }
  0x33   :  { %s14567_s9 = sld [smem:[%s15626_s0 + %s14366_s22]]   ;;  %s14370_s22 = smov 32  }
  0x34   :  { %15697 = sst [smem:[#allocation87_spill]] %s14552_s17 }
  0x35   :  { %s14572_s17 = sld [smem:[%s15626_s0 + %s14367_s28]]   ;;  %s14371_s28 = smov 33  }
  0x36   :  { %s14577_s13 = sld [smem:[%s15626_s0 + %s14368_s7]]   ;;  %s14372_s7 = smov 34  }
  0x37   :  { %s14587_s27 = sld [smem:[%s15626_s0 + %s14370_s22]]   ;;  %s14374_s22 = smov 36  }
  0x38   :  { %15698 = sst [smem:[#allocation88_spill]] %s14562_s5 }
  0x39   :  { %15699 = sst [smem:[#allocation89_spill]] %s14567_s9 }
  0x3a   :  { %s14582_s5 = sld [smem:[%s15626_s0 + %s14369_s15]]   ;;  %s14373_s15 = smov 35  }
  0x3b   :  { %15700 = sst [smem:[#allocation90_spill]] %s14572_s17 }
  0x3c   :  { %15701 = sst [smem:[#allocation91_spill]] %s14577_s13 }
  0x3d   :  { %s14592_s17 = sld [smem:[%s15626_s0 + %s14371_s28]]   ;;  %s14375_s28 = smov 37  }
  0x3e   :  { %s14597_s6 = sld [smem:[%s15626_s0 + %s14372_s7]]   ;;  %s14376_s7 = smov 38  }
  0x3f   :  { %s14607_s24 = sld [smem:[%s15626_s0 + %s14374_s22]]   ;;  %s14378_s22 = smov 40  }
  0x40   :  { %15702 = sst [smem:[#allocation92_spill]] %s14582_s5 }
  0x41   :  { %s14602_s5 = sld [smem:[%s15626_s0 + %s14373_s15]]   ;;  %s14377_s15 = smov 39  }
  0x42   :  { %s14617_s14 = sld [smem:[%s15626_s0 + %s14376_s7]]  }
  0x43   :  { %15703 = sst [smem:[#allocation93_spill]] %s14592_s17 }
  0x44   :  { %15704 = sst [smem:[#allocation94_spill]] %s14597_s6 }
  0x45   :  { %15706 = sst [smem:[#allocation96_spill]] %s14607_s24 }
  0x46   :  { %s14612_s17 = sld [smem:[%s15626_s0 + %s14375_s28]]  }
  0x47   :  { %15705 = sst [smem:[#allocation95_spill]] %s14602_s5 }
  0x48   :  { %s14622_s5 = sld [smem:[%s15626_s0 + %s14377_s15]]  }
  0x49   :  { %s14627_s24 = sld [smem:[%s15626_s0 + %s14378_s22]]  }
  0x4c   :  { %15707 = sst [smem:[#allocation97_spill]] %s14612_s17 }
  0x4e   :  { %15708 = sst [smem:[#allocation98_spill]] %s14622_s5 }
  0x4f   :  { %15709 = sst [smem:[#allocation99_spill]] %s14627_s24 }
  0x50   :  { %87 = vsyncpa [#allocation9], 0 }
  0x51   :  { %89 = vsyncpa [#allocation9 + $0x1], 0 }
  0x52   :  { %90 = vsyncpa [#allocation11], 0 }
  0x53   :  { %91 = vsyncpa [#allocation14], 0 }
  0x54   :  { %92 = vsyncpa [#allocation17], 0 }
  0x55   :  { %93 = vsyncpa [#allocation20], 0 }
  0x56   :  { %94 = vsyncpa [#allocation23], 0 }
  0x57   :  { %95 = vsyncpa [#allocation26], 0 }
  0x58   :  { %96 = vsyncpa [#allocation29], 0 }
  0x59   :  { %97 = vsyncpa [#allocation32], 0 }
  0x5a   :  { %98 = vsyncpa [#allocation35], 0 }
  0x5b   :  { %99 = vsyncpa [#allocation38], 0 }
  0x5c   :  { %100 = vsyncpa [#allocation41], 0 }
  0x5d   :  { %101 = vsyncpa [#allocation44], 0 }
  0x5e   :  { %102 = vsyncpa [#allocation47], 0 }
  0x5f   :  { %103 = vsyncpa [#allocation50], 0  ;;  %s14629_s28 = smov 0   ;;  %s14631_s0 = smov 0  }
  0x60   :  { %s14633_s1 = smov 0   ;;  %s14635_s2 = smov 0  }
  0x61 LB: > { %s15710_s13 = sld [smem:[#allocation91_spill]]  ;;  %s14648_s7 = sadd.s32 4294967295, %s14337_s2   ;;  %s14337_s2 = sphi %s14635_s2, %s15760_s2   ;;  %s14333_s1 = sphi %s14633_s1, %s15764_s1   ;;  %s14329_s0 = sphi %s14631_s0, %s15763_s0   ;;  %s14325_s28 = sphi %s14629_s28, %s15762_s28  }
  0x62   : > { %s15711_s12 = sld [smem:[#allocation78_spill]]  ;;  %s14651_s10 = sadd.s32 1, %s14337_s2  }
  0x63   : > { %s15712_s9 = sld [smem:[#allocation89_spill]]  ;;  %s139_s11 = ssub.s32 %s14337_s2, %s14651_s10 }
  0x64   : > { %s15713_s8 = sld [smem:[#allocation74_spill]]  ;;  %s142_s15 = sadd.s32 1, %s14333_s1 }
  0x65   : > { %s15714_s6 = sld [smem:[#allocation94_spill]]  ;;  %p140_p0 = scmp.eq.s32.totalorder %s139_s11, 0 }
  0x66   : > { %s15715_s3 = sld [smem:[#allocation73_spill]]  ;;  %p149_p1 = scmp.ne.s32.totalorder %s14333_s1, %s14329_s0 }
  0x67   : > { %s15716_s4 = sld [smem:[#allocation81_spill]]  ;;  %p150_p2 = scmp.eq.s32.totalorder %s14337_s2, 0 }
  0x68   : > { %s15717_s29 = sld [smem:[#allocation72_spill]]  ;;  %p155_p3 = scmp.ne.s32.totalorder %s14329_s0, %s14325_s28 }
  0x69   : > { %15718 = sst [smem:[#allocation100_spill]] %s14651_s10  ;;  %p14663_p4 = por %p150_p2, %p149_p1 }
  0x6a   : > { %s14661_s16 = scalar_select %p140_p0, %s14333_s1, %s142_s15  }
  0x6b   : > { %p156_p5 = scmp.eq.s32.totalorder %s14648_s7, 0  ;;  %p9370_p6 = scmp.ge.s32.totalorder %s14337_s2, 1 }
  0x6c   : > { %15719 = sst [smem:[#allocation101_spill]] %s14661_s16  ;;  %p1000_p7 = scmp.lt.s32.totalorder %s14337_s2, 3 }
  0x6d   : > { %p14672_p8 = por %p156_p5, %p155_p3 }
  0x6e   : > { %p14676_p9 = pnand %p9370_p6, %p1000_p7 }
  0x6f   : > { %s15721_s22 = scalar_select %p14672_p8, 1, 0 }
  0x70   : > { %1004 = sbr.rel (%p14676_p9) target bundleno = 476 (0x1dc), region = 12  ;;  %s1020_s26 = sshll.u32 (!%p14676_p9), %s15717_s29, 4  ;;  %s1021_s26 = int_to_ptr.hbm [resolvable:$true] %s1020_s26 }
  0x71   : > { %15722 = sst [smem:[#allocation102_spill]] %s15721_s22  ;;  %s14379_s28 = smov (!%p14676_p9), [#allocation10]  }
  0x72   : > { %s1022_s11 = sshll.u32 (!%p14676_p9), %s14379_s28, 4  ;;  %s13461_s15 = sshra.s32 (!%p14676_p9), %s1021_s26, 4  ;;  %s1023_s11 = int_to_ptr.vmem [resolvable:$true] %s1022_s11  ;;  %s13462_s15 = int_to_ptr.hbm [resolvable:$true] %s13461_s15 }
  0x73   : > { %s13463_s16 = scalar_lea.hbm (!%p14676_p9), %s13462_s15, 4  ;;  %s13467_s10 = scalar_lea.hbm (!%p14676_p9), %s15717_s29, 4 }
  0x74   : > { %p13464_p10 = scmp.ne.s32.totalorder (!%p14676_p9), %s13462_s15, %s13463_s16  ;;  %p13468_p13 = scmp.lt.s32.totalorder (!%p14676_p9), %s13462_s15, %s15717_s29 }
  0x75   : > { %p13469_p0 = scmp.lt.s32.totalorder %s13467_s10, %s13463_s16 }
  0x76   : > { %p13465_p11 = pnand %p13464_p10, %p156_p5 }
  0x77   : > { %p13470_p1 = por %p13469_p0, %p13468_p13 }
  0x78   : > { %p13466_p12 = pneg %p13465_p11 }
  0x7a   : > { %p13471_p2 = pnand %p13470_p1, %p13466_p12 }
  0x7c   : > { %13474 = shalt.err (!%p13471_p2)
}
  0x7d   : > { %s15654_s24 = smov 16   ;;  %s15657_s28 = smov 1  }
  0x7e   : > { %13084 = dma.hbm_to_vmem [thread:$0]  (%p156_p5), %s1021_s26, 64, %s1023_s11, [#allocation11], %s15654_s24, %s15654_s24, %s15657_s28  }
  0x7f   : > { %s1048_s5 = sshll.u32 %s15713_s8, 4  ;;  %s14382_s15 = smov [#allocation13]   ;;  %s1049_s5 = int_to_ptr.hbm [resolvable:$true] %s1048_s5 }
  0x80   : > { %s1050_s10 = sshll.u32 %s14382_s15, 4  ;;  %s1076_s16 = sshll.u32 %s14477_s19, 4  ;;  %s1051_s10 = int_to_ptr.vmem [resolvable:$true] %s1050_s10  ;;  %s1077_s16 = int_to_ptr.hbm [resolvable:$true] %s1076_s16 }
  0x81   : > { %s13489_s29 = sshra.s32 %s1049_s5, 4  ;;  %s13495_s22 = scalar_lea.hbm %s15713_s8, 4  ;;  %s13490_s29 = int_to_ptr.hbm [resolvable:$true] %s13489_s29 }
  0x82   : > { %s13491_s17 = scalar_lea.hbm %s13490_s29, 4  ;;  %p13496_p10 = scmp.lt.s32.totalorder %s13490_s29, %s15713_s8 }
  0x83   : > { %p13492_p3 = scmp.ne.s32.totalorder %s13490_s29, %s13491_s17  ;;  %p13497_p11 = scmp.lt.s32.totalorder %s13495_s22, %s13491_s17 }
  0x85   : > { %p13493_p6 = pnand %p13492_p3, %p156_p5  ;;  %p13498_p12 = por %p13497_p11, %p13496_p10 }
  0x87   : > { %p13494_p7 = pneg %p13493_p6 }
  0x89   : > { %p13499_p13 = pnand %p13498_p12, %p13494_p7 }
  0x8b   : > { %13502 = shalt.err (!%p13499_p13)
}
  0x8c   : > { %13088 = dma.hbm_to_vmem [thread:$0]  (%p156_p5), %s1049_s5, 64, %s1051_s10, [#allocation14], %s15654_s24, %s15654_s24, %s15657_s28  }
  0x8d   : > { %s14383_s26 = smov [#allocation16]   ;;  %s1104_s15 = sshll.u32 %s14487_s30, 4  ;;  %s14704_s15 = int_to_ptr.hbm [resolvable:$true] %s1104_s15 }
  0x8e   : > { %s1078_s11 = sshll.u32 %s14383_s26, 4  ;;  %s13517_s17 = sshra.s32 %s1077_s16, 4  ;;  %s1079_s11 = int_to_ptr.vmem [resolvable:$true] %s1078_s11  ;;  %s13518_s17 = int_to_ptr.hbm [resolvable:$true] %s13517_s17 }
  0x8f   : > { %s13519_s29 = scalar_lea.hbm %s13518_s17, 2  ;;  %s13523_s22 = scalar_lea.hbm %s14477_s19, 2 }
  0x90   : > { %p13520_p0 = scmp.ne.s32.totalorder %s13518_s17, %s13519_s29  ;;  %p13524_p3 = scmp.lt.s32.totalorder %s13518_s17, %s14477_s19 }
  0x91   : > { %p13525_p6 = scmp.lt.s32.totalorder %s13523_s22, %s13519_s29 }
  0x92   : > { %p13521_p1 = pnand %p13520_p0, %p156_p5 }
  0x93   : > { %p13526_p7 = por %p13525_p6, %p13524_p3 }
  0x94   : > { %p13522_p2 = pneg %p13521_p1 }
  0x96   : > { %p13527_p10 = pnand %p13526_p7, %p13522_p2 }
  0x98   : > { %13530 = shalt.err (!%p13527_p10)
}
  0x99   : > { %13092 = dma.hbm_to_vmem [thread:$0]  (%p156_p5), %s1077_s16, 32, %s1079_s11, [#allocation17], %s15654_s24, %s15654_s24, %s15657_s28  }
  0x9a   : > { %s1132_s5 = sshll.u32 %s15711_s12, 4  ;;  %s14384_s10 = smov [#allocation19]   ;;  %s14716_s5 = int_to_ptr.hbm [resolvable:$true] %s1132_s5 }
  0x9b   : > { %s1106_s26 = sshll.u32 %s14384_s10, 4  ;;  %s13545_s17 = sshra.s32 %s14704_s15, 4  ;;  %s1107_s26 = int_to_ptr.vmem [resolvable:$true] %s1106_s26  ;;  %s13546_s17 = int_to_ptr.hbm [resolvable:$true] %s13545_s17 }
  0x9c   : > { %s13547_s29 = scalar_lea.hbm %s13546_s17, 2  ;;  %s13551_s22 = scalar_lea.hbm %s14487_s30, 2 }
  0x9d   : > { %p13548_p11 = scmp.ne.s32.totalorder %s13546_s17, %s13547_s29  ;;  %p13552_p0 = scmp.lt.s32.totalorder %s13546_s17, %s14487_s30 }
  0x9e   : > { %p13553_p1 = scmp.lt.s32.totalorder %s13551_s22, %s13547_s29 }
  0x9f   : > { %p13549_p12 = pnand %p13548_p11, %p156_p5 }
  0xa0   : > { %p13554_p2 = por %p13553_p1, %p13552_p0 }
  0xa1   : > { %p13550_p13 = pneg %p13549_p12 }
  0xa3   : > { %p13555_p3 = pnand %p13554_p2, %p13550_p13 }
  0xa5   : > { %13558 = shalt.err (!%p13555_p3)
}
  0xa6   : > { %13096 = dma.hbm_to_vmem [thread:$0]  (%p156_p5), %s14704_s15, 32, %s1107_s26, [#allocation20], %s15654_s24, %s15654_s24, %s15657_s28  }
  0xa7   : > { %s14385_s16 = smov [#allocation22]   ;;  %s1163_s10 = sshll.u32 %s15716_s4, 4  ;;  %s14730_s10 = int_to_ptr.hbm [resolvable:$true] %s1163_s10 }
  0xa8   : > { %s1134_s11 = sshll.u32 %s14385_s16, 4  ;;  %s13573_s17 = sshra.s32 %s14716_s5, 4  ;;  %s1135_s11 = int_to_ptr.vmem [resolvable:$true] %s1134_s11  ;;  %s13574_s17 = int_to_ptr.hbm [resolvable:$true] %s13573_s17 }
  0xa9   : > { %s13575_s29 = scalar_lea.hbm %s13574_s17, 2  ;;  %s13579_s22 = scalar_lea.hbm %s15711_s12, 2 }
  0xaa   : > { %p13576_p6 = scmp.ne.s32.totalorder %s13574_s17, %s13575_s29  ;;  %p13580_p11 = scmp.lt.s32.totalorder %s13574_s17, %s15711_s12 }
  0xab   : > { %p13581_p12 = scmp.lt.s32.totalorder %s13579_s22, %s13575_s29 }
  0xac   : > { %p13577_p7 = pnand %p13576_p6, %p156_p5 }
  0xad   : > { %p13582_p13 = por %p13581_p12, %p13580_p11 }
  0xae   : > { %p13578_p10 = pneg %p13577_p7 }
  0xb0   : > { %p13583_p0 = pnand %p13582_p13, %p13578_p10 }
  0xb2   : > { %13586 = shalt.err (!%p13583_p0)
}
  0xb3   : > { %13100 = dma.hbm_to_vmem [thread:$0]  (%p156_p5), %s14716_s5, 32, %s1135_s11, [#allocation23], %s15654_s24, %s15654_s24, %s15657_s28  }
  0xb4   : > { %s1192_s15 = sshll.u32 %s14522_s20, 4  ;;  %s14386_s26 = smov [#allocation25]   ;;  %s14744_s15 = int_to_ptr.hbm [resolvable:$true] %s1192_s15 }
  0xb5   : > { %s1165_s16 = sshll.u32 %s14386_s26, 4  ;;  %s13601_s17 = sshra.s32 %s14730_s10, 4  ;;  %s1166_s16 = int_to_ptr.vmem [resolvable:$true] %s1165_s16  ;;  %s13602_s17 = int_to_ptr.hbm [resolvable:$true] %s13601_s17 }
  0xb6   : > { %s13603_s29 = scalar_lea.hbm %s13602_s17, 2  ;;  %s13607_s22 = scalar_lea.hbm %s15716_s4, 2 }
  0xb7   : > { %p13604_p1 = scmp.ne.s32.totalorder %s13602_s17, %s13603_s29  ;;  %p13608_p6 = scmp.lt.s32.totalorder %s13602_s17, %s15716_s4 }
  0xb8   : > { %p13609_p7 = scmp.lt.s32.totalorder %s13607_s22, %s13603_s29 }
  0xb9   : > { %p13605_p2 = pnand %p13604_p1, %p156_p5 }
  0xba   : > { %p13610_p10 = por %p13609_p7, %p13608_p6 }
  0xbb   : > { %p13606_p3 = pneg %p13605_p2 }
  0xbd   : > { %p13611_p11 = pnand %p13610_p10, %p13606_p3 }
  0xbf   : > { %13614 = shalt.err (!%p13611_p11)
}
  0xc0   : > { %13104 = dma.hbm_to_vmem [thread:$0]  (%p156_p5), %s14730_s10, 32, %s1166_s16, [#allocation26], %s15654_s24, %s15654_s24, %s15657_s28  }
  0xc1   : > { %s14387_s5 = smov [#allocation28]   ;;  %s1219_s26 = sshll.u32 %s14537_s21, 4  ;;  %s14758_s26 = int_to_ptr.hbm [resolvable:$true] %s1219_s26 }
  0xc2   : > { %s1194_s11 = sshll.u32 %s14387_s5, 4  ;;  %s13629_s17 = sshra.s32 %s14744_s15, 4  ;;  %s1195_s11 = int_to_ptr.vmem [resolvable:$true] %s1194_s11  ;;  %s13630_s17 = int_to_ptr.hbm [resolvable:$true] %s13629_s17 }
  0xc3   : > { %s13631_s29 = scalar_lea.hbm %s13630_s17, 4  ;;  %s13635_s22 = scalar_lea.hbm %s14522_s20, 4 }
  0xc4   : > { %p13632_p12 = scmp.ne.s32.totalorder %s13630_s17, %s13631_s29  ;;  %p13636_p1 = scmp.lt.s32.totalorder %s13630_s17, %s14522_s20 }
  0xc5   : > { %p13637_p2 = scmp.lt.s32.totalorder %s13635_s22, %s13631_s29 }
  0xc6   : > { %p13633_p13 = pnand %p13632_p12, %p156_p5 }
  0xc7   : > { %p13638_p3 = por %p13637_p2, %p13636_p1 }
  0xc8   : > { %p13634_p0 = pneg %p13633_p13 }
  0xca   : > { %p13639_p6 = pnand %p13638_p3, %p13634_p0 }
  0xcc   : > { %13642 = shalt.err (!%p13639_p6)
}
  0xcd   : > { %13108 = dma.hbm_to_vmem [thread:$0]  (%p156_p5), %s14744_s15, 64, %s1195_s11, [#allocation29]  }
  0xce   : > { %s1249_s10 = sshll.u32 %s14557_s25, 4  ;;  %s14388_s16 = smov [#allocation31]   ;;  %s14769_s10 = int_to_ptr.hbm [resolvable:$true] %s1249_s10 }
  0xcf   : > { %s1221_s5 = sshll.u32 %s14388_s16, 4  ;;  %s13657_s17 = sshra.s32 %s14758_s26, 4  ;;  %s1222_s5 = int_to_ptr.vmem [resolvable:$true] %s1221_s5  ;;  %s13658_s17 = int_to_ptr.hbm [resolvable:$true] %s13657_s17 }
  0xd0   : > { %s13659_s29 = scalar_lea.hbm %s13658_s17, 1  ;;  %s13663_s22 = scalar_lea.hbm %s14537_s21, 1 }
  0xd1   : > { %p13660_p7 = scmp.ne.s32.totalorder %s13658_s17, %s13659_s29  ;;  %p13664_p12 = scmp.lt.s32.totalorder %s13658_s17, %s14537_s21 }
  0xd2   : > { %p13665_p13 = scmp.lt.s32.totalorder %s13663_s22, %s13659_s29 }
  0xd3   : > { %p13661_p10 = pnand %p13660_p7, %p156_p5 }
  0xd4   : > { %p13666_p0 = por %p13665_p13, %p13664_p12 }
  0xd5   : > { %p13662_p11 = pneg %p13661_p10 }
  0xd7   : > { %p13667_p1 = pnand %p13666_p0, %p13662_p11 }
  0xd9   : > { %13670 = shalt.err (!%p13667_p1)
}
  0xda   : > { %13112 = dma.hbm_to_vmem [thread:$0]  (%p156_p5), %s14758_s26, 16, %s1222_s5, [#allocation32]  }
  0xdb   : > { %s14389_s15 = smov [#allocation34]   ;;  %s1275_s16 = sshll.u32 %s15712_s9, 4  ;;  %s14780_s16 = int_to_ptr.hbm [resolvable:$true] %s1275_s16 }
  0xdc   : > { %s1251_s11 = sshll.u32 %s14389_s15, 4  ;;  %s13685_s17 = sshra.s32 %s14769_s10, 4  ;;  %s1252_s11 = int_to_ptr.vmem [resolvable:$true] %s1251_s11  ;;  %s13686_s17 = int_to_ptr.hbm [resolvable:$true] %s13685_s17 }
  0xdd   : > { %s13687_s29 = scalar_lea.hbm %s13686_s17, 1  ;;  %s13691_s22 = scalar_lea.hbm %s14557_s25, 1 }
  0xde   : > { %p13688_p2 = scmp.ne.s32.totalorder %s13686_s17, %s13687_s29  ;;  %p13692_p7 = scmp.lt.s32.totalorder %s13686_s17, %s14557_s25 }
  0xdf   : > { %p13693_p10 = scmp.lt.s32.totalorder %s13691_s22, %s13687_s29 }
  0xe0   : > { %p13689_p3 = pnand %p13688_p2, %p156_p5 }
  0xe1   : > { %p13694_p11 = por %p13693_p10, %p13692_p7 }
  0xe2   : > { %p13690_p6 = pneg %p13689_p3 }
  0xe4   : > { %p13695_p12 = pnand %p13694_p11, %p13690_p6 }
  0xe6   : > { %13698 = shalt.err (!%p13695_p12)
}
  0xe7   : > { %13116 = dma.hbm_to_vmem [thread:$0]  (%p156_p5), %s14769_s10, 16, %s1252_s11, [#allocation35]  }
  0xe8   : > { %s1301_s26 = sshll.u32 %s15710_s13, 4  ;;  %s14390_s5 = smov [#allocation37]   ;;  %s14791_s26 = int_to_ptr.hbm [resolvable:$true] %s1301_s26 }
  0xe9   : > { %s1277_s15 = sshll.u32 %s14390_s5, 4  ;;  %s13713_s17 = sshra.s32 %s14780_s16, 4  ;;  %s1278_s15 = int_to_ptr.vmem [resolvable:$true] %s1277_s15  ;;  %s13714_s17 = int_to_ptr.hbm [resolvable:$true] %s13713_s17 }
  0xea   : > { %s13715_s29 = scalar_lea.hbm %s13714_s17, 1  ;;  %s13719_s22 = scalar_lea.hbm %s15712_s9, 1 }
  0xeb   : > { %p13716_p13 = scmp.ne.s32.totalorder %s13714_s17, %s13715_s29  ;;  %p13720_p2 = scmp.lt.s32.totalorder %s13714_s17, %s15712_s9 }
  0xec   : > { %p13721_p3 = scmp.lt.s32.totalorder %s13719_s22, %s13715_s29 }
  0xed   : > { %p13717_p0 = pnand %p13716_p13, %p156_p5 }
  0xee   : > { %p13722_p6 = por %p13721_p3, %p13720_p2 }
  0xef   : > { %p13718_p1 = pneg %p13717_p0 }
  0xf1   : > { %p13723_p7 = pnand %p13722_p6, %p13718_p1 }
  0xf3   : > { %13726 = shalt.err (!%p13723_p7)
}
  0xf4   : > { %13120 = dma.hbm_to_vmem [thread:$0]  (%p156_p5), %s14780_s16, 16, %s1278_s15, [#allocation38]  }
  0xf5   : > { %s14391_s10 = smov [#allocation40]   ;;  %s1327_s5 = sshll.u32 %s14587_s27, 4  ;;  %s14802_s5 = int_to_ptr.hbm [resolvable:$true] %s1327_s5 }
  0xf6   : > { %s1303_s11 = sshll.u32 %s14391_s10, 4  ;;  %s13741_s17 = sshra.s32 %s14791_s26, 4  ;;  %s1304_s11 = int_to_ptr.vmem [resolvable:$true] %s1303_s11  ;;  %s13742_s17 = int_to_ptr.hbm [resolvable:$true] %s13741_s17 }
  0xf7   : > { %s13743_s29 = scalar_lea.hbm %s13742_s17, 4  ;;  %s13747_s22 = scalar_lea.hbm %s15710_s13, 4 }
  0xf8   : > { %p13744_p10 = scmp.ne.s32.totalorder %s13742_s17, %s13743_s29  ;;  %p13748_p13 = scmp.lt.s32.totalorder %s13742_s17, %s15710_s13 }
  0xf9   : > { %p13749_p0 = scmp.lt.s32.totalorder %s13747_s22, %s13743_s29 }
  0xfa   : > { %p13745_p11 = pnand %p13744_p10, %p156_p5 }
  0xfb   : > { %p13750_p1 = por %p13749_p0, %p13748_p13 }
  0xfc   : > { %p13746_p12 = pneg %p13745_p11 }
  0xfe   : > { %p13751_p2 = pnand %p13750_p1, %p13746_p12 }
 0x100   : > { %13754 = shalt.err (!%p13751_p2)
}
 0x101   : > { %13124 = dma.hbm_to_vmem [thread:$0]  (%p156_p5), %s14791_s26, 64, %s1304_s11, [#allocation41]  }
 0x102   : > { %s1353_s16 = sshll.u32 %s15714_s6, 4  ;;  %s14392_s15 = smov [#allocation43]   ;;  %s14813_s16 = int_to_ptr.hbm [resolvable:$true] %s1353_s16 }
 0x103   : > { %s1329_s10 = sshll.u32 %s14392_s15, 4  ;;  %s13769_s17 = sshra.s32 %s14802_s5, 4  ;;  %s1330_s10 = int_to_ptr.vmem [resolvable:$true] %s1329_s10  ;;  %s13770_s17 = int_to_ptr.hbm [resolvable:$true] %s13769_s17 }
 0x104   : > { %s13771_s29 = scalar_lea.hbm %s13770_s17, 2  ;;  %s13775_s22 = scalar_lea.hbm %s14587_s27, 2 }
 0x105   : > { %p13772_p3 = scmp.ne.s32.totalorder %s13770_s17, %s13771_s29  ;;  %p13776_p10 = scmp.lt.s32.totalorder %s13770_s17, %s14587_s27 }
 0x106   : > { %p13777_p11 = scmp.lt.s32.totalorder %s13775_s22, %s13771_s29 }
 0x107   : > { %p13773_p6 = pnand %p13772_p3, %p156_p5 }
 0x108   : > { %p13778_p12 = por %p13777_p11, %p13776_p10 }
 0x109   : > { %p13774_p7 = pneg %p13773_p6 }
 0x10b   : > { %p13779_p13 = pnand %p13778_p12, %p13774_p7 }
 0x10d   : > { %13782 = shalt.err (!%p13779_p13)
}
 0x10e   : > { %13128 = dma.hbm_to_vmem [thread:$0]  (%p156_p5), %s14802_s5, 32, %s1330_s10, [#allocation44]  }
 0x10f   : > { %s14393_s26 = smov [#allocation46]   ;;  %s1034_s15 = sshll.u32 %s15715_s3, 4  ;;  %s14824_s15 = int_to_ptr.hbm [resolvable:$true] %s1034_s15 }
 0x110   : > { %s1355_s11 = sshll.u32 %s14393_s26, 4  ;;  %s13797_s17 = sshra.s32 %s14813_s16, 4  ;;  %s1356_s11 = int_to_ptr.vmem [resolvable:$true] %s1355_s11  ;;  %s13798_s17 = int_to_ptr.hbm [resolvable:$true] %s13797_s17 }
 0x111   : > { %s13799_s29 = scalar_lea.hbm %s13798_s17, 1  ;;  %s13803_s22 = scalar_lea.hbm %s15714_s6, 1 }
 0x112   : > { %p13800_p0 = scmp.ne.s32.totalorder %s13798_s17, %s13799_s29  ;;  %p13804_p3 = scmp.lt.s32.totalorder %s13798_s17, %s15714_s6 }
 0x113   : > { %p13805_p6 = scmp.lt.s32.totalorder %s13803_s22, %s13799_s29 }
 0x114   : > { %p13801_p1 = pnand %p13800_p0, %p156_p5 }
 0x115   : > { %p13806_p7 = por %p13805_p6, %p13804_p3 }
 0x116   : > { %p13802_p2 = pneg %p13801_p1 }
 0x118   : > { %p13807_p10 = pnand %p13806_p7, %p13802_p2 }
 0x11a   : > { %13810 = shalt.err (!%p13807_p10)
}
 0x11b   : > { %s15724_s5 = sld [smem:[#allocation75_spill]]  ;;  %s14394_s26 = smov [#allocation12]  }
 0x11c   : > { %13132 = dma.hbm_to_vmem [thread:$0]  (%p156_p5), %s14813_s16, 16, %s1356_s11, [#allocation47]  }
 0x11d   : > { %s1036_s24 = sshll.u32 %s14394_s26, 4  ;;  %s13825_s17 = sshra.s32 %s14824_s15, 4  ;;  %s1037_s24 = int_to_ptr.vmem [resolvable:$true] %s1036_s24  ;;  %s13826_s17 = int_to_ptr.hbm [resolvable:$true] %s13825_s17 }
 0x11e   : > { %s13827_s29 = scalar_lea.hbm %s13826_s17, 4  ;;  %s13831_s22 = scalar_lea.hbm %s15715_s3, 4 }
 0x11f   : > { %p13828_p11 = scmp.ne.s32.totalorder %s13826_s17, %s13827_s29  ;;  %p13832_p0 = scmp.lt.s32.totalorder %s13826_s17, %s15715_s3 }
 0x120   : > { %p13833_p1 = scmp.lt.s32.totalorder %s13831_s22, %s13827_s29 }
 0x121   : > { %s1062_s10 = sshll.u32 %s15724_s5, 4  ;;  %p13829_p12 = pnand %p13828_p11, %p156_p5  ;;  %s14835_s10 = int_to_ptr.hbm [resolvable:$true] %s1062_s10 }
 0x122   : > { %p13834_p2 = por %p13833_p1, %p13832_p0 }
 0x123   : > { %p13830_p13 = pneg %p13829_p12 }
 0x125   : > { %p13835_p3 = pnand %p13834_p2, %p13830_p13 }
 0x127   : > { %13838 = shalt.err (!%p13835_p3)
}
 0x128   : > { %s15725_s16 = smov 16   ;;  %s14395_s11 = smov [#allocation15]  }
 0x129   : > { %13086 = dma.hbm_to_vmem [thread:$0]  (%p156_p5), %s14824_s15, 64, %s1037_s24, [#allocation11], %s15725_s16, %s15725_s16, %s15657_s28  }
 0x12a   : > { %s1064_s26 = sshll.u32 %s14395_s11, 4  ;;  %s13853_s4 = sshra.s32 %s14835_s10, 4  ;;  %s1065_s26 = int_to_ptr.vmem [resolvable:$true] %s1064_s26  ;;  %s13854_s4 = int_to_ptr.hbm [resolvable:$true] %s13853_s4 }
 0x12b   : > { %s13855_s17 = scalar_lea.hbm %s13854_s4, 8  ;;  %s13859_s29 = scalar_lea.hbm %s15724_s5, 8 }
 0x12c   : > { %p13856_p6 = scmp.ne.s32.totalorder %s13854_s4, %s13855_s17  ;;  %p13860_p11 = scmp.lt.s32.totalorder %s13854_s4, %s15724_s5 }
 0x12d   : > { %p13861_p12 = scmp.lt.s32.totalorder %s13859_s29, %s13855_s17 }
 0x12e   : > { %p13857_p7 = pnand %p13856_p6, %p156_p5 }
 0x12f   : > { %p13862_p13 = por %p13861_p12, %p13860_p11 }
 0x130   : > { %p13858_p10 = pneg %p13857_p7 }
 0x132   : > { %p13863_p0 = pnand %p13862_p13, %p13858_p10 }
 0x134   : > { %13866 = shalt.err (!%p13863_p0)
}
 0x135   : > { %s15662_s22 = smov 64   ;;  %s15726_s24 = sld [smem:[#allocation76_spill]] }
 0x136   : > { %s15727_s15 = sld [smem:[#allocation77_spill]]  ;;  %s15664_s11 = smov 4  }
 0x137   : > { %13090 = dma.hbm_to_vmem [thread:$0]  (%p156_p5), %s14835_s10, 128, %s1065_s26, [#allocation14], %s15662_s22, %s15662_s22, %s15664_s11  }
 0x138   : > { %s14398_s4 = smov [#allocation18]  }
 0x139   : > { %s1092_s17 = sshll.u32 %s14398_s4, 4  ;;  %s1093_s17 = int_to_ptr.vmem [resolvable:$true] %s1092_s17 }
 0x13b   : > { %s1090_s28 = sshll.u32 %s15726_s24, 4  ;;  %s13887_s6 = scalar_lea.hbm %s15726_s24, 2  ;;  %s1091_s28 = int_to_ptr.hbm [resolvable:$true] %s1090_s28 }
 0x13c   : > { %s1118_s29 = sshll.u32 %s15727_s15, 4  ;;  %s13881_s3 = sshra.s32 %s1091_s28, 4  ;;  %s13882_s3 = int_to_ptr.hbm [resolvable:$true] %s13881_s3  ;;  %s1119_s29 = int_to_ptr.hbm [resolvable:$true] %s1118_s29 }
 0x13d   : > { %s13883_s5 = scalar_lea.hbm %s13882_s3, 2  ;;  %p13888_p6 = scmp.lt.s32.totalorder %s13882_s3, %s15726_s24 }
 0x13e   : > { %p13884_p1 = scmp.ne.s32.totalorder %s13882_s3, %s13883_s5  ;;  %p13889_p7 = scmp.lt.s32.totalorder %s13887_s6, %s13883_s5 }
 0x140   : > { %p13885_p2 = pnand %p13884_p1, %p156_p5  ;;  %p13890_p10 = por %p13889_p7, %p13888_p6 }
 0x142   : > { %p13886_p3 = pneg %p13885_p2 }
 0x144   : > { %p13891_p11 = pnand %p13890_p10, %p13886_p3 }
 0x146   : > { %13894 = shalt.err (!%p13891_p11)
}
 0x147   : > { %s15728_s10 = smov 1   ;;  %s15729_s26 = sld [smem:[#allocation80_spill]] }
 0x148   : > { %13094 = dma.hbm_to_vmem [thread:$0]  (%p156_p5), %s1091_s28, 32, %s1093_s17, [#allocation17], %s15725_s16, %s15725_s16, %s15728_s10  }
 0x149   : > { %s14399_s4 = smov [#allocation21]   ;;  %s13909_s3 = sshra.s32 %s1119_s29, 4  ;;  %s13910_s3 = int_to_ptr.hbm [resolvable:$true] %s13909_s3 }
 0x14a   : > { %s1120_s22 = sshll.u32 %s14399_s4, 4  ;;  %s13911_s6 = scalar_lea.hbm %s13910_s3, 8  ;;  %s1121_s22 = int_to_ptr.vmem [resolvable:$true] %s1120_s22 }
 0x14b   : > { %p13912_p12 = scmp.ne.s32.totalorder %s13910_s3, %s13911_s6  ;;  %s13915_s5 = scalar_lea.hbm %s15727_s15, 8 }
 0x14c   : > { %p13916_p1 = scmp.lt.s32.totalorder %s13910_s3, %s15727_s15  ;;  %p13917_p2 = scmp.lt.s32.totalorder %s13915_s5, %s13911_s6 }
 0x14d   : > { %s1149_s11 = sshll.u32 %s15729_s26, 4  ;;  %p13913_p13 = pnand %p13912_p12, %p156_p5  ;;  %s14871_s11 = int_to_ptr.hbm [resolvable:$true] %s1149_s11 }
 0x14e   : > { %p13918_p3 = por %p13917_p2, %p13916_p1 }
 0x14f   : > { %p13914_p0 = pneg %p13913_p13 }
 0x151   : > { %p13919_p6 = pnand %p13918_p3, %p13914_p0 }
 0x153   : > { %13922 = shalt.err (!%p13919_p6)
}
 0x154   : > { %s15730_s28 = smov 4   ;;  %s15731_s17 = smov 64  }
 0x155   : > { %s15732_s4 = sld [smem:[#allocation82_spill]]  ;;  %s14400_s9 = smov [#allocation24]  }
 0x156   : > { %13098 = dma.hbm_to_vmem [thread:$0]  (%p156_p5), %s1119_s29, 128, %s1121_s22, [#allocation20], %s15731_s17, %s15731_s17, %s15730_s28  }
 0x157   : > { %s1151_s12 = sshll.u32 %s14400_s9, 4  ;;  %s13937_s3 = sshra.s32 %s14871_s11, 4  ;;  %s1152_s12 = int_to_ptr.vmem [resolvable:$true] %s1151_s12  ;;  %s13938_s3 = int_to_ptr.hbm [resolvable:$true] %s13937_s3 }
 0x158   : > { %s13939_s6 = scalar_lea.hbm %s13938_s3, 2  ;;  %s13943_s5 = scalar_lea.hbm %s15729_s26, 2 }
 0x159   : > { %p13940_p7 = scmp.ne.s32.totalorder %s13938_s3, %s13939_s6  ;;  %p13944_p12 = scmp.lt.s32.totalorder %s13938_s3, %s15729_s26 }
 0x15a   : > { %p13945_p13 = scmp.lt.s32.totalorder %s13943_s5, %s13939_s6 }
 0x15b   : > { %s1177_s8 = sshll.u32 %s15732_s4, 4  ;;  %p13941_p10 = pnand %p13940_p7, %p156_p5  ;;  %s14883_s8 = int_to_ptr.hbm [resolvable:$true] %s1177_s8 }
 0x15c   : > { %p13946_p0 = por %p13945_p13, %p13944_p12 }
 0x15d   : > { %p13942_p11 = pneg %p13941_p10 }
 0x15f   : > { %p13947_p1 = pnand %p13946_p0, %p13942_p11 }
 0x161   : > { %13950 = shalt.err (!%p13947_p1)
}
 0x162   : > { %s15733_s9 = sld [smem:[#allocation83_spill]]  ;;  %s14401_s22 = smov [#allocation27]  }
 0x163   : > { %13102 = dma.hbm_to_vmem [thread:$0]  (%p156_p5), %s14871_s11, 32, %s1152_s12, [#allocation23], %s15725_s16, %s15725_s16, %s15728_s10  }
 0x164   : > { %s1179_s29 = sshll.u32 %s14401_s22, 4  ;;  %s13965_s3 = sshra.s32 %s14883_s8, 4  ;;  %s1180_s29 = int_to_ptr.vmem [resolvable:$true] %s1179_s29  ;;  %s13966_s3 = int_to_ptr.hbm [resolvable:$true] %s13965_s3 }
 0x165   : > { %s13967_s6 = scalar_lea.hbm %s13966_s3, 2  ;;  %s13971_s5 = scalar_lea.hbm %s15732_s4, 2 }
 0x166   : > { %p13968_p2 = scmp.ne.s32.totalorder %s13966_s3, %s13967_s6  ;;  %p13972_p7 = scmp.lt.s32.totalorder %s13966_s3, %s15732_s4 }
 0x167   : > { %p13973_p10 = scmp.lt.s32.totalorder %s13971_s5, %s13967_s6 }
 0x168   : > { %s1204_s13 = sshll.u32 %s15733_s9, 4  ;;  %p13969_p3 = pnand %p13968_p2, %p156_p5  ;;  %s14897_s13 = int_to_ptr.hbm [resolvable:$true] %s1204_s13 }
 0x169   : > { %p13974_p11 = por %p13973_p10, %p13972_p7 }
 0x16a   : > { %p13970_p6 = pneg %p13969_p3 }
 0x16c   : > { %p13975_p12 = pnand %p13974_p11, %p13970_p6 }
 0x16e   : > { %13978 = shalt.err (!%p13975_p12)
}
 0x16f   : > { %s15734_s12 = sld [smem:[#allocation86_spill]]  ;;  %s14402_s22 = smov [#allocation30]  }
 0x170   : > { %13106 = dma.hbm_to_vmem [thread:$0]  (%p156_p5), %s14883_s8, 32, %s1180_s29, [#allocation26], %s15725_s16, %s15725_s16, %s15728_s10  }
 0x171   : > { %s1206_s15 = sshll.u32 %s14402_s22, 4  ;;  %s13993_s3 = sshra.s32 %s14897_s13, 4  ;;  %s1207_s15 = int_to_ptr.vmem [resolvable:$true] %s1206_s15  ;;  %s13994_s3 = int_to_ptr.hbm [resolvable:$true] %s13993_s3 }
 0x172   : > { %s13995_s6 = scalar_lea.hbm %s13994_s3, 1  ;;  %s13999_s5 = scalar_lea.hbm %s15733_s9, 1 }
 0x173   : > { %p13996_p13 = scmp.ne.s32.totalorder %s13994_s3, %s13995_s6  ;;  %p14000_p2 = scmp.lt.s32.totalorder %s13994_s3, %s15733_s9 }
 0x174   : > { %p14001_p3 = scmp.lt.s32.totalorder %s13999_s5, %s13995_s6 }
 0x175   : > { %s1234_s11 = sshll.u32 %s15734_s12, 4  ;;  %p13997_p0 = pnand %p13996_p13, %p156_p5  ;;  %s14911_s11 = int_to_ptr.hbm [resolvable:$true] %s1234_s11 }
 0x176   : > { %p14002_p6 = por %p14001_p3, %p14000_p2 }
 0x177   : > { %p13998_p1 = pneg %p13997_p0 }
 0x179   : > { %p14003_p7 = pnand %p14002_p6, %p13998_p1 }
 0x17b   : > { %14006 = shalt.err (!%p14003_p7)
}
 0x17c   : > { %s15735_s8 = sld [smem:[#allocation88_spill]]  ;;  %s14403_s10 = smov [#allocation33]  }
 0x17d   : > { %13110 = dma.hbm_to_vmem [thread:$0]  (%p156_p5), %s14897_s13, 16, %s1207_s15, [#allocation29]  }
 0x17e   : > { %s1236_s29 = sshll.u32 %s14403_s10, 4  ;;  %s14021_s3 = sshra.s32 %s14911_s11, 4  ;;  %s1237_s29 = int_to_ptr.vmem [resolvable:$true] %s1236_s29  ;;  %s14022_s3 = int_to_ptr.hbm [resolvable:$true] %s14021_s3 }
 0x17f   : > { %s14023_s6 = scalar_lea.hbm %s14022_s3, 1  ;;  %s14027_s5 = scalar_lea.hbm %s15734_s12, 1 }
 0x180   : > { %p14024_p10 = scmp.ne.s32.totalorder %s14022_s3, %s14023_s6  ;;  %p14028_p13 = scmp.lt.s32.totalorder %s14022_s3, %s15734_s12 }
 0x181   : > { %p14029_p0 = scmp.lt.s32.totalorder %s14027_s5, %s14023_s6 }
 0x182   : > { %s1260_s22 = sshll.u32 %s15735_s8, 4  ;;  %p14025_p11 = pnand %p14024_p10, %p156_p5  ;;  %s14922_s22 = int_to_ptr.hbm [resolvable:$true] %s1260_s22 }
 0x183   : > { %p14030_p1 = por %p14029_p0, %p14028_p13 }
 0x184   : > { %p14026_p12 = pneg %p14025_p11 }
 0x186   : > { %p14031_p2 = pnand %p14030_p1, %p14026_p12 }
 0x188   : > { %14034 = shalt.err (!%p14031_p2)
}
 0x189   : > { %s15736_s13 = sld [smem:[#allocation90_spill]]  ;;  %s14404_s10 = smov [#allocation36]  }
 0x18a   : > { %13114 = dma.hbm_to_vmem [thread:$0]  (%p156_p5), %s14911_s11, 16, %s1237_s29, [#allocation32]  }
 0x18b   : > { %s1262_s4 = sshll.u32 %s14404_s10, 4  ;;  %s14049_s3 = sshra.s32 %s14922_s22, 4  ;;  %s1263_s4 = int_to_ptr.vmem [resolvable:$true] %s1262_s4  ;;  %s14050_s3 = int_to_ptr.hbm [resolvable:$true] %s14049_s3 }
 0x18c   : > { %s14051_s6 = scalar_lea.hbm %s14050_s3, 192  ;;  %s14055_s5 = scalar_lea.hbm %s15735_s8, 192 }
 0x18d   : > { %p14052_p3 = scmp.ne.s32.totalorder %s14050_s3, %s14051_s6  ;;  %p14056_p10 = scmp.lt.s32.totalorder %s14050_s3, %s15735_s8 }
 0x18e   : > { %p14057_p11 = scmp.lt.s32.totalorder %s14055_s5, %s14051_s6 }
 0x18f   : > { %s1286_s15 = sshll.u32 %s15736_s13, 4  ;;  %p14053_p6 = pnand %p14052_p3, %p156_p5  ;;  %s14933_s15 = int_to_ptr.hbm [resolvable:$true] %s1286_s15 }
 0x190   : > { %p14058_p12 = por %p14057_p11, %p14056_p10 }
 0x191   : > { %p14054_p7 = pneg %p14053_p6 }
 0x193   : > { %p14059_p13 = pnand %p14058_p12, %p14054_p7 }
 0x195   : > { %14062 = shalt.err (!%p14059_p13)
}
 0x196   : > { %s15737_s11 = sld [smem:[#allocation92_spill]]  ;;  %s14405_s29 = smov [#allocation39]  }
 0x197   : > { %13118 = dma.hbm_to_vmem [thread:$0]  (%p156_p5), %s14922_s22, 3072, %s1263_s4, [#allocation35], %s15731_s17, %s15731_s17, %s15730_s28  }
 0x198   : > { %s1288_s10 = sshll.u32 %s14405_s29, 4  ;;  %s14077_s6 = sshra.s32 %s14933_s15, 4  ;;  %s1289_s10 = int_to_ptr.vmem [resolvable:$true] %s1288_s10  ;;  %s14078_s6 = int_to_ptr.hbm [resolvable:$true] %s14077_s6 }
 0x199   : > { %s14079_s5 = scalar_lea.hbm %s14078_s6, 4096  ;;  %s14083_s8 = scalar_lea.hbm %s15736_s13, 4096 }
 0x19a   : > { %p14080_p0 = scmp.ne.s32.totalorder %s14078_s6, %s14079_s5  ;;  %p14084_p3 = scmp.lt.s32.totalorder %s14078_s6, %s15736_s13 }
 0x19b   : > { %p14085_p6 = scmp.lt.s32.totalorder %s14083_s8, %s14079_s5 }
 0x19c   : > { %s1312_s3 = sshll.u32 %s15737_s11, 4  ;;  %p14081_p1 = pnand %p14080_p0, %p156_p5  ;;  %s1313_s3 = int_to_ptr.hbm [resolvable:$true] %s1312_s3 }
 0x19d   : > { %p14086_p7 = por %p14085_p6, %p14084_p3 }
 0x19e   : > { %p14082_p2 = pneg %p14081_p1 }
 0x1a0   : > { %p14087_p10 = pnand %p14086_p7, %p14082_p2 }
 0x1a2   : > { %14090 = shalt.err (!%p14087_p10)
}
 0x1a3   : > { %s14406_s9 = smov 256   ;;  %s14407_s4 = smov [#allocation42]  }
 0x1a4   : > { %13122 = dma.hbm_to_vmem [thread:$0]  (%p156_p5), %s14933_s15, 65536, %s1289_s10, [#allocation38], %s14406_s9, %s14406_s9, %s15725_s16  }
 0x1a5   : > { %s1314_s22 = sshll.u32 %s14407_s4, 4  ;;  %s14105_s29 = sshra.s32 %s1313_s3, 4  ;;  %s1315_s22 = int_to_ptr.vmem [resolvable:$true] %s1314_s22  ;;  %s14106_s29 = int_to_ptr.hbm [resolvable:$true] %s14105_s29 }
 0x1a6   : > { %s14107_s6 = scalar_lea.hbm %s14106_s29, 512  ;;  %s14111_s8 = scalar_lea.hbm %s15737_s11, 512 }
 0x1a7   : > { %p14108_p11 = scmp.ne.s32.totalorder %s14106_s29, %s14107_s6  ;;  %p14112_p0 = scmp.lt.s32.totalorder %s14106_s29, %s15737_s11 }
 0x1a8   : > { %p14113_p1 = scmp.lt.s32.totalorder %s14111_s8, %s14107_s6 }
 0x1a9   : > { %p14109_p12 = pnand %p14108_p11, %p156_p5 }
 0x1aa   : > { %p14114_p2 = por %p14113_p1, %p14112_p0 }
 0x1ab   : > { %p14110_p13 = pneg %p14109_p12 }
 0x1ad   : > { %p14115_p3 = pnand %p14114_p2, %p14110_p13 }
 0x1af   : > { %14118 = shalt.err (!%p14115_p3)
}
 0x1b0   : > { %s14408_s5 = smov 128   ;;  %s15738_s16 = sld [smem:[#allocation93_spill]] }
 0x1b1   : > { %s15739_s9 = sld [smem:[#allocation96_spill]]  ;;  %s14409_s15 = smov 8  }
 0x1b2   : > { %13126 = dma.hbm_to_vmem [thread:$0]  (%p156_p5), %s1313_s3, 8192, %s1315_s22, [#allocation41], %s14408_s5, %s14408_s5, %s14409_s15  }
 0x1b3   : > { %s14410_s4 = smov [#allocation45]  }
 0x1b4   : > { %s1340_s12 = sshll.u32 %s14410_s4, 4  ;;  %s1341_s12 = int_to_ptr.vmem [resolvable:$true] %s1340_s12 }
 0x1b6   : > { %s1338_s10 = sshll.u32 %s15738_s16, 4  ;;  %s14139_s11 = scalar_lea.hbm %s15738_s16, 128  ;;  %s1339_s10 = int_to_ptr.hbm [resolvable:$true] %s1338_s10 }
 0x1b7   : > { %s1368_s29 = sshll.u32 %s15739_s9, 4  ;;  %s14133_s6 = sshra.s32 %s1339_s10, 4  ;;  %s14134_s6 = int_to_ptr.hbm [resolvable:$true] %s14133_s6  ;;  %s1369_s29 = int_to_ptr.hbm [resolvable:$true] %s1368_s29 }
 0x1b8   : > { %s14135_s8 = scalar_lea.hbm %s14134_s6, 128  ;;  %p14140_p11 = scmp.lt.s32.totalorder %s14134_s6, %s15738_s16 }
 0x1b9   : > { %p14136_p6 = scmp.ne.s32.totalorder %s14134_s6, %s14135_s8  ;;  %p14141_p12 = scmp.lt.s32.totalorder %s14139_s11, %s14135_s8 }
 0x1bb   : > { %p14137_p7 = pnand %p14136_p6, %p156_p5  ;;  %p14142_p13 = por %p14141_p12, %p14140_p11 }
 0x1bd   : > { %p14138_p10 = pneg %p14137_p7 }
 0x1bf   : > { %p14143_p0 = pnand %p14142_p13, %p14138_p10 }
 0x1c1   : > { %14146 = shalt.err (!%p14143_p0)
}
 0x1c2   : > { %13130 = dma.hbm_to_vmem [thread:$0]  (%p156_p5), %s1339_s10, 2048, %s1341_s12, [#allocation44], %s15731_s17, %s15731_s17, %s15730_s28  }
 0x1c3   : > { %s14411_s3 = smov [#allocation48]   ;;  %s1383_s5 = sshll.u32 %s14617_s14, 4  ;;  %s1384_s5 = int_to_ptr.hbm [resolvable:$true] %s1383_s5 }
 0x1c4   : > { %s1370_s22 = sshll.u32 %s14411_s3, 4  ;;  %s14161_s15 = sshra.s32 %s1369_s29, 4  ;;  %s1371_s22 = int_to_ptr.vmem [resolvable:$true] %s1370_s22  ;;  %s14162_s15 = int_to_ptr.hbm [resolvable:$true] %s14161_s15 }
 0x1c5   : > { %s14163_s11 = scalar_lea.hbm %s14162_s15, 1  ;;  %s14167_s4 = scalar_lea.hbm %s15739_s9, 1 }
 0x1c6   : > { %p14164_p1 = scmp.ne.s32.totalorder %s14162_s15, %s14163_s11  ;;  %p14168_p6 = scmp.lt.s32.totalorder %s14162_s15, %s15739_s9 }
 0x1c7   : > { %p14169_p7 = scmp.lt.s32.totalorder %s14167_s4, %s14163_s11 }
 0x1c8   : > { %p14165_p2 = pnand %p14164_p1, %p156_p5 }
 0x1c9   : > { %p14170_p10 = por %p14169_p7, %p14168_p6 }
 0x1ca   : > { %p14166_p3 = pneg %p14165_p2 }
 0x1cc   : > { %p14171_p11 = pnand %p14170_p10, %p14166_p3 }
 0x1ce   : > { %14174 = shalt.err (!%p14171_p11)
}
 0x1cf   : > { %13134 = dma.hbm_to_vmem [thread:$0]  (%p156_p5), %s1369_s29, 16, %s1371_s22, [#allocation47]  }
 0x1d0   : > { %s14412_s28 = smov [#allocation49]   ;;  %s14189_s12 = sshra.s32 %s1384_s5, 4  ;;  %s14190_s12 = int_to_ptr.hbm [resolvable:$true] %s14189_s12 }
 0x1d1   : > { %s1385_s17 = sshll.u32 %s14412_s28, 4  ;;  %s14191_s10 = scalar_lea.hbm %s14190_s12, 1  ;;  %s1386_s17 = int_to_ptr.vmem [resolvable:$true] %s1385_s17 }
 0x1d2   : > { %p14192_p12 = scmp.ne.s32.totalorder %s14190_s12, %s14191_s10  ;;  %s14195_s6 = scalar_lea.hbm %s14617_s14, 1 }
 0x1d3   : > { %p14196_p1 = scmp.lt.s32.totalorder %s14190_s12, %s14617_s14  ;;  %p14197_p2 = scmp.lt.s32.totalorder %s14195_s6, %s14191_s10 }
 0x1d4   : > { %p14193_p13 = pnand %p14192_p12, %p156_p5 }
 0x1d5   : > { %p14198_p3 = por %p14197_p2, %p14196_p1 }
 0x1d6   : > { %p14194_p0 = pneg %p14193_p13 }
 0x1d8   : > { %p14199_p6 = pnand %p14198_p3, %p14194_p0 }
 0x1da   : > { %14202 = shalt.err (!%p14199_p6)
}
 0x1db   : > { %13136 = dma.hbm_to_vmem [thread:$0]  (%p156_p5), %s1384_s5, 16, %s1386_s17, [#allocation50]  }
 0x1dc PF: > { %s15740_s29 = sld [smem:[#allocation67_spill]]  ;;  %p13224_p7 = scmp.lt.s32.totalorder %s14337_s2, 2 }
 0x1dd   : > { %s1404_s8 = sand.u32 1, %s14333_s1   ;;  %s12365_s3 = sshll.u32 %s14337_s2, 4 }
 0x1de   : > { %s9399_s22 = sshll.u32 %s1404_s8, 4  ;;  %p14992_p10 = pnand %p13224_p7, %p14663_p4 }
 0x1df   : > { %s1408_s4 = scalar_lea.vmem [#allocation8], %s9399_s22  ;;  %s1405_s17 = scalar_lea.sflag [#allocation9], %s1404_s8 }
 0x1e0   : > { %s1416_s28 = sshll.u32 %s1408_s4, 4  ;;  %p14221_p12 = pneg %p14992_p10  ;;  %s1417_s28 = int_to_ptr.vmem [resolvable:$true] %s1416_s28 }
 0x1e2   : > { %s1413_s15 = scalar_lea.hbm %s15740_s29, %s12365_s3  ;;  %s14224_s2 = scalar_lea.hbm %s15740_s29, 32 }
 0x1e3   : > { %s1414_s11 = sshll.u32 %s1413_s15, 4  ;;  %s1415_s11 = int_to_ptr.hbm [resolvable:$true] %s1414_s11 }
 0x1e4   : > { %s14217_s12 = sshra.s32 %s1415_s11, 4  ;;  %s14218_s12 = int_to_ptr.hbm [resolvable:$true] %s14217_s12 }
 0x1e5   : > { %s14219_s10 = scalar_lea.hbm %s14218_s12, 16  ;;  %p14225_p1 = scmp.lt.s32.totalorder %s14218_s12, %s15740_s29 }
 0x1e6   : > { %p14220_p11 = scmp.ne.s32.totalorder %s14218_s12, %s14219_s10  ;;  %p14226_p2 = scmp.lt.s32.totalorder %s14224_s2, %s14219_s10 }
 0x1e8   : > { %p14222_p13 = pnand %p14221_p12, %p14220_p11  ;;  %p14227_p3 = por %p14226_p2, %p14225_p1 }
 0x1ea   : > { %p14223_p0 = pneg %p14222_p13 }
 0x1ec   : > { %p14228_p6 = pnand %p14227_p3, %p14223_p0 }
 0x1ee   : > { %14231 = shalt.err (!%p14228_p6)
}
 0x1ef   : > { %s14413_s18 = smov 128   ;;  %s14414_s6 = smov 8  }
 0x1f0   : > { %13196 = dma.hbm_to_vmem [thread:$0]  (!%p14992_p10), %s1415_s11, 256, %s1417_s28, %s1405_s17, %s14413_s18, %s14413_s18, %s14414_s6  }
 0x1f1   : > { %1434 = sbr.rel (%p14676_p9) target bundleno = 7146 (0x1bea), region = 176  ;;  %s1436_s3 = sand.u32 (!%p14676_p9), 1, %s14329_s0  }
 0x1f2   : > { %s15005_s22 = sshll.u32 (!%p14676_p9), %s1436_s3, 4  ;;  %s1437_s15 = scalar_lea.sflag (!%p14676_p9), [#allocation9], %s1436_s3 }
 0x1f3   : > { %s1440_s4 = scalar_lea.vmem (!%p14676_p9), [#allocation8], %s15005_s22 }
 0x1f6   : > { %14264 = dma.done.wait (%p14672_p8), %s1437_s15, 256  }
 0x1f7   : > { %14266 = vsyncadd (%p14672_p8), %s1437_s15, 4294967040 }
 0x1f8   : > { %14268 = dma.done.wait (%p156_p5), [#allocation11], 128  }
 0x1f9   : > { %14270 = vsyncadd (%p156_p5), [#allocation11], 4294967168 }
 0x1fa   : > { %14272 = dma.done.wait (%p156_p5), [#allocation14], 192  }
 0x1fb   : > { %14274 = vsyncadd (%p156_p5), [#allocation14], 4294967104 }
 0x1fc   : > { %14276 = dma.done.wait (%p156_p5), [#allocation17], 64  }
 0x1fd   : > { %14278 = vsyncadd (%p156_p5), [#allocation17], 4294967232 }
 0x1fe   : > { %14280 = dma.done.wait (%p156_p5), [#allocation20], 160  }
 0x1ff   : > { %14282 = vsyncadd (%p156_p5), [#allocation20], 4294967136 }
 0x200   : > { %14284 = dma.done.wait (%p156_p5), [#allocation23], 64  }
 0x201   : > { %14286 = vsyncadd (%p156_p5), [#allocation23], 4294967232 }
 0x202   : > { %14288 = dma.done.wait (%p156_p5), [#allocation26], 64  }
 0x203   : > { %14290 = vsyncadd (%p156_p5), [#allocation26], 4294967232 }
 0x204   : > { %14292 = dma.done.wait (%p156_p5), [#allocation29], 80  }
 0x205   : > { %14294 = vsyncadd (%p156_p5), [#allocation29], 4294967216 }
 0x206   : > { %14296 = dma.done.wait (%p156_p5), [#allocation32], 32  }
 0x207   : > { %14298 = vsyncadd (%p156_p5), [#allocation32], 4294967264 }
 0x208   : > { %14300 = dma.done.wait (%p156_p5), [#allocation35], 3088  }
 0x209   : > { %14302 = vsyncadd (%p156_p5), [#allocation35], 4294964208 }
 0x20a   : > { %14304 = dma.done.wait (%p156_p5), [#allocation38], 65552  }
 0x20b   : > { %14306 = vsyncadd (%p156_p5), [#allocation38], 4294901744 }
 0x20c   : > { %14308 = dma.done.wait (%p156_p5), [#allocation41], 8256  }
 0x20d   : > { %14310 = vsyncadd (%p156_p5), [#allocation41], 4294959040 }
 0x20e   : > { %14312 = dma.done.wait (%p156_p5), [#allocation44], 2080  }
 0x20f   : > { %14314 = vsyncadd (%p156_p5), [#allocation44], 4294965216 }
 0x210   : > { %14316 = dma.done.wait (%p156_p5), [#allocation47], 32  }
 0x211   : > { %14318 = vsyncadd (%p156_p5), [#allocation47], 4294967264 }
 0x212   : > { %14320 = dma.done.wait (%p156_p5), [#allocation50], 16  }
 0x213   : > { %14322 = vsyncadd (%p156_p5), [#allocation50], 4294967280  ;;  %s15743_s23 = sld [smem:[#allocation66_spill]]  ;;  %p1682_p4 = scmp.lt.s32.totalorder %s14648_s7, 1  ;;  %vm1712_vm0 = vcmask 1043456   ;;  %vm1708_vm1 = vcmask 64512  }
 0x214   : > { %s15744_s11 = sld [smem:[#allocation70_spill]]  ;;  %v13364_v8 = vld [vmem:[#allocation12] ss:$0 sm:$0xff]  ;;  %vm1774_vm2 = vcmask 31744   ;;  %v13365_v11 = vld [vmem:[#allocation10] ss:$0 sm:$0xff] }
 0x215   : > { %s15745_s28 = sld [smem:[#allocation69_spill]]  ;;  %s15766_s7 = smov (!%p1682_p4, %s14648_s7), 1  ;;  %v14415_v17 = vmov 0.0   ;;  %vm1817_vm4 = vcmask 130048   ;;  %v13366_v38 = vld [vmem:[#allocation13] ss:$0 sm:$0xff] }
 0x216   : > { %s12366_s17 = sshll.u32 %s15766_s7, 4  ;;  %s15747_s10 = sld [smem:[#allocation71_spill]]  ;;  %3013 = vst [vmem:[#allocation2] sm:$0xff] %v14415_v17  ;;  %v13367_v51 = vld [vmem:[#allocation12 + $0x1] ss:$0 sm:$0xff]  ;;  %vm2041_vm5 = vcmask 64544  }
 0x217   : > { %s15748_s2 = sld [smem:[#allocation68_spill]]  ;;  %3014 = vst [vmem:[#allocation2 + $0x8] sm:$0xff] %v14415_v17  ;;  %v13368_v61 = vld [vmem:[#allocation10 + $0x1] ss:$0 sm:$0xff]  ;;  %s14416_s6 = smov 4   ;;  %vm2186_vm13 = vcmask 261120  }
 0x218   : > { %3015 = vst [vmem:[#allocation2 + $0x10] sm:$0xff] %v14415_v17  ;;  %s15749_s8 = sld [smem:[#allocation79_spill]]  ;;  %s14418_s22 = smov 96  }
 0x219   : > { %s1686_s12 = scalar_lea.vmem %s15743_s23, %s12366_s17  ;;  %3016 = vst [vmem:[#allocation2 + $0x18] sm:$0xff] %v14415_v17  ;;  %s15750_s3 = sld [smem:[#allocation84_spill]] }
 0x21a   : > { %v1730_v0 = vld [vmem:[%s15744_s11] sm:$0xf]  ;;  %v15077_v2 = vld [vmem:[%s1686_s12 + $0x8] sm:$0xff]  ;;  %3811 = vst [vmem:[#allocation4] sm:$0xff] %v14415_v17  ;;  %v9444_v19 = vld [vmem:[%s15744_s11 + $0x4] sm:$0xf] }
 0x21b   : > { %s15746_s5 = smov %s15745_s28  ;;  %v15075_v1 = vld [vmem:[%s1686_s12] sm:$0xff]  ;;  %v1736_v3 = vsel %vm1712_vm0, %v1730_v0, 0  ;;  %3812 = vst [vmem:[#allocation4 + $0x8] sm:$0xff] %v14415_v17  ;;  %v1903_v21 = vsel %vm1712_vm0, %v9444_v19, 0  ;;  %v13369_v19 = vld [vmem:[#allocation13 + $0x1] ss:$0 sm:$0xff] }
 0x21c   : > { %v15082_v4 = vpack.c.bf16 %v15077_v2, %v15075_v1  ;;  %v1703_v5 = vld [vmem:[%s15745_s28] sm:$0xf]  ;;  %1745 = vmatpush.bf16.msra.mxu1 %v1736_v3  ;;  %3813 = vst [vmem:[#allocation4 + $0x10] sm:$0xff] %v14415_v17  ;;  %v9442_v33 = vld [vmem:[%s15746_s5 + $0x4] sm:$0xf]  ;;  %s15751_s15 = sld [smem:[#allocation85_spill]] }
 0x21d   : > { %v1714_v6 = vsel %vm1712_vm0, %v1703_v5, 0  ;;  %3814 = vst [vmem:[#allocation4 + $0x18] sm:$0xff] %v14415_v17  ;;  %v1752_v18 = vld [vmem:[%s15747_s10] sm:$0xf]  ;;  %s1689_s18 = scalar_lea.vmem %s15748_s2, %s15766_s7  ;;  %v1879_v34 = vsel %vm1712_vm0, %v9442_v33, 0  ;;  %s15752_s23 = sld [smem:[#allocation87_spill]] }
 0x21e   : > { %1723 = vmatpush.bf16.msra.mxu0 %v1714_v6  ;;  %v1758_v20 = vsel %vm1712_vm0, %v1752_v18, 0  ;;  %v1697_v22 = vld [vmem:[%s1689_s18] sm:$0x1]  ;;  %v9446_v5 = vld [vmem:[%s15747_s10 + $0x4] sm:$0xf]  ;;  %s15756_s28 = sld [smem:[#allocation97_spill]] }
 0x21f   : > { %9434 = vmatmul.msk.bf16.vlgmr.msra.gmra.mxu1 %vm1708_vm1, %v15082_v4  ;;  %1767 = vmatpush.bf16.msra.mxu2 %v1758_v20  ;;  %vm1698_vm3 = vcmp.ne.s32.totalorder %v1697_v22, 0  ;;  %v1927_v6 = vsel %vm1712_vm0, %v9446_v5, 0  ;;  %s15758_s12 = sld [smem:[#allocation98_spill]] }
 0x220   : > { %v1699_v23 = vsel %vm1698_vm3, -1e+09, %v14415_v17  ;;  %1888 = vmatpush.bf16.msrb.mxu1 %v1879_v34  ;;  %s15759_s2 = sld [smem:[#allocation99_spill]] }
 0x221   : > { %9433 = vmatmul.msk.bf16.vlgmr.msra.gmra.mxu0 %vm1708_vm1, %v15082_v4  ;;  %v15102_v24 = vperm.slane %v1699_v23, 0 }
 0x222   : > { %9435 = vmatmul.msk.bf16.vlgmr.msra.gmra.mxu2 %vm1708_vm1, %v15082_v4 }
 0x223   : > { %1912 = vmatpush.bf16.msrb.mxu2 %v1903_v21 }
 0x224   : > { %s15757_s17 = smov %s15756_s28 }
 0x225   : > { %s1692_s18 = scalar_lea.vmem %s15758_s12, %s15766_s7 }
 0x22f   : > { %9443 = vmatmul.msk.bf16.vlgmr.msrb.gmra.mxu1 %vm1708_vm1, %v15082_v4 }
 0x232   : > { %9445 = vmatmul.msk.bf16.vlgmr.msrb.gmra.mxu2 %vm1708_vm1, %v15082_v4 }
 0x29c   : > { %v1747_v7 = vpop.f32.mrf.mxu1 }
 0x29d   : > { %v1748_v13 = vadd.f32 %v13364_v8, %v1747_v7 }
 0x29e   : > { %v1725_v12 = vpop.f32.mrf.mxu0 }
 0x29f   : > { %v1726_v14 = vadd.f32 %v13365_v11, %v1725_v12 }
 0x2a4   : > { %v1749_v9 = vpop.f32.mrf.mxu1 }
 0x2a5   : > { %v1750_v10 = vadd.f32 %v13364_v8, %v1749_v9  ;;  %v1769_v35 = vpop.f32.mrf.mxu2 }
 0x2a6   : > { %v1727_v15 = vpop.f32.mrf.mxu0  ;;  %v1770_v41 = vadd.f32 %v13366_v38, %v1769_v35 }
 0x2a7   : > { %9436 = vmatpush.xpose.msk.msra.mxu3 %vm1774_vm2, %v1750_v10  ;;  %v1728_v16 = vadd.f32 %v13365_v11, %v1727_v15 }
 0x2ab   : > { %9437 = vmatpush.xpose.msk.msra.mxu3 %vm1774_vm2, %v1748_v13 }
 0x2ac   : > { %v1890_v62 = vpop.f32.mrf.mxu1 }
 0x2ad   : > { %v1771_v40 = vpop.f32.mrf.mxu2  ;;  %v1891_v63 = vadd.f32 %v13368_v61, %v1890_v62 }
 0x2ae   : > { %9438 = vmatmul.msk.f32.vlgmr.msra.gmra.mxu3 %vm1774_vm2, %v1726_v14  ;;  %v1772_v42 = vadd.f32 %v13366_v38, %v1771_v40 }
 0x2af   : > { %1936 = vmatpush.bf16.msrb.mxu3 %v1927_v6 }
 0x2b0   : > { %1860 = vmatpush.msrb.mxu0 %v1772_v42 }
 0x2b2   : > { %1861 = vmatpush.msrb.mxu0 %v1770_v41  ;;  %v2046_v41 = vld [vmem:[#allocation15] sm:$0xf] }
 0x2b3   : > { %v2056_v42 = vsel %vm1712_vm0, %v2046_v41, 0  ;;  %v12368_v41 = vld [vmem:[%s15749_s8 + $0x8] sm:$0xff] }
 0x2b4   : > { %v1892_v0 = vpop.f32.mrf.mxu1  ;;  %2065 = vmatpush.bf16.msra.mxu2 %v2056_v42  ;;  %v12367_v42 = vld [vmem:[%s15749_s8] sm:$0xff] }
 0x2b5   : > { %v1914_v50 = vpop.f32.mrf.mxu2  ;;  %v1893_v3 = vadd.f32 %v13368_v61, %v1892_v0 }
 0x2b6   : > { %9439 = vmatmul.msk.f32.gmra.mxu3 %vm1774_vm2, %v1728_v16  ;;  %v1915_v54 = vadd.f32 %v13367_v51, %v1914_v50 }
 0x2bd   : > { %v1916_v52 = vpop.f32.mrf.mxu2 }
 0x2be   : > { %v1917_v53 = vadd.f32 %v13367_v51, %v1916_v52  ;;  %9447 = vmatmul.msk.bf16.vlgmr.msrb.gmra.mxu3 %vm1708_vm1, %v15082_v4 }
 0x2c0   : > { %9448 = vmatpush.xpose.msk.msra.mxu0 %vm1774_vm2, %v1917_v53 }
 0x2c4   : > { %9449 = vmatpush.xpose.msk.msra.mxu0 %vm1774_vm2, %v1915_v54 }
 0x331   : > { %v1804_v25 = vpop.f32.mrf.mxu3 }
 0x332   : > { %v1810_v26 = vmul.f32 0.5, %v1804_v25 }
 0x334   : > { %v1815_v27 = vadd.f32 %v15102_v24, %v1810_v26 }
 0x336   : > { %v1818_v28 = vsel %vm1817_vm4, %v1815_v27, -inf }
 0x337   : > { %1819 = vmax.xlane.f32.xlu0 %v1818_v28 }
 0x339   : > { %v1807_v29 = vpop.f32.mrf.mxu3 }
 0x33a   : > { %v1811_v30 = vmul.f32 0.5, %v1807_v29 }
 0x33c   : > { %v1816_v31 = vadd.f32 %v15102_v24, %v1811_v30 }
 0x33e   : > { %v1821_v32 = vsel %vm1817_vm4, %v1816_v31, -inf }
 0x33f   : > { %1822 = vmax.xlane.f32.xlu0 %v1821_v32 }
 0x341   : > { %v1938_v17 = vpop.f32.mrf.mxu3 }
 0x342   : > { %v1939_v22 = vadd.f32 %v13369_v19, %v1938_v17 }
 0x349   : > { %v1940_v21 = vpop.f32.mrf.mxu3 }
 0x34a   : > { %v1941_v23 = vadd.f32 %v13369_v19, %v1940_v21 }
 0x34c   : > { %2024 = vmatpush.msra.mxu1 %v1941_v23 }
 0x34e   : > { %2025 = vmatpush.msra.mxu1 %v1939_v22 }
 0x3aa   : > { %v1820_v36 = vpop.xlane.xlu0 %1819 }
 0x3ab   : > { %v1824_v37 = vsub.f32 %v1815_v27, %v1820_v36 }
 0x3ad   : > { %v1826_v39 = vmul.f32 1.442695, %v1824_v37 }
 0x3af   : > { %13395 = vpow2.f32 %v1826_v39 }
 0x3b2   : > { %v1823_v43 = vpop.xlane.xlu0 %1822 }
 0x3b3   : > { %v1825_v44 = vsub.f32 %v1816_v31, %v1823_v43 }
 0x3b5   : > { %v13396_v45 = vpop.eup %13395  ;;  %v1828_v46 = vmul.f32 1.442695, %v1825_v44 }
 0x3b6   : > { %v1830_v47 = vsel %vm1817_vm4, %v13396_v45, 0.0 }
 0x3b7   : > { %13397 = vpow2.f32 %v1828_v46  ;;  %1831 = vadd.xlane.f32.xlu1 %v1830_v47  ;;  %v13370_v47 = vld [vmem:[#allocation16] ss:$0 sm:$0xff] }
 0x3bd   : > { %v13398_v48 = vpop.eup %13397 }
 0x3be   : > { %v1833_v49 = vsel %vm1817_vm4, %v13398_v48, 0.0 }
 0x3bf   : > { %1834 = vadd.xlane.f32.xlu1 %v1833_v49 }
 0x42a   : > { %v1832_v55 = vpop.xlane.xlu1 %1831 }
 0x42b   : > { %13399 = vrcp.f32 %v1832_v55 }
 0x431   : > { %v13400_v56 = vpop.eup %13399 }
 0x432   : > { %v1835_v57 = vpop.xlane.xlu1 %1834  ;;  %v1838_v58 = vmul.f32 %v13400_v56, %v13396_v45  ;;  %v14417_v56 = vmov 8.0  }
 0x433   : > { %13401 = vrcp.f32 %v1835_v57 }
 0x434   : > { %9440 = vmatmul.msk.f32.vlgmr.msrb.gmra.mxu0 %vm1817_vm4, %v1838_v58 }
 0x435   : > { %2196 = vmatpush.bf16.msrb.mxu0 %v12368_v41 }
 0x439   : > { %v13402_v59 = vpop.eup %13401  ;;  %2197 = vmatpush.bf16.msrb.mxu0 %v12367_v42 }
 0x43a   : > { %v1839_v60 = vmul.f32 %v13402_v59, %v13398_v48 }
 0x43c   : > { %9441 = vmatmul.msk.f32.gmra.mxu0 %vm1817_vm4, %v1839_v60 }
 0x444   : > { %9450 = vmatmul.msk.f32.vlgmr.msra.gmra.mxu0 %vm1774_vm2, %v1891_v63 }
 0x44c   : > { %9451 = vmatmul.msk.f32.gmra.mxu0 %vm1774_vm2, %v1893_v3 }
 0x4b1   : > { %v1863_v7 = vpop.f32.mrf.mxu0 }
 0x4b2   : > { %1869 = vst.msk [vmem:[#allocation6] sm:$0xff] %vm1774_vm2, %v1863_v7 }
 0x4b9   : > { %v1866_v8 = vpop.f32.mrf.mxu0 }
 0x4ba   : > { %1870 = vst.msk [vmem:[#allocation6 + $0x8] sm:$0xff] %vm1774_vm2, %v1866_v8 }
 0x4c1   : > { %v1972_v9 = vpop.f32.mrf.mxu0 }
 0x4c2   : > { %v1978_v10 = vmul.f32 0.5, %v1972_v9 }
 0x4c4   : > { %v1980_v11 = vadd.f32 %v1978_v10, %v15102_v24 }
 0x4c6   : > { %v1982_v12 = vsel %vm1817_vm4, %v1980_v11, -inf }
 0x4c7   : > { %1983 = vmax.xlane.f32.xlu2 %v1982_v12  ;;  %v2137_v12 = vld [vmem:[#allocation21] sm:$0xf] }
 0x4c9   : > { %v1975_v13 = vpop.f32.mrf.mxu0 }
 0x4ca   : > { %v1979_v14 = vmul.f32 0.5, %v1975_v13 }
 0x4cc   : > { %v1981_v15 = vadd.f32 %v1979_v14, %v15102_v24  ;;  %v2147_v14 = vsel %vm1712_vm0, %v2137_v12, 0  ;;  %v9469_v12 = vld [vmem:[%s15747_s10 + $0x8] sm:$0xf] }
 0x4cd   : > { %2156 = vmatpush.bf16.msra.mxu3 %v2147_v14 }
 0x4ce   : > { %v1985_v16 = vsel %vm1817_vm4, %v1981_v15, -inf }
 0x4cf   : > { %1986 = vmax.xlane.f32.xlu2 %v1985_v16 }
 0x53a   : > { %v1984_v18 = vpop.xlane.xlu2 %1983 }
 0x53b   : > { %v1988_v4 = vsub.f32 %v1980_v11, %v1984_v18 }
 0x53d   : > { %v1990_v20 = vmul.f32 1.442695, %v1988_v4 }
 0x53f   : > { %13403 = vpow2.f32 %v1990_v20 }
 0x542   : > { %v1987_v25 = vpop.xlane.xlu2 %1986 }
 0x543   : > { %v1989_v26 = vsub.f32 %v1981_v15, %v1987_v25 }
 0x545   : > { %v13404_v27 = vpop.eup %13403  ;;  %v1992_v28 = vmul.f32 1.442695, %v1989_v26 }
 0x546   : > { %v1994_v29 = vsel %vm1817_vm4, %v13404_v27, 0.0 }
 0x547   : > { %13405 = vpow2.f32 %v1992_v28  ;;  %1995 = vadd.xlane.f32.xlu0 %v1994_v29 }
 0x54d   : > { %v13406_v30 = vpop.eup %13405 }
 0x54e   : > { %v1997_v31 = vsel %vm1817_vm4, %v13406_v30, 0.0 }
 0x54f   : > { %1998 = vadd.xlane.f32.xlu1 %v1997_v31 }
 0x5ba   : > { %v1996_v32 = vpop.xlane.xlu0 %1995 }
 0x5bb   : > { %13407 = vrcp.f32 %v1996_v32 }
 0x5c1   : > { %v13408_v33 = vpop.eup %13407 }
 0x5c2   : > { %v2002_v34 = vmul.f32 %v13408_v33, %v13404_v27  ;;  %v1999_v35 = vpop.xlane.xlu1 %1998 }
 0x5c3   : > { %13409 = vrcp.f32 %v1999_v35 }
 0x5c4   : > { %9452 = vmatmul.msk.f32.vlgmr.msra.gmra.mxu1 %vm1817_vm4, %v2002_v34  ;;  %13411 = vrcp.f32 %v14417_v56  ;;  %v13372_v34 = vld [vmem:[#allocation19] ss:$0 sm:$0xff] }
 0x5c9   : > { %v13410_v36 = vpop.eup %13409 }
 0x5ca   : > { %v2003_v37 = vmul.f32 %v13410_v36, %v13406_v30  ;;  %v13412_v57 = vpop.eup %13411  ;;  %v13371_v30 = vld [vmem:[#allocation18] ss:$0 sm:$0xff] }
 0x5cb   : > { %v2083_v58 = vmul.f32 8.0, %v13412_v57  ;;  %vm2087_vm6 = vweird.f32 %v13412_v57 }
 0x5cc   : > { %9453 = vmatmul.msk.f32.gmra.mxu1 %vm1817_vm4, %v2003_v37 }
 0x5cd   : > { %v2084_v59 = vsub.f32 1.0, %v2083_v58 }
 0x5cf   : > { %v2085_v60 = vmul.f32 %v13412_v57, %v2084_v59 }
 0x5d1   : > { %v2086_v61 = vadd.f32 %v13412_v57, %v2085_v60 }
 0x5d3   : > { %v15146_v62 = vsel %vm2087_vm6, %v13412_v57, %v2086_v61 }
 0x641   : > { %v2027_v38 = vpop.f32.mrf.mxu1 }
 0x642   : > { %2035 = vrot.lane.b32.xlu2 %v2027_v38, %s14416_s6 }
 0x649   : > { %v2030_v39 = vpop.f32.mrf.mxu1 }
 0x64a   : > { %2037 = vrot.lane.b32.xlu0 %v2030_v39, %s14416_s6 }
 0x69c   : > { %v2036_v40 = vpop.permute.xlu2 %2035 }
 0x69d   : > { %2042 = vst.msk [vmem:[#allocation6] sm:$0xff] %vm2041_vm5, %v2036_v40 }
 0x6a4   : > { %v2044_v44 = vld [vmem:[#allocation6] sm:$0xff] }
 0x6bc   : > { %v2038_v43 = vpop.permute.xlu0 %2037 }
 0x6bd   : > { %2043 = vst.msk [vmem:[#allocation6 + $0x8] sm:$0xff] %vm2041_vm5, %v2038_v43 }
 0x6c4   : > { %v2045_v45 = vld [vmem:[#allocation6 + $0x8] sm:$0xff] }
 0x6c5   : > { %v2047_v46 = vpack.c.bf16 %v2045_v45, %v2044_v44  ;;  %v13373_v44 = vld [vmem:[#allocation22] ss:$0 sm:$0xff] }
 0x6c7   : > { %9454 = vmatmul.msk.bf16.vlgmr.msra.gmra.mxu2 %vm1708_vm1, %v2047_v46 }
 0x74a   : > { %v2067_v48 = vpop.f32.mrf.mxu2 }
 0x74b   : > { %v2068_v49 = vadd.f32 %v13370_v47, %v2067_v48 }
 0x74d   : > { %v2072_v50 = vadd.f32 %v2068_v49, %v15075_v1 }
 0x74f   : > { %v2076_v51 = vsel %vm1708_vm1, %v2072_v50, 0.0 }
 0x750   : > { %2077 = vadd.xlane.f32.xlu1 %v2076_v51  ;;  %v13374_v51 = vld [vmem:[#allocation24] ss:$0 sm:$0xff] }
 0x752   : > { %v2069_v52 = vpop.f32.mrf.mxu2 }
 0x753   : > { %v2070_v53 = vadd.f32 %v13370_v47, %v2069_v52 }
 0x755   : > { %v2073_v54 = vadd.f32 %v2070_v53, %v15077_v2 }
 0x757   : > { %v2079_v55 = vsel %vm1708_vm1, %v2073_v54, 0.0 }
 0x758   : > { %2080 = vadd.xlane.f32.xlu1 %v2079_v55 }
 0x7c3   : > { %v2078_v1 = vpop.xlane.xlu1 %2077 }
 0x7c4   : > { %v2089_v63 = vmul.f32 %v15146_v62, %v2078_v1 }
 0x7c6   : > { %v2091_v0 = vsub.f32 %v2072_v50, %v2089_v63 }
 0x7c8   : > { %v2093_v3 = vmul.f32 %v2091_v0, %v2091_v0 }
 0x7ca   : > { %v2095_v2 = vsel %vm1708_vm1, %v2093_v3, 0.0 }
 0x7cb   : > { %2096 = vadd.xlane.f32.xlu1 %v2095_v2  ;;  %v2081_v5 = vpop.xlane.xlu1 %2080 }
 0x7cc   : > { %v2090_v6 = vmul.f32 %v15146_v62, %v2081_v5 }
 0x7ce   : > { %v2092_v7 = vsub.f32 %v2073_v54, %v2090_v6 }
 0x7d0   : > { %v2094_v8 = vmul.f32 %v2092_v7, %v2092_v7 }
 0x7d2   : > { %v2098_v9 = vsel %vm1708_vm1, %v2094_v8, 0.0 }
 0x7d3   : > { %2099 = vadd.xlane.f32.xlu2 %v2098_v9 }
 0x83e   : > { %v2097_v10 = vpop.xlane.xlu1 %2096 }
 0x83f   : > { %v2101_v11 = vmul.f32 %v2097_v10, %v15146_v62  ;;  %v9465_v10 = vld [vmem:[%s15746_s5 + $0x8] sm:$0xf] }
 0x840   : > { %v2274_v14 = vsel %vm1712_vm0, %v9465_v10, 0 }
 0x841   : > { %v2103_v13 = vadd.f32 1e-05, %v2101_v11  ;;  %v9467_v11 = vld [vmem:[%s15744_s11 + $0x8] sm:$0xf]  ;;  %2283 = vmatpush.bf16.msrb.mxu1 %v2274_v14 }
 0x843   : > { %13413 = vrsqrt.f32 %v2103_v13  ;;  %vm2111_vm8 = vweird.f32 %v2103_v13 }
 0x846   : > { %v2100_v15 = vpop.xlane.xlu2 %2099 }
 0x847   : > { %v2102_v16 = vmul.f32 %v2100_v15, %v15146_v62  ;;  %v2298_v15 = vsel %vm1712_vm0, %v9467_v11, 0 }
 0x848   : > { %2307 = vmatpush.bf16.msrb.mxu2 %v2298_v15 }
 0x849   : > { %v13414_v17 = vpop.eup %13413  ;;  %v2104_v18 = vadd.f32 1e-05, %v2102_v16  ;;  %v2322_v16 = vsel %vm1712_vm0, %v9469_v12, 0 }
 0x84a   : > { %v2106_v4 = vmul.f32 %v13414_v17, %v2103_v13  ;;  %vm2112_vm7 = vweird.f32 %v13414_v17  ;;  %2331 = vmatpush.bf16.msrb.mxu3 %v2322_v16  ;;  %v13382_v16 = vld [vmem:[#allocation13 + $0x3] ss:$0 sm:$0xff] }
 0x84b   : > { %13415 = vrsqrt.f32 %v2104_v18  ;;  %vm2113_vm9 = vmor %vm2111_vm8, %vm2112_vm7  ;;  %vm2121_vm11 = vweird.f32 %v2104_v18 }
 0x84c   : > { %v2107_v19 = vmul.f32 %v13414_v17, %v2106_v4  ;;  %v9479_v4 = vld [vmem:[%s15744_s11 + $0xc] sm:$0xf] }
 0x84e   : > { %v2108_v20 = vmul.f32 0.5, %v2107_v19 }
 0x850   : > { %v2109_v21 = vsub.f32 1.5, %v2108_v20 }
 0x851   : > { %v13416_v22 = vpop.eup %13415 }
 0x852   : > { %v2110_v23 = vmul.f32 %v13414_v17, %v2109_v21  ;;  %v2116_v25 = vmul.f32 %v13416_v22, %v2104_v18  ;;  %vm2122_vm10 = vweird.f32 %v13416_v22  ;;  %v9477_v18 = vld [vmem:[%s15746_s5 + $0xc] sm:$0xf]  ;;  %v2462_v21 = vsel %vm1712_vm0, %v9479_v4, 0 }
 0x853   : > { %vm2123_vm12 = vmor %vm2121_vm11, %vm2122_vm10  ;;  %v2438_v20 = vsel %vm1712_vm0, %v9477_v18, 0 }
 0x854   : > { %v2117_v26 = vmul.f32 %v13416_v22, %v2116_v25  ;;  %v2114_v27 = vsel %vm2113_vm9, %v13414_v17, %v2110_v23  ;;  %2447 = vmatpush.bf16.msra.mxu2 %v2438_v20 }
 0x855   : > { %v2125_v31 = vmul.f32 %v2114_v27, %v2091_v0 }
 0x856   : > { %v2118_v28 = vmul.f32 0.5, %v2117_v26 }
 0x857   : > { %v2130_v35 = vmul.f32 %v13371_v30, %v2125_v31 }
 0x858   : > { %v2119_v29 = vsub.f32 1.5, %v2118_v28 }
 0x859   : > { %v2135_v38 = vadd.f32 %v13372_v34, %v2130_v35 }
 0x85a   : > { %v2120_v32 = vmul.f32 %v13416_v22, %v2119_v29 }
 0x85c   : > { %v2124_v33 = vsel %vm2123_vm12, %v13416_v22, %v2120_v32 }
 0x85d   : > { %v2126_v36 = vmul.f32 %v2124_v33, %v2092_v7 }
 0x85f   : > { %v2131_v37 = vmul.f32 %v13371_v30, %v2126_v36  ;;  %v13375_v36 = vld [vmem:[#allocation25] ss:$0 sm:$0xff] }
 0x861   : > { %v2136_v39 = vadd.f32 %v13372_v34, %v2131_v37 }
 0x863   : > { %v2138_v40 = vpack.c.bf16 %v2136_v39, %v2135_v38 }
 0x865   : > { %9455 = vmatmul.msk.bf16.vlgmr.msra.gmra.mxu3 %vm1708_vm1, %v2138_v40  ;;  %v13376_v40 = vld [vmem:[#allocation27] ss:$0 sm:$0xff] }
 0x866   : > { %2471 = vmatpush.bf16.msra.mxu3 %v2462_v21 }
 0x8e8   : > { %v2158_v43 = vpop.f32.mrf.mxu3 }
 0x8e9   : > { %v2159_v45 = vadd.f32 %v13373_v44, %v2158_v43 }
 0x8eb   : > { %v2163_v48 = vmax.f32 %v2159_v45, 0.0 }
 0x8f0   : > { %v2160_v46 = vpop.f32.mrf.mxu3 }
 0x8f1   : > { %v2161_v47 = vadd.f32 %v13373_v44, %v2160_v46 }
 0x8f3   : > { %v2164_v49 = vmax.f32 %v2161_v47, 0.0 }
 0x8f5   : > { %v2169_v50 = vpack.c.bf16 %v2164_v49, %v2163_v48  ;;  %v13378_v49 = vld [vmem:[#allocation12 + $0x2] ss:$0 sm:$0xff] }
 0x8f7   : > { %9464 = vmatmul.msk.bf16.vlgmr.msrb.gmra.mxu0 %vm2186_vm13, %v2169_v50  ;;  %v13379_v50 = vld [vmem:[#allocation13 + $0x2] ss:$0 sm:$0xff] }
 0x974   : > { %v2199_v52 = vpop.f32.mrf.mxu0 }
 0x975   : > { %v2200_v53 = vadd.f32 %v13374_v51, %v2199_v52 }
 0x977   : > { %v2204_v54 = vadd.f32 %v2200_v53, %v2135_v38 }
 0x979   : > { %v2208_v55 = vsel %vm1708_vm1, %v2204_v54, 0.0 }
 0x97a   : > { %2209 = vadd.xlane.f32.xlu0 %v2208_v55  ;;  %v9481_v55 = vld [vmem:[%s15747_s10 + $0xc] sm:$0xf] }
 0x97c   : > { %v2201_v56 = vpop.f32.mrf.mxu0 }
 0x97d   : > { %v2202_v57 = vadd.f32 %v13374_v51, %v2201_v56 }
 0x97f   : > { %v2205_v58 = vadd.f32 %v2202_v57, %v2136_v39  ;;  %v13377_v57 = vld [vmem:[#allocation10 + $0x2] ss:$0 sm:$0xff] }
 0x981   : > { %v2211_v59 = vsel %vm1708_vm1, %v2205_v58, 0.0 }
 0x982   : > { %2212 = vadd.xlane.f32.xlu1 %v2211_v59 }
 0x9ed   : > { %v2210_v60 = vpop.xlane.xlu0 %2209 }
 0x9ee   : > { %v2214_v61 = vmul.f32 %v2210_v60, %v15146_v62  ;;  %v2486_v60 = vsel %vm1712_vm0, %v9481_v55, 0 }
 0x9f0   : > { %v2216_v1 = vsub.f32 %v2204_v54, %v2214_v61 }
 0x9f2   : > { %v2218_v63 = vmul.f32 %v2216_v1, %v2216_v1 }
 0x9f4   : > { %v2220_v0 = vsel %vm1708_vm1, %v2218_v63, 0.0 }
 0x9f5   : > { %v2213_v3 = vpop.xlane.xlu1 %2212  ;;  %2221 = vadd.xlane.f32.xlu1 %v2220_v0 }
 0x9f6   : > { %v2215_v2 = vmul.f32 %v2213_v3, %v15146_v62  ;;  %v13381_v3 = vld [vmem:[#allocation12 + $0x3] ss:$0 sm:$0xff] }
 0x9f8   : > { %v2217_v5 = vsub.f32 %v2205_v58, %v2215_v2 }
 0x9fa   : > { %v2219_v6 = vmul.f32 %v2217_v5, %v2217_v5 }
 0x9fc   : > { %v2223_v7 = vsel %vm1708_vm1, %v2219_v6, 0.0 }
 0x9fd   : > { %2224 = vadd.xlane.f32.xlu1 %v2223_v7 }
 0xa68   : > { %v2222_v8 = vpop.xlane.xlu1 %2221 }
 0xa69   : > { %v2226_v9 = vmul.f32 %v2222_v8, %v15146_v62 }
 0xa6b   : > { %v2228_v13 = vadd.f32 1e-05, %v2226_v9 }
 0xa6d   : > { %13417 = vrsqrt.f32 %v2228_v13  ;;  %vm2236_vm15 = vweird.f32 %v2228_v13 }
 0xa70   : > { %v2225_v17 = vpop.xlane.xlu1 %2224 }
 0xa71   : > { %v2227_v19 = vmul.f32 %v2225_v17, %v15146_v62 }
 0xa73   : > { %v13418_v22 = vpop.eup %13417  ;;  %v2229_v23 = vadd.f32 1e-05, %v2227_v19 }
 0xa74   : > { %v2231_v25 = vmul.f32 %v13418_v22, %v2228_v13  ;;  %vm2237_vm14 = vweird.f32 %v13418_v22 }
 0xa75   : > { %13419 = vrsqrt.f32 %v2229_v23  ;;  %vm2238_vm3 = vmor %vm2236_vm15, %vm2237_vm14  ;;  %vm2246_vm7 = vweird.f32 %v2229_v23 }
 0xa76   : > { %v2232_v26 = vmul.f32 %v13418_v22, %v2231_v25 }
 0xa78   : > { %v2233_v27 = vmul.f32 0.5, %v2232_v26 }
 0xa7a   : > { %v2234_v28 = vsub.f32 1.5, %v2233_v27 }
 0xa7b   : > { %v13420_v29 = vpop.eup %13419 }
 0xa7c   : > { %v2235_v30 = vmul.f32 %v13418_v22, %v2234_v28  ;;  %v2241_v31 = vmul.f32 %v13420_v29, %v2229_v23  ;;  %vm2247_vm6 = vweird.f32 %v13420_v29 }
 0xa7d   : > { %vm2248_vm8 = vmor %vm2246_vm7, %vm2247_vm6 }
 0xa7e   : > { %v2242_v32 = vmul.f32 %v13420_v29, %v2241_v31  ;;  %v2239_v33 = vsel %vm2238_vm3, %v13418_v22, %v2235_v30 }
 0xa7f   : > { %v2250_v37 = vmul.f32 %v2239_v33, %v2216_v1 }
 0xa80   : > { %v2243_v34 = vmul.f32 0.5, %v2242_v32 }
 0xa81   : > { %v2255_v41 = vmul.f32 %v13375_v36, %v2250_v37  ;;  %v13380_v37 = vld [vmem:[#allocation10 + $0x3] ss:$0 sm:$0xff] }
 0xa82   : > { %v2244_v35 = vsub.f32 1.5, %v2243_v34 }
 0xa83   : > { %v15177_v44 = vadd.f32 %v13376_v40, %v2255_v41 }
 0xa84   : > { %v2245_v38 = vmul.f32 %v13420_v29, %v2244_v35 }
 0xa86   : > { %v2249_v39 = vsel %vm2248_vm8, %v13420_v29, %v2245_v38  ;;  %vm2903_vm8 = vcmask 785408  }
 0xa87   : > { %v2251_v42 = vmul.f32 %v2249_v39, %v2217_v5 }
 0xa89   : > { %v2256_v43 = vmul.f32 %v13375_v36, %v2251_v42 }
 0xa8b   : > { %v15179_v45 = vadd.f32 %v13376_v40, %v2256_v43 }
 0xa8d   : > { %v2262_v46 = vpack.c.bf16 %v15179_v45, %v15177_v44 }
 0xa8f   : > { %9466 = vmatmul.msk.bf16.vlgmr.msrb.gmra.mxu1 %vm1708_vm1, %v2262_v46  ;;  %9468 = vmatmul.msk.bf16.vlgmr.msrb.gmra.mxu2 %vm1708_vm1, %v2262_v46 }
 0xa90   : > { %9470 = vmatmul.msk.bf16.vlgmr.msrb.gmra.mxu3 %vm1708_vm1, %v2262_v46 }
 0xa9f   : > { %9478 = vmatmul.msk.bf16.vlgmr.msra.gmra.mxu2 %vm1708_vm1, %v2262_v46 }
 0xaa0   : > { %9480 = vmatmul.msk.bf16.vlgmr.msra.gmra.mxu3 %vm1708_vm1, %v2262_v46 }
 0xb0c   : > { %v2285_v56 = vpop.f32.mrf.mxu1 }
 0xb0d   : > { %v2286_v61 = vadd.f32 %v13377_v57, %v2285_v56 }
 0xb12   : > { %v2309_v47 = vpop.f32.mrf.mxu2 }
 0xb13   : > { %v2333_v48 = vpop.f32.mrf.mxu3  ;;  %v2310_v59 = vadd.f32 %v13378_v49, %v2309_v47 }
 0xb14   : > { %v2334_v58 = vadd.f32 %v13379_v50, %v2333_v48  ;;  %v2287_v63 = vpop.f32.mrf.mxu1 }
 0xb15   : > { %v2288_v0 = vadd.f32 %v13377_v57, %v2287_v63 }
 0xb1a   : > { %v2311_v51 = vpop.f32.mrf.mxu2 }
 0xb1b   : > { %v2312_v52 = vadd.f32 %v13378_v49, %v2311_v51  ;;  %v2335_v53 = vpop.f32.mrf.mxu3 }
 0xb1c   : > { %v2336_v54 = vadd.f32 %v13379_v50, %v2335_v53 }
 0xb1d   : > { %9471 = vmatpush.xpose.msk.msra.mxu0 %vm1774_vm2, %v2312_v52 }
 0xb1e   : > { %2419 = vmatpush.msra.mxu1 %v2336_v54 }
 0xb20   : > { %2420 = vmatpush.msra.mxu1 %v2334_v58 }
 0xb21   : > { %9472 = vmatpush.xpose.msk.msra.mxu0 %vm1774_vm2, %v2310_v59 }
 0xb22   : > { %v2449_v36 = vpop.f32.mrf.mxu2 }
 0xb23   : > { %v2473_v1 = vpop.f32.mrf.mxu3  ;;  %v2450_v38 = vadd.f32 %v13380_v37, %v2449_v36 }
 0xb24   : > { %9473 = vmatmul.msk.f32.vlgmr.msra.gmra.mxu0 %vm1774_vm2, %v2286_v61  ;;  %v2474_v6 = vadd.f32 %v13381_v3, %v2473_v1 }
 0xb25   : > { %2495 = vmatpush.bf16.msrb.mxu0 %v2486_v60 }
 0xb2a   : > { %v2451_v39 = vpop.f32.mrf.mxu2 }
 0xb2b   : > { %v2475_v2 = vpop.f32.mrf.mxu3  ;;  %v2452_v40 = vadd.f32 %v13380_v37, %v2451_v39 }
 0xb2c   : > { %v2476_v5 = vadd.f32 %v13381_v3, %v2475_v2  ;;  %9474 = vmatmul.msk.f32.gmra.mxu0 %vm1774_vm2, %v2288_v0 }
 0xb2e   : > { %9483 = vmatpush.xpose.msk.msrb.mxu1 %vm1774_vm2, %v2476_v5 }
 0xb32   : > { %9484 = vmatpush.xpose.msk.msrb.mxu1 %vm1774_vm2, %v2474_v6 }
 0xb34   : > { %9482 = vmatmul.msk.bf16.vlgmr.msrb.gmra.mxu0 %vm1708_vm1, %v2262_v46 }
 0xba1   : > { %v2367_v7 = vpop.f32.mrf.mxu0 }
 0xba2   : > { %v2373_v8 = vmul.f32 0.5, %v2367_v7 }
 0xba4   : > { %v2375_v9 = vadd.f32 %v2373_v8, %v15102_v24 }
 0xba6   : > { %v2377_v10 = vsel %vm1817_vm4, %v2375_v9, -inf }
 0xba7   : > { %2378 = vmax.xlane.f32.xlu1 %v2377_v10 }
 0xba9   : > { %v2370_v11 = vpop.f32.mrf.mxu0 }
 0xbaa   : > { %v2374_v12 = vmul.f32 0.5, %v2370_v11 }
 0xbac   : > { %v2376_v13 = vadd.f32 %v2374_v12, %v15102_v24 }
 0xbae   : > { %v2380_v14 = vsel %vm1817_vm4, %v2376_v13, -inf }
 0xbaf   : > { %2381 = vmax.xlane.f32.xlu1 %v2380_v14 }
 0xbb1   : > { %v2497_v15 = vpop.f32.mrf.mxu0 }
 0xbb2   : > { %v2498_v4 = vadd.f32 %v13382_v16, %v2497_v15  ;;  %v13383_v15 = vld [vmem:[#allocation16 + $0x1] ss:$0 sm:$0xff] }
 0xbb9   : > { %v2499_v17 = vpop.f32.mrf.mxu0 }
 0xbba   : > { %v2500_v18 = vadd.f32 %v13382_v16, %v2499_v17 }
 0xbbc   : > { %2583 = vmatpush.msrb.mxu2 %v2500_v18 }
 0xbbe   : > { %2584 = vmatpush.msrb.mxu2 %v2498_v4 }
 0xc1a   : > { %v2379_v19 = vpop.xlane.xlu1 %2378 }
 0xc1b   : > { %v2383_v20 = vsub.f32 %v2375_v9, %v2379_v19  ;;  %v2605_v9 = vld [vmem:[#allocation15 + $0x4] sm:$0xf] }
 0xc1c   : > { %v2616_v10 = vsel %vm1712_vm0, %v2605_v9, 0 }
 0xc1d   : > { %v2385_v21 = vmul.f32 1.442695, %v2383_v20  ;;  %2625 = vmatpush.bf16.msrb.mxu3 %v2616_v10 }
 0xc1f   : > { %13421 = vpow2.f32 %v2385_v21 }
 0xc22   : > { %v2382_v22 = vpop.xlane.xlu1 %2381 }
 0xc23   : > { %v2384_v23 = vsub.f32 %v2376_v13, %v2382_v22 }
 0xc25   : > { %v13422_v25 = vpop.eup %13421  ;;  %v2387_v26 = vmul.f32 1.442695, %v2384_v23 }
 0xc26   : > { %v2389_v27 = vsel %vm1817_vm4, %v13422_v25, 0.0 }
 0xc27   : > { %13423 = vpow2.f32 %v2387_v26  ;;  %2390 = vadd.xlane.f32.xlu2 %v2389_v27 }
 0xc2d   : > { %v13424_v28 = vpop.eup %13423 }
 0xc2e   : > { %v2392_v29 = vsel %vm1817_vm4, %v13424_v28, 0.0 }
 0xc2f   : > { %2393 = vadd.xlane.f32.xlu0 %v2392_v29 }
 0xc9a   : > { %v2391_v30 = vpop.xlane.xlu2 %2390 }
 0xc9b   : > { %13425 = vrcp.f32 %v2391_v30 }
 0xca1   : > { %v13426_v31 = vpop.eup %13425 }
 0xca2   : > { %v2397_v32 = vmul.f32 %v13426_v31, %v13422_v25  ;;  %v2394_v33 = vpop.xlane.xlu0 %2393 }
 0xca3   : > { %13427 = vrcp.f32 %v2394_v33 }
 0xca4   : > { %9475 = vmatmul.msk.f32.vlgmr.msra.gmra.mxu1 %vm1817_vm4, %v2397_v32 }
 0xca9   : > { %v13428_v34 = vpop.eup %13427 }
 0xcaa   : > { %v2398_v35 = vmul.f32 %v13428_v34, %v13424_v28 }
 0xcac   : > { %9476 = vmatmul.msk.f32.gmra.mxu1 %vm1817_vm4, %v2398_v35  ;;  %v2693_v35 = vld [vmem:[#allocation21 + $0x4] sm:$0xf] }
 0xcad   : > { %v2704_v36 = vsel %vm1712_vm0, %v2693_v35, 0 }
 0xcae   : > { %2713 = vmatpush.bf16.msra.mxu0 %v2704_v36 }
 0xcb4   : > { %9485 = vmatmul.msk.f32.vlgmr.msrb.gmra.mxu1 %vm1774_vm2, %v2450_v38 }
 0xcbc   : > { %9486 = vmatmul.msk.f32.gmra.mxu1 %vm1774_vm2, %v2452_v40 }
 0xd21   : > { %v2422_v41 = vpop.f32.mrf.mxu1 }
 0xd22   : > { %2428 = vst.msk [vmem:[#allocation6] sm:$0xff] %vm1774_vm2, %v2422_v41 }
 0xd29   : > { %v2425_v42 = vpop.f32.mrf.mxu1 }
 0xd2a   : > { %2429 = vst.msk [vmem:[#allocation6 + $0x8] sm:$0xff] %vm1774_vm2, %v2425_v42 }
 0xd31   : > { %v2531_v43 = vpop.f32.mrf.mxu1 }
 0xd32   : > { %v2537_v46 = vmul.f32 0.5, %v2531_v43 }
 0xd34   : > { %v2539_v47 = vadd.f32 %v2537_v46, %v15102_v24 }
 0xd36   : > { %v2541_v48 = vsel %vm1817_vm4, %v2539_v47, -inf }
 0xd37   : > { %2542 = vmax.xlane.f32.xlu1 %v2541_v48 }
 0xd39   : > { %v2534_v49 = vpop.f32.mrf.mxu1 }
 0xd3a   : > { %v2538_v50 = vmul.f32 0.5, %v2534_v49 }
 0xd3c   : > { %v2540_v51 = vadd.f32 %v2538_v50, %v15102_v24 }
 0xd3e   : > { %v2544_v52 = vsel %vm1817_vm4, %v2540_v51, -inf }
 0xd3f   : > { %2545 = vmax.xlane.f32.xlu2 %v2544_v52 }
 0xdaa   : > { %v2543_v53 = vpop.xlane.xlu1 %2542 }
 0xdab   : > { %v2547_v54 = vsub.f32 %v2539_v47, %v2543_v53 }
 0xdad   : > { %v2549_v55 = vmul.f32 1.442695, %v2547_v54  ;;  %v13384_v54 = vld [vmem:[#allocation18 + $0x1] ss:$0 sm:$0xff] }
 0xdaf   : > { %13429 = vpow2.f32 %v2549_v55 }
 0xdb2   : > { %v2546_v56 = vpop.xlane.xlu2 %2545 }
 0xdb3   : > { %v2548_v57 = vsub.f32 %v2540_v51, %v2546_v56 }
 0xdb5   : > { %v13430_v58 = vpop.eup %13429  ;;  %v2551_v59 = vmul.f32 1.442695, %v2548_v57 }
 0xdb6   : > { %v2553_v60 = vsel %vm1817_vm4, %v13430_v58, 0.0 }
 0xdb7   : > { %13431 = vpow2.f32 %v2551_v59  ;;  %2554 = vadd.xlane.f32.xlu0 %v2553_v60 }
 0xdbd   : > { %v13432_v61 = vpop.eup %13431 }
 0xdbe   : > { %v2556_v1 = vsel %vm1817_vm4, %v13432_v61, 0.0 }
 0xdbf   : > { %2557 = vadd.xlane.f32.xlu1 %v2556_v1 }
 0xe2a   : > { %v2555_v24 = vpop.xlane.xlu0 %2554 }
 0xe2b   : > { %13433 = vrcp.f32 %v2555_v24 }
 0xe31   : > { %v13434_v63 = vpop.eup %13433 }
 0xe32   : > { %v2561_v0 = vmul.f32 %v13434_v63, %v13430_v58  ;;  %v2558_v3 = vpop.xlane.xlu1 %2557  ;;  %v13385_v58 = vld [vmem:[#allocation19 + $0x1] ss:$0 sm:$0xff] }
 0xe33   : > { %13435 = vrcp.f32 %v2558_v3  ;;  %v12369_v3 = vld [vmem:[%s15749_s8 + $0x10] sm:$0xff] }
 0xe34   : > { %9487 = vmatmul.msk.f32.vlgmr.msrb.gmra.mxu2 %vm1817_vm4, %v2561_v0  ;;  %v12370_v0 = vld [vmem:[%s15749_s8 + $0x18] sm:$0xff] }
 0xe35   : > { %2754 = vmatpush.bf16.msra.mxu1 %v12370_v0  ;;  %v12372_v0 = vld [vmem:[%s15750_s3 + $0x8] sm:$0xff] }
 0xe39   : > { %v13436_v2 = vpop.eup %13435  ;;  %2755 = vmatpush.bf16.msra.mxu1 %v12369_v3  ;;  %v12371_v3 = vld [vmem:[%s15750_s3] sm:$0xff] }
 0xe3a   : > { %v2562_v5 = vmul.f32 %v13436_v2, %v13432_v61 }
 0xe3c   : > { %9488 = vmatmul.msk.f32.gmra.mxu2 %vm1817_vm4, %v2562_v5  ;;  %v13386_v5 = vld [vmem:[#allocation22 + $0x1] ss:$0 sm:$0xff] }
 0xeb7   : > { %v2586_v6 = vpop.f32.mrf.mxu2 }
 0xeb8   : > { %2594 = vrot.lane.b32.xlu2 %v2586_v6, %s14416_s6 }
 0xebf   : > { %v2589_v7 = vpop.f32.mrf.mxu2 }
 0xec0   : > { %2596 = vrot.lane.b32.xlu0 %v2589_v7, %s14416_s6  ;;  %s1695_s6 = scalar_lea.vmem %s15759_s2, %s15766_s7 }
 0xf12   : > { %v2595_v8 = vpop.permute.xlu2 %2594 }
 0xf13   : > { %2600 = vst.msk [vmem:[#allocation6] sm:$0xff] %vm2041_vm5, %v2595_v8 }
 0xf1a   : > { %v2602_v12 = vld [vmem:[#allocation6] sm:$0xff] }
 0xf32   : > { %v2597_v11 = vpop.permute.xlu0 %2596 }
 0xf33   : > { %2601 = vst.msk [vmem:[#allocation6 + $0x8] sm:$0xff] %vm2041_vm5, %v2597_v11 }
 0xf3a   : > { %v2603_v13 = vld [vmem:[#allocation6 + $0x8] sm:$0xff] }
 0xf3b   : > { %v2606_v14 = vpack.c.bf16 %v2603_v13, %v2602_v12  ;;  %v13387_v12 = vld [vmem:[#allocation24 + $0x1] ss:$0 sm:$0xff] }
 0xf3d   : > { %9489 = vmatmul.msk.bf16.vlgmr.msrb.gmra.mxu3 %vm1708_vm1, %v2606_v14 }
 0xfc0   : > { %v2627_v16 = vpop.f32.mrf.mxu3 }
 0xfc1   : > { %v2628_v17 = vadd.f32 %v13383_v15, %v2627_v16 }
 0xfc3   : > { %v2632_v18 = vadd.f32 %v2628_v17, %v15177_v44 }
 0xfc5   : > { %v2638_v4 = vsel %vm1708_vm1, %v2632_v18, 0.0 }
 0xfc6   : > { %2639 = vadd.xlane.f32.xlu1 %v2638_v4 }
 0xfc8   : > { %v2629_v19 = vpop.f32.mrf.mxu3 }
 0xfc9   : > { %v2630_v20 = vadd.f32 %v13383_v15, %v2629_v19 }
 0xfcb   : > { %v2633_v21 = vadd.f32 %v2630_v20, %v15179_v45 }
 0xfcd   : > { %v2641_v22 = vsel %vm1708_vm1, %v2633_v21, 0.0 }
 0xfce   : > { %2642 = vadd.xlane.f32.xlu1 %v2641_v22 }
0x1039   : > { %v2640_v23 = vpop.xlane.xlu1 %2639 }
0x103a   : > { %v2644_v25 = vmul.f32 %v2640_v23, %v15146_v62 }
0x103c   : > { %v2646_v26 = vsub.f32 %v2632_v18, %v2644_v25 }
0x103e   : > { %v2648_v27 = vmul.f32 %v2646_v26, %v2646_v26 }
0x1040   : > { %v2650_v28 = vsel %vm1708_vm1, %v2648_v27, 0.0 }
0x1041   : > { %2651 = vadd.xlane.f32.xlu1 %v2650_v28  ;;  %v2643_v29 = vpop.xlane.xlu1 %2642 }
0x1042   : > { %v2645_v44 = vmul.f32 %v2643_v29, %v15146_v62 }
0x1044   : > { %v2647_v30 = vsub.f32 %v2633_v21, %v2645_v44 }
0x1046   : > { %v2649_v31 = vmul.f32 %v2647_v30, %v2647_v30 }
0x1048   : > { %v2653_v32 = vsel %vm1708_vm1, %v2649_v31, 0.0 }
0x1049   : > { %2654 = vadd.xlane.f32.xlu2 %v2653_v32 }
0x10b4   : > { %v2652_v45 = vpop.xlane.xlu1 %2651 }
0x10b5   : > { %v2656_v33 = vmul.f32 %v2652_v45, %v15146_v62  ;;  %v2822_v45 = vld [vmem:[#allocation28] sm:$0xf] }
0x10b7   : > { %v2658_v34 = vadd.f32 1e-05, %v2656_v33  ;;  %v2832_v33 = vsel %vm1712_vm0, %v2822_v45, 0  ;;  %v12393_v45 = vld [vmem:[%s15752_s23 + $0x70] sm:$0xff] }
0x10b8   : > { %2841 = vmatpush.bf16.msra.mxu2 %v2832_v33  ;;  %v12401_v33 = vld [vmem:[%s15752_s23 + $0xb0] sm:$0xff] }
0x10b9   : > { %13437 = vrsqrt.f32 %v2658_v34  ;;  %vm2666_vm5 = vweird.f32 %v2658_v34 }
0x10bc   : > { %v2655_v37 = vpop.xlane.xlu2 %2654 }
0x10bd   : > { %v2657_v38 = vmul.f32 %v2655_v37, %v15146_v62  ;;  %v12375_v37 = vld [vmem:[%s15750_s3 + $0x20] sm:$0xff] }
0x10bf   : > { %v13438_v39 = vpop.eup %13437  ;;  %v2659_v40 = vadd.f32 1e-05, %v2657_v38 }
0x10c0   : > { %v2661_v41 = vmul.f32 %v13438_v39, %v2658_v34  ;;  %vm2667_vm2 = vweird.f32 %v13438_v39  ;;  %v12376_v34 = vld [vmem:[%s15750_s3 + $0x28] sm:$0xff] }
0x10c1   : > { %13439 = vrsqrt.f32 %v2659_v40  ;;  %vm2668_vm9 = vmor %vm2666_vm5, %vm2667_vm2  ;;  %vm2676_vm11 = vweird.f32 %v2659_v40  ;;  %2909 = vmatpush.bf16.msra.mxu3 %v12376_v34  ;;  %v12409_v34 = vld [vmem:[%s15752_s23 + $0xf0] sm:$0xff] }
0x10c2   : > { %v2662_v42 = vmul.f32 %v13438_v39, %v2661_v41  ;;  %v12374_v41 = vld [vmem:[%s15750_s3 + $0x18] sm:$0xff] }
0x10c4   : > { %v2663_v43 = vmul.f32 0.5, %v2662_v42 }
0x10c5   : > { %2910 = vmatpush.bf16.msra.mxu3 %v12375_v37  ;;  %v12400_v37 = vld [vmem:[%s15752_s23 + $0xa8] sm:$0xff] }
0x10c6   : > { %v2664_v46 = vsub.f32 1.5, %v2663_v43 }
0x10c7   : > { %v13440_v47 = vpop.eup %13439 }
0x10c8   : > { %v2665_v48 = vmul.f32 %v13438_v39, %v2664_v46  ;;  %v2671_v49 = vmul.f32 %v13440_v47, %v2659_v40  ;;  %vm2677_vm10 = vweird.f32 %v13440_v47 }
0x10c9   : > { %vm2678_vm12 = vmor %vm2676_vm11, %vm2677_vm10  ;;  %2911 = vmatpush.bf16.msra.mxu3 %v12374_v41  ;;  %v12399_v41 = vld [vmem:[%s15752_s23 + $0xa0] sm:$0xff]  ;;  %vm8963_vm10 = vcmask 122880  }
0x10ca   : > { %v2672_v50 = vmul.f32 %v13440_v47, %v2671_v49  ;;  %v2669_v51 = vsel %vm2668_vm9, %v13438_v39, %v2665_v48 }
0x10cb   : > { %v2680_v55 = vmul.f32 %v2669_v51, %v2646_v26 }
0x10cc   : > { %v2673_v52 = vmul.f32 0.5, %v2672_v50 }
0x10cd   : > { %v2685_v59 = vmul.f32 %v13384_v54, %v2680_v55 }
0x10ce   : > { %v2674_v53 = vsub.f32 1.5, %v2673_v52 }
0x10cf   : > { %v2690_v1 = vadd.f32 %v13385_v58, %v2685_v59 }
0x10d0   : > { %v2675_v56 = vmul.f32 %v13440_v47, %v2674_v53  ;;  %v13388_v53 = vld [vmem:[#allocation25 + $0x1] ss:$0 sm:$0xff] }
0x10d2   : > { %v2679_v57 = vsel %vm2678_vm12, %v13440_v47, %v2675_v56 }
0x10d3   : > { %v2681_v60 = vmul.f32 %v2679_v57, %v2647_v30  ;;  %v13389_v57 = vld [vmem:[#allocation27 + $0x1] ss:$0 sm:$0xff] }
0x10d5   : > { %v2686_v61 = vmul.f32 %v13384_v54, %v2681_v60 }
0x10d7   : > { %v2691_v24 = vadd.f32 %v13385_v58, %v2686_v61 }
0x10d9   : > { %v2694_v63 = vpack.c.bf16 %v2691_v24, %v2690_v1 }
0x10db   : > { %9490 = vmatmul.msk.bf16.vlgmr.msra.gmra.mxu0 %vm1708_vm1, %v2694_v63  ;;  %v12373_v63 = vld [vmem:[%s15750_s3 + $0x10] sm:$0xff] }
0x10dc   : > { %2912 = vmatpush.bf16.msra.mxu3 %v12373_v63  ;;  %v12442_v63 = vld [vmem:[%s15752_s23 + $0x1f8] sm:$0xff] }
0x10e0   : > { %2913 = vmatpush.bf16.msra.mxu3 %v12372_v0 }
0x10e4   : > { %2914 = vmatpush.bf16.msra.mxu3 %v12371_v3  ;;  %v12417_v3 = vld [vmem:[%s15752_s23 + $0x130] sm:$0xff] }
0x1158   : > { %v2715_v2 = vpop.f32.mrf.mxu0 }
0x1159   : > { %v2716_v6 = vadd.f32 %v13386_v5, %v2715_v2  ;;  %v13390_v2 = vld [vmem:[#allocation30] ss:$0 sm:$0xff] }
0x115b   : > { %v2720_v9 = vmax.f32 %v2716_v6, 0.0 }
0x1160   : > { %v2717_v7 = vpop.f32.mrf.mxu0 }
0x1161   : > { %v2718_v8 = vadd.f32 %v13386_v5, %v2717_v7 }
0x1163   : > { %v2721_v10 = vmax.f32 %v2718_v8, 0.0 }
0x1165   : > { %v2727_v11 = vpack.c.bf16 %v2721_v10, %v2720_v9 }
0x1167   : > { %9503 = vmatmul.msk.bf16.vlgmr.msra.gmra.mxu1 %vm2186_vm13, %v2727_v11  ;;  %v13391_v11 = vld [vmem:[#allocation31] ss:$0 sm:$0xff] }
0x11e4   : > { %v2757_v13 = vpop.f32.mrf.mxu1 }
0x11e5   : > { %v2758_v14 = vadd.f32 %v13387_v12, %v2757_v13 }
0x11e7   : > { %v2762_v15 = vadd.f32 %v2758_v14, %v2690_v1 }
0x11e9   : > { %v2768_v16 = vsel %vm1708_vm1, %v2762_v15, 0.0 }
0x11ea   : > { %2769 = vadd.xlane.f32.xlu0 %v2768_v16  ;;  %v2849_v16 = vld [vmem:[%s1440_s4 + $0x8] sm:$0xff] }
0x11ec   : > { %v2759_v17 = vpop.f32.mrf.mxu1 }
0x11ed   : > { %v2760_v18 = vadd.f32 %v13387_v12, %v2759_v17  ;;  %v12378_v17 = vld [vmem:[%s15751_s15 + $0x8] sm:$0xff] }
0x11ee   : > { %2982 = vmatpush.bf16.msrb.mxu1 %v12378_v17  ;;  %v12439_v17 = vld [vmem:[%s15752_s23 + $0x1e0] sm:$0xff] }
0x11ef   : > { %v2763_v4 = vadd.f32 %v2760_v18, %v2691_v24  ;;  %v12377_v18 = vld [vmem:[%s15751_s15] sm:$0xff] }
0x11f1   : > { %v2771_v19 = vsel %vm1708_vm1, %v2763_v4, 0.0 }
0x11f2   : > { %2772 = vadd.xlane.f32.xlu1 %v2771_v19  ;;  %2983 = vmatpush.bf16.msrb.mxu1 %v12377_v18  ;;  %v12411_v18 = vld [vmem:[%s15752_s23 + $0x100] sm:$0xff] }
0x125d   : > { %v2770_v20 = vpop.xlane.xlu0 %2769 }
0x125e   : > { %v2774_v21 = vmul.f32 %v2770_v20, %v15146_v62 }
0x1260   : > { %v2776_v22 = vsub.f32 %v2762_v15, %v2774_v21  ;;  %v2848_v15 = vld [vmem:[%s1440_s4] sm:$0xff]  ;;  %s15755_s4 = sld [smem:[#allocation95_spill]] }
0x1262   : > { %v2778_v23 = vmul.f32 %v2776_v22, %v2776_v22 }
0x1264   : > { %v2780_v25 = vsel %vm1708_vm1, %v2778_v23, 0.0 }
0x1265   : > { %v2773_v26 = vpop.xlane.xlu1 %2772  ;;  %2781 = vadd.xlane.f32.xlu1 %v2780_v25  ;;  %v13392_v25 = vld [vmem:[#allocation33] ss:$0 sm:$0xff] }
0x1266   : > { %v2775_v27 = vmul.f32 %v2773_v26, %v15146_v62 }
0x1268   : > { %v2777_v28 = vsub.f32 %v2763_v4, %v2775_v27 }
0x126a   : > { %v2779_v29 = vmul.f32 %v2777_v28, %v2777_v28 }
0x126c   : > { %v2783_v44 = vsel %vm1708_vm1, %v2779_v29, 0.0  ;;  %v12386_v29 = vld [vmem:[%s15752_s23 + $0x38] sm:$0xff] }
0x126d   : > { %2784 = vadd.xlane.f32.xlu1 %v2783_v44  ;;  %v12394_v44 = vld [vmem:[%s15752_s23 + $0x78] sm:$0xff]  ;;  %3673 = vmatpush.bf16.msrb.mxu3 %v12386_v29  ;;  %v12419_v29 = vld [vmem:[%s15752_s23 + $0x140] sm:$0xff] }
0x12d8   : > { %v2782_v30 = vpop.xlane.xlu1 %2781 }
0x12d9   : > { %v2786_v31 = vmul.f32 %v2782_v30, %v15146_v62  ;;  %v12402_v30 = vld [vmem:[%s15752_s23 + $0xb8] sm:$0xff] }
0x12da   : > { %3701 = vmatpush.bf16.msra.mxu1 %v12402_v30  ;;  %v12435_v30 = vld [vmem:[%s15752_s23 + $0x1c0] sm:$0xff] }
0x12db   : > { %v2788_v32 = vadd.f32 1e-05, %v2786_v31  ;;  %v12385_v31 = vld [vmem:[%s15752_s23 + $0x30] sm:$0xff] }
0x12dc   : > { %3674 = vmatpush.bf16.msrb.mxu3 %v12385_v31 }
0x12dd   : > { %13441 = vrsqrt.f32 %v2788_v32  ;;  %vm2796_vm14 = vweird.f32 %v2788_v32 }
0x12de   : > { %3702 = vmatpush.bf16.msra.mxu1 %v12401_v33 }
0x12e0   : > { %v2785_v35 = vpop.xlane.xlu1 %2784 }
0x12e1   : > { %v2787_v36 = vmul.f32 %v2785_v35, %v15146_v62  ;;  %v12384_v35 = vld [vmem:[%s15752_s23 + $0x28] sm:$0xff] }
0x12e2   : > { %3675 = vmatpush.bf16.msrb.mxu3 %v12384_v35  ;;  %3703 = vmatpush.bf16.msra.mxu1 %v12400_v37 }
0x12e3   : > { %v13442_v38 = vpop.eup %13441  ;;  %v2789_v39 = vadd.f32 1e-05, %v2787_v36  ;;  %v12392_v36 = vld [vmem:[%s15752_s23 + $0x68] sm:$0xff] }
0x12e4   : > { %v2791_v40 = vmul.f32 %v13442_v38, %v2788_v32  ;;  %vm2797_vm0 = vweird.f32 %v13442_v38  ;;  %v12410_v32 = vld [vmem:[%s15752_s23 + $0xf8] sm:$0xff] }
0x12e5   : > { %13443 = vrsqrt.f32 %v2789_v39  ;;  %vm2798_vm15 = vmor %vm2796_vm14, %vm2797_vm0  ;;  %vm2806_vm6 = vweird.f32 %v2789_v39 }
0x12e6   : > { %v2792_v42 = vmul.f32 %v13442_v38, %v2791_v40  ;;  %v12391_v40 = vld [vmem:[%s15752_s23 + $0x60] sm:$0xff]  ;;  %3704 = vmatpush.bf16.msra.mxu1 %v12399_v41 }
0x12e8   : > { %v2793_v43 = vmul.f32 0.5, %v2792_v42  ;;  %v12407_v42 = vld [vmem:[%s15752_s23 + $0xe0] sm:$0xff] }
0x12ea   : > { %v2794_v46 = vsub.f32 1.5, %v2793_v43  ;;  %v12382_v43 = vld [vmem:[%s15752_s23 + $0x18] sm:$0xff] }
0x12eb   : > { %v13444_v47 = vpop.eup %13443 }
0x12ec   : > { %v2795_v48 = vmul.f32 %v13442_v38, %v2794_v46  ;;  %v2801_v49 = vmul.f32 %v13444_v47, %v2789_v39  ;;  %vm2807_vm3 = vweird.f32 %v13444_v47  ;;  %v12383_v39 = vld [vmem:[%s15752_s23 + $0x20] sm:$0xff]  ;;  %v12390_v46 = vld [vmem:[%s15752_s23 + $0x58] sm:$0xff] }
0x12ed   : > { %vm2808_vm7 = vmor %vm2806_vm6, %vm2807_vm3  ;;  %3676 = vmatpush.bf16.msrb.mxu3 %v12383_v39 }
0x12ee   : > { %v2802_v50 = vmul.f32 %v13444_v47, %v2801_v49  ;;  %v2799_v62 = vsel %vm2798_vm15, %v13442_v38, %v2795_v48  ;;  %v12408_v38 = vld [vmem:[%s15752_s23 + $0xe8] sm:$0xff]  ;;  %v12406_v48 = vld [vmem:[%s15752_s23 + $0xd8] sm:$0xff]  ;;  %v12381_v49 = vld [vmem:[%s15752_s23 + $0x10] sm:$0xff] }
0x12ef   : > { %v2810_v54 = vmul.f32 %v2799_v62, %v2776_v22  ;;  %v12397_v62 = vld [vmem:[%s15752_s23 + $0x90] sm:$0xff] }
0x12f0   : > { %v2803_v51 = vmul.f32 0.5, %v2802_v50  ;;  %v12389_v50 = vld [vmem:[%s15752_s23 + $0x50] sm:$0xff] }
0x12f1   : > { %v2815_v58 = vmul.f32 %v13388_v53, %v2810_v54  ;;  %3677 = vmatpush.bf16.msrb.mxu3 %v12382_v43  ;;  %v12388_v54 = vld [vmem:[%s15752_s23 + $0x48] sm:$0xff] }
0x12f2   : > { %v2804_v52 = vsub.f32 1.5, %v2803_v51  ;;  %v12405_v51 = vld [vmem:[%s15752_s23 + $0xd0] sm:$0xff] }
0x12f3   : > { %v2820_v61 = vadd.f32 %v13389_v57, %v2815_v58  ;;  %v12418_v58 = vld [vmem:[%s15752_s23 + $0x138] sm:$0xff] }
0x12f4   : > { %v2805_v55 = vmul.f32 %v13444_v47, %v2804_v52  ;;  %v12380_v52 = vld [vmem:[%s15752_s23 + $0x8] sm:$0xff] }
0x12f5   : > { %3678 = vmatpush.bf16.msrb.mxu3 %v12381_v49 }
0x12f6   : > { %v2809_v56 = vsel %vm2808_vm7, %v13444_v47, %v2805_v55  ;;  %v12398_v47 = vld [vmem:[%s15752_s23 + $0x98] sm:$0xff]  ;;  %v12396_v55 = vld [vmem:[%s15752_s23 + $0x88] sm:$0xff] }
0x12f7   : > { %v2811_v59 = vmul.f32 %v2809_v56, %v2777_v28  ;;  %3705 = vmatpush.bf16.msra.mxu1 %v12398_v47  ;;  %v12404_v56 = vld [vmem:[%s15752_s23 + $0xc8] sm:$0xff] }
0x12f8   : > { %v12448_v47 = vld [vmem:[%s15752_s23 + $0x228] sm:$0xff] }
0x12f9   : > { %v2816_v60 = vmul.f32 %v13388_v53, %v2811_v59  ;;  %3679 = vmatpush.bf16.msrb.mxu3 %v12380_v52  ;;  %v12387_v59 = vld [vmem:[%s15752_s23 + $0x40] sm:$0xff] }
0x12fb   : > { %v2821_v1 = vadd.f32 %v13389_v57, %v2816_v60  ;;  %3706 = vmatpush.bf16.msra.mxu1 %v12397_v62  ;;  %v12379_v57 = vld [vmem:[%s15752_s23] sm:$0xff] }
0x12fc   : > { %v12395_v60 = vld [vmem:[%s15752_s23 + $0x80] sm:$0xff] }
0x12fd   : > { %v2823_v24 = vpack.c.bf16 %v2821_v1, %v2820_v61  ;;  %v12403_v61 = vld [vmem:[%s15752_s23 + $0xc0] sm:$0xff]  ;;  %v12426_v1 = vld [vmem:[%s15752_s23 + $0x178] sm:$0xff]  ;;  %3680 = vmatpush.bf16.msrb.mxu3 %v12379_v57 }
0x12fe   : > { %v12446_v57 = vld [vmem:[%s15752_s23 + $0x218] sm:$0xff] }
0x12ff   : > { %9504 = vmatmul.msk.bf16.vlgmr.msra.gmra.mxu2 %vm1708_vm1, %v2823_v24  ;;  %3707 = vmatpush.bf16.msra.mxu1 %v12396_v55  ;;  %v12434_v24 = vld [vmem:[%s15752_s23 + $0x1b8] sm:$0xff]  ;;  %vm3027_vm1 = vcmask 917248  }
0x1303   : > { %3708 = vmatpush.bf16.msra.mxu1 %v12395_v60 }
0x1382   : > { %v2843_v5 = vpop.f32.mrf.mxu2 }
0x1383   : > { %v2844_v6 = vadd.f32 %v13390_v2, %v2843_v5  ;;  %v12433_v5 = vld [vmem:[%s15752_s23 + $0x1b0] sm:$0xff] }
0x1385   : > { %3017 = vst.msk [vmem:[#allocation2 + $0x8] sm:$0xff] %vm2903_vm8, %v2844_v6 }
0x138a   : > { %v2845_v7 = vpop.f32.mrf.mxu2 }
0x138b   : > { %v2846_v8 = vadd.f32 %v13390_v2, %v2845_v7  ;;  %v12425_v2 = vld [vmem:[%s15752_s23 + $0x170] sm:$0xff]  ;;  %v12416_v7 = vld [vmem:[%s15752_s23 + $0x128] sm:$0xff] }
0x138d   : > { %v2862_v9 = vpack.c.bf16 %v2846_v8, %v2844_v6  ;;  %3018 = vst.msk [vmem:[#allocation2 + $0x10] sm:$0xff] %vm2903_vm8, %v2846_v8  ;;  %v12441_v6 = vld [vmem:[%s15752_s23 + $0x1f0] sm:$0xff]  ;;  %v12415_v8 = vld [vmem:[%s15752_s23 + $0x120] sm:$0xff] }
0x138f   : > { %9529 = vmatmul.msk.bf16.vlgmr.msra.gmra.mxu3 %vm2903_vm8, %v2862_v9  ;;  %v12414_v9 = vld [vmem:[%s15752_s23 + $0x118] sm:$0xff] }
0x1390   : > { %3729 = vmatpush.bf16.msra.mxu3 %v12418_v58 }
0x1394   : > { %3730 = vmatpush.bf16.msra.mxu3 %v12417_v3 }
0x1398   : > { %3731 = vmatpush.bf16.msra.mxu3 %v12416_v7  ;;  %v12458_v7 = vld [vmem:[#allocation36 + $0x38] sm:$0xff] }
0x139c   : > { %3732 = vmatpush.bf16.msra.mxu3 %v12415_v8  ;;  %v12466_v8 = vld [vmem:[#allocation36 + $0x78] sm:$0xff] }
0x13a0   : > { %3733 = vmatpush.bf16.msra.mxu3 %v12414_v9  ;;  %v12474_v9 = vld [vmem:[#allocation36 + $0xb8] sm:$0xff] }
0x1412   : > { %v2916_v10 = vpop.f32.mrf.mxu3 }
0x1413   : > { %v2917_v14 = vadd.f32 %v13391_v11, %v2916_v10  ;;  %v12413_v10 = vld [vmem:[%s15752_s23 + $0x110] sm:$0xff] }
0x1414   : > { %3734 = vmatpush.bf16.msra.mxu3 %v12413_v10 }
0x141a   : > { %v2918_v12 = vpop.f32.mrf.mxu3 }
0x141b   : > { %v2919_v13 = vadd.f32 %v13391_v11, %v2918_v12  ;;  %v12424_v11 = vld [vmem:[%s15752_s23 + $0x168] sm:$0xff] }
0x141c   : > { %v12432_v12 = vld [vmem:[%s15752_s23 + $0x1a8] sm:$0xff] }
0x141d   : > { %2941 = vmatpush.msrb.mxu0 %v2919_v13  ;;  %v12440_v13 = vld [vmem:[%s15752_s23 + $0x1e8] sm:$0xff] }
0x141f   : > { %2942 = vmatpush.msrb.mxu0 %v2917_v14  ;;  %v12412_v14 = vld [vmem:[%s15752_s23 + $0x108] sm:$0xff] }
0x1420   : > { %9530 = vmatmul.msk.f32.vlgmr.msrb.gmra.mxu0 %vm1817_vm4, %v2848_v15  ;;  %3735 = vmatpush.bf16.msra.mxu3 %v12412_v14  ;;  %v12465_v14 = vld [vmem:[#allocation36 + $0x70] sm:$0xff] }
0x1421   : > { %3687 = vmatpush.bf16.msra.mxu0 %v12394_v44  ;;  %v12427_v44 = vld [vmem:[%s15752_s23 + $0x180] sm:$0xff] }
0x1424   : > { %3736 = vmatpush.bf16.msra.mxu3 %v12411_v18  ;;  %v12456_v18 = vld [vmem:[#allocation36 + $0x28] sm:$0xff] }
0x1425   : > { %3688 = vmatpush.bf16.msra.mxu0 %v12393_v45 }
0x1428   : > { %9531 = vmatmul.msk.f32.gmra.mxu0 %vm1817_vm4, %v2849_v16 }
0x1429   : > { %3689 = vmatpush.bf16.msra.mxu0 %v12392_v36 }
0x142d   : > { %3690 = vmatpush.bf16.msra.mxu0 %v12391_v40 }
0x1431   : > { %3691 = vmatpush.bf16.msra.mxu0 %v12390_v46  ;;  %v12449_v46 = vld [vmem:[%s15752_s23 + $0x230] sm:$0xff] }
0x1435   : > { %3692 = vmatpush.bf16.msra.mxu0 %v12389_v50 }
0x1439   : > { %3693 = vmatpush.bf16.msra.mxu0 %v12388_v54 }
0x143d   : > { %3694 = vmatpush.bf16.msra.mxu0 %v12387_v59 }
0x1441   : > { %3743 = vmatpush.bf16.msrb.mxu0 %v12426_v1  ;;  %v12444_v1 = vld [vmem:[%s15752_s23 + $0x208] sm:$0xff] }
0x1445   : > { %3744 = vmatpush.bf16.msrb.mxu0 %v12425_v2 }
0x1449   : > { %3745 = vmatpush.bf16.msrb.mxu0 %v12424_v11 }
0x149d   : > { %v2944_v4 = vpop.f32.mrf.mxu0 }
0x149e   : > { %v2950_v20 = vmax.f32 %v2944_v4, 0.0  ;;  %v12422_v4 = vld [vmem:[%s15752_s23 + $0x158] sm:$0xff] }
0x14a5   : > { %v2947_v19 = vpop.f32.mrf.mxu0 }
0x14a6   : > { %v2951_v21 = vmax.f32 %v2947_v19, 0.0  ;;  %v12430_v19 = vld [vmem:[%s15752_s23 + $0x198] sm:$0xff] }
0x14a8   : > { %v2956_v22 = vpack.c.bf16 %v2951_v21, %v2950_v20  ;;  %v12438_v20 = vld [vmem:[%s15752_s23 + $0x1d8] sm:$0xff]  ;;  %v12421_v21 = vld [vmem:[%s15752_s23 + $0x150] sm:$0xff] }
0x14aa   : > { %9540 = vmatmul.msk.bf16.vlgmr.msrb.gmra.mxu1 %vm2186_vm13, %v2956_v22  ;;  %v12429_v22 = vld [vmem:[%s15752_s23 + $0x190] sm:$0xff] }
0x14ab   : > { %3757 = vmatpush.bf16.msrb.mxu1 %v12434_v24  ;;  %v12443_v24 = vld [vmem:[%s15752_s23 + $0x200] sm:$0xff] }
0x14af   : > { %3758 = vmatpush.bf16.msrb.mxu1 %v12433_v5  ;;  %v13393_v5 = vld [vmem:[#allocation34] ss:$0 sm:$0xff] }
0x14b3   : > { %3759 = vmatpush.bf16.msrb.mxu1 %v12432_v12 }
0x1527   : > { %v2985_v23 = vpop.f32.mrf.mxu1 }
0x1528   : > { %v2986_v28 = vadd.f32 %v13392_v25, %v2985_v23  ;;  %v12437_v23 = vld [vmem:[%s15752_s23 + $0x1d0] sm:$0xff] }
0x152f   : > { %v2987_v26 = vpop.f32.mrf.mxu1 }
0x1530   : > { %v2988_v27 = vadd.f32 %v13392_v25, %v2987_v26  ;;  %v12420_v26 = vld [vmem:[%s15752_s23 + $0x148] sm:$0xff] }
0x1532   : > { %3004 = vmatpush.msrb.mxu2 %v2988_v27  ;;  %v12428_v27 = vld [vmem:[%s15752_s23 + $0x188] sm:$0xff] }
0x1534   : > { %3005 = vmatpush.msrb.mxu2 %v2986_v28  ;;  %v12436_v28 = vld [vmem:[%s15752_s23 + $0x1c8] sm:$0xff] }
0x1535   : > { %9541 = vmatmul.msk.f32.vlgmr.msrb.gmra.mxu2 %vm1817_vm4, %v2848_v15  ;;  %v12423_v15 = vld [vmem:[%s15752_s23 + $0x160] sm:$0xff] }
0x1536   : > { %3715 = vmatpush.bf16.msra.mxu2 %v12410_v32  ;;  %3746 = vmatpush.bf16.msrb.mxu0 %v12423_v15  ;;  %v12450_v32 = vld [vmem:[%s15752_s23 + $0x238] sm:$0xff]  ;;  %v12473_v15 = vld [vmem:[#allocation36 + $0xb0] sm:$0xff] }
0x153a   : > { %3716 = vmatpush.bf16.msra.mxu2 %v12409_v34  ;;  %3747 = vmatpush.bf16.msrb.mxu0 %v12422_v4  ;;  %v12464_v4 = vld [vmem:[#allocation36 + $0x68] sm:$0xff] }
0x153d   : > { %9542 = vmatmul.msk.f32.gmra.mxu2 %vm1817_vm4, %v2849_v16  ;;  %v12431_v16 = vld [vmem:[%s15752_s23 + $0x1a0] sm:$0xff] }
0x153e   : > { %3717 = vmatpush.bf16.msra.mxu2 %v12408_v38  ;;  %3760 = vmatpush.bf16.msrb.mxu1 %v12431_v16 }
0x153f   : > { %3748 = vmatpush.bf16.msrb.mxu0 %v12421_v21 }
0x1542   : > { %3718 = vmatpush.bf16.msra.mxu2 %v12407_v42  ;;  %3761 = vmatpush.bf16.msrb.mxu1 %v12430_v19  ;;  %v12472_v19 = vld [vmem:[#allocation36 + $0xa8] sm:$0xff] }
0x1543   : > { %3749 = vmatpush.bf16.msrb.mxu0 %v12420_v26  ;;  %v12463_v26 = vld [vmem:[#allocation36 + $0x60] sm:$0xff] }
0x1546   : > { %3719 = vmatpush.bf16.msra.mxu2 %v12406_v48  ;;  %3762 = vmatpush.bf16.msrb.mxu1 %v12429_v22  ;;  %v12447_v48 = vld [vmem:[%s15752_s23 + $0x220] sm:$0xff] }
0x1547   : > { %3750 = vmatpush.bf16.msrb.mxu0 %v12419_v29 }
0x154a   : > { %3720 = vmatpush.bf16.msra.mxu2 %v12405_v51  ;;  %3763 = vmatpush.bf16.msrb.mxu1 %v12428_v27  ;;  %v12471_v27 = vld [vmem:[#allocation36 + $0xa0] sm:$0xff] }
0x154e   : > { %3721 = vmatpush.bf16.msra.mxu2 %v12404_v56  ;;  %3764 = vmatpush.bf16.msrb.mxu1 %v12427_v44 }
0x1552   : > { %3722 = vmatpush.bf16.msra.mxu2 %v12403_v61  ;;  %v12445_v61 = vld [vmem:[%s15752_s23 + $0x210] sm:$0xff] }
0x1556   : > { %3771 = vmatpush.bf16.msrb.mxu2 %v12442_v63 }
0x155a   : > { %3772 = vmatpush.bf16.msrb.mxu2 %v12441_v6 }
0x155e   : > { %3773 = vmatpush.bf16.msrb.mxu2 %v12440_v13  ;;  %v12457_v13 = vld [vmem:[#allocation36 + $0x30] sm:$0xff] }
0x1562   : > { %3774 = vmatpush.bf16.msrb.mxu2 %v12439_v17 }
0x1566   : > { %3775 = vmatpush.bf16.msrb.mxu2 %v12438_v20 }
0x156a   : > { %3776 = vmatpush.bf16.msrb.mxu2 %v12437_v23 }
0x156e   : > { %3777 = vmatpush.bf16.msrb.mxu2 %v12436_v28 }
0x1572   : > { %3778 = vmatpush.bf16.msrb.mxu2 %v12435_v30 }
0x15b8   : > { %v3007_v53 = vpop.f32.mrf.mxu2 }
0x15b9   : > { %3021 = vrot.lane.b32.xlu1 %v3007_v53, %s14418_s22 }
0x15c0   : > { %v3010_v0 = vpop.f32.mrf.mxu2 }
0x15c1   : > { %3023 = vrot.lane.b32.xlu2 %v3010_v0, %s14418_s22 }
0x161b   : > { %v3024_v25 = vpop.permute.xlu2 %3023 }
0x161c   : > { %3029 = vst.msk [vmem:[#allocation2 + $0x10] sm:$0xff] %vm3027_vm1, %v3024_v25  ;;  %v12455_v25 = vld [vmem:[#allocation36 + $0x20] sm:$0xff] }
0x1623   : > { %v3047_v50 = vld [vmem:[#allocation2 + $0x10] sm:$0xff] }
0x1624   : > { %v3051_v62 = vld [vmem:[#allocation2 + $0x11] sm:$0xff] }
0x1625   : > { %v3055_v53 = vld [vmem:[#allocation2 + $0x12] sm:$0xff] }
0x1626   : > { %v3059_v55 = vld [vmem:[#allocation2 + $0x13] sm:$0xff] }
0x1627   : > { %v3063_v63 = vld [vmem:[#allocation2 + $0x14] sm:$0xff] }
0x162b   : > { %v3022_v31 = vpop.permute.xlu1 %3021 }
0x162c   : > { %3028 = vst.msk [vmem:[#allocation2 + $0x8] sm:$0xff] %vm3027_vm1, %v3022_v31 }
0x1633   : > { %v3030_v45 = vld [vmem:[#allocation2 + $0x4] sm:$0xff]  ;;  %v3031_v33 = vld [vmem:[#allocation2 + $0xc] sm:$0xff] }
0x1634   : > { %v3034_v34 = vld [vmem:[#allocation2 + $0x5] sm:$0xff]  ;;  %v3228_v35 = vpack.c.bf16 %v3031_v33, %v3030_v45  ;;  %v3035_v36 = vld [vmem:[#allocation2 + $0xd] sm:$0xff]  ;;  %v3236_v0 = vpack.c.bf16 %v3063_v63, %v3031_v33 }
0x1635   : > { %v3038_v37 = vld [vmem:[#allocation2 + $0x6] sm:$0xff]  ;;  %v3039_v38 = vld [vmem:[#allocation2 + $0xe] sm:$0xff]  ;;  %v3229_v39 = vpack.c.bf16 %v3035_v36, %v3034_v34 }
0x1636   : > { %v3230_v40 = vpack.c.bf16 %v3039_v38, %v3038_v37  ;;  %v3042_v41 = vld [vmem:[#allocation2 + $0x7] sm:$0xff]  ;;  %v3043_v42 = vld [vmem:[#allocation2 + $0xf] sm:$0xff]  ;;  %3681 = vmatmul.bf16.vlgmr.msrb.gmra.mxu3 %v3228_v35 }
0x1637   : > { %v3231_v43 = vpack.c.bf16 %v3043_v42, %v3042_v41  ;;  %3695 = vmatmul.bf16.vlgmr.msra.gmra.mxu0 %v3229_v39  ;;  %3785 = vmatpush.bf16.msrb.mxu3 %v12450_v32  ;;  %v3046_v49 = vld [vmem:[#allocation2 + $0x8] sm:$0xff]  ;;  %v12452_v42 = vld [vmem:[#allocation36 + $0x8] sm:$0xff] }
0x1638   : > { %3709 = vmatmul.bf16.vlgmr.msra.gmra.mxu1 %v3230_v40  ;;  %v3050_v51 = vld [vmem:[#allocation2 + $0x9] sm:$0xff]  ;;  %v3232_v56 = vpack.c.bf16 %v3047_v50, %v3046_v49  ;;  %4034 = vmatpush.bf16.msra.mxu0 %v12458_v7 }
0x1639   : > { %3723 = vmatmul.bf16.vlgmr.msra.gmra.mxu2 %v3231_v43  ;;  %v3054_v52 = vld [vmem:[#allocation2 + $0xa] sm:$0xff]  ;;  %v3233_v58 = vpack.c.bf16 %v3051_v62, %v3050_v51  ;;  %4048 = vmatpush.bf16.msra.mxu1 %v12466_v8  ;;  %v12460_v43 = vld [vmem:[#allocation36 + $0x48] sm:$0xff]  ;;  %v12451_v62 = vld [vmem:[#allocation36] sm:$0xff] }
0x163a   : > { %v3058_v54 = vld [vmem:[#allocation2 + $0xb] sm:$0xff]  ;;  %v3234_v59 = vpack.c.bf16 %v3055_v53, %v3054_v52  ;;  %4062 = vmatpush.bf16.msra.mxu2 %v12474_v9  ;;  %v12459_v51 = vld [vmem:[#allocation36 + $0x40] sm:$0xff] }
0x163b   : > { %3786 = vmatpush.bf16.msrb.mxu3 %v12449_v46  ;;  %v3235_v60 = vpack.c.bf16 %v3059_v55, %v3058_v54  ;;  %v12454_v32 = vld [vmem:[#allocation36 + $0x18] sm:$0xff]  ;;  %v12453_v38 = vld [vmem:[#allocation36 + $0x10] sm:$0xff]  ;;  %v12467_v54 = vld [vmem:[#allocation36 + $0x80] sm:$0xff] }
0x163c   : > { %4035 = vmatpush.bf16.msra.mxu0 %v12457_v13  ;;  %v12462_v45 = vld [vmem:[#allocation36 + $0x58] sm:$0xff]  ;;  %v12461_v39 = vld [vmem:[#allocation36 + $0x50] sm:$0xff] }
0x163d   : > { %4049 = vmatpush.bf16.msra.mxu1 %v12465_v14  ;;  %v12470_v33 = vld [vmem:[#allocation36 + $0x98] sm:$0xff]  ;;  %v12469_v40 = vld [vmem:[#allocation36 + $0x90] sm:$0xff] }
0x163e   : > { %4063 = vmatpush.bf16.msra.mxu2 %v12473_v15 }
0x163f   : > { %3787 = vmatpush.bf16.msrb.mxu3 %v12448_v47 }
0x1640   : > { %4036 = vmatpush.bf16.msra.mxu0 %v12456_v18 }
0x1641   : > { %4050 = vmatpush.bf16.msra.mxu1 %v12464_v4  ;;  %v13394_v4 = vld [vmem:[#allocation37] ss:$0 sm:$0xff] }
0x1642   : > { %4064 = vmatpush.bf16.msra.mxu2 %v12472_v19 }
0x1643   : > { %3788 = vmatpush.bf16.msrb.mxu3 %v12447_v48  ;;  %v12468_v48 = vld [vmem:[#allocation36 + $0x88] sm:$0xff] }
0x1644   : > { %4037 = vmatpush.bf16.msra.mxu0 %v12455_v25 }
0x1645   : > { %4051 = vmatpush.bf16.msra.mxu1 %v12463_v26  ;;  %v12537_v26 = vld [vmem:[#allocation39 + $0x1ec] sm:$0xf0] }
0x1646   : > { %3737 = vmatmul.bf16.vlgmr.msra.gmra.mxu3 %v3232_v56  ;;  %4065 = vmatpush.bf16.msra.mxu2 %v12471_v27  ;;  %v10301_v27 = vld [vmem:[#allocation39 + $0x2e0] sm:$0xf] }
0x1647   : > { %3751 = vmatmul.bf16.vlgmr.msrb.gmra.mxu0 %v3233_v58  ;;  %3789 = vmatpush.bf16.msrb.mxu3 %v12446_v57 }
0x1648   : > { %3765 = vmatmul.bf16.vlgmr.msrb.gmra.mxu1 %v3234_v59  ;;  %4038 = vmatpush.bf16.msra.mxu0 %v12454_v32  ;;  %v12601_v32 = vld [vmem:[#allocation39 + $0x3ec] sm:$0xf0] }
0x1649   : > { %3779 = vmatmul.bf16.vlgmr.msrb.gmra.mxu2 %v3235_v60  ;;  %4052 = vmatpush.bf16.msra.mxu1 %v12462_v45 }
0x164a   : > { %4066 = vmatpush.bf16.msra.mxu2 %v12470_v33  ;;  %v10029_v33 = vld [vmem:[#allocation39 + $0xc0] sm:$0xf] }
0x164b   : > { %3790 = vmatpush.bf16.msrb.mxu3 %v12445_v61 }
0x164c   : > { %4039 = vmatpush.bf16.msra.mxu0 %v12453_v38  ;;  %v12533_v38 = vld [vmem:[#allocation39 + $0x1cc] sm:$0xf0] }
0x164d   : > { %4053 = vmatpush.bf16.msra.mxu1 %v12461_v39  ;;  %v10285_v39 = vld [vmem:[#allocation39 + $0x2c0] sm:$0xf] }
0x164e   : > { %4067 = vmatpush.bf16.msra.mxu2 %v12469_v40  ;;  %v12565_v40 = vld [vmem:[#allocation39 + $0x2cc] sm:$0xf0] }
0x164f   : > { %3791 = vmatpush.bf16.msrb.mxu3 %v12444_v1 }
0x1650   : > { %4040 = vmatpush.bf16.msra.mxu0 %v12452_v42 }
0x1651   : > { %4054 = vmatpush.bf16.msra.mxu1 %v12460_v43  ;;  %v10286_v43 = vor.u32 %v12565_v40, %v10285_v39  ;;  %v10221_v39 = vld [vmem:[#allocation39 + $0x240] sm:$0xf] }
0x1652   : > { %4068 = vmatpush.bf16.msra.mxu2 %v12468_v48 }
0x1653   : > { %3792 = vmatpush.bf16.msrb.mxu3 %v12443_v24 }
0x1654   : > { %4041 = vmatpush.bf16.msra.mxu0 %v12451_v62  ;;  %v10013_v62 = vld [vmem:[#allocation39 + $0xa0] sm:$0xf] }
0x1655   : > { %4055 = vmatpush.bf16.msra.mxu1 %v12459_v51  ;;  %v12497_v51 = vld [vmem:[#allocation39 + $0xac] sm:$0xf0] }
0x1656   : > { %3793 = vmatmul.bf16.vlgmr.msrb.gmra.mxu3 %v3236_v0  ;;  %4069 = vmatpush.bf16.msra.mxu2 %v12467_v54 }
0x16b4   : > { %v3696_v2 = vpop.f32.mrf.mxu0 }
0x16b5   : > { %v3710_v6 = vpop.f32.mrf.mxu1 }
0x16b9   : > { %v3682_v3 = vpop.f32.mrf.mxu3 }
0x16ba   : > { %v3683_v10 = vadd.f32 %v13393_v5, %v3682_v3 }
0x16bc   : > { %v3724_v12 = vpop.f32.mrf.mxu2  ;;  %v3697_v16 = vadd.f32 %v3696_v2, %v3683_v10  ;;  %v3698_v17 = vpop.f32.mrf.mxu0 }
0x16bd   : > { %v3712_v22 = vpop.f32.mrf.mxu1 }
0x16be   : > { %v3711_v20 = vadd.f32 %v3710_v6, %v3697_v16 }
0x16c0   : > { %v3725_v28 = vadd.f32 %v3724_v12, %v3711_v20  ;;  %v10045_v20 = vld [vmem:[#allocation39 + $0xe0] sm:$0xf] }
0x16c1   : > { %v3684_v11 = vpop.f32.mrf.mxu3 }
0x16c2   : > { %v3685_v21 = vadd.f32 %v13393_v5, %v3684_v11 }
0x16c4   : > { %v3699_v29 = vadd.f32 %v3698_v17, %v3685_v21  ;;  %v3726_v44 = vpop.f32.mrf.mxu2  ;;  %v3752_v31 = vpop.f32.mrf.mxu0  ;;  %v12505_v21 = vld [vmem:[#allocation39 + $0xec] sm:$0xf0] }
0x16c5   : > { %v3766_v37 = vpop.f32.mrf.mxu1  ;;  %v10046_v25 = vor.u32 %v12505_v21, %v10045_v20  ;;  %v10109_v20 = vld [vmem:[#allocation39 + $0x160] sm:$0xf] }
0x16c6   : > { %v3713_v34 = vadd.f32 %v3712_v22, %v3699_v29  ;;  %v10173_v22 = vld [vmem:[#allocation39 + $0x1e0] sm:$0xf] }
0x16c7   : > { %7300 = vmatpush.bf16.msra.mxu3 %v10046_v25  ;;  %v10237_v25 = vld [vmem:[#allocation39 + $0x260] sm:$0xf] }
0x16c8   : > { %v3727_v41 = vadd.f32 %v3726_v44, %v3713_v34  ;;  %v10174_v44 = vor.u32 %v12537_v26, %v10173_v22  ;;  %v12501_v34 = vld [vmem:[#allocation39 + $0xcc] sm:$0xf0] }
0x16c9   : > { %v3738_v23 = vpop.f32.mrf.mxu3 }
0x16ca   : > { %v3739_v30 = vadd.f32 %v3738_v23, %v3725_v28  ;;  %v12569_v28 = vld [vmem:[#allocation39 + $0x2ec] sm:$0xf0]  ;;  %7313 = vmatpush.bf16.msrb.mxu0 %v10174_v44 }
0x16cc   : > { %v3753_v35 = vadd.f32 %v3752_v31, %v3739_v30  ;;  %v3780_v49 = vpop.f32.mrf.mxu2  ;;  %v3754_v50 = vpop.f32.mrf.mxu0  ;;  %v10302_v30 = vor.u32 %v12569_v28, %v10301_v27  ;;  %v10429_v31 = vld [vmem:[#allocation39 + $0x3e0] sm:$0xf]  ;;  %v12553_v27 = vld [vmem:[#allocation39 + $0x26c] sm:$0xf0] }
0x16cd   : > { %v3768_v57 = vpop.f32.mrf.mxu1  ;;  %v10430_v45 = vor.u32 %v12601_v32, %v10429_v31  ;;  %v10365_v28 = vld [vmem:[#allocation39 + $0x360] sm:$0xf]  ;;  %v10238_v32 = vor.u32 %v12553_v27, %v10237_v25 }
0x16ce   : > { %v3767_v46 = vadd.f32 %v3766_v37, %v3753_v35  ;;  %7326 = vmatpush.bf16.msrb.mxu1 %v10302_v30  ;;  %v10157_v35 = vld [vmem:[#allocation39 + $0x1c0] sm:$0xf]  ;;  %v10030_v37 = vor.u32 %v12501_v34, %v10029_v33 }
0x16cf   : > { %7339 = vmatpush.bf16.msrb.mxu2 %v10430_v45  ;;  %v10158_v42 = vor.u32 %v12533_v38, %v10157_v35  ;;  %v9965_v34 = vld [vmem:[#allocation39 + $0x40] sm:$0xf]  ;;  %v12485_v35 = vld [vmem:[#allocation39 + $0x4c] sm:$0xf0] }
0x16d0   : > { %v3781_v52 = vadd.f32 %v3780_v49, %v3767_v46  ;;  %v10413_v46 = vld [vmem:[#allocation39 + $0x3c0] sm:$0xf]  ;;  %7301 = vmatpush.bf16.msra.mxu3 %v10030_v37  ;;  %v12517_v38 = vld [vmem:[#allocation39 + $0x14c] sm:$0xf0] }
0x16d1   : > { %v3740_v36 = vpop.f32.mrf.mxu3  ;;  %7314 = vmatpush.bf16.msrb.mxu0 %v10158_v42  ;;  %v10093_v37 = vld [vmem:[#allocation39 + $0x140] sm:$0xf]  ;;  %v12549_v42 = vld [vmem:[#allocation39 + $0x24c] sm:$0xf0] }
0x16d2   : > { %v3741_v47 = vadd.f32 %v3740_v36, %v3727_v41  ;;  %7327 = vmatpush.bf16.msrb.mxu1 %v10286_v43  ;;  %v10349_v43 = vld [vmem:[#allocation39 + $0x340] sm:$0xf] }
0x16d3   : > { %v10541_v25 = vld [vmem:[#allocation39 + $0x4c0] sm:$0xf] }
0x16d4   : > { %v3755_v53 = vadd.f32 %v3754_v50, %v3741_v47  ;;  %v3782_v61 = vpop.f32.mrf.mxu2  ;;  %v12597_v47 = vld [vmem:[#allocation39 + $0x3cc] sm:$0xf0]  ;;  %v10669_v27 = vld [vmem:[#allocation39 + $0x5c0] sm:$0xf] }
0x16d5   : > { %v10414_v50 = vor.u32 %v12597_v47, %v10413_v46  ;;  %v12581_v46 = vld [vmem:[#allocation39 + $0x34c] sm:$0xf0]  ;;  %v10222_v47 = vor.u32 %v12549_v42, %v10221_v39 }
0x16d6   : > { %v3769_v58 = vadd.f32 %v3768_v57, %v3755_v53  ;;  %v10269_v57 = vld [vmem:[#allocation39 + $0x2a0] sm:$0xf]  ;;  %v12657_v39 = vld [vmem:[#allocation39 + $0x5ac] sm:$0xf0] }
0x16d7   : > { %7340 = vmatpush.bf16.msrb.mxu2 %v10414_v50  ;;  %v9949_v50 = vld [vmem:[#allocation39 + $0x20] sm:$0xf] }
0x16d8   : > { %v3783_v1 = vadd.f32 %v3782_v61, %v3769_v58  ;;  %v12593_v61 = vld [vmem:[#allocation39 + $0x3ac] sm:$0xf0] }
0x16d9   : > { %v3794_v55 = vpop.f32.mrf.mxu3 }
0x16da   : > { %v3795_v56 = vadd.f32 %v3794_v55, %v3781_v52  ;;  %v10141_v52 = vld [vmem:[#allocation39 + $0x1a0] sm:$0xf]  ;;  %v10014_v55 = vor.u32 %v12497_v51, %v10013_v62  ;;  %v12481_v62 = vld [vmem:[#allocation39 + $0x2c] sm:$0xf0] }
0x16db   : > { %v10077_v51 = vld [vmem:[#allocation39 + $0x120] sm:$0xf] }
0x16dc   : > { %v3801_v59 = vmin.f32 %v3795_v56, 0.0  ;;  %vm3799_vm4 = vcmp.gt.f32.partialorder %v3795_v56, 0.0  ;;  %7302 = vmatpush.bf16.msra.mxu3 %v10014_v55  ;;  %v12545_v55 = vld [vmem:[#allocation39 + $0x22c] sm:$0xf0] }
0x16de   : > { %v3803_v60 = vmul.f32 1.442695, %v3801_v59  ;;  %v12561_v59 = vld [vmem:[#allocation39 + $0x2ac] sm:$0xf0] }
0x16e0   : > { %13445 = vpow2.f32 %v3803_v60  ;;  %v10397_v60 = vld [vmem:[#allocation39 + $0x3a0] sm:$0xf] }
0x16e1   : > { %v3796_v24 = vpop.f32.mrf.mxu3 }
0x16e2   : > { %v3797_v63 = vadd.f32 %v3796_v24, %v3783_v1  ;;  %v10270_v24 = vor.u32 %v12561_v59, %v10269_v57  ;;  %v12577_v57 = vld [vmem:[#allocation39 + $0x32c] sm:$0xf0] }
0x16e4   : > { %v3802_v0 = vmin.f32 %v3797_v63, 0.0  ;;  %vm3800_vm13 = vcmp.gt.f32.partialorder %v3797_v63, 0.0  ;;  %7328 = vmatpush.bf16.msrb.mxu1 %v10270_v24  ;;  %v12477_v24 = vld [vmem:[#allocation39 + $0xc] sm:$0xf0] }
0x16e6   : > { %v13446_v3 = vpop.eup %13445  ;;  %v3805_v2 = vmul.f32 1.442695, %v3802_v0 }
0x16e7   : > { %v9831_v5 = vadd.f32 -1.0, %v13446_v3  ;;  %v9997_v3 = vld [vmem:[#allocation39 + $0x80] sm:$0xf] }
0x16e8   : > { %13447 = vpow2.f32 %v3805_v2  ;;  %v12493_v2 = vld [vmem:[#allocation39 + $0x8c] sm:$0xf0] }
0x16e9   : > { %v3809_v6 = vsel %vm3799_vm4, %v3795_v56, %v9831_v5  ;;  %v12529_v56 = vld [vmem:[#allocation39 + $0x1ac] sm:$0xf0]  ;;  %v10125_v5 = vld [vmem:[#allocation39 + $0x180] sm:$0xf] }
0x16ea   : > { %3815 = vst.msk [vmem:[#allocation4 + $0x8] sm:$0xff] %vm2903_vm8, %v3809_v6  ;;  %v10142_v58 = vor.u32 %v12529_v56, %v10141_v52  ;;  %v12513_v52 = vld [vmem:[#allocation39 + $0x12c] sm:$0xf0]  ;;  %v10333_v56 = vld [vmem:[#allocation39 + $0x320] sm:$0xf] }
0x16ec   : > { %7315 = vmatpush.bf16.msrb.mxu0 %v10142_v58 }
0x16ee   : > { %v13448_v7 = vpop.eup %13447 }
0x16ef   : > { %v9832_v8 = vadd.f32 -1.0, %v13448_v7  ;;  %v9998_v7 = vor.u32 %v12493_v2, %v9997_v3  ;;  %v12509_v3 = vld [vmem:[#allocation39 + $0x10c] sm:$0xf0]  ;;  %v10189_v2 = vld [vmem:[#allocation39 + $0x200] sm:$0xf] }
0x16f1   : > { %v3810_v9 = vsel %vm3800_vm13, %v3797_v63, %v9832_v8  ;;  %v3817_v10 = vld [vmem:[#allocation4 + $0x7] sm:$0xff]  ;;  %v10398_v63 = vor.u32 %v12593_v61, %v10397_v60  ;;  %7303 = vmatpush.bf16.msra.mxu3 %v9998_v7  ;;  %v10334_v60 = vor.u32 %v12577_v57, %v10333_v56 }
0x16f2   : > { %3816 = vst.msk [vmem:[#allocation4 + $0x10] sm:$0xff] %vm2903_vm8, %v3810_v9  ;;  %v3821_v11 = vld [vmem:[#allocation4 + $0x8] sm:$0xff]  ;;  %v10253_v9 = vld [vmem:[#allocation39 + $0x280] sm:$0xf] }
0x16f3   : > { %7341 = vmatpush.bf16.msrb.mxu2 %v10398_v63  ;;  %v12525_v8 = vld [vmem:[#allocation39 + $0x18c] sm:$0xf0] }
0x16f4   : > { %v12541_v7 = vld [vmem:[#allocation39 + $0x20c] sm:$0xf0] }
0x16f5   : > { %v12685_v57 = vld [vmem:[#allocation39 + $0x68c] sm:$0xf0] }
0x16f9   : > { %v3818_v12 = vld [vmem:[#allocation4 + $0xf] sm:$0xff] }
0x16fa   : > { %v3822_v13 = vld [vmem:[#allocation4 + $0x10] sm:$0xff]  ;;  %v3883_v15 = vpack.c.bf16 %v3818_v12, %v3817_v10  ;;  %v12557_v10 = vld [vmem:[#allocation39 + $0x28c] sm:$0xf0]  ;;  %v10126_v12 = vor.u32 %v12525_v8, %v10125_v5  ;;  %v10317_v8 = vld [vmem:[#allocation39 + $0x300] sm:$0xf] }
0x16fb   : > { %v3825_v14 = vld [vmem:[#allocation4 + $0x9] sm:$0xff]  ;;  %v3884_v16 = vpack.c.bf16 %v3822_v13, %v3821_v11  ;;  %v3826_v17 = vld [vmem:[#allocation4 + $0x11] sm:$0xff]  ;;  %v10254_v13 = vor.u32 %v12557_v10, %v10253_v9 }
0x16fc   : > { %v3885_v18 = vpack.c.bf16 %v3826_v17, %v3825_v14  ;;  %4042 = vmatmul.bf16.vlgmr.msra.gmra.mxu0 %v3883_v15  ;;  %v10381_v14 = vld [vmem:[#allocation39 + $0x380] sm:$0xf]  ;;  %v12589_v15 = vld [vmem:[#allocation39 + $0x38c] sm:$0xf0] }
0x16fd   : > { %4056 = vmatmul.bf16.vlgmr.msra.gmra.mxu1 %v3884_v16  ;;  %v4088_v16 = vlaneseq  ;;  %7316 = vmatpush.bf16.msrb.mxu0 %v10126_v12  ;;  %v12573_v9 = vld [vmem:[#allocation39 + $0x30c] sm:$0xf0] }
0x16fe   : > { %4070 = vmatmul.bf16.vlgmr.msra.gmra.mxu2 %v3885_v18  ;;  %v10382_v18 = vor.u32 %v12589_v15, %v10381_v14  ;;  %7329 = vmatpush.bf16.msrb.mxu1 %v10254_v13  ;;  %v10318_v12 = vor.u32 %v12573_v9, %v10317_v8  ;;  %v10557_v13 = vld [vmem:[#allocation39 + $0x4e0] sm:$0xf]  ;;  %v12633_v14 = vld [vmem:[#allocation39 + $0x4ec] sm:$0xf0] }
0x16ff   : > { %vm15350_vm2 = vcmp.lt.s32.totalorder %v4088_v16, 128  ;;  %v10685_v15 = vld [vmem:[#allocation39 + $0x5e0] sm:$0xf]  ;;  %v10558_v16 = vor.u32 %v12633_v14, %v10557_v13 }
0x1700   : > { %7342 = vmatpush.bf16.msrb.mxu2 %v10382_v18  ;;  %v10813_v18 = vld [vmem:[#allocation39 + $0x6e0] sm:$0xf] }
0x1701   : > { %v10877_v9 = vld [vmem:[#allocation39 + $0x760] sm:$0xf] }
0x1702   : > { %7330 = vmatpush.bf16.msrb.mxu1 %v10238_v32  ;;  %v10477_v14 = vld [vmem:[#allocation39 + $0x440] sm:$0xf] }
0x1706   : > { %7331 = vmatpush.bf16.msrb.mxu1 %v10222_v47 }
0x1779   : > { %v4043_v19 = vpop.f32.mrf.mxu0 }
0x177a   : > { %v4044_v23 = vadd.f32 %v13394_v4, %v4043_v19  ;;  %v4057_v29 = vpop.f32.mrf.mxu1  ;;  %v12489_v19 = vld [vmem:[#allocation39 + $0x6c] sm:$0xf0] }
0x177c   : > { %v4058_v36 = vadd.f32 %v4057_v29, %v4044_v23  ;;  %v12521_v23 = vld [vmem:[#allocation39 + $0x16c] sm:$0xf0] }
0x177d   : > { %v10110_v26 = vor.u32 %v12521_v23, %v10109_v20  ;;  %v12585_v29 = vld [vmem:[#allocation39 + $0x36c] sm:$0xf0]  ;;  %v10941_v20 = vld [vmem:[#allocation39 + $0x7e0] sm:$0xf] }
0x177e   : > { %v10366_v45 = vor.u32 %v12585_v29, %v10365_v28  ;;  %v12661_v29 = vld [vmem:[#allocation39 + $0x5cc] sm:$0xf0] }
0x177f   : > { %7317 = vmatpush.bf16.msrb.mxu0 %v10110_v26  ;;  %v12629_v26 = vld [vmem:[#allocation39 + $0x4cc] sm:$0xf0]  ;;  %v10670_v32 = vor.u32 %v12661_v29, %v10669_v27 }
0x1780   : > { %7343 = vmatpush.bf16.msrb.mxu2 %v10366_v45  ;;  %v10542_v28 = vor.u32 %v12629_v26, %v10541_v25  ;;  %v10461_v26 = vld [vmem:[#allocation39 + $0x420] sm:$0xf]  ;;  %v12609_v27 = vld [vmem:[#allocation39 + $0x42c] sm:$0xf0] }
0x1781   : > { %v4071_v41 = vpop.f32.mrf.mxu2  ;;  %v4045_v49 = vpop.f32.mrf.mxu0  ;;  %v12641_v29 = vld [vmem:[#allocation39 + $0x52c] sm:$0xf0] }
0x1782   : > { %v15344_v48 = vadd.f32 %v4071_v41, %v4058_v36  ;;  %v4046_v54 = vadd.f32 %v13394_v4, %v4045_v49  ;;  %v4059_v0 = vpop.f32.mrf.mxu1  ;;  %v9981_v4 = vld [vmem:[#allocation39 + $0x60] sm:$0xf]  ;;  %v9966_v36 = vor.u32 %v12485_v35, %v9965_v34  ;;  %v10094_v41 = vor.u32 %v12517_v38, %v10093_v37  ;;  %v12725_v34 = vld [vmem:[#allocation39 + $0x7cc] sm:$0xf0] }
0x1783   : > { %v9982_v22 = vor.u32 %v12489_v19, %v9981_v4  ;;  %v10350_v49 = vor.u32 %v12581_v46, %v10349_v43  ;;  %v12697_v19 = vld [vmem:[#allocation39 + $0x6ec] sm:$0xf0]  ;;  %v10525_v35 = vld [vmem:[#allocation39 + $0x4a0] sm:$0xf] }
0x1784   : > { %v4078_v53 = vmin.f32 %v15344_v48, 0.0  ;;  %v4060_v6 = vadd.f32 %v4059_v0, %v4046_v54  ;;  %vm4076_vm5 = vcmp.gt.f32.partialorder %v15344_v48, 0.0  ;;  %7318 = vmatpush.bf16.msrb.mxu0 %v10094_v41  ;;  %v10078_v54 = vor.u32 %v12513_v52, %v10077_v51  ;;  %v10061_v0 = vld [vmem:[#allocation39 + $0x100] sm:$0xf]  ;;  %v12625_v37 = vld [vmem:[#allocation39 + $0x4ac] sm:$0xf0] }
0x1785   : > { %7304 = vmatpush.bf16.msra.mxu3 %v9982_v22  ;;  %7344 = vmatpush.bf16.msrb.mxu2 %v10350_v49  ;;  %v10814_v22 = vor.u32 %v12697_v19, %v10813_v18  ;;  %v10653_v38 = vld [vmem:[#allocation39 + $0x5a0] sm:$0xf]  ;;  %v10526_v42 = vor.u32 %v12625_v37, %v10525_v35  ;;  %v12689_v46 = vld [vmem:[#allocation39 + $0x6ac] sm:$0xf0] }
0x1786   : > { %v4080_v1 = vmul.f32 1.442695, %v4078_v53  ;;  %v10205_v53 = vld [vmem:[#allocation39 + $0x220] sm:$0xf]  ;;  %v10654_v47 = vor.u32 %v12657_v39, %v10653_v38  ;;  %v12621_v52 = vld [vmem:[#allocation39 + $0x48c] sm:$0xf0] }
0x1787   : > { %v10206_v59 = vor.u32 %v12545_v55, %v10205_v53  ;;  %v10781_v43 = vld [vmem:[#allocation39 + $0x6a0] sm:$0xf]  ;;  %v12677_v19 = vld [vmem:[#allocation39 + $0x64c] sm:$0xf0] }
0x1788   : > { %13449 = vpow2.f32 %v4080_v1  ;;  %7319 = vmatpush.bf16.msrb.mxu0 %v10078_v54  ;;  %v9933_v1 = vld [vmem:[#allocation39] sm:$0xf]  ;;  %v12653_v54 = vld [vmem:[#allocation39 + $0x58c] sm:$0xf0] }
0x1789   : > { %v4073_v11 = vpop.f32.mrf.mxu2  ;;  %7305 = vmatpush.bf16.msra.mxu3 %v9966_v36  ;;  %7332 = vmatpush.bf16.msrb.mxu1 %v10206_v59  ;;  %v9934_v63 = vor.u32 %v12477_v24, %v9933_v1  ;;  %v10909_v49 = vld [vmem:[#allocation39 + $0x7a0] sm:$0xf]  ;;  %v12717_v59 = vld [vmem:[#allocation39 + $0x78c] sm:$0xf0] }
0x178a   : > { %v15347_v17 = vadd.f32 %v4073_v11, %v4060_v6  ;;  %7345 = vmatpush.bf16.msrb.mxu2 %v10334_v60  ;;  %v10062_v6 = vor.u32 %v12509_v3, %v10061_v0  ;;  %v10190_v11 = vor.u32 %v12541_v7, %v10189_v2  ;;  %v10509_v51 = vld [vmem:[#allocation39 + $0x480] sm:$0xf]  ;;  %v12649_v3 = vld [vmem:[#allocation39 + $0x56c] sm:$0xf0] }
0x178b   : > { %v10637_v53 = vld [vmem:[#allocation39 + $0x580] sm:$0xf]  ;;  %v10510_v56 = vor.u32 %v12621_v52, %v10509_v51  ;;  %v12605_v39 = vld [vmem:[#allocation39 + $0x40c] sm:$0xf0] }
0x178c   : > { %v4079_v21 = vmin.f32 %v15347_v17, 0.0  ;;  %vm4077_vm9 = vcmp.gt.f32.partialorder %v15347_v17, 0.0  ;;  %7320 = vmatpush.bf16.msrb.mxu0 %v10062_v6  ;;  %v10765_v55 = vld [vmem:[#allocation39 + $0x680] sm:$0xf]  ;;  %v10638_v60 = vor.u32 %v12653_v54, %v10637_v53  ;;  %v12681_v6 = vld [vmem:[#allocation39 + $0x66c] sm:$0xf0] }
0x178d   : > { %7333 = vmatpush.bf16.msrb.mxu1 %v10190_v11  ;;  %v10493_v24 = vld [vmem:[#allocation39 + $0x460] sm:$0xf] }
0x178e   : > { %v13450_v44 = vpop.eup %13449  ;;  %v4082_v31 = vmul.f32 1.442695, %v4079_v21  ;;  %7346 = vmatpush.bf16.msrb.mxu2 %v10318_v12  ;;  %v12729_v21 = vld [vmem:[#allocation39 + $0x7ec] sm:$0xf0]  ;;  %v10621_v0 = vld [vmem:[#allocation39 + $0x560] sm:$0xf] }
0x178f   : > { %v9929_v33 = vadd.f32 -1.0, %v13450_v44  ;;  %v10942_v23 = vor.u32 %v12729_v21, %v10941_v20  ;;  %v10797_v44 = vld [vmem:[#allocation39 + $0x6c0] sm:$0xf]  ;;  %v10622_v11 = vor.u32 %v12649_v3, %v10621_v0  ;;  %v12709_v21 = vld [vmem:[#allocation39 + $0x74c] sm:$0xf0] }
0x1790   : > { %13451 = vpow2.f32 %v4082_v31  ;;  %v12693_v31 = vld [vmem:[#allocation39 + $0x6cc] sm:$0xf0]  ;;  %v10749_v2 = vld [vmem:[#allocation39 + $0x660] sm:$0xf] }
0x1791   : > { %v15356_v40 = vsel %vm4076_vm5, %v15344_v48, %v9929_v33  ;;  %v9950_v48 = vor.u32 %v12481_v62, %v9949_v50  ;;  %7378 = vmatpush.bf16.msra.mxu1 %v10814_v22  ;;  %v10798_v45 = vor.u32 %v12693_v31, %v10797_v44  ;;  %v10925_v33 = vld [vmem:[#allocation39 + $0x7c0] sm:$0xf]  ;;  %v12721_v50 = vld [vmem:[#allocation39 + $0x7ac] sm:$0xf0]  ;;  %v10782_v62 = vor.u32 %v12689_v46, %v10781_v43 }
0x1792   : > { %4092 = vst.msk [vmem:[#allocation7] sm:$0x1] %vm15350_vm2, %v15356_v40  ;;  %7391 = vmatpush.bf16.msra.mxu2 %v10942_v23  ;;  %v10926_v36 = vor.u32 %v12725_v34, %v10925_v33  ;;  %v10750_v12 = vor.u32 %v12681_v6, %v10749_v2  ;;  %v10733_v18 = vld [vmem:[#allocation39 + $0x640] sm:$0xf]  ;;  %v12673_v31 = vld [vmem:[#allocation39 + $0x62c] sm:$0xf0] }
0x1793   : > { %4094 = vst [vmem:[#allocation1] sm:$0xff] %v15356_v40  ;;  %7306 = vmatpush.bf16.msra.mxu3 %v9950_v48  ;;  %v10910_v48 = vor.u32 %v12721_v50, %v10909_v49  ;;  %v10861_v20 = vld [vmem:[#allocation39 + $0x740] sm:$0xf]  ;;  %v10734_v23 = vor.u32 %v12677_v19, %v10733_v18  ;;  %v12705_v34 = vld [vmem:[#allocation39 + $0x72c] sm:$0xf0] }
0x1794   : > { %v10862_v25 = vor.u32 %v12709_v21, %v10861_v20  ;;  %v10717_v44 = vld [vmem:[#allocation39 + $0x620] sm:$0xf]  ;;  %v12701_v50 = vld [vmem:[#allocation39 + $0x70c] sm:$0xf0] }
0x1795   : > { %7379 = vmatpush.bf16.msra.mxu1 %v10798_v45  ;;  %v10462_v45 = vor.u32 %v12609_v27, %v10461_v26  ;;  %v10845_v33 = vld [vmem:[#allocation39 + $0x720] sm:$0xf]  ;;  %v12853_v20 = vld [vmem:[#allocation39 + $0xbcc] sm:$0xf0] }
0x1796   : > { %v13452_v58 = vpop.eup %13451  ;;  %7392 = vmatpush.bf16.msra.mxu2 %v10926_v36  ;;  %v10718_v36 = vor.u32 %v12673_v31, %v10717_v44  ;;  %v10846_v37 = vor.u32 %v12705_v34, %v10845_v33  ;;  %v10445_v38 = vld [vmem:[#allocation39 + $0x400] sm:$0xf]  ;;  %v12849_v33 = vld [vmem:[#allocation39 + $0xbac] sm:$0xf0] }
0x1797   : > { %v9930_v61 = vadd.f32 -1.0, %v13452_v58  ;;  %7307 = vmatpush.bf16.msra.mxu3 %v9934_v63  ;;  %v10893_v58 = vld [vmem:[#allocation39 + $0x780] sm:$0xf]  ;;  %v12617_v63 = vld [vmem:[#allocation39 + $0x46c] sm:$0xf0]  ;;  %v10446_v46 = vor.u32 %v12605_v39, %v10445_v38 }
0x1798   : > { %v10894_v1 = vor.u32 %v12717_v59, %v10893_v58  ;;  %v10494_v8 = vor.u32 %v12617_v63, %v10493_v24  ;;  %v10701_v43 = vld [vmem:[#allocation39 + $0x600] sm:$0xf]  ;;  %v12793_v58 = vld [vmem:[#allocation39 + $0x9ec] sm:$0xf0] }
0x1799   : > { %v15364_v5 = vsel %vm4077_vm9, %v15347_v17, %v9930_v61  ;;  %v12665_v17 = vld [vmem:[#allocation39 + $0x5ec] sm:$0xf0]  ;;  %7380 = vmatpush.bf16.msra.mxu1 %v10782_v62  ;;  %v10766_v61 = vor.u32 %v12685_v57, %v10765_v55  ;;  %v10829_v49 = vld [vmem:[#allocation39 + $0x700] sm:$0xf] }
0x179a   : > { %v4096_v10 = vld [vmem:[#allocation1 + $0x1] ss:$9 sm:$0xff]  ;;  %4129 = vst.msk [vmem:[#allocation7 + $0x8] sm:$0x1] %vm15350_vm2, %v15364_v5  ;;  %v10686_v4 = vor.u32 %v12665_v17, %v10685_v15  ;;  %7393 = vmatpush.bf16.msra.mxu2 %v10910_v48  ;;  %v10830_v51 = vor.u32 %v12701_v50, %v10829_v49 }
0x179b   : > { %4099 = vst [vmem:[#allocation1] sm:$0xff] %v15356_v40  ;;  %7352 = vmatpush.bf16.msrb.mxu3 %v10558_v16  ;;  %v12613_v15 = vld [vmem:[#allocation39 + $0x44c] sm:$0xf0]  ;;  %v10605_v16 = vld [vmem:[#allocation39 + $0x540] sm:$0xf] }
0x179c   : > { %4098 = vst.msk [vmem:[#allocation7 + $0x1] sm:$0x1] %vm15350_vm2, %v4096_v10  ;;  %7365 = vmatpush.bf16.msra.mxu0 %v10686_v4  ;;  %v12713_v10 = vld [vmem:[#allocation39 + $0x76c] sm:$0xf0]  ;;  %v10478_v4 = vor.u32 %v12613_v15, %v10477_v14  ;;  %v11069_v55 = vld [vmem:[#allocation39 + $0x8e0] sm:$0xf] }
0x179d   : > { %7381 = vmatpush.bf16.msra.mxu1 %v10766_v61  ;;  %v10878_v13 = vor.u32 %v12713_v10, %v10877_v9  ;;  %v12645_v17 = vld [vmem:[#allocation39 + $0x54c] sm:$0xf0]  ;;  %v11197_v57 = vld [vmem:[#allocation39 + $0x9e0] sm:$0xf] }
0x179e   : > { %7394 = vmatpush.bf16.msra.mxu2 %v10894_v1  ;;  %v10606_v22 = vor.u32 %v12645_v17, %v10605_v16  ;;  %v12825_v61 = vld [vmem:[#allocation39 + $0xaec] sm:$0xf0]  ;;  %v11181_v16 = vld [vmem:[#allocation39 + $0x9c0] sm:$0xf] }
0x179f   : > { %7353 = vmatpush.bf16.msrb.mxu3 %v10542_v28  ;;  %v10589_v28 = vld [vmem:[#allocation39 + $0x520] sm:$0xf]  ;;  %v12857_v24 = vld [vmem:[#allocation39 + $0xbec] sm:$0xf0] }
0x17a0   : > { %7366 = vmatpush.bf16.msra.mxu0 %v10670_v32  ;;  %v10590_v35 = vor.u32 %v12641_v29, %v10589_v28  ;;  %v12789_v17 = vld [vmem:[#allocation39 + $0x9cc] sm:$0xf0]  ;;  %v11309_v18 = vld [vmem:[#allocation39 + $0xac0] sm:$0xf] }
0x17a1   : > { %7382 = vmatpush.bf16.msra.mxu1 %v10750_v12  ;;  %v11053_v12 = vld [vmem:[#allocation39 + $0x8c0] sm:$0xf]  ;;  %v11182_v26 = vor.u32 %v12789_v17, %v11181_v16  ;;  %v12785_v28 = vld [vmem:[#allocation39 + $0x9ac] sm:$0xf0] }
0x17a2   : > { %v4101_v41 = vld [vmem:[#allocation1 + $0x2] ss:$9 sm:$0xff]  ;;  %7395 = vmatpush.bf16.msra.mxu2 %v10878_v13  ;;  %v12757_v13 = vld [vmem:[#allocation39 + $0x8cc] sm:$0xf0] }
0x17a3   : > { %4104 = vst [vmem:[#allocation1] sm:$0xff] %v15356_v40  ;;  %7354 = vmatpush.bf16.msrb.mxu3 %v10526_v42  ;;  %v12637_v42 = vld [vmem:[#allocation39 + $0x50c] sm:$0xf0]  ;;  %v11437_v19 = vld [vmem:[#allocation39 + $0xbc0] sm:$0xf] }
0x17a4   : > { %4103 = vst.msk [vmem:[#allocation7 + $0x2] sm:$0x1] %vm15350_vm2, %v4101_v41  ;;  %7367 = vmatpush.bf16.msra.mxu0 %v10654_v47  ;;  %v10573_v41 = vld [vmem:[#allocation39 + $0x500] sm:$0xf]  ;;  %v12669_v47 = vld [vmem:[#allocation39 + $0x60c] sm:$0xf0]  ;;  %v11438_v44 = vor.u32 %v12853_v20, %v11437_v19 }
0x17a5   : > { %7383 = vmatpush.bf16.msra.mxu1 %v10734_v23  ;;  %v10574_v62 = vor.u32 %v12637_v42, %v10573_v41  ;;  %v10702_v48 = vor.u32 %v12669_v47, %v10701_v43  ;;  %v11037_v21 = vld [vmem:[#allocation39 + $0x8a0] sm:$0xf]  ;;  %v12781_v42 = vld [vmem:[#allocation39 + $0x98c] sm:$0xf0] }
0x17a6   : > { %7396 = vmatpush.bf16.msra.mxu2 %v10862_v25  ;;  %v11054_v25 = vor.u32 %v12757_v13, %v11053_v12  ;;  %v11165_v27 = vld [vmem:[#allocation39 + $0x9a0] sm:$0xf]  ;;  %v12845_v49 = vld [vmem:[#allocation39 + $0xb8c] sm:$0xf0] }
0x17a7   : > { %7355 = vmatpush.bf16.msrb.mxu3 %v10510_v56  ;;  %v12761_v56 = vld [vmem:[#allocation39 + $0x8ec] sm:$0xf0]  ;;  %v11293_v31 = vld [vmem:[#allocation39 + $0xaa0] sm:$0xf] }
0x17a8   : > { %7368 = vmatpush.bf16.msra.mxu0 %v10638_v60  ;;  %v11325_v60 = vld [vmem:[#allocation39 + $0xae0] sm:$0xf]  ;;  %v11070_v6 = vor.u32 %v12761_v56, %v11069_v55  ;;  %v12741_v13 = vld [vmem:[#allocation39 + $0x84c] sm:$0xf0] }
0x17a9   : > { %7384 = vmatpush.bf16.msra.mxu1 %v10718_v36  ;;  %v11326_v14 = vor.u32 %v12825_v61, %v11325_v60  ;;  %v11021_v36 = vld [vmem:[#allocation39 + $0x880] sm:$0xf]  ;;  %v12773_v17 = vld [vmem:[#allocation39 + $0x94c] sm:$0xf0] }
0x17aa   : > { %v4106_v7 = vld [vmem:[#allocation1 + $0x3] ss:$9 sm:$0xff]  ;;  %7397 = vmatpush.bf16.msra.mxu2 %v10846_v37 }
0x17ab   : > { %4109 = vst [vmem:[#allocation1] sm:$0xff] %v15356_v40  ;;  %7356 = vmatpush.bf16.msrb.mxu3 %v10494_v8  ;;  %v12749_v37 = vld [vmem:[#allocation39 + $0x88c] sm:$0xf0]  ;;  %v11149_v38 = vld [vmem:[#allocation39 + $0x980] sm:$0xf] }
0x17ac   : > { %4108 = vst.msk [vmem:[#allocation7 + $0x3] sm:$0x1] %vm15350_vm2, %v4106_v7  ;;  %7369 = vmatpush.bf16.msra.mxu0 %v10622_v11  ;;  %v11198_v7 = vor.u32 %v12793_v58, %v11197_v57  ;;  %v11277_v43 = vld [vmem:[#allocation39 + $0xa80] sm:$0xf]  ;;  %v12837_v20 = vld [vmem:[#allocation39 + $0xb4c] sm:$0xf0] }
0x17ad   : > { %7385 = vmatpush.bf16.msra.mxu1 %v10702_v48  ;;  %v11405_v47 = vld [vmem:[#allocation39 + $0xb80] sm:$0xf] }
0x17ae   : > { %7398 = vmatpush.bf16.msra.mxu2 %v10830_v51  ;;  %v11005_v50 = vld [vmem:[#allocation39 + $0x860] sm:$0xf]  ;;  %v12777_v51 = vld [vmem:[#allocation39 + $0x96c] sm:$0xf0] }
0x17af   : > { %7357 = vmatpush.bf16.msrb.mxu3 %v10478_v4  ;;  %v12821_v4 = vld [vmem:[#allocation39 + $0xacc] sm:$0xf0]  ;;  %v11133_v48 = vld [vmem:[#allocation39 + $0x960] sm:$0xf] }
0x17b0   : > { %7370 = vmatpush.bf16.msra.mxu0 %v10606_v22  ;;  %v12753_v22 = vld [vmem:[#allocation39 + $0x8ac] sm:$0xf0]  ;;  %v11310_v29 = vor.u32 %v12821_v4, %v11309_v18  ;;  %v11261_v57 = vld [vmem:[#allocation39 + $0xa60] sm:$0xf] }
0x17b1   : > { %v11038_v34 = vor.u32 %v12753_v22, %v11037_v21  ;;  %v10989_v12 = vld [vmem:[#allocation39 + $0x840] sm:$0xf]  ;;  %v12805_v4 = vld [vmem:[#allocation39 + $0xa4c] sm:$0xf0] }
0x17b2   : > { %v4111_v32 = vld [vmem:[#allocation1 + $0x4] ss:$9 sm:$0xff] }
0x17b3   : > { %4114 = vst [vmem:[#allocation1] sm:$0xff] %v15356_v40  ;;  %7358 = vmatpush.bf16.msrb.mxu3 %v10462_v45  ;;  %v11421_v45 = vld [vmem:[#allocation39 + $0xba0] sm:$0xf]  ;;  %v12737_v22 = vld [vmem:[#allocation39 + $0x82c] sm:$0xf0] }
0x17b4   : > { %4113 = vst.msk [vmem:[#allocation7 + $0x4] sm:$0x1] %vm15350_vm2, %v4111_v32  ;;  %7371 = vmatpush.bf16.msra.mxu0 %v10590_v35  ;;  %v12817_v32 = vld [vmem:[#allocation39 + $0xaac] sm:$0xf0]  ;;  %v11166_v35 = vor.u32 %v12785_v28, %v11165_v27  ;;  %v11422_v41 = vor.u32 %v12849_v33, %v11421_v45  ;;  %v11117_v16 = vld [vmem:[#allocation39 + $0x940] sm:$0xf] }
0x17b5   : > { %v11294_v39 = vor.u32 %v12817_v32, %v11293_v31  ;;  %v11245_v18 = vld [vmem:[#allocation39 + $0xa40] sm:$0xf]  ;;  %v12769_v28 = vld [vmem:[#allocation39 + $0x92c] sm:$0xf0] }
0x17b6   : > { %v11373_v19 = vld [vmem:[#allocation39 + $0xb40] sm:$0xf]  ;;  %v12801_v32 = vld [vmem:[#allocation39 + $0xa2c] sm:$0xf0] }
0x17b7   : > { %7359 = vmatpush.bf16.msrb.mxu3 %v10446_v46  ;;  %v12813_v46 = vld [vmem:[#allocation39 + $0xa8c] sm:$0xf0]  ;;  %v10973_v21 = vld [vmem:[#allocation39 + $0x820] sm:$0xf] }
0x17b8   : > { %7372 = vmatpush.bf16.msra.mxu0 %v10574_v62  ;;  %v12745_v62 = vld [vmem:[#allocation39 + $0x86c] sm:$0xf0]  ;;  %v11278_v58 = vor.u32 %v12813_v46, %v11277_v43  ;;  %v11101_v27 = vld [vmem:[#allocation39 + $0x920] sm:$0xf] }
0x17b9   : > { %v11229_v31 = vld [vmem:[#allocation39 + $0xa20] sm:$0xf]  ;;  %v12833_v33 = vld [vmem:[#allocation39 + $0xb2c] sm:$0xf0] }
0x17ba   : > { %v4116_v52 = vld [vmem:[#allocation1 + $0x5] ss:$9 sm:$0xff] }
0x17bb   : > { %4119 = vst [vmem:[#allocation1] sm:$0xff] %v15356_v40  ;;  %v11357_v45 = vld [vmem:[#allocation39 + $0xb20] sm:$0xf]  ;;  %v12797_v46 = vld [vmem:[#allocation39 + $0xa0c] sm:$0xf0] }
0x17bc   : > { %4118 = vst.msk [vmem:[#allocation7 + $0x5] sm:$0x1] %vm15350_vm2, %v4116_v52  ;;  %v11358_v43 = vor.u32 %v12833_v33, %v11357_v45  ;;  %v11533_v45 = vld [vmem:[#allocation39 + $0xc80] sm:$0xf]  ;;  %v12877_v33 = vld [vmem:[#allocation39 + $0xc8c] sm:$0xf0] }
0x17c2   : > { %v4121_v53 = vld [vmem:[#allocation1 + $0x6] ss:$9 sm:$0xff] }
0x17c3   : > { %4124 = vst [vmem:[#allocation1] sm:$0xff] %v15356_v40  ;;  %v11453_v40 = vld [vmem:[#allocation39 + $0xbe0] sm:$0xf] }
0x17c4   : > { %4123 = vst.msk [vmem:[#allocation7 + $0x6] sm:$0x1] %vm15350_vm2, %v4121_v53  ;;  %v11454_v15 = vor.u32 %v12857_v24, %v11453_v40  ;;  %v11022_v53 = vor.u32 %v12749_v37, %v11021_v36  ;;  %v12809_v40 = vld [vmem:[#allocation39 + $0xa6c] sm:$0xf0]  ;;  %v11389_v24 = vld [vmem:[#allocation39 + $0xb60] sm:$0xf]  ;;  %v10974_v36 = vor.u32 %v12737_v22, %v10973_v21  ;;  %v11102_v37 = vor.u32 %v12769_v28, %v11101_v27 }
0x17c5   : > { %v11677_v21 = vld [vmem:[#allocation39 + $0xda0] sm:$0xf]  ;;  %v12945_v27 = vld [vmem:[#allocation39 + $0xeac] sm:$0xf0] }
0x17c6   : > { %v11933_v28 = vld [vmem:[#allocation39 + $0xfa0] sm:$0xf] }
0x17ca   : > { %v4126_v54 = vld [vmem:[#allocation1 + $0x7] ss:$9 sm:$0xff] }
0x17cb   : > { %4131 = vst [vmem:[#allocation1] sm:$0xff] %v15364_v5 }
0x17cc   : > { %4128 = vst.msk [vmem:[#allocation7 + $0x7] sm:$0x1] %vm15350_vm2, %v4126_v54  ;;  %v11150_v54 = vor.u32 %v12781_v42, %v11149_v38  ;;  %v11085_v38 = vld [vmem:[#allocation39 + $0x900] sm:$0xf]  ;;  %v11230_v42 = vor.u32 %v12801_v32, %v11229_v31 }
0x17d2   : > { %v4133_v59 = vld [vmem:[#allocation1 + $0x1] ss:$9 sm:$0xff] }
0x17d3   : > { %4136 = vst [vmem:[#allocation1] sm:$0xff] %v15364_v5  ;;  %v15391_v1 = vld [vmem:[#allocation7] sm:$0xff] }
0x17d4   : > { %4135 = vst.msk [vmem:[#allocation7 + $0x9] sm:$0x1] %vm15350_vm2, %v4133_v59  ;;  %v4682_v63 = vperm.slane %v15391_v1, 0  ;;  %v4683_v0 = vperm.slane %v15391_v1, 1  ;;  %v4684_v3 = vperm.slane %v15391_v1, 2  ;;  %v4685_v2 = vperm.slane %v15391_v1, 3 }
0x17d5   : > { %v4686_v55 = vperm.slane %v15391_v1, 4  ;;  %v4687_v56 = vperm.slane %v15391_v1, 5  ;;  %v11406_v59 = vor.u32 %v12845_v49, %v11405_v47  ;;  %v4688_v60 = vperm.slane %v15391_v1, 6  ;;  %v11341_v47 = vld [vmem:[#allocation39 + $0xb00] sm:$0xf] }
0x17d6   : > { %v15399_v8 = vpack.c.bf16 %v4682_v63, %v4682_v63  ;;  %v15401_v9 = vpack.c.bf16 %v4683_v0, %v4683_v0  ;;  %v15403_v10 = vpack.c.bf16 %v4684_v3, %v4684_v3  ;;  %v15405_v11 = vpack.c.bf16 %v4685_v2, %v4685_v2  ;;  %v12841_v63 = vld [vmem:[#allocation39 + $0xb6c] sm:$0xf0] }
0x17d7   : > { %v4689_v61 = vperm.slane %v15391_v1, 7  ;;  %v11006_v0 = vor.u32 %v12745_v62, %v11005_v50  ;;  %v11134_v3 = vor.u32 %v12777_v51, %v11133_v48  ;;  %v15421_v2 = vpack.c.bf16 %v4686_v55, %v4686_v55  ;;  %v12829_v49 = vld [vmem:[#allocation39 + $0xb0c] sm:$0xf0]  ;;  %v11581_v50 = vld [vmem:[#allocation39 + $0xce0] sm:$0xf] }
0x17d8   : > { %7308 = vmatmul.bf16.vlgmr.msra.gmra.mxu3 %v15399_v8  ;;  %7321 = vmatmul.bf16.vlgmr.msrb.gmra.mxu0 %v15401_v9  ;;  %v15425_v1 = vpack.c.bf16 %v4688_v60, %v4688_v60  ;;  %v12889_v62 = vld [vmem:[#allocation39 + $0xcec] sm:$0xf0]  ;;  %v11709_v48 = vld [vmem:[#allocation39 + $0xde0] sm:$0xf]  ;;  %v11342_v60 = vor.u32 %v12829_v49, %v11341_v47 }
0x17d9   : > { %7334 = vmatmul.bf16.vlgmr.msrb.gmra.mxu1 %v15403_v10  ;;  %7347 = vmatmul.bf16.vlgmr.msrb.gmra.mxu2 %v15405_v11  ;;  %v12921_v51 = vld [vmem:[#allocation39 + $0xdec] sm:$0xf0]  ;;  %v11517_v47 = vld [vmem:[#allocation39 + $0xc60] sm:$0xf] }
0x17da   : > { %v4138_v23 = vld [vmem:[#allocation1 + $0x2] ss:$9 sm:$0xff]  ;;  %7404 = vmatpush.bf16.msra.mxu3 %v11070_v6  ;;  %7417 = vmatpush.bf16.msrb.mxu0 %v11198_v7  ;;  %v15423_v6 = vpack.c.bf16 %v4687_v56, %v4687_v56  ;;  %v11262_v7 = vor.u32 %v12809_v40, %v11261_v57  ;;  %v11710_v40 = vor.u32 %v12921_v51, %v11709_v48  ;;  %v12873_v49 = vld [vmem:[#allocation39 + $0xc6c] sm:$0xf0] }
0x17db   : > { %4141 = vst [vmem:[#allocation1] sm:$0xff] %v15364_v5  ;;  %7430 = vmatpush.bf16.msrb.mxu1 %v11326_v14  ;;  %7443 = vmatpush.bf16.msrb.mxu2 %v11454_v15  ;;  %v15427_v14 = vpack.c.bf16 %v4689_v61, %v4689_v61  ;;  %v11390_v15 = vor.u32 %v12841_v63, %v11389_v24  ;;  %v11965_v57 = vld [vmem:[#allocation39 + $0xfe0] sm:$0xf]  ;;  %v12885_v63 = vld [vmem:[#allocation39 + $0xccc] sm:$0xf0] }
0x17dc   : > { %4140 = vst.msk [vmem:[#allocation7 + $0xa] sm:$0x1] %vm15350_vm2, %v4138_v23  ;;  %v11582_v61 = vor.u32 %v12889_v62, %v11581_v50  ;;  %v11565_v24 = vld [vmem:[#allocation39 + $0xcc0] sm:$0xf]  ;;  %v12905_v48 = vld [vmem:[#allocation39 + $0xd6c] sm:$0xf0] }
0x17dd   : > { %v11645_v62 = vld [vmem:[#allocation39 + $0xd60] sm:$0xf] }
0x17de   : > { %7405 = vmatpush.bf16.msra.mxu3 %v11054_v25  ;;  %7418 = vmatpush.bf16.msrb.mxu0 %v11182_v26  ;;  %v10990_v25 = vor.u32 %v12741_v13, %v10989_v12  ;;  %v11118_v26 = vor.u32 %v12773_v17, %v11117_v16  ;;  %v12917_v12 = vld [vmem:[#allocation39 + $0xdcc] sm:$0xf0]  ;;  %v11821_v13 = vld [vmem:[#allocation39 + $0xec0] sm:$0xf] }
0x17df   : > { %7431 = vmatpush.bf16.msrb.mxu1 %v11310_v29  ;;  %7444 = vmatpush.bf16.msrb.mxu2 %v11438_v44  ;;  %v11246_v29 = vor.u32 %v12805_v4, %v11245_v18  ;;  %v11374_v44 = vor.u32 %v12837_v20, %v11373_v19  ;;  %v11949_v16 = vld [vmem:[#allocation39 + $0xfc0] sm:$0xf]  ;;  %v12981_v17 = vld [vmem:[#allocation39 + $0xfcc] sm:$0xf0]  ;;  %v11566_v18 = vor.u32 %v12885_v63, %v11565_v24 }
0x17e0   : > { %v11549_v19 = vld [vmem:[#allocation39 + $0xca0] sm:$0xf]  ;;  %v12881_v20 = vld [vmem:[#allocation39 + $0xcac] sm:$0xf0] }
0x17e1   : > { %v11550_v31 = vor.u32 %v12881_v20, %v11549_v19  ;;  %v11773_v51 = vld [vmem:[#allocation39 + $0xe60] sm:$0xf]  ;;  %v12901_v24 = vld [vmem:[#allocation39 + $0xd4c] sm:$0xf0] }
0x17e2   : > { %v4143_v52 = vld [vmem:[#allocation1 + $0x3] ss:$9 sm:$0xff]  ;;  %7406 = vmatpush.bf16.msra.mxu3 %v11038_v34  ;;  %7419 = vmatpush.bf16.msrb.mxu0 %v11166_v35 }
0x17e3   : > { %4146 = vst [vmem:[#allocation1] sm:$0xff] %v15364_v5  ;;  %7432 = vmatpush.bf16.msrb.mxu1 %v11294_v39  ;;  %7445 = vmatpush.bf16.msrb.mxu2 %v11422_v41  ;;  %v10957_v34 = vld [vmem:[#allocation39 + $0x800] sm:$0xf]  ;;  %v12733_v35 = vld [vmem:[#allocation39 + $0x80c] sm:$0xf0] }
0x17e4   : > { %4145 = vst.msk [vmem:[#allocation7 + $0xb] sm:$0x1] %vm15350_vm2, %v4143_v52  ;;  %v12765_v39 = vld [vmem:[#allocation39 + $0x90c] sm:$0xf0]  ;;  %v11213_v41 = vld [vmem:[#allocation39 + $0xa00] sm:$0xf]  ;;  %v10958_v55 = vor.u32 %v12733_v35, %v10957_v34 }
0x17e5   : > { %v11837_v52 = vld [vmem:[#allocation39 + $0xee0] sm:$0xf]  ;;  %v11086_v56 = vor.u32 %v12765_v39, %v11085_v38  ;;  %v12941_v39 = vld [vmem:[#allocation39 + $0xe8c] sm:$0xf0] }
0x17e6   : > { %7407 = vmatpush.bf16.msra.mxu3 %v11022_v53  ;;  %7420 = vmatpush.bf16.msrb.mxu0 %v11150_v54  ;;  %v12953_v53 = vld [vmem:[#allocation39 + $0xeec] sm:$0xf0]  ;;  %v11789_v38 = vld [vmem:[#allocation39 + $0xe80] sm:$0xf] }
0x17e7   : > { %7433 = vmatpush.bf16.msrb.mxu1 %v11278_v58  ;;  %7446 = vmatpush.bf16.msrb.mxu2 %v11406_v59  ;;  %v12985_v58 = vld [vmem:[#allocation39 + $0xfec] sm:$0xf0]  ;;  %v11214_v59 = vor.u32 %v12797_v46, %v11213_v41  ;;  %v11917_v41 = vld [vmem:[#allocation39 + $0xf80] sm:$0xf]  ;;  %v11790_v50 = vor.u32 %v12941_v39, %v11789_v38 }
0x17e8   : > { %7360 = vmatmul.bf16.vlgmr.msrb.gmra.mxu3 %v15421_v2  ;;  %7373 = vmatmul.bf16.vlgmr.msra.gmra.mxu0 %v15423_v6  ;;  %v11757_v63 = vld [vmem:[#allocation39 + $0xe40] sm:$0xf]  ;;  %v12929_v20 = vld [vmem:[#allocation39 + $0xe2c] sm:$0xf0] }
0x17e9   : > { %7386 = vmatmul.bf16.vlgmr.msra.gmra.mxu1 %v15425_v1  ;;  %7399 = vmatmul.bf16.vlgmr.msra.gmra.mxu2 %v15427_v14  ;;  %v11741_v19 = vld [vmem:[#allocation39 + $0xe20] sm:$0xf] }
0x17ea   : > { %v4148_v23 = vld [vmem:[#allocation1 + $0x4] ss:$9 sm:$0xff]  ;;  %7408 = vmatpush.bf16.msra.mxu3 %v11006_v0  ;;  %7421 = vmatpush.bf16.msrb.mxu0 %v11134_v3  ;;  %v11838_v0 = vor.u32 %v12953_v53, %v11837_v52  ;;  %v11966_v3 = vor.u32 %v12985_v58, %v11965_v57  ;;  %v11646_v57 = vor.u32 %v12905_v48, %v11645_v62 }
0x17eb   : > { %4151 = vst [vmem:[#allocation1] sm:$0xff] %v15364_v5  ;;  %7434 = vmatpush.bf16.msrb.mxu1 %v11262_v7  ;;  %7447 = vmatpush.bf16.msrb.mxu2 %v11390_v15  ;;  %v11693_v7 = vld [vmem:[#allocation39 + $0xdc0] sm:$0xf]  ;;  %v12949_v15 = vld [vmem:[#allocation39 + $0xecc] sm:$0xf0] }
0x17ec   : > { %4150 = vst.msk [vmem:[#allocation7 + $0xc] sm:$0x1] %vm15350_vm2, %v4148_v23  ;;  %v11694_v4 = vor.u32 %v12917_v12, %v11693_v7  ;;  %v11822_v22 = vor.u32 %v12949_v15, %v11821_v13  ;;  %v11950_v23 = vor.u32 %v12981_v17, %v11949_v16  ;;  %v12937_v52 = vld [vmem:[#allocation39 + $0xe6c] sm:$0xf0]  ;;  %v11901_v53 = vld [vmem:[#allocation39 + $0xf60] sm:$0xf] }
0x17ed   : > { %v11501_v58 = vld [vmem:[#allocation39 + $0xc40] sm:$0xf]  ;;  %v12965_v7 = vld [vmem:[#allocation39 + $0xf4c] sm:$0xf0]  ;;  %v12567_v62 = vld [vmem:[#allocation39 + $0x2e4] sm:$0xf] }
0x17ee   : > { %7409 = vmatpush.bf16.msra.mxu3 %v10990_v25  ;;  %7422 = vmatpush.bf16.msrb.mxu0 %v11118_v26  ;;  %v12913_v25 = vld [vmem:[#allocation39 + $0xdac] sm:$0xf0]  ;;  %v11805_v26 = vld [vmem:[#allocation39 + $0xea0] sm:$0xf] }
0x17ef   : > { %7435 = vmatpush.bf16.msrb.mxu1 %v11246_v29  ;;  %7448 = vmatpush.bf16.msrb.mxu2 %v11374_v44  ;;  %v12977_v29 = vld [vmem:[#allocation39 + $0xfac] sm:$0xf0]  ;;  %v11678_v32 = vor.u32 %v12913_v25, %v11677_v21  ;;  %v11806_v34 = vor.u32 %v12945_v27, %v11805_v26  ;;  %v11485_v12 = vld [vmem:[#allocation39 + $0xc20] sm:$0xf] }
0x17f0   : > { %v11934_v35 = vor.u32 %v12977_v29, %v11933_v28  ;;  %v12865_v16 = vld [vmem:[#allocation39 + $0xc2c] sm:$0xf0]  ;;  %v11613_v17 = vld [vmem:[#allocation39 + $0xd20] sm:$0xf] }
0x17f1   : > { %v11869_v21 = vld [vmem:[#allocation39 + $0xf20] sm:$0xf]  ;;  %v12861_v28 = vld [vmem:[#allocation39 + $0xc0c] sm:$0xf0] }
0x17f2   : > { %v4153_v54 = vld [vmem:[#allocation1 + $0x5] ss:$9 sm:$0xff]  ;;  %7410 = vmatpush.bf16.msra.mxu3 %v10974_v36  ;;  %7423 = vmatpush.bf16.msrb.mxu0 %v11102_v37 }
0x17f3   : > { %4156 = vst [vmem:[#allocation1] sm:$0xff] %v15364_v5  ;;  %7436 = vmatpush.bf16.msrb.mxu1 %v11230_v42  ;;  %7449 = vmatpush.bf16.msrb.mxu2 %v11358_v43  ;;  %v11661_v36 = vld [vmem:[#allocation39 + $0xd80] sm:$0xf]  ;;  %v12909_v37 = vld [vmem:[#allocation39 + $0xd8c] sm:$0xf0]  ;;  %v11534_v43 = vor.u32 %v12877_v33, %v11533_v45 }
0x17f4   : > { %4155 = vst.msk [vmem:[#allocation7 + $0xd] sm:$0x1] %vm15350_vm2, %v4153_v54  ;;  %v12973_v42 = vld [vmem:[#allocation39 + $0xf8c] sm:$0xf0]  ;;  %v11662_v46 = vor.u32 %v12909_v37, %v11661_v36  ;;  %v11469_v27 = vld [vmem:[#allocation39 + $0xc00] sm:$0xf] }
0x17f5   : > { %v12969_v54 = vld [vmem:[#allocation39 + $0xf6c] sm:$0xf0]  ;;  %v11597_v29 = vld [vmem:[#allocation39 + $0xd00] sm:$0xf]  ;;  %v11470_v48 = vor.u32 %v12861_v28, %v11469_v27  ;;  %v12491_v28 = vld [vmem:[#allocation39 + $0x84] sm:$0xf] }
0x17f6   : > { %7411 = vmatpush.bf16.msra.mxu3 %v10958_v55  ;;  %7424 = vmatpush.bf16.msrb.mxu0 %v11086_v56  ;;  %v11518_v56 = vor.u32 %v12873_v49, %v11517_v47  ;;  %v12893_v33 = vld [vmem:[#allocation39 + $0xd0c] sm:$0xf0]  ;;  %v11725_v36 = vld [vmem:[#allocation39 + $0xe00] sm:$0xf] }
0x17f7   : > { %7437 = vmatpush.bf16.msrb.mxu1 %v11214_v59  ;;  %7450 = vmatpush.bf16.msrb.mxu2 %v11342_v60  ;;  %v12869_v59 = vld [vmem:[#allocation39 + $0xc4c] sm:$0xf0]  ;;  %v11774_v60 = vor.u32 %v12937_v52, %v11773_v51  ;;  %v11853_v38 = vld [vmem:[#allocation39 + $0xf00] sm:$0xf]  ;;  %v11598_v51 = vor.u32 %v12893_v33, %v11597_v29  ;;  %v10303_v52 = vld [vmem:[#allocation39 + $0x2f0] sm:$0xf0] }
0x17f8   : > { %v11502_v13 = vor.u32 %v12869_v59, %v11501_v58  ;;  %v12925_v37 = vld [vmem:[#allocation39 + $0xe0c] sm:$0xf0]  ;;  %v12499_v59 = vld [vmem:[#allocation39 + $0xc4] sm:$0xf]  ;;  %v9999_v29 = vld [vmem:[#allocation39 + $0x90] sm:$0xf0] }
0x17f9   : > { %v12555_v33 = vld [vmem:[#allocation39 + $0x284] sm:$0xf] }
0x17fa   : > { %7456 = vmatpush.bf16.msrb.mxu3 %v11582_v61  ;;  %7469 = vmatpush.bf16.msra.mxu0 %v11710_v40  ;;  %v4158_v44 = vld [vmem:[#allocation1 + $0x6] ss:$9 sm:$0xff]  ;;  %v11902_v61 = vor.u32 %v12969_v54, %v11901_v53  ;;  %v10431_v54 = vld [vmem:[#allocation39 + $0x3f0] sm:$0xf0] }
0x17fb   : > { %7482 = vmatpush.bf16.msra.mxu1 %v11838_v0  ;;  %7495 = vmatpush.bf16.msra.mxu2 %v11966_v3  ;;  %4160 = vst.msk [vmem:[#allocation7 + $0xe] sm:$0x1] %vm15350_vm2, %v4158_v44  ;;  %v11629_v40 = vld [vmem:[#allocation39 + $0xd40] sm:$0xf]  ;;  %v12933_v0 = vld [vmem:[#allocation39 + $0xe4c] sm:$0xf0] }
0x17fc   : > { %4161 = vst [vmem:[#allocation1] sm:$0xff] %v15364_v5  ;;  %v11918_v5 = vor.u32 %v12973_v42, %v11917_v41  ;;  %v11885_v3 = vld [vmem:[#allocation39 + $0xf40] sm:$0xf]  ;;  %v11630_v15 = vor.u32 %v12901_v24, %v11629_v40  ;;  %v11758_v30 = vor.u32 %v12933_v0, %v11757_v63  ;;  %v12957_v42 = vld [vmem:[#allocation39 + $0xf0c] sm:$0xf0] }
0x17fd   : > { %v12599_v53 = vld [vmem:[#allocation39 + $0x3e4] sm:$0xf]  ;;  %v10159_v63 = vld [vmem:[#allocation39 + $0x1d0] sm:$0xf0] }
0x17fe   : > { %7457 = vmatpush.bf16.msrb.mxu3 %v11566_v18  ;;  %7470 = vmatpush.bf16.msra.mxu0 %v11694_v4  ;;  %v12897_v18 = vld [vmem:[#allocation39 + $0xd2c] sm:$0xf0]  ;;  %v11886_v4 = vor.u32 %v12965_v7, %v11885_v3  ;;  %v10434_v40 = vor.u32 %v12599_v53, %v10431_v54  ;;  %v12531_v24 = vld [vmem:[#allocation39 + $0x1c4] sm:$0xf]  ;;  %v10287_v3 = vld [vmem:[#allocation39 + $0x2d0] sm:$0xf0] }
0x17ff   : > { %7483 = vmatpush.bf16.msra.mxu1 %v11822_v22  ;;  %7496 = vmatpush.bf16.msra.mxu2 %v11950_v23  ;;  %v12961_v22 = vld [vmem:[#allocation39 + $0xf2c] sm:$0xf0]  ;;  %v11486_v23 = vor.u32 %v12865_v16, %v11485_v12  ;;  %v11614_v25 = vor.u32 %v12897_v18, %v11613_v17  ;;  %v12563_v0 = vld [vmem:[#allocation39 + $0x2c4] sm:$0xf]  ;;  %v10415_v12 = vld [vmem:[#allocation39 + $0x3d0] sm:$0xf0] }
0x1800   : > { %v12595_v7 = vld [vmem:[#allocation39 + $0x3c4] sm:$0xf]  ;;  %v10015_v17 = vld [vmem:[#allocation39 + $0xb0] sm:$0xf0]  ;;  %v10290_v18 = vor.u32 %v12563_v0, %v10287_v3 }
0x1801   : > { %v12495_v16 = vld [vmem:[#allocation39 + $0xa4] sm:$0xf] }
0x1802   : > { %7458 = vmatpush.bf16.msrb.mxu3 %v11550_v31  ;;  %7471 = vmatpush.bf16.msra.mxu0 %v11678_v32  ;;  %v12551_v54 = vld [vmem:[#allocation39 + $0x264] sm:$0xf] }
0x1803   : > { %7484 = vmatpush.bf16.msra.mxu1 %v11806_v34  ;;  %7497 = vmatpush.bf16.msra.mxu2 %v11934_v35  ;;  %v4163_v55 = vld [vmem:[#allocation1 + $0x7] ss:$9 sm:$0xff]  ;;  %v11742_v34 = vor.u32 %v12929_v20, %v11741_v19  ;;  %v11870_v35 = vor.u32 %v12961_v22, %v11869_v21 }
0x1804   : > { %4165 = vst.msk [vmem:[#allocation7 + $0xf] sm:$0x1] %vm15350_vm2, %v4163_v55  ;;  %v11726_v55 = vor.u32 %v12925_v37, %v11725_v36  ;;  %v10143_v19 = vld [vmem:[#allocation39 + $0x1b0] sm:$0xf0]  ;;  %v12559_v20 = vld [vmem:[#allocation39 + $0x2a4] sm:$0xf] }
0x1805   : > { %v10271_v21 = vld [vmem:[#allocation39 + $0x2b0] sm:$0xf0]  ;;  %v12591_v22 = vld [vmem:[#allocation39 + $0x3a4] sm:$0xf] }
0x1806   : > { %7459 = vmatpush.bf16.msrb.mxu3 %v11534_v43  ;;  %7472 = vmatpush.bf16.msra.mxu0 %v11662_v46  ;;  %v12503_v43 = vld [vmem:[#allocation39 + $0xe4] sm:$0xf]  ;;  %v10047_v46 = vld [vmem:[#allocation39 + $0xf0] sm:$0xf0] }
0x1807   : > { %7485 = vmatpush.bf16.msra.mxu1 %v11790_v50  ;;  %7498 = vmatpush.bf16.msra.mxu2 %v11918_v5  ;;  %v12535_v50 = vld [vmem:[#allocation39 + $0x1e4] sm:$0xf]  ;;  %v10175_v5 = vld [vmem:[#allocation39 + $0x1f0] sm:$0xf0] }
0x1808   : > { %v10178_v58 = vor.u32 %v12535_v50, %v10175_v5  ;;  %v10383_v36 = vld [vmem:[#allocation39 + $0x390] sm:$0xf0]  ;;  %v12487_v37 = vld [vmem:[#allocation39 + $0x64] sm:$0xf] }
0x1809   : > { %v12519_v5 = vld [vmem:[#allocation39 + $0x164] sm:$0xf] }
0x180a   : > { %7460 = vmatpush.bf16.msrb.mxu3 %v11518_v56  ;;  %7473 = vmatpush.bf16.msra.mxu0 %v11646_v57  ;;  %v11854_v56 = vor.u32 %v12957_v42, %v11853_v38  ;;  %v10050_v57 = vor.u32 %v12503_v43, %v10047_v46  ;;  %v9983_v38 = vld [vmem:[#allocation39 + $0x70] sm:$0xf0]  ;;  %v10002_v42 = vor.u32 %v12491_v28, %v9999_v29  ;;  %v12575_v28 = vld [vmem:[#allocation39 + $0x324] sm:$0xf] }
0x180b   : > { %7486 = vmatpush.bf16.msra.mxu1 %v11774_v60  ;;  %7499 = vmatpush.bf16.msra.mxu2 %v11902_v61  ;;  %v15444_v26 = vld [vmem:[#allocation7 + $0x8] sm:$0xff]  ;;  %v10031_v60 = vld [vmem:[#allocation39 + $0xd0] sm:$0xf0]  ;;  %v10306_v61 = vor.u32 %v12567_v62, %v10303_v52 }
0x180c   : > { %v4690_v44 = vperm.slane %v15444_v26, 0  ;;  %v4691_v31 = vperm.slane %v15444_v26, 1  ;;  %v4692_v32 = vperm.slane %v15444_v26, 2  ;;  %v4693_v45 = vperm.slane %v15444_v26, 3  ;;  %v10111_v62 = vld [vmem:[#allocation39 + $0x170] sm:$0xf0] }
0x180d   : > { %v4694_v46 = vperm.slane %v15444_v26, 4  ;;  %v4695_v50 = vperm.slane %v15444_v26, 5  ;;  %v4696_v52 = vperm.slane %v15444_v26, 6  ;;  %v4697_v53 = vperm.slane %v15444_v26, 7  ;;  %v10335_v29 = vld [vmem:[#allocation39 + $0x330] sm:$0xf0] }
0x180e   : > { %7461 = vmatpush.bf16.msrb.mxu3 %v11502_v13  ;;  %7474 = vmatpush.bf16.msra.mxu0 %v11630_v15  ;;  %v15450_v39 = vpack.c.bf16 %v4690_v44, %v4690_v44  ;;  %v15452_v41 = vpack.c.bf16 %v4691_v31, %v4691_v31  ;;  %v15454_v47 = vpack.c.bf16 %v4692_v32, %v4692_v32  ;;  %v12523_v32 = vld [vmem:[#allocation39 + $0x184] sm:$0xf] }
0x180f   : > { %7487 = vmatpush.bf16.msra.mxu1 %v11758_v30  ;;  %7500 = vmatpush.bf16.msra.mxu2 %v11886_v4  ;;  %v15456_v49 = vpack.c.bf16 %v4693_v45, %v4693_v45  ;;  %v10034_v13 = vor.u32 %v12499_v59, %v10031_v60  ;;  %v10162_v15 = vor.u32 %v12531_v24, %v10159_v63  ;;  %v12527_v4 = vld [vmem:[#allocation39 + $0x1a4] sm:$0xf]  ;;  %v10127_v45 = vld [vmem:[#allocation39 + $0x190] sm:$0xf0] }
0x1810   : > { %7412 = vmatmul.bf16.vlgmr.msra.gmra.mxu3 %v15450_v39  ;;  %7425 = vmatmul.bf16.vlgmr.msrb.gmra.mxu0 %v15452_v41  ;;  %v10418_v30 = vor.u32 %v12595_v7, %v10415_v12  ;;  %v10146_v27 = vor.u32 %v12527_v4, %v10143_v19  ;;  %v10274_v44 = vor.u32 %v12559_v20, %v10271_v21  ;;  %v12483_v24 = vld [vmem:[#allocation39 + $0x44] sm:$0xf]  ;;  %v9967_v63 = vld [vmem:[#allocation39 + $0x50] sm:$0xf0] }
0x1811   : > { %7438 = vmatmul.bf16.vlgmr.msrb.gmra.mxu1 %v15454_v47  ;;  %7451 = vmatmul.bf16.vlgmr.msrb.gmra.mxu2 %v15456_v49  ;;  %v10130_v43 = vor.u32 %v12523_v32, %v10127_v45  ;;  %v10114_v59 = vor.u32 %v12519_v5, %v10111_v62  ;;  %v15466_v60 = vpack.c.bf16 %v4694_v46, %v4694_v46  ;;  %v12515_v7 = vld [vmem:[#allocation39 + $0x144] sm:$0xf]  ;;  %v10095_v12 = vld [vmem:[#allocation39 + $0x150] sm:$0xf0] }
0x1812   : > { %7462 = vmatpush.bf16.msrb.mxu3 %v11486_v23  ;;  %7475 = vmatpush.bf16.msra.mxu0 %v11614_v25  ;;  %v10399_v23 = vld [vmem:[#allocation39 + $0x3b0] sm:$0xf0]  ;;  %v10018_v25 = vor.u32 %v12495_v16, %v10015_v17  ;;  %v15470_v0 = vpack.c.bf16 %v4696_v52, %v4696_v52  ;;  %v15472_v26 = vpack.c.bf16 %v4697_v53, %v4697_v53  ;;  %v12579_v16 = vld [vmem:[#allocation39 + $0x344] sm:$0xf] }
0x1813   : > { %7488 = vmatpush.bf16.msra.mxu1 %v11742_v34  ;;  %7501 = vmatpush.bf16.msra.mxu2 %v11870_v35  ;;  %v10402_v31 = vor.u32 %v12591_v22, %v10399_v23  ;;  %v10255_v34 = vld [vmem:[#allocation39 + $0x290] sm:$0xf0]  ;;  %v12587_v35 = vld [vmem:[#allocation39 + $0x384] sm:$0xf] }
0x1814   : > { %v10351_v17 = vld [vmem:[#allocation39 + $0x350] sm:$0xf0]  ;;  %v12479_v4 = vld [vmem:[#allocation39 + $0x24] sm:$0xf] }
0x1815   : > { %v9951_v19 = vld [vmem:[#allocation39 + $0x30] sm:$0xf0]  ;;  %v10354_v21 = vor.u32 %v12579_v16, %v10351_v17  ;;  %v12511_v22 = vld [vmem:[#allocation39 + $0x124] sm:$0xf] }
0x1816   : > { %7463 = vmatpush.bf16.msrb.mxu3 %v11470_v48  ;;  %7476 = vmatpush.bf16.msra.mxu0 %v11598_v51  ;;  %v10258_v48 = vor.u32 %v12555_v33, %v10255_v34  ;;  %v10386_v51 = vor.u32 %v12587_v35, %v10383_v36  ;;  %v10079_v23 = vld [vmem:[#allocation39 + $0x130] sm:$0xf0]  ;;  %v12507_v33 = vld [vmem:[#allocation39 + $0x104] sm:$0xf]  ;;  %v10338_v36 = vor.u32 %v12575_v28, %v10335_v29 }
0x1817   : > { %7489 = vmatpush.bf16.msra.mxu1 %v11726_v55  ;;  %7502 = vmatpush.bf16.msra.mxu2 %v11854_v56  ;;  %v10239_v55 = vld [vmem:[#allocation39 + $0x270] sm:$0xf0]  ;;  %v12583_v56 = vld [vmem:[#allocation39 + $0x364] sm:$0xf]  ;;  %v10082_v32 = vor.u32 %v12511_v22, %v10079_v23 }
0x1818   : > { %v9935_v45 = vld [vmem:[#allocation39 + $0x10] sm:$0xf0]  ;;  %v12631_v46 = vld [vmem:[#allocation39 + $0x4e4] sm:$0xf] }
0x1819   : > { %v10063_v34 = vld [vmem:[#allocation39 + $0x110] sm:$0xf0]  ;;  %v12663_v5 = vld [vmem:[#allocation39 + $0x5e4] sm:$0xf] }
0x181a   : > { %7508 = vmatpush.bf16.msra.mxu3 %v10050_v57  ;;  %7521 = vmatpush.bf16.msrb.mxu0 %v10178_v58  ;;  %v10367_v57 = vld [vmem:[#allocation39 + $0x370] sm:$0xf0]  ;;  %v9986_v58 = vor.u32 %v12487_v37, %v9983_v38  ;;  %v12539_v37 = vld [vmem:[#allocation39 + $0x204] sm:$0xf]  ;;  %v10066_v52 = vor.u32 %v12507_v33, %v10063_v34 }
0x181b   : > { %7534 = vmatpush.bf16.msrb.mxu1 %v10306_v61  ;;  %7547 = vmatpush.bf16.msrb.mxu2 %v10434_v40  ;;  %v15468_v61 = vpack.c.bf16 %v4695_v50, %v4695_v50  ;;  %v10242_v40 = vor.u32 %v12551_v54, %v10239_v55  ;;  %v10370_v3 = vor.u32 %v12583_v56, %v10367_v57  ;;  %v10191_v38 = vld [vmem:[#allocation39 + $0x210] sm:$0xf0]  ;;  %v12727_v54 = vld [vmem:[#allocation39 + $0x7e4] sm:$0xf] }
0x181c   : > { %v10559_v50 = vld [vmem:[#allocation39 + $0x4f0] sm:$0xf0]  ;;  %v10194_v56 = vor.u32 %v12539_v37, %v10191_v38  ;;  %v12723_v16 = vld [vmem:[#allocation39 + $0x7c4] sm:$0xf] }
0x181d   : > { %v10687_v62 = vld [vmem:[#allocation39 + $0x5f0] sm:$0xf0]  ;;  %v12655_v22 = vld [vmem:[#allocation39 + $0x5a4] sm:$0xf] }
0x181e   : > { %7509 = vmatpush.bf16.msra.mxu3 %v10034_v13  ;;  %7522 = vmatpush.bf16.msrb.mxu0 %v10162_v15  ;;  %v12547_v13 = vld [vmem:[#allocation39 + $0x244] sm:$0xf]  ;;  %v10223_v15 = vld [vmem:[#allocation39 + $0x250] sm:$0xf0] }
0x181f   : > { %7535 = vmatpush.bf16.msrb.mxu1 %v10290_v18  ;;  %7548 = vmatpush.bf16.msrb.mxu2 %v10418_v30  ;;  %v9970_v18 = vor.u32 %v12483_v24, %v9967_v63  ;;  %v10098_v30 = vor.u32 %v12515_v7, %v10095_v12  ;;  %v10226_v20 = vor.u32 %v12547_v13, %v10223_v15  ;;  %v10815_v53 = vld [vmem:[#allocation39 + $0x6f0] sm:$0xf0]  ;;  %v12659_v7 = vld [vmem:[#allocation39 + $0x5c4] sm:$0xf] }
0x1820   : > { %7464 = vmatmul.bf16.vlgmr.msrb.gmra.mxu3 %v15466_v60  ;;  %7477 = vmatmul.bf16.vlgmr.msra.gmra.mxu0 %v15468_v61  ;;  %v10943_v55 = vld [vmem:[#allocation39 + $0x7f0] sm:$0xf0]  ;;  %v12691_v13 = vld [vmem:[#allocation39 + $0x6c4] sm:$0xf] }
0x1821   : > { %7490 = vmatmul.bf16.vlgmr.msra.gmra.mxu1 %v15470_v0  ;;  %7503 = vmatmul.bf16.vlgmr.msra.gmra.mxu2 %v15472_v26  ;;  %v10543_v24 = vld [vmem:[#allocation39 + $0x4d0] sm:$0xf0]  ;;  %v12719_v28 = vld [vmem:[#allocation39 + $0x7a4] sm:$0xf] }
0x1822   : > { %7510 = vmatpush.bf16.msra.mxu3 %v10018_v25  ;;  %7523 = vmatpush.bf16.msrb.mxu0 %v10146_v27  ;;  %v12543_v25 = vld [vmem:[#allocation39 + $0x224] sm:$0xf]  ;;  %v10207_v27 = vld [vmem:[#allocation39 + $0x230] sm:$0xf0] }
0x1823   : > { %7536 = vmatpush.bf16.msrb.mxu1 %v10274_v44  ;;  %7549 = vmatpush.bf16.msrb.mxu2 %v10402_v31  ;;  %v12475_v44 = vld [vmem:[#allocation39 + $0x4] sm:$0xf]  ;;  %v9954_v31 = vor.u32 %v12479_v4, %v9951_v19  ;;  %v10210_v35 = vor.u32 %v12543_v25, %v10207_v27  ;;  %v10671_v12 = vld [vmem:[#allocation39 + $0x5d0] sm:$0xf0] }
0x1824   : > { %v10799_v15 = vld [vmem:[#allocation39 + $0x6d0] sm:$0xf0]  ;;  %v12623_v4 = vld [vmem:[#allocation39 + $0x4a4] sm:$0xf] }
0x1825   : > { %v10927_v17 = vld [vmem:[#allocation39 + $0x7d0] sm:$0xf0]  ;;  %v12687_v25 = vld [vmem:[#allocation39 + $0x6a4] sm:$0xf] }
0x1826   : > { %7511 = vmatpush.bf16.msra.mxu3 %v10002_v42  ;;  %7524 = vmatpush.bf16.msrb.mxu0 %v10130_v43  ;;  %v12571_v42 = vld [vmem:[#allocation39 + $0x304] sm:$0xf]  ;;  %v10319_v43 = vld [vmem:[#allocation39 + $0x310] sm:$0xf0] }
0x1827   : > { %7537 = vmatpush.bf16.msrb.mxu1 %v10258_v48  ;;  %7550 = vmatpush.bf16.msrb.mxu2 %v10386_v51  ;;  %v12695_v48 = vld [vmem:[#allocation39 + $0x6e4] sm:$0xf]  ;;  %v9938_v51 = vor.u32 %v12475_v44, %v9935_v45  ;;  %v10322_v57 = vor.u32 %v12571_v42, %v10319_v43  ;;  %v10527_v19 = vld [vmem:[#allocation39 + $0x4b0] sm:$0xf0] }
0x1828   : > { %v10818_v63 = vor.u32 %v12695_v48, %v10815_v53  ;;  %v10655_v23 = vld [vmem:[#allocation39 + $0x5b0] sm:$0xf0]  ;;  %v10530_v44 = vor.u32 %v12623_v4, %v10527_v19  ;;  %v12683_v37 = vld [vmem:[#allocation39 + $0x684] sm:$0xf] }
0x1829   : > { %v10783_v27 = vld [vmem:[#allocation39 + $0x6b0] sm:$0xf0]  ;;  %v12715_v42 = vld [vmem:[#allocation39 + $0x784] sm:$0xf] }
0x182a   : > { %7512 = vmatpush.bf16.msra.mxu3 %v9986_v58  ;;  %7525 = vmatpush.bf16.msrb.mxu0 %v10114_v59  ;;  %v10562_v58 = vor.u32 %v12631_v46, %v10559_v50  ;;  %v10690_v59 = vor.u32 %v12663_v5, %v10687_v62  ;;  %v10911_v29 = vld [vmem:[#allocation39 + $0x7b0] sm:$0xf0]  ;;  %v10786_v33 = vor.u32 %v12687_v25, %v10783_v27  ;;  %v12615_v5 = vld [vmem:[#allocation39 + $0x464] sm:$0xf] }
0x182b   : > { %7538 = vmatpush.bf16.msrb.mxu1 %v10242_v40  ;;  %7551 = vmatpush.bf16.msrb.mxu2 %v10370_v3  ;;  %v12627_v40 = vld [vmem:[#allocation39 + $0x4c4] sm:$0xf]  ;;  %v10946_v3 = vor.u32 %v12727_v54, %v10943_v55  ;;  %v10511_v45 = vld [vmem:[#allocation39 + $0x490] sm:$0xf0]  ;;  %v10914_v34 = vor.u32 %v12719_v28, %v10911_v29 }
0x182c   : > { %v10767_v38 = vld [vmem:[#allocation39 + $0x690] sm:$0xf0]  ;;  %v12679_v54 = vld [vmem:[#allocation39 + $0x664] sm:$0xf] }
0x182d   : > { %v10895_v43 = vld [vmem:[#allocation39 + $0x790] sm:$0xf0]  ;;  %v10770_v48 = vor.u32 %v12683_v37, %v10767_v38  ;;  %v12607_v4 = vld [vmem:[#allocation39 + $0x424] sm:$0xf] }
0x182e   : > { %7513 = vmatpush.bf16.msra.mxu3 %v9970_v18  ;;  %7526 = vmatpush.bf16.msrb.mxu0 %v10098_v30  ;;  %v10546_v18 = vor.u32 %v12627_v40, %v10543_v24  ;;  %v10674_v30 = vor.u32 %v12659_v7, %v10671_v12  ;;  %v10495_v62 = vld [vmem:[#allocation39 + $0x470] sm:$0xf0]  ;;  %v12611_v40 = vld [vmem:[#allocation39 + $0x444] sm:$0xf] }
0x182f   : > { %7539 = vmatpush.bf16.msrb.mxu1 %v10226_v20  ;;  %7552 = vmatpush.bf16.msrb.mxu2 %v10354_v21  ;;  %v10802_v20 = vor.u32 %v12691_v13, %v10799_v15  ;;  %v10930_v21 = vor.u32 %v12723_v16, %v10927_v17  ;;  %v10623_v53 = vld [vmem:[#allocation39 + $0x570] sm:$0xf0]  ;;  %v12643_v7 = vld [vmem:[#allocation39 + $0x544] sm:$0xf] }
0x1830   : > { %v10751_v55 = vld [vmem:[#allocation39 + $0x670] sm:$0xf0]  ;;  %v12675_v13 = vld [vmem:[#allocation39 + $0x644] sm:$0xf] }
0x1831   : > { %v10479_v24 = vld [vmem:[#allocation39 + $0x450] sm:$0xf0]  ;;  %v12707_v16 = vld [vmem:[#allocation39 + $0x744] sm:$0xf] }
0x1832   : > { %7514 = vmatpush.bf16.msra.mxu3 %v9954_v31  ;;  %7527 = vmatpush.bf16.msrb.mxu0 %v10082_v32  ;;  %v10658_v31 = vor.u32 %v12655_v22, %v10655_v23  ;;  %v12619_v32 = vld [vmem:[#allocation39 + $0x484] sm:$0xf]  ;;  %v10607_v12 = vld [vmem:[#allocation39 + $0x550] sm:$0xf0] }
0x1833   : > { %7540 = vmatpush.bf16.msrb.mxu1 %v10210_v35  ;;  %7553 = vmatpush.bf16.msrb.mxu2 %v10338_v36  ;;  %v12651_v35 = vld [vmem:[#allocation39 + $0x584] sm:$0xf]  ;;  %v10639_v36 = vld [vmem:[#allocation39 + $0x590] sm:$0xf0]  ;;  %v10514_v46 = vor.u32 %v12619_v32, %v10511_v45 }
0x1834   : > { %v10642_v50 = vor.u32 %v12651_v35, %v10639_v36  ;;  %v10735_v15 = vld [vmem:[#allocation39 + $0x650] sm:$0xf0]  ;;  %v12639_v22 = vld [vmem:[#allocation39 + $0x524] sm:$0xf] }
0x1835   : > { %v10863_v17 = vld [vmem:[#allocation39 + $0x750] sm:$0xf0]  ;;  %v12671_v25 = vld [vmem:[#allocation39 + $0x624] sm:$0xf] }
0x1836   : > { %7515 = vmatpush.bf16.msra.mxu3 %v9938_v51  ;;  %7528 = vmatpush.bf16.msrb.mxu0 %v10066_v52  ;;  %v10898_v51 = vor.u32 %v12715_v42, %v10895_v43  ;;  %v12647_v52 = vld [vmem:[#allocation39 + $0x564] sm:$0xf]  ;;  %v10463_v19 = vld [vmem:[#allocation39 + $0x430] sm:$0xf0] }
0x1837   : > { %7541 = vmatpush.bf16.msrb.mxu1 %v10194_v56  ;;  %7554 = vmatpush.bf16.msrb.mxu2 %v10322_v57  ;;  %v12711_v56 = vld [vmem:[#allocation39 + $0x764] sm:$0xf]  ;;  %v10879_v57 = vld [vmem:[#allocation39 + $0x770] sm:$0xf0] }
0x1838   : > { %v10591_v23 = vld [vmem:[#allocation39 + $0x530] sm:$0xf0]  ;;  %v12703_v28 = vld [vmem:[#allocation39 + $0x724] sm:$0xf] }
0x1839   : > { %7516 = vmatmul.bf16.vlgmr.msra.gmra.mxu3 %v15399_v8  ;;  %7529 = vmatmul.bf16.vlgmr.msrb.gmra.mxu0 %v15401_v9  ;;  %v10719_v27 = vld [vmem:[#allocation39 + $0x630] sm:$0xf0]  ;;  %v10594_v32 = vor.u32 %v12639_v22, %v10591_v23  ;;  %v12667_v37 = vld [vmem:[#allocation39 + $0x604] sm:$0xf] }
0x183a   : > { %7560 = vmatpush.bf16.msrb.mxu3 %v10562_v58  ;;  %7573 = vmatpush.bf16.msra.mxu0 %v10690_v59  ;;  %v10498_v58 = vor.u32 %v12615_v5, %v10495_v62  ;;  %v10626_v59 = vor.u32 %v12647_v52, %v10623_v53  ;;  %v10847_v29 = vld [vmem:[#allocation39 + $0x730] sm:$0xf0]  ;;  %v10722_v35 = vor.u32 %v12671_v25, %v10719_v27  ;;  %v12699_v42 = vld [vmem:[#allocation39 + $0x704] sm:$0xf] }
0x183b   : > { %7586 = vmatpush.bf16.msra.mxu1 %v10818_v63  ;;  %7599 = vmatpush.bf16.msra.mxu2 %v10946_v3  ;;  %v10754_v63 = vor.u32 %v12679_v54, %v10751_v55  ;;  %v10882_v3 = vor.u32 %v12711_v56, %v10879_v57  ;;  %v10447_v45 = vld [vmem:[#allocation39 + $0x410] sm:$0xf0]  ;;  %v10850_v36 = vor.u32 %v12703_v28, %v10847_v29  ;;  %v12791_v5 = vld [vmem:[#allocation39 + $0x9e4] sm:$0xf] }
0x183c   : > { %7542 = vmatmul.bf16.vlgmr.msrb.gmra.mxu1 %v15403_v10  ;;  %7555 = vmatmul.bf16.vlgmr.msrb.gmra.mxu2 %v15405_v11  ;;  %v10703_v38 = vld [vmem:[#allocation39 + $0x610] sm:$0xf0]  ;;  %v12855_v54 = vld [vmem:[#allocation39 + $0xbe4] sm:$0xf] }
0x183d   : > { %v10831_v43 = vld [vmem:[#allocation39 + $0x710] sm:$0xf0]  ;;  %v10706_v56 = vor.u32 %v12667_v37, %v10703_v38  ;;  %v12783_v22 = vld [vmem:[#allocation39 + $0x9a4] sm:$0xf] }
0x183e   : > { %7561 = vmatpush.bf16.msrb.mxu3 %v10546_v18  ;;  %7574 = vmatpush.bf16.msra.mxu0 %v10674_v30  ;;  %v10482_v18 = vor.u32 %v12611_v40, %v10479_v24  ;;  %v10610_v30 = vor.u32 %v12643_v7, %v10607_v12  ;;  %v11199_v62 = vld [vmem:[#allocation39 + $0x9f0] sm:$0xf0]  ;;  %v10834_v57 = vor.u32 %v12699_v42, %v10831_v43  ;;  %v12755_v40 = vld [vmem:[#allocation39 + $0x8c4] sm:$0xf] }
0x183f   : > { %7587 = vmatpush.bf16.msra.mxu1 %v10802_v20  ;;  %7600 = vmatpush.bf16.msra.mxu2 %v10930_v21  ;;  %v10738_v20 = vor.u32 %v12675_v13, %v10735_v15  ;;  %v10866_v21 = vor.u32 %v12707_v16, %v10863_v17  ;;  %v11327_v53 = vld [vmem:[#allocation39 + $0xaf0] sm:$0xf0]  ;;  %v12787_v7 = vld [vmem:[#allocation39 + $0x9c4] sm:$0xf] }
0x1840   : > { %v11455_v55 = vld [vmem:[#allocation39 + $0xbf0] sm:$0xf0]  ;;  %v12819_v13 = vld [vmem:[#allocation39 + $0xac4] sm:$0xf] }
0x1841   : > { %v11055_v24 = vld [vmem:[#allocation39 + $0x8d0] sm:$0xf0]  ;;  %v12851_v16 = vld [vmem:[#allocation39 + $0xbc4] sm:$0xf] }
0x1842   : > { %7562 = vmatpush.bf16.msrb.mxu3 %v10530_v44  ;;  %7575 = vmatpush.bf16.msra.mxu0 %v10658_v31  ;;  %v12603_v44 = vld [vmem:[#allocation39 + $0x404] sm:$0xf]  ;;  %v10466_v31 = vor.u32 %v12607_v4, %v10463_v19  ;;  %v11183_v12 = vld [vmem:[#allocation39 + $0x9d0] sm:$0xf0] }
0x1843   : > { %7588 = vmatpush.bf16.msra.mxu1 %v10786_v33  ;;  %7601 = vmatpush.bf16.msra.mxu2 %v10914_v34  ;;  %v12635_v33 = vld [vmem:[#allocation39 + $0x504] sm:$0xf]  ;;  %v10575_v34 = vld [vmem:[#allocation39 + $0x510] sm:$0xf0] }
0x1844   : > { %v10578_v52 = vor.u32 %v12635_v33, %v10575_v34  ;;  %v11311_v15 = vld [vmem:[#allocation39 + $0xad0] sm:$0xf0]  ;;  %v12751_v4 = vld [vmem:[#allocation39 + $0x8a4] sm:$0xf] }
0x1845   : > { %v11439_v17 = vld [vmem:[#allocation39 + $0xbd0] sm:$0xf0]  ;;  %v12815_v25 = vld [vmem:[#allocation39 + $0xaa4] sm:$0xf] }
0x1846   : > { %7563 = vmatpush.bf16.msrb.mxu3 %v10514_v46  ;;  %7576 = vmatpush.bf16.msra.mxu0 %v10642_v50  ;;  %v12759_v46 = vld [vmem:[#allocation39 + $0x8e4] sm:$0xf]  ;;  %v11071_v50 = vld [vmem:[#allocation39 + $0x8f0] sm:$0xf0] }
0x1847   : > { %7589 = vmatpush.bf16.msra.mxu1 %v10770_v48  ;;  %7602 = vmatpush.bf16.msra.mxu2 %v10898_v51  ;;  %v12823_v48 = vld [vmem:[#allocation39 + $0xae4] sm:$0xf]  ;;  %v10450_v51 = vor.u32 %v12603_v44, %v10447_v45  ;;  %v11039_v19 = vld [vmem:[#allocation39 + $0x8b0] sm:$0xf0] }
0x1848   : > { %v11167_v23 = vld [vmem:[#allocation39 + $0x9b0] sm:$0xf0]  ;;  %v12847_v28 = vld [vmem:[#allocation39 + $0xba4] sm:$0xf] }
0x1849   : > { %v11295_v27 = vld [vmem:[#allocation39 + $0xab0] sm:$0xf0]  ;;  %v11170_v45 = vor.u32 %v12783_v22, %v11167_v23  ;;  %v12747_v34 = vld [vmem:[#allocation39 + $0x884] sm:$0xf] }
0x184a   : > { %7564 = vmatpush.bf16.msrb.mxu3 %v10498_v58  ;;  %7577 = vmatpush.bf16.msra.mxu0 %v10626_v59  ;;  %v11074_v58 = vor.u32 %v12759_v46, %v11071_v50  ;;  %v11202_v59 = vor.u32 %v12791_v5, %v11199_v62  ;;  %v11423_v29 = vld [vmem:[#allocation39 + $0xbb0] sm:$0xf0]  ;;  %v11298_v37 = vor.u32 %v12815_v25, %v11295_v27  ;;  %v12811_v43 = vld [vmem:[#allocation39 + $0xa84] sm:$0xf] }
0x184b   : > { %7590 = vmatpush.bf16.msra.mxu1 %v10754_v63  ;;  %7603 = vmatpush.bf16.msra.mxu2 %v10882_v3  ;;  %v11330_v63 = vor.u32 %v12823_v48, %v11327_v53  ;;  %v11458_v3 = vor.u32 %v12855_v54, %v11455_v55  ;;  %v11426_v38 = vor.u32 %v12847_v28, %v11423_v29  ;;  %v11151_v42 = vld [vmem:[#allocation39 + $0x990] sm:$0xf0]  ;;  %v12843_v50 = vld [vmem:[#allocation39 + $0xb84] sm:$0xf] }
0x184c   : > { %v11279_v46 = vld [vmem:[#allocation39 + $0xa90] sm:$0xf0]  ;;  %v12803_v22 = vld [vmem:[#allocation39 + $0xa44] sm:$0xf] }
0x184d   : > { %v11407_v5 = vld [vmem:[#allocation39 + $0xb90] sm:$0xf0]  ;;  %v11282_v54 = vor.u32 %v12811_v43, %v11279_v46  ;;  %v12835_v27 = vld [vmem:[#allocation39 + $0xb44] sm:$0xf] }
0x184e   : > { %7565 = vmatpush.bf16.msrb.mxu3 %v10482_v18  ;;  %7578 = vmatpush.bf16.msra.mxu0 %v10610_v30  ;;  %v11058_v18 = vor.u32 %v12755_v40, %v11055_v24  ;;  %v11186_v30 = vor.u32 %v12787_v7, %v11183_v12  ;;  %v11007_v53 = vld [vmem:[#allocation39 + $0x870] sm:$0xf0]  ;;  %v11410_v55 = vor.u32 %v12843_v50, %v11407_v5  ;;  %v12799_v43 = vld [vmem:[#allocation39 + $0xa24] sm:$0xf] }
0x184f   : > { %7591 = vmatpush.bf16.msra.mxu1 %v10738_v20  ;;  %7604 = vmatpush.bf16.msra.mxu2 %v10866_v21  ;;  %v11314_v20 = vor.u32 %v12819_v13, %v11311_v15  ;;  %v11442_v21 = vor.u32 %v12851_v16, %v11439_v17  ;;  %v11391_v7 = vld [vmem:[#allocation39 + $0xb70] sm:$0xf0]  ;;  %v12831_v50 = vld [vmem:[#allocation39 + $0xb24] sm:$0xf] }
0x1850   : > { %v11247_v25 = vld [vmem:[#allocation39 + $0xa50] sm:$0xf0] }
0x1851   : > { %v11375_v28 = vld [vmem:[#allocation39 + $0xb50] sm:$0xf0] }
0x1852   : > { %7566 = vmatpush.bf16.msrb.mxu3 %v10466_v31  ;;  %7579 = vmatpush.bf16.msra.mxu0 %v10594_v32  ;;  %v15486_v31 = vld [vmem:[#allocation40] sm:$0xf]  ;;  %v11042_v32 = vor.u32 %v12751_v4, %v11039_v19  ;;  %v11359_v5 = vld [vmem:[#allocation39 + $0xb30] sm:$0xf0] }
0x1853   : > { %7592 = vmatpush.bf16.msra.mxu1 %v10722_v35  ;;  %7605 = vmatpush.bf16.msra.mxu2 %v10850_v36  ;;  %v11023_v35 = vld [vmem:[#allocation39 + $0x890] sm:$0xf0]  ;;  %v12779_v36 = vld [vmem:[#allocation39 + $0x984] sm:$0xf]  ;;  %v7292_v62 = vperm.slane %v15486_v31, 0 }
0x1854   : > { %v11026_v48 = vor.u32 %v12747_v34, %v11023_v35  ;;  %v10975_v34 = vld [vmem:[#allocation39 + $0x830] sm:$0xf0]  ;;  %v11250_v35 = vor.u32 %v12803_v22, %v11247_v25 }
0x1855   : > { %v7322_v44 = vpop.f32.mrf.mxu0 }
0x1856   : > { %7567 = vmatpush.bf16.msrb.mxu3 %v10450_v51  ;;  %7580 = vmatpush.bf16.msra.mxu0 %v10578_v52  ;;  %v7335_v33 = vpop.f32.mrf.mxu1  ;;  %v11154_v51 = vor.u32 %v12779_v36, %v11151_v42  ;;  %v12743_v52 = vld [vmem:[#allocation39 + $0x864] sm:$0xf]  ;;  %v11378_v36 = vor.u32 %v12835_v27, %v11375_v28  ;;  %v11103_v42 = vld [vmem:[#allocation39 + $0x930] sm:$0xf0] }
0x1857   : > { %7593 = vmatpush.bf16.msra.mxu1 %v10706_v56  ;;  %7606 = vmatpush.bf16.msra.mxu2 %v10834_v57  ;;  %v12775_v57 = vld [vmem:[#allocation39 + $0x964] sm:$0xf]  ;;  %v11010_v15 = vor.u32 %v12743_v52, %v11007_v53 }
0x1858   : > { %v12883_v28 = vld [vmem:[#allocation39 + $0xcc4] sm:$0xf] }
0x1859   : > { %7568 = vmatmul.bf16.vlgmr.msrb.gmra.mxu3 %v15421_v2  ;;  %7581 = vmatmul.bf16.vlgmr.msra.gmra.mxu0 %v15423_v6 }
0x185a   : > { %7612 = vmatpush.bf16.msra.mxu3 %v11074_v58  ;;  %7625 = vmatpush.bf16.msrb.mxu0 %v11202_v59  ;;  %v11135_v58 = vld [vmem:[#allocation39 + $0x970] sm:$0xf0]  ;;  %v12807_v59 = vld [vmem:[#allocation39 + $0xa64] sm:$0xf] }
0x185b   : > { %7638 = vmatpush.bf16.msrb.mxu1 %v11330_v63  ;;  %7651 = vmatpush.bf16.msrb.mxu2 %v11458_v3  ;;  %v7309_v56 = vpop.f32.mrf.mxu3  ;;  %v11263_v63 = vld [vmem:[#allocation39 + $0xa70] sm:$0xf0]  ;;  %v12839_v3 = vld [vmem:[#allocation39 + $0xb64] sm:$0xf]  ;;  %v11138_v16 = vor.u32 %v12775_v57, %v11135_v58  ;;  %v11362_v58 = vor.u32 %v12831_v50, %v11359_v5 }
0x185c   : > { %7594 = vmatmul.bf16.vlgmr.msra.gmra.mxu1 %v15425_v1  ;;  %7607 = vmatmul.bf16.vlgmr.msra.gmra.mxu2 %v15427_v14  ;;  %v7310_v40 = vadd.f32 %v7309_v56, %v7292_v62  ;;  %v7348_v24 = vpop.f32.mrf.mxu2  ;;  %v11266_v4 = vor.u32 %v12807_v59, %v11263_v63  ;;  %v11394_v19 = vor.u32 %v12839_v3, %v11391_v7  ;;  %v11087_v56 = vld [vmem:[#allocation39 + $0x910] sm:$0xf0]  ;;  %v12795_v59 = vld [vmem:[#allocation39 + $0xa04] sm:$0xf] }
0x185d   : > { %v7324_v12 = vpop.f32.mrf.mxu0  ;;  %v11343_v63 = vld [vmem:[#allocation39 + $0xb10] sm:$0xf0]  ;;  %v12887_v3 = vld [vmem:[#allocation39 + $0xce4] sm:$0xf] }
0x185e   : > { %7613 = vmatpush.bf16.msra.mxu3 %v11058_v18  ;;  %7626 = vmatpush.bf16.msrb.mxu0 %v11186_v30  ;;  %v7323_v13 = vadd.f32 %v7322_v44, %v7310_v40  ;;  %v7337_v17 = vpop.f32.mrf.mxu1  ;;  %v12739_v18 = vld [vmem:[#allocation39 + $0x844] sm:$0xf]  ;;  %v10991_v30 = vld [vmem:[#allocation39 + $0x850] sm:$0xf0] }
0x185f   : > { %7639 = vmatpush.bf16.msrb.mxu1 %v11314_v20  ;;  %7652 = vmatpush.bf16.msrb.mxu2 %v11442_v21  ;;  %v12771_v20 = vld [vmem:[#allocation39 + $0x944] sm:$0xf]  ;;  %v11119_v21 = vld [vmem:[#allocation39 + $0x950] sm:$0xf0]  ;;  %v10994_v44 = vor.u32 %v12739_v18, %v10991_v30 }
0x1860   : > { %v7336_v23 = vadd.f32 %v7335_v33, %v7323_v13  ;;  %v11231_v33 = vld [vmem:[#allocation39 + $0xa30] sm:$0xf0]  ;;  %v12919_v12 = vld [vmem:[#allocation39 + $0xde4] sm:$0xf] }
0x1861   : > { %v11234_v57 = vor.u32 %v12799_v43, %v11231_v33  ;;  %v11215_v40 = vld [vmem:[#allocation39 + $0xa10] sm:$0xf0]  ;;  %v12983_v30 = vld [vmem:[#allocation39 + $0xfe4] sm:$0xf] }
0x1862   : > { %7614 = vmatpush.bf16.msra.mxu3 %v11042_v32  ;;  %7627 = vmatpush.bf16.msrb.mxu0 %v11170_v45  ;;  %v7349_v29 = vadd.f32 %v7348_v24, %v7336_v23  ;;  %v11122_v32 = vor.u32 %v12771_v20, %v11119_v21  ;;  %v12735_v45 = vld [vmem:[#allocation39 + $0x824] sm:$0xf]  ;;  %v11583_v7 = vld [vmem:[#allocation39 + $0xcf0] sm:$0xf0] }
0x1863   : > { %7640 = vmatpush.bf16.msrb.mxu1 %v11298_v37  ;;  %7653 = vmatpush.bf16.msrb.mxu2 %v11426_v38  ;;  %v7311_v37 = vpop.f32.mrf.mxu3  ;;  %v12767_v38 = vld [vmem:[#allocation39 + $0x924] sm:$0xf]  ;;  %v11711_v13 = vld [vmem:[#allocation39 + $0xdf0] sm:$0xf0]  ;;  %v11586_v22 = vor.u32 %v12887_v3, %v11583_v7 }
0x1864   : > { %v7350_v46 = vpop.f32.mrf.mxu2  ;;  %v11106_v52 = vor.u32 %v12767_v38, %v11103_v42  ;;  %v12827_v24 = vld [vmem:[#allocation39 + $0xb04] sm:$0xf]  ;;  %v11839_v18 = vld [vmem:[#allocation39 + $0xef0] sm:$0xf0]  ;;  %v11714_v23 = vor.u32 %v12919_v12, %v11711_v13 }
0x1865   : > { %v7374_v62 = vpop.f32.mrf.mxu0  ;;  %v11346_v20 = vor.u32 %v12827_v24, %v11343_v63  ;;  %v12947_v37 = vld [vmem:[#allocation39 + $0xec4] sm:$0xf]  ;;  %v11823_v43 = vld [vmem:[#allocation39 + $0xed0] sm:$0xf0] }
0x1866   : > { %7615 = vmatpush.bf16.msra.mxu3 %v11026_v48  ;;  %7628 = vmatpush.bf16.msrb.mxu0 %v11154_v51  ;;  %v12731_v48 = vld [vmem:[#allocation39 + $0x804] sm:$0xf]  ;;  %v10978_v51 = vor.u32 %v12735_v45, %v10975_v34  ;;  %v7387_v53 = vpop.f32.mrf.mxu1  ;;  %v11951_v33 = vld [vmem:[#allocation39 + $0xfd0] sm:$0xf0] }
0x1867   : > { %7641 = vmatpush.bf16.msrb.mxu1 %v11282_v54  ;;  %7654 = vmatpush.bf16.msrb.mxu2 %v11410_v55  ;;  %v10959_v54 = vld [vmem:[#allocation39 + $0x810] sm:$0xf0]  ;;  %v12763_v55 = vld [vmem:[#allocation39 + $0x904] sm:$0xf] }
0x1868   : > { %v11090_v17 = vor.u32 %v12763_v55, %v11087_v56  ;;  %v12979_v46 = vld [vmem:[#allocation39 + $0xfc4] sm:$0xf]  ;;  %v11679_v56 = vld [vmem:[#allocation39 + $0xdb0] sm:$0xf0] }
0x1869   : > { %v12911_v55 = vld [vmem:[#allocation39 + $0xda4] sm:$0xf]  ;;  %v11535_v12 = vld [vmem:[#allocation39 + $0xc90] sm:$0xf0] }
0x186a   : > { %7616 = vmatpush.bf16.msra.mxu3 %v11010_v15  ;;  %7629 = vmatpush.bf16.msrb.mxu0 %v11138_v16  ;;  %v12951_v15 = vld [vmem:[#allocation39 + $0xee4] sm:$0xf]  ;;  %v10962_v16 = vor.u32 %v12731_v48, %v10959_v54  ;;  %v11954_v54 = vor.u32 %v12979_v46, %v11951_v33  ;;  %v11682_v63 = vor.u32 %v12911_v55, %v11679_v56  ;;  %v11487_v56 = vld [vmem:[#allocation39 + $0xc30] sm:$0xf0] }
0x186b   : > { %7642 = vmatpush.bf16.msrb.mxu1 %v11266_v4  ;;  %7655 = vmatpush.bf16.msrb.mxu2 %v11394_v19  ;;  %v11967_v4 = vld [vmem:[#allocation39 + $0xff0] sm:$0xf0]  ;;  %v11218_v19 = vor.u32 %v12795_v59, %v11215_v40  ;;  %v7361_v21 = vpop.f32.mrf.mxu3  ;;  %v12879_v48 = vld [vmem:[#allocation39 + $0xca4] sm:$0xf] }
0x186c   : > { %v7362_v25 = vadd.f32 %v7361_v21, %v7349_v29  ;;  %v7400_v27 = vpop.f32.mrf.mxu2  ;;  %v11970_v45 = vor.u32 %v12983_v30, %v11967_v4  ;;  %v12975_v59 = vld [vmem:[#allocation39 + $0xfa4] sm:$0xf]  ;;  %v11791_v30 = vld [vmem:[#allocation39 + $0xe90] sm:$0xf0] }
0x186d   : > { %v7376_v34 = vpop.f32.mrf.mxu0  ;;  %v12875_v7 = vld [vmem:[#allocation39 + $0xc84] sm:$0xf] }
0x186e   : > { %7617 = vmatpush.bf16.msra.mxu3 %v10994_v44  ;;  %7630 = vmatpush.bf16.msrb.mxu0 %v11122_v32  ;;  %v11567_v44 = vld [vmem:[#allocation39 + $0xcd0] sm:$0xf0]  ;;  %v11842_v32 = vor.u32 %v12951_v15, %v11839_v18  ;;  %v7375_v38 = vadd.f32 %v7374_v62, %v7362_v25  ;;  %v7389_v42 = vpop.f32.mrf.mxu1  ;;  %v12943_v62 = vld [vmem:[#allocation39 + $0xea4] sm:$0xf] }
0x186f   : > { %7643 = vmatpush.bf16.msrb.mxu1 %v11250_v35  ;;  %7656 = vmatpush.bf16.msrb.mxu2 %v11378_v36  ;;  %v12915_v35 = vld [vmem:[#allocation39 + $0xdc4] sm:$0xf]  ;;  %v11695_v36 = vld [vmem:[#allocation39 + $0xdd0] sm:$0xf0]  ;;  %v11570_v50 = vor.u32 %v12883_v28, %v11567_v44 }
0x1870   : > { %v7388_v29 = vadd.f32 %v7387_v53, %v7375_v38  ;;  %v11698_v5 = vor.u32 %v12915_v35, %v11695_v36  ;;  %v11935_v53 = vld [vmem:[#allocation39 + $0xfb0] sm:$0xf0]  ;;  %v12939_v18 = vld [vmem:[#allocation39 + $0xe84] sm:$0xf] }
0x1871   : > { %v11938_v15 = vor.u32 %v12975_v59, %v11935_v53  ;;  %v12971_v4 = vld [vmem:[#allocation39 + $0xf84] sm:$0xf]  ;;  %v11794_v25 = vor.u32 %v12939_v18, %v11791_v30  ;;  %v11647_v44 = vld [vmem:[#allocation39 + $0xd70] sm:$0xf0] }
0x1872   : > { %7618 = vmatpush.bf16.msra.mxu3 %v10978_v51  ;;  %7631 = vmatpush.bf16.msrb.mxu0 %v11106_v52  ;;  %v11551_v51 = vld [vmem:[#allocation39 + $0xcb0] sm:$0xf0]  ;;  %v11826_v52 = vor.u32 %v12947_v37, %v11823_v43  ;;  %v12903_v28 = vld [vmem:[#allocation39 + $0xd64] sm:$0xf] }
0x1873   : > { %7644 = vmatpush.bf16.msrb.mxu1 %v11234_v57  ;;  %7657 = vmatpush.bf16.msrb.mxu2 %v11362_v58  ;;  %v15489_v57 = vadd.f32 %v7400_v27, %v7388_v29  ;;  %v11807_v58 = vld [vmem:[#allocation39 + $0xeb0] sm:$0xf0]  ;;  %v7363_v40 = vpop.f32.mrf.mxu3  ;;  %v11554_v24 = vor.u32 %v12879_v48, %v11551_v51  ;;  %v12967_v34 = vld [vmem:[#allocation39 + $0xf64] sm:$0xf]  ;;  %v11650_v37 = vor.u32 %v12903_v28, %v11647_v44  ;;  %v10309_v28 = vld [vmem:[#allocation39 + $0x2e8] sm:$0xf] }
0x1874   : > { %v7402_v3 = vpop.f32.mrf.mxu2  ;;  %v11810_v13 = vor.u32 %v12943_v62, %v11807_v58  ;;  %v11903_v35 = vld [vmem:[#allocation39 + $0xf70] sm:$0xf0]  ;;  %v12867_v38 = vld [vmem:[#allocation39 + $0xc44] sm:$0xf] }
0x1875   : > { %v11503_v42 = vld [vmem:[#allocation39 + $0xc50] sm:$0xf0]  ;;  %v11906_v46 = vor.u32 %v12967_v34, %v11903_v35  ;;  %v12899_v33 = vld [vmem:[#allocation39 + $0xd44] sm:$0xf]  ;;  %v10437_v34 = vld [vmem:[#allocation39 + $0x3e8] sm:$0xf] }
0x1876   : > { %7619 = vmatpush.bf16.msra.mxu3 %v10962_v16  ;;  %7632 = vmatpush.bf16.msrb.mxu0 %v11090_v17  ;;  %v12907_v16 = vld [vmem:[#allocation39 + $0xd84] sm:$0xf]  ;;  %v11663_v17 = vld [vmem:[#allocation39 + $0xd90] sm:$0xf0]  ;;  %v12602_v35 = vld [vmem:[#allocation39 + $0x3f4] sm:$0xf0] }
0x1877   : > { %7645 = vmatpush.bf16.msrb.mxu1 %v11218_v19  ;;  %7658 = vmatpush.bf16.msrb.mxu2 %v11346_v20  ;;  %v11919_v19 = vld [vmem:[#allocation39 + $0xf90] sm:$0xf0]  ;;  %v11538_v20 = vor.u32 %v12875_v7, %v11535_v12  ;;  %v11666_v21 = vor.u32 %v12907_v16, %v11663_v17  ;;  %v12963_v48 = vld [vmem:[#allocation39 + $0xf44] sm:$0xf] }
0x1878   : > { %v11922_v27 = vor.u32 %v12971_v4, %v11919_v19  ;;  %v11631_v29 = vld [vmem:[#allocation39 + $0xd50] sm:$0xf0]  ;;  %v12863_v55 = vld [vmem:[#allocation39 + $0xc24] sm:$0xf] }
0x1879   : > { %7620 = vmatmul.bf16.vlgmr.msra.gmra.mxu3 %v15450_v39  ;;  %7633 = vmatmul.bf16.vlgmr.msrb.gmra.mxu0 %v15452_v41  ;;  %v11887_v51 = vld [vmem:[#allocation39 + $0xf50] sm:$0xf0]  ;;  %v12895_v59 = vld [vmem:[#allocation39 + $0xd24] sm:$0xf]  ;;  %v11490_v12 = vor.u32 %v12863_v55, %v11487_v56 }
0x187a   : > { %7664 = vmatpush.bf16.msrb.mxu3 %v11586_v22  ;;  %7677 = vmatpush.bf16.msra.mxu0 %v11714_v23  ;;  %v12871_v22 = vld [vmem:[#allocation39 + $0xc64] sm:$0xf]  ;;  %v11519_v23 = vld [vmem:[#allocation39 + $0xc70] sm:$0xf0]  ;;  %v11890_v58 = vor.u32 %v12963_v48, %v11887_v51  ;;  %v10293_v48 = vld [vmem:[#allocation39 + $0x2c8] sm:$0xf] }
0x187b   : > { %7690 = vmatpush.bf16.msra.mxu1 %v11842_v32  ;;  %7703 = vmatpush.bf16.msra.mxu2 %v11970_v45  ;;  %v12935_v32 = vld [vmem:[#allocation39 + $0xe64] sm:$0xf]  ;;  %v11775_v45 = vld [vmem:[#allocation39 + $0xe70] sm:$0xf0]  ;;  %v11522_v36 = vor.u32 %v12871_v22, %v11519_v23  ;;  %v10053_v22 = vld [vmem:[#allocation39 + $0xe8] sm:$0xf] }
0x187c   : > { %7646 = vmatmul.bf16.vlgmr.msrb.gmra.mxu1 %v15454_v47  ;;  %7659 = vmatmul.bf16.vlgmr.msrb.gmra.mxu2 %v15456_v49  ;;  %v11778_v43 = vor.u32 %v12935_v32, %v11775_v45  ;;  %v11615_v53 = vld [vmem:[#allocation39 + $0xd30] sm:$0xf0]  ;;  %v12927_v40 = vld [vmem:[#allocation39 + $0xe24] sm:$0xf]  ;;  %v12506_v23 = vld [vmem:[#allocation39 + $0xf4] sm:$0xf0] }
0x187d   : > { %v11871_v3 = vld [vmem:[#allocation39 + $0xf30] sm:$0xf0]  ;;  %v12859_v7 = vld [vmem:[#allocation39 + $0xc04] sm:$0xf]  ;;  %v12570_v45 = vld [vmem:[#allocation39 + $0x2f4] sm:$0xf0] }
0x187e   : > { %7665 = vmatpush.bf16.msrb.mxu3 %v11570_v50  ;;  %7678 = vmatpush.bf16.msra.mxu0 %v11698_v5  ;;  %v12931_v50 = vld [vmem:[#allocation39 + $0xe44] sm:$0xf]  ;;  %v11759_v5 = vld [vmem:[#allocation39 + $0xe50] sm:$0xf0]  ;;  %v12566_v51 = vld [vmem:[#allocation39 + $0x2d4] sm:$0xf0] }
0x187f   : > { %7691 = vmatpush.bf16.msra.mxu1 %v11826_v52  ;;  %7704 = vmatpush.bf16.msra.mxu2 %v11954_v54  ;;  %v11506_v52 = vor.u32 %v12867_v38, %v11503_v42  ;;  %v11634_v54 = vor.u32 %v12899_v33, %v11631_v29  ;;  %v11762_v62 = vor.u32 %v12931_v50, %v11759_v5  ;;  %v12891_v16 = vld [vmem:[#allocation39 + $0xd04] sm:$0xf]  ;;  %v11599_v17 = vld [vmem:[#allocation39 + $0xd10] sm:$0xf0]  ;;  %v10165_v50 = vld [vmem:[#allocation39 + $0x1c8] sm:$0xf] }
0x1880   : > { %v12923_v4 = vld [vmem:[#allocation39 + $0xe04] sm:$0xf]  ;;  %v11727_v19 = vld [vmem:[#allocation39 + $0xe10] sm:$0xf0]  ;;  %v11602_v32 = vor.u32 %v12891_v16, %v11599_v17  ;;  %v10054_v38 = vor.u32 %v12506_v23, %v10053_v22  ;;  %v10310_v33 = vor.u32 %v12570_v45, %v10309_v28  ;;  %v10438_v29 = vor.u32 %v12602_v35, %v10437_v34  ;;  %v12534_v5 = vld [vmem:[#allocation39 + $0x1d4] sm:$0xf0] }
0x1881   : > { %v10166_v56 = vor.u32 %v12534_v5, %v10165_v50  ;;  %v10261_v22 = vld [vmem:[#allocation39 + $0x288] sm:$0xf]  ;;  %v12558_v23 = vld [vmem:[#allocation39 + $0x294] sm:$0xf0] }
0x1882   : > { %7666 = vmatpush.bf16.msrb.mxu3 %v11554_v24  ;;  %7679 = vmatpush.bf16.msra.mxu0 %v11682_v63  ;;  %v11743_v24 = vld [vmem:[#allocation39 + $0xe30] sm:$0xf0]  ;;  %v12959_v63 = vld [vmem:[#allocation39 + $0xf24] sm:$0xf]  ;;  %v9989_v35 = vld [vmem:[#allocation39 + $0x68] sm:$0xf] }
0x1883   : > { %7692 = vmatpush.bf16.msra.mxu1 %v11810_v13  ;;  %7705 = vmatpush.bf16.msra.mxu2 %v11938_v15  ;;  %v11618_v13 = vor.u32 %v12895_v59, %v11615_v53  ;;  %v11471_v15 = vld [vmem:[#allocation39 + $0xc10] sm:$0xf0]  ;;  %v11746_v18 = vor.u32 %v12927_v40, %v11743_v24  ;;  %v11874_v30 = vor.u32 %v12959_v63, %v11871_v3  ;;  %v10149_v24 = vld [vmem:[#allocation39 + $0x1a8] sm:$0xf]  ;;  %v12530_v63 = vld [vmem:[#allocation39 + $0x1b4] sm:$0xf0] }
0x1884   : > { %v11474_v44 = vor.u32 %v12859_v7, %v11471_v15  ;;  %v10294_v59 = vor.u32 %v12566_v51, %v10293_v48  ;;  %v10277_v3 = vld [vmem:[#allocation39 + $0x2a8] sm:$0xf]  ;;  %v12594_v15 = vld [vmem:[#allocation39 + $0x3b4] sm:$0xf0]  ;;  %v10150_v17 = vor.u32 %v12530_v63, %v10149_v24 }
0x1885   : > { %v12554_v5 = vld [vmem:[#allocation39 + $0x274] sm:$0xf0]  ;;  %v10373_v48 = vld [vmem:[#allocation39 + $0x368] sm:$0xf] }
0x1886   : > { %7667 = vmatpush.bf16.msrb.mxu3 %v11538_v20  ;;  %7680 = vmatpush.bf16.msra.mxu0 %v11666_v21  ;;  %v12955_v20 = vld [vmem:[#allocation39 + $0xf04] sm:$0xf]  ;;  %v11855_v21 = vld [vmem:[#allocation39 + $0xf10] sm:$0xf0]  ;;  %v12586_v51 = vld [vmem:[#allocation39 + $0x374] sm:$0xf0] }
0x1887   : > { %7693 = vmatpush.bf16.msra.mxu1 %v11794_v25  ;;  %7706 = vmatpush.bf16.msra.mxu2 %v11922_v27  ;;  %v10181_v25 = vld [vmem:[#allocation39 + $0x1e8] sm:$0xf]  ;;  %v12538_v27 = vld [vmem:[#allocation39 + $0x1f4] sm:$0xf0] }
0x1888   : > { %v10182_v42 = vor.u32 %v12538_v27, %v10181_v25  ;;  %v10389_v25 = vld [vmem:[#allocation39 + $0x388] sm:$0xf]  ;;  %v12590_v27 = vld [vmem:[#allocation39 + $0x394] sm:$0xf0] }
0x1889   : > { %v10229_v24 = vld [vmem:[#allocation39 + $0x248] sm:$0xf] }
0x188a   : > { %7668 = vmatpush.bf16.msrb.mxu3 %v11522_v36  ;;  %7681 = vmatpush.bf16.msra.mxu0 %v11650_v37  ;;  %v11730_v36 = vor.u32 %v12923_v4, %v11727_v19  ;;  %v11858_v37 = vor.u32 %v12955_v20, %v11855_v21  ;;  %v10133_v20 = vld [vmem:[#allocation39 + $0x188] sm:$0xf]  ;;  %v12526_v21 = vld [vmem:[#allocation39 + $0x194] sm:$0xf0] }
0x188b   : > { %7694 = vmatpush.bf16.msra.mxu1 %v11778_v43  ;;  %7707 = vmatpush.bf16.msra.mxu2 %v11906_v46  ;;  %v10037_v43 = vld [vmem:[#allocation39 + $0xc8] sm:$0xf]  ;;  %v12502_v46 = vld [vmem:[#allocation39 + $0xd4] sm:$0xf0] }
0x188c   : > { %v10038_v55 = vor.u32 %v12502_v46, %v10037_v43  ;;  %v10117_v43 = vld [vmem:[#allocation39 + $0x168] sm:$0xf]  ;;  %v12522_v46 = vld [vmem:[#allocation39 + $0x174] sm:$0xf0] }
0x188d   : > { %v7426_v40 = vpop.f32.mrf.mxu0 }
0x188e   : > { %7669 = vmatpush.bf16.msrb.mxu3 %v11506_v52  ;;  %7682 = vmatpush.bf16.msra.mxu0 %v11634_v54  ;;  %v10421_v52 = vld [vmem:[#allocation39 + $0x3c8] sm:$0xf]  ;;  %v12598_v54 = vld [vmem:[#allocation39 + $0x3d4] sm:$0xf0]  ;;  %v7439_v7 = vpop.f32.mrf.mxu1 }
0x188f   : > { %7695 = vmatpush.bf16.msra.mxu1 %v11762_v62  ;;  %7708 = vmatpush.bf16.msra.mxu2 %v11890_v58  ;;  %v10021_v62 = vld [vmem:[#allocation39 + $0xa8] sm:$0xf]  ;;  %v12498_v58 = vld [vmem:[#allocation39 + $0xb4] sm:$0xf0]  ;;  %v10422_v53 = vor.u32 %v12598_v54, %v10421_v52  ;;  %v10118_v54 = vor.u32 %v12522_v46, %v10117_v43 }
0x1890   : > { %v10022_v16 = vor.u32 %v12498_v58, %v10021_v62  ;;  %v10374_v58 = vor.u32 %v12586_v51, %v10373_v48  ;;  %v12542_v43 = vld [vmem:[#allocation39 + $0x214] sm:$0xf0]  ;;  %v10325_v46 = vld [vmem:[#allocation39 + $0x308] sm:$0xf] }
0x1891   : > { %v12666_v48 = vld [vmem:[#allocation39 + $0x5f4] sm:$0xf0]  ;;  %v10821_v51 = vld [vmem:[#allocation39 + $0x6e8] sm:$0xf] }
0x1892   : > { %7670 = vmatpush.bf16.msrb.mxu3 %v11490_v12  ;;  %7683 = vmatpush.bf16.msra.mxu0 %v11618_v13  ;;  %v12562_v12 = vld [vmem:[#allocation39 + $0x2b4] sm:$0xf0]  ;;  %v10405_v13 = vld [vmem:[#allocation39 + $0x3a8] sm:$0xf] }
0x1893   : > { %7696 = vmatpush.bf16.msra.mxu1 %v11746_v18  ;;  %7709 = vmatpush.bf16.msra.mxu2 %v11874_v30  ;;  %v10005_v18 = vld [vmem:[#allocation39 + $0x88] sm:$0xf]  ;;  %v12494_v30 = vld [vmem:[#allocation39 + $0x94] sm:$0xf0]  ;;  %v10278_v4 = vor.u32 %v12562_v12, %v10277_v3  ;;  %v10406_v19 = vor.u32 %v12594_v15, %v10405_v13  ;;  %v7413_v28 = vpop.f32.mrf.mxu3 }
0x1894   : > { %v7414_v45 = vadd.f32 %v7413_v28, %v15489_v57  ;;  %v7452_v34 = vpop.f32.mrf.mxu2  ;;  %v10357_v3 = vld [vmem:[#allocation39 + $0x348] sm:$0xf]  ;;  %v12582_v12 = vld [vmem:[#allocation39 + $0x354] sm:$0xf0] }
0x1895   : > { %v9941_v28 = vld [vmem:[#allocation39 + $0x8] sm:$0xf] }
0x1896   : > { %7671 = vmatpush.bf16.msrb.mxu3 %v11474_v44  ;;  %7684 = vmatpush.bf16.msra.mxu0 %v11602_v32  ;;  %v10006_v44 = vor.u32 %v12494_v30, %v10005_v18  ;;  %v10134_v32 = vor.u32 %v12526_v21, %v10133_v20  ;;  %v7441_v50 = vpop.f32.mrf.mxu1  ;;  %v12482_v18 = vld [vmem:[#allocation39 + $0x34] sm:$0xf0]  ;;  %v10213_v21 = vld [vmem:[#allocation39 + $0x228] sm:$0xf] }
0x1897   : > { %7697 = vmatpush.bf16.msra.mxu1 %v11730_v36  ;;  %7710 = vmatpush.bf16.msra.mxu2 %v11858_v37  ;;  %v12490_v36 = vld [vmem:[#allocation39 + $0x74] sm:$0xf0]  ;;  %v10262_v37 = vor.u32 %v12558_v23, %v10261_v22  ;;  %v10341_v23 = vld [vmem:[#allocation39 + $0x328] sm:$0xf] }
0x1898   : > { %v9990_v57 = vor.u32 %v12490_v36, %v9989_v35  ;;  %v12514_v20 = vld [vmem:[#allocation39 + $0x134] sm:$0xf0]  ;;  %v10069_v35 = vld [vmem:[#allocation39 + $0x108] sm:$0xf] }
0x1899   : > { %7672 = vmatmul.bf16.vlgmr.msrb.gmra.mxu3 %v15466_v60  ;;  %7685 = vmatmul.bf16.vlgmr.msra.gmra.mxu0 %v15468_v61  ;;  %v12546_v22 = vld [vmem:[#allocation39 + $0x234] sm:$0xf0] }
0x189a   : > { %7716 = vmatpush.bf16.msra.mxu3 %v10054_v38  ;;  %7729 = vmatpush.bf16.msrb.mxu0 %v10182_v42  ;;  %v10390_v38 = vor.u32 %v12590_v27, %v10389_v25  ;;  %v7428_v42 = vpop.f32.mrf.mxu0  ;;  %v12578_v25 = vld [vmem:[#allocation39 + $0x334] sm:$0xf0] }
0x189b   : > { %7742 = vmatpush.bf16.msrb.mxu1 %v10310_v33  ;;  %7755 = vmatpush.bf16.msrb.mxu2 %v10438_v29  ;;  %v10245_v33 = vld [vmem:[#allocation39 + $0x268] sm:$0xf]  ;;  %v7427_v29 = vadd.f32 %v7426_v40, %v7414_v45  ;;  %v12550_v40 = vld [vmem:[#allocation39 + $0x254] sm:$0xf0]  ;;  %v7415_v13 = vpop.f32.mrf.mxu3 }
0x189c   : > { %7698 = vmatmul.bf16.vlgmr.msra.gmra.mxu1 %v15470_v0  ;;  %7711 = vmatmul.bf16.vlgmr.msra.gmra.mxu2 %v15472_v26  ;;  %v10246_v62 = vor.u32 %v12554_v5, %v10245_v33  ;;  %v10230_v30 = vor.u32 %v12550_v40, %v10229_v24  ;;  %v12510_v36 = vld [vmem:[#allocation39 + $0x114] sm:$0xf0]  ;;  %v10197_v42 = vld [vmem:[#allocation39 + $0x208] sm:$0xf] }
0x189d   : > { %v7440_v52 = vadd.f32 %v7439_v7, %v7427_v29  ;;  %v12574_v33 = vld [vmem:[#allocation39 + $0x314] sm:$0xf0]  ;;  %v10565_v29 = vld [vmem:[#allocation39 + $0x4e8] sm:$0xf] }
0x189e   : > { %7717 = vmatpush.bf16.msra.mxu3 %v10038_v55  ;;  %7730 = vmatpush.bf16.msrb.mxu0 %v10166_v56  ;;  %v9973_v55 = vld [vmem:[#allocation39 + $0x48] sm:$0xf]  ;;  %v12486_v56 = vld [vmem:[#allocation39 + $0x54] sm:$0xf0] }
0x189f   : > { %7743 = vmatpush.bf16.msrb.mxu1 %v10294_v59  ;;  %7756 = vmatpush.bf16.msrb.mxu2 %v10422_v53  ;;  %v10101_v59 = vld [vmem:[#allocation39 + $0x148] sm:$0xf]  ;;  %v12518_v53 = vld [vmem:[#allocation39 + $0x154] sm:$0xf0]  ;;  %v7453_v63 = vadd.f32 %v7452_v34, %v7440_v52  ;;  %v9974_v15 = vor.u32 %v12486_v56, %v9973_v55 }
0x18a0   : > { %v10102_v7 = vor.u32 %v12518_v53, %v10101_v59  ;;  %v12478_v34 = vld [vmem:[#allocation39 + $0x14] sm:$0xf0]  ;;  %v10693_v5 = vld [vmem:[#allocation39 + $0x5e8] sm:$0xf] }
0x18a1   : > { %v12634_v50 = vld [vmem:[#allocation39 + $0x4f4] sm:$0xf0]  ;;  %v9942_v52 = vor.u32 %v12478_v34, %v9941_v28  ;;  %v10949_v55 = vld [vmem:[#allocation39 + $0x7e8] sm:$0xf] }
0x18a2   : > { %7718 = vmatpush.bf16.msra.mxu3 %v10022_v16  ;;  %7731 = vmatpush.bf16.msrb.mxu0 %v10150_v17  ;;  %v7454_v16 = vpop.f32.mrf.mxu2  ;;  %v9957_v17 = vld [vmem:[#allocation39 + $0x28] sm:$0xf]  ;;  %v7478_v27 = vpop.f32.mrf.mxu0  ;;  %v12730_v56 = vld [vmem:[#allocation39 + $0x7f4] sm:$0xf0]  ;;  %v10566_v40 = vor.u32 %v12634_v50, %v10565_v29 }
0x18a3   : > { %7744 = vmatpush.bf16.msrb.mxu1 %v10278_v4  ;;  %7757 = vmatpush.bf16.msrb.mxu2 %v10406_v19  ;;  %v10358_v4 = vor.u32 %v12582_v12, %v10357_v3  ;;  %v10085_v19 = vld [vmem:[#allocation39 + $0x128] sm:$0xf]  ;;  %v7465_v59 = vpop.f32.mrf.mxu3  ;;  %v10694_v3 = vor.u32 %v12666_v48, %v10693_v5  ;;  %v12630_v13 = vld [vmem:[#allocation39 + $0x4d4] sm:$0xf0] }
0x18a4   : > { %v10086_v45 = vor.u32 %v12514_v20, %v10085_v19  ;;  %v7466_v53 = vadd.f32 %v7465_v59, %v7453_v63  ;;  %v10549_v12 = vld [vmem:[#allocation39 + $0x4c8] sm:$0xf]  ;;  %v12694_v20 = vld [vmem:[#allocation39 + $0x6d4] sm:$0xf0] }
0x18a5   : > { %v10533_v28 = vld [vmem:[#allocation39 + $0x4a8] sm:$0xf]  ;;  %v12622_v5 = vld [vmem:[#allocation39 + $0x494] sm:$0xf0] }
0x18a6   : > { %7719 = vmatpush.bf16.msra.mxu3 %v10006_v44  ;;  %7732 = vmatpush.bf16.msrb.mxu0 %v10134_v32  ;;  %v7491_v44 = vpop.f32.mrf.mxu1  ;;  %v9958_v32 = vor.u32 %v12482_v18, %v9957_v17  ;;  %v10677_v17 = vld [vmem:[#allocation39 + $0x5c8] sm:$0xf]  ;;  %v12662_v18 = vld [vmem:[#allocation39 + $0x5d4] sm:$0xf0] }
0x18a7   : > { %7745 = vmatpush.bf16.msrb.mxu1 %v10262_v37  ;;  %7758 = vmatpush.bf16.msrb.mxu2 %v10390_v38  ;;  %v10214_v37 = vor.u32 %v12546_v22, %v10213_v21  ;;  %v10342_v38 = vor.u32 %v12578_v25, %v10341_v23  ;;  %v10933_v21 = vld [vmem:[#allocation39 + $0x7c8] sm:$0xf]  ;;  %v12726_v22 = vld [vmem:[#allocation39 + $0x7d4] sm:$0xf0]  ;;  %v10550_v23 = vor.u32 %v12630_v13, %v10549_v12 }
0x18a8   : > { %v10678_v25 = vor.u32 %v12662_v18, %v10677_v17  ;;  %v10934_v34 = vor.u32 %v12726_v22, %v10933_v21  ;;  %v10517_v50 = vld [vmem:[#allocation39 + $0x488] sm:$0xf]  ;;  %v12682_v17 = vld [vmem:[#allocation39 + $0x674] sm:$0xf0] }
0x18a9   : > { %v10629_v12 = vld [vmem:[#allocation39 + $0x568] sm:$0xf]  ;;  %v12614_v22 = vld [vmem:[#allocation39 + $0x454] sm:$0xf0] }
0x18aa   : > { %7720 = vmatpush.bf16.msra.mxu3 %v9990_v57  ;;  %7733 = vmatpush.bf16.msrb.mxu0 %v10118_v54  ;;  %v10070_v57 = vor.u32 %v12510_v36, %v10069_v35  ;;  %v12698_v54 = vld [vmem:[#allocation39 + $0x6f4] sm:$0xf0]  ;;  %v7504_v24 = vpop.f32.mrf.mxu2  ;;  %v7480_v16 = vpop.f32.mrf.mxu0  ;;  %v10661_v35 = vld [vmem:[#allocation39 + $0x5a8] sm:$0xf] }
0x18ab   : > { %7746 = vmatpush.bf16.msrb.mxu1 %v10246_v62  ;;  %7759 = vmatpush.bf16.msrb.mxu2 %v10374_v58  ;;  %v10198_v62 = vor.u32 %v12542_v43, %v10197_v42  ;;  %v10326_v58 = vor.u32 %v12574_v33, %v10325_v46  ;;  %v12658_v36 = vld [vmem:[#allocation39 + $0x5b4] sm:$0xf0]  ;;  %v7467_v43 = vpop.f32.mrf.mxu3  ;;  %v10757_v16 = vld [vmem:[#allocation39 + $0x668] sm:$0xf] }
0x18ac   : > { %v12722_v42 = vld [vmem:[#allocation39 + $0x7b4] sm:$0xf0]  ;;  %v10662_v29 = vor.u32 %v12658_v36, %v10661_v35  ;;  %v10885_v18 = vld [vmem:[#allocation39 + $0x768] sm:$0xf] }
0x18ad   : > { %v10485_v21 = vld [vmem:[#allocation39 + $0x448] sm:$0xf]  ;;  %v12678_v36 = vld [vmem:[#allocation39 + $0x654] sm:$0xf0] }
0x18ae   : > { %7721 = vmatpush.bf16.msra.mxu3 %v9974_v15  ;;  %7734 = vmatpush.bf16.msrb.mxu0 %v10102_v7  ;;  %v10822_v15 = vor.u32 %v12698_v54, %v10821_v51  ;;  %v10950_v7 = vor.u32 %v12730_v56, %v10949_v55  ;;  %v7493_v19 = vpop.f32.mrf.mxu1  ;;  %v10773_v54 = vld [vmem:[#allocation39 + $0x688] sm:$0xf]  ;;  %v12686_v55 = vld [vmem:[#allocation39 + $0x694] sm:$0xf0]  ;;  %v10486_v43 = vor.u32 %v12614_v22, %v10485_v21 }
0x18af   : > { %7747 = vmatpush.bf16.msrb.mxu1 %v10230_v30  ;;  %7760 = vmatpush.bf16.msrb.mxu2 %v10358_v4  ;;  %v10805_v30 = vld [vmem:[#allocation39 + $0x6c8] sm:$0xf]  ;;  %v7479_v4 = vadd.f32 %v7478_v27, %v7466_v53  ;;  %v10518_v53 = vor.u32 %v12622_v5, %v10517_v50  ;;  %v10774_v13 = vor.u32 %v12686_v55, %v10773_v54  ;;  %v12674_v54 = vld [vmem:[#allocation39 + $0x634] sm:$0xf0] }
0x18b0   : > { %v10789_v27 = vld [vmem:[#allocation39 + $0x6a8] sm:$0xf]  ;;  %v12794_v21 = vld [vmem:[#allocation39 + $0x9f4] sm:$0xf0] }
0x18b1   : > { %v7492_v63 = vadd.f32 %v7491_v44, %v7479_v4  ;;  %v12690_v44 = vld [vmem:[#allocation39 + $0x6b4] sm:$0xf0]  ;;  %v10901_v56 = vld [vmem:[#allocation39 + $0x788] sm:$0xf]  ;;  %v7293_v4 = vperm.slane %v15486_v31, 1 }
0x18b2   : > { %7722 = vmatpush.bf16.msra.mxu3 %v9958_v32  ;;  %7735 = vmatpush.bf16.msrb.mxu0 %v10086_v45  ;;  %v12626_v32 = vld [vmem:[#allocation39 + $0x4b4] sm:$0xf0]  ;;  %v10806_v45 = vor.u32 %v12694_v20, %v10805_v30  ;;  %v7506_v46 = vpop.f32.mrf.mxu2  ;;  %v10790_v48 = vor.u32 %v12690_v44, %v10789_v27  ;;  %v10869_v27 = vld [vmem:[#allocation39 + $0x748] sm:$0xf] }
0x18b3   : > { %7748 = vmatpush.bf16.msrb.mxu1 %v10214_v37  ;;  %7761 = vmatpush.bf16.msrb.mxu2 %v10342_v38  ;;  %v15500_v37 = vadd.f32 %v7504_v24, %v7492_v63  ;;  %v10917_v38 = vld [vmem:[#allocation39 + $0x7a8] sm:$0xf]  ;;  %v10534_v33 = vor.u32 %v12626_v32, %v10533_v28  ;;  %v12714_v30 = vld [vmem:[#allocation39 + $0x774] sm:$0xf0]  ;;  %v10758_v63 = vor.u32 %v12682_v17, %v10757_v16 }
0x18b4   : > { %v10918_v51 = vor.u32 %v12722_v42, %v10917_v38  ;;  %v10613_v28 = vld [vmem:[#allocation39 + $0x548] sm:$0xf]  ;;  %v12646_v32 = vld [vmem:[#allocation39 + $0x554] sm:$0xf0] }
0x18b5   : > { %v12710_v44 = vld [vmem:[#allocation39 + $0x754] sm:$0xf0]  ;;  %v10614_v46 = vor.u32 %v12646_v32, %v10613_v28  ;;  %v10853_v55 = vld [vmem:[#allocation39 + $0x728] sm:$0xf] }
0x18b6   : > { %7723 = vmatpush.bf16.msra.mxu3 %v9942_v52  ;;  %7736 = vmatpush.bf16.msrb.mxu0 %v10070_v57  ;;  %v10645_v52 = vld [vmem:[#allocation39 + $0x588] sm:$0xf]  ;;  %v12654_v57 = vld [vmem:[#allocation39 + $0x594] sm:$0xf0]  ;;  %v10870_v5 = vor.u32 %v12710_v44, %v10869_v27 }
0x18b7   : > { %7749 = vmatpush.bf16.msrb.mxu1 %v10198_v62  ;;  %7762 = vmatpush.bf16.msrb.mxu2 %v10326_v58  ;;  %v12718_v62 = vld [vmem:[#allocation39 + $0x794] sm:$0xf0]  ;;  %v7530_v58 = vpop.f32.mrf.mxu0  ;;  %v10646_v24 = vor.u32 %v12654_v57, %v10645_v52  ;;  %v10725_v52 = vld [vmem:[#allocation39 + $0x628] sm:$0xf] }
0x18b8   : > { %v10709_v16 = vld [vmem:[#allocation39 + $0x608] sm:$0xf]  ;;  %v12858_v32 = vld [vmem:[#allocation39 + $0xbf4] sm:$0xf0] }
0x18b9   : > { %7724 = vmatmul.bf16.vlgmr.msra.gmra.mxu3 %v15399_v8  ;;  %7737 = vmatmul.bf16.vlgmr.msrb.gmra.mxu0 %v15401_v9  ;;  %v7543_v59 = vpop.f32.mrf.mxu1  ;;  %v10837_v17 = vld [vmem:[#allocation39 + $0x708] sm:$0xf]  ;;  %v12758_v44 = vld [vmem:[#allocation39 + $0x8d4] sm:$0xf0] }
0x18ba   : > { %7768 = vmatpush.bf16.msrb.mxu3 %v10566_v40  ;;  %7781 = vmatpush.bf16.msra.mxu0 %v10694_v3  ;;  %v10501_v40 = vld [vmem:[#allocation39 + $0x468] sm:$0xf]  ;;  %v12618_v3 = vld [vmem:[#allocation39 + $0x474] sm:$0xf0] }
0x18bb   : > { %7794 = vmatpush.bf16.msra.mxu1 %v10822_v15  ;;  %7807 = vmatpush.bf16.msra.mxu2 %v10950_v7  ;;  %v10902_v15 = vor.u32 %v12718_v62, %v10901_v56  ;;  %v12650_v7 = vld [vmem:[#allocation39 + $0x574] sm:$0xf0]  ;;  %v10502_v19 = vor.u32 %v12618_v3, %v10501_v40  ;;  %v10453_v62 = vld [vmem:[#allocation39 + $0x408] sm:$0xf] }
0x18bc   : > { %7750 = vmatmul.bf16.vlgmr.msrb.gmra.mxu1 %v15403_v10  ;;  %7763 = vmatmul.bf16.vlgmr.msrb.gmra.mxu2 %v15405_v11  ;;  %v10630_v20 = vor.u32 %v12650_v7, %v10629_v12  ;;  %v12706_v56 = vld [vmem:[#allocation39 + $0x734] sm:$0xf0]  ;;  %v10581_v3 = vld [vmem:[#allocation39 + $0x508] sm:$0xf] }
0x18bd   : > { %v12606_v40 = vld [vmem:[#allocation39 + $0x414] sm:$0xf0]  ;;  %v11333_v22 = vld [vmem:[#allocation39 + $0xae8] sm:$0xf] }
0x18be   : > { %7769 = vmatpush.bf16.msrb.mxu3 %v10550_v23  ;;  %7782 = vmatpush.bf16.msra.mxu0 %v10678_v25  ;;  %v10886_v23 = vor.u32 %v12714_v30, %v10885_v18  ;;  %v7517_v25 = vpop.f32.mrf.mxu3  ;;  %v12638_v12 = vld [vmem:[#allocation39 + $0x514] sm:$0xf0]  ;;  %v11461_v28 = vld [vmem:[#allocation39 + $0xbe8] sm:$0xf] }
0x18bf   : > { %7795 = vmatpush.bf16.msra.mxu1 %v10806_v45  ;;  %7808 = vmatpush.bf16.msra.mxu2 %v10934_v34  ;;  %v10741_v45 = vld [vmem:[#allocation39 + $0x648] sm:$0xf]  ;;  %v7518_v34 = vadd.f32 %v7517_v25, %v7293_v4  ;;  %v7556_v35 = vpop.f32.mrf.mxu2  ;;  %v7532_v31 = vpop.f32.mrf.mxu0  ;;  %v12702_v30 = vld [vmem:[#allocation39 + $0x714] sm:$0xf0] }
0x18c0   : > { %v10742_v50 = vor.u32 %v12678_v36, %v10741_v45  ;;  %v11077_v4 = vld [vmem:[#allocation39 + $0x8e8] sm:$0xf]  ;;  %v12826_v25 = vld [vmem:[#allocation39 + $0xaf4] sm:$0xf0] }
0x18c1   : > { %v7531_v38 = vadd.f32 %v7530_v58, %v7518_v34  ;;  %v7545_v42 = vpop.f32.mrf.mxu1  ;;  %v10838_v34 = vor.u32 %v12702_v30, %v10837_v17  ;;  %v11061_v27 = vld [vmem:[#allocation39 + $0x8c8] sm:$0xf]  ;;  %v11334_v31 = vor.u32 %v12826_v25, %v11333_v22  ;;  %v12782_v17 = vld [vmem:[#allocation39 + $0x994] sm:$0xf0] }
0x18c2   : > { %7770 = vmatpush.bf16.msrb.mxu3 %v10534_v33  ;;  %7783 = vmatpush.bf16.msra.mxu0 %v10662_v29  ;;  %v10469_v33 = vld [vmem:[#allocation39 + $0x428] sm:$0xf]  ;;  %v12610_v29 = vld [vmem:[#allocation39 + $0x434] sm:$0xf0] }
0x18c3   : > { %7796 = vmatpush.bf16.msra.mxu1 %v10790_v48  ;;  %7809 = vmatpush.bf16.msra.mxu2 %v10918_v51  ;;  %v10597_v48 = vld [vmem:[#allocation39 + $0x528] sm:$0xf]  ;;  %v12642_v51 = vld [vmem:[#allocation39 + $0x534] sm:$0xf0]  ;;  %v7544_v57 = vadd.f32 %v7543_v59, %v7531_v38  ;;  %v10470_v58 = vor.u32 %v12610_v29, %v10469_v33  ;;  %v11462_v38 = vor.u32 %v12858_v32, %v11461_v28 }
0x18c4   : > { %v12670_v59 = vld [vmem:[#allocation39 + $0x614] sm:$0xf0]  ;;  %v11189_v42 = vld [vmem:[#allocation39 + $0x9c8] sm:$0xf] }
0x18c5   : > { %v10710_v45 = vor.u32 %v12670_v59, %v10709_v16  ;;  %v12822_v33 = vld [vmem:[#allocation39 + $0xad4] sm:$0xf0]  ;;  %v11445_v29 = vld [vmem:[#allocation39 + $0xbc8] sm:$0xf] }
0x18c6   : > { %7771 = vmatpush.bf16.msrb.mxu3 %v10518_v53  ;;  %7784 = vmatpush.bf16.msra.mxu0 %v10646_v24  ;;  %v15507_v53 = vadd.f32 %v7556_v35, %v7544_v57  ;;  %v10598_v24 = vor.u32 %v12642_v51, %v10597_v48  ;;  %v7519_v7 = vpop.f32.mrf.mxu3  ;;  %v11045_v51 = vld [vmem:[#allocation39 + $0x8a8] sm:$0xf]  ;;  %v12814_v30 = vld [vmem:[#allocation39 + $0xa94] sm:$0xf0] }
0x18c7   : > { %7797 = vmatpush.bf16.msra.mxu1 %v10774_v13  ;;  %7810 = vmatpush.bf16.msra.mxu2 %v10902_v15  ;;  %v10726_v13 = vor.u32 %v12674_v54, %v10725_v52  ;;  %v10854_v15 = vor.u32 %v12706_v56, %v10853_v55  ;;  %v7558_v18 = vpop.f32.mrf.mxu2  ;;  %v12754_v52 = vld [vmem:[#allocation39 + $0x8b4] sm:$0xf0]  ;;  %v11173_v55 = vld [vmem:[#allocation39 + $0x9a8] sm:$0xf] }
0x18c8   : > { %v12786_v56 = vld [vmem:[#allocation39 + $0x9b4] sm:$0xf0]  ;;  %v11157_v59 = vld [vmem:[#allocation39 + $0x988] sm:$0xf] }
0x18c9   : > { %v11285_v18 = vld [vmem:[#allocation39 + $0xa88] sm:$0xf]  ;;  %v12746_v25 = vld [vmem:[#allocation39 + $0x874] sm:$0xf0] }
0x18ca   : > { %7772 = vmatpush.bf16.msrb.mxu3 %v10502_v19  ;;  %7785 = vmatpush.bf16.msra.mxu0 %v10630_v20  ;;  %v12762_v19 = vld [vmem:[#allocation39 + $0x8f4] sm:$0xf0]  ;;  %v11205_v20 = vld [vmem:[#allocation39 + $0x9e8] sm:$0xf]  ;;  %v11286_v28 = vor.u32 %v12814_v30, %v11285_v18 }
0x18cb   : > { %7798 = vmatpush.bf16.msra.mxu1 %v10758_v63  ;;  %7811 = vmatpush.bf16.msra.mxu2 %v10886_v23  ;;  %v10454_v63 = vor.u32 %v12606_v40, %v10453_v62  ;;  %v10582_v23 = vor.u32 %v12638_v12, %v10581_v3  ;;  %v11078_v35 = vor.u32 %v12762_v19, %v11077_v4  ;;  %v11301_v62 = vld [vmem:[#allocation39 + $0xaa8] sm:$0xf]  ;;  %v12850_v40 = vld [vmem:[#allocation39 + $0xbb4] sm:$0xf0] }
0x18cc   : > { %v11206_v36 = vor.u32 %v12794_v21, %v11205_v20  ;;  %v11046_v3 = vor.u32 %v12754_v52, %v11045_v51  ;;  %v11174_v12 = vor.u32 %v12786_v56, %v11173_v55  ;;  %v11413_v4 = vld [vmem:[#allocation39 + $0xb88] sm:$0xf]  ;;  %v12846_v19 = vld [vmem:[#allocation39 + $0xb94] sm:$0xf0] }
0x18cd   : > { %v11414_v32 = vor.u32 %v12846_v19, %v11413_v4  ;;  %v12838_v55 = vld [vmem:[#allocation39 + $0xb54] sm:$0xf0]  ;;  %v11365_v18 = vld [vmem:[#allocation39 + $0xb28] sm:$0xf] }
0x18ce   : > { %7773 = vmatpush.bf16.msrb.mxu3 %v10486_v43  ;;  %7786 = vmatpush.bf16.msra.mxu0 %v10614_v46  ;;  %v12790_v43 = vld [vmem:[#allocation39 + $0x9d4] sm:$0xf0]  ;;  %v11317_v46 = vld [vmem:[#allocation39 + $0xac8] sm:$0xf] }
0x18cf   : > { %7799 = vmatpush.bf16.msra.mxu1 %v10742_v50  ;;  %7812 = vmatpush.bf16.msra.mxu2 %v10870_v5  ;;  %v12854_v50 = vld [vmem:[#allocation39 + $0xbd4] sm:$0xf0]  ;;  %v11062_v5 = vor.u32 %v12758_v44, %v11061_v27  ;;  %v11190_v48 = vor.u32 %v12790_v43, %v11189_v42  ;;  %v11318_v57 = vor.u32 %v12822_v33, %v11317_v46  ;;  %v11397_v27 = vld [vmem:[#allocation39 + $0xb68] sm:$0xf] }
0x18d0   : > { %v11446_v54 = vor.u32 %v12854_v50, %v11445_v29  ;;  %v12842_v44 = vld [vmem:[#allocation39 + $0xb74] sm:$0xf0]  ;;  %v10997_v42 = vld [vmem:[#allocation39 + $0x848] sm:$0xf] }
0x18d1   : > { %v12742_v43 = vld [vmem:[#allocation39 + $0x854] sm:$0xf0]  ;;  %v11398_v33 = vor.u32 %v12842_v44, %v11397_v27  ;;  %v11125_v50 = vld [vmem:[#allocation39 + $0x948] sm:$0xf] }
0x18d2   : > { %7774 = vmatpush.bf16.msrb.mxu3 %v10470_v58  ;;  %7787 = vmatpush.bf16.msra.mxu0 %v10598_v24  ;;  %v12818_v58 = vld [vmem:[#allocation39 + $0xab4] sm:$0xf0]  ;;  %v11429_v24 = vld [vmem:[#allocation39 + $0xba8] sm:$0xf] }
0x18d3   : > { %7800 = vmatpush.bf16.msra.mxu1 %v10726_v13  ;;  %7813 = vmatpush.bf16.msra.mxu2 %v10854_v15  ;;  %v11029_v13 = vld [vmem:[#allocation39 + $0x888] sm:$0xf]  ;;  %v12750_v15 = vld [vmem:[#allocation39 + $0x894] sm:$0xf0]  ;;  %v11302_v7 = vor.u32 %v12818_v58, %v11301_v62  ;;  %v11430_v16 = vor.u32 %v12850_v40, %v11429_v24  ;;  %v10998_v24 = vor.u32 %v12742_v43, %v10997_v42 }
0x18d4   : > { %v11030_v22 = vor.u32 %v12750_v15, %v11029_v13  ;;  %v12834_v30 = vld [vmem:[#allocation39 + $0xb34] sm:$0xf0]  ;;  %v10965_v4 = vld [vmem:[#allocation39 + $0x808] sm:$0xf] }
0x18d5   : > { %v12830_v27 = vld [vmem:[#allocation39 + $0xb14] sm:$0xf0]  ;;  %v11589_v44 = vld [vmem:[#allocation39 + $0xce8] sm:$0xf] }
0x18d6   : > { %7775 = vmatpush.bf16.msrb.mxu3 %v10454_v63  ;;  %7788 = vmatpush.bf16.msra.mxu0 %v10582_v23  ;;  %v7582_v20 = vpop.f32.mrf.mxu0  ;;  %v11158_v63 = vor.u32 %v12782_v17, %v11157_v59  ;;  %v11013_v23 = vld [vmem:[#allocation39 + $0x868] sm:$0xf]  ;;  %v12802_v17 = vld [vmem:[#allocation39 + $0xa34] sm:$0xf0] }
0x18d7   : > { %7801 = vmatpush.bf16.msra.mxu1 %v10710_v45  ;;  %7814 = vmatpush.bf16.msra.mxu2 %v10838_v34  ;;  %v11141_v45 = vld [vmem:[#allocation39 + $0x968] sm:$0xf]  ;;  %v12778_v34 = vld [vmem:[#allocation39 + $0x974] sm:$0xf0] }
0x18d8   : > { %v12922_v42 = vld [vmem:[#allocation39 + $0xdf4] sm:$0xf0]  ;;  %v11845_v43 = vld [vmem:[#allocation39 + $0xee8] sm:$0xf] }
0x18d9   : > { %7776 = vmatmul.bf16.vlgmr.msrb.gmra.mxu3 %v15421_v2  ;;  %7789 = vmatmul.bf16.vlgmr.msra.gmra.mxu0 %v15423_v6  ;;  %v7595_v21 = vpop.f32.mrf.mxu1 }
0x18da   : > { %7820 = vmatpush.bf16.msra.mxu3 %v11078_v35  ;;  %7833 = vmatpush.bf16.msrb.mxu0 %v11206_v36  ;;  %v11269_v35 = vld [vmem:[#allocation39 + $0xa68] sm:$0xf]  ;;  %v12810_v36 = vld [vmem:[#allocation39 + $0xa74] sm:$0xf0] }
0x18db   : > { %7846 = vmatpush.bf16.msrb.mxu1 %v11334_v31  ;;  %7859 = vmatpush.bf16.msrb.mxu2 %v11462_v38  ;;  %v11014_v31 = vor.u32 %v12746_v25, %v11013_v23  ;;  %v11142_v38 = vor.u32 %v12778_v34, %v11141_v45  ;;  %v11270_v46 = vor.u32 %v12810_v36, %v11269_v35  ;;  %v11093_v23 = vld [vmem:[#allocation39 + $0x908] sm:$0xf]  ;;  %v12766_v25 = vld [vmem:[#allocation39 + $0x914] sm:$0xf0] }
0x18dc   : > { %7802 = vmatmul.bf16.vlgmr.msra.gmra.mxu1 %v15425_v1  ;;  %7815 = vmatmul.bf16.vlgmr.msra.gmra.mxu2 %v15427_v14  ;;  %v7569_v29 = vpop.f32.mrf.mxu3  ;;  %v11221_v34 = vld [vmem:[#allocation39 + $0xa08] sm:$0xf] }
0x18dd   : > { %v7570_v51 = vadd.f32 %v7569_v29, %v15507_v53  ;;  %v11237_v53 = vld [vmem:[#allocation39 + $0xa28] sm:$0xf]  ;;  %v12954_v29 = vld [vmem:[#allocation39 + $0xef4] sm:$0xf0] }
0x18de   : > { %7821 = vmatpush.bf16.msra.mxu3 %v11062_v5  ;;  %7834 = vmatpush.bf16.msrb.mxu0 %v11190_v48  ;;  %v12774_v5 = vld [vmem:[#allocation39 + $0x954] sm:$0xf0]  ;;  %v11253_v48 = vld [vmem:[#allocation39 + $0xa48] sm:$0xf]  ;;  %v7584_v56 = vpop.f32.mrf.mxu0 }
0x18df   : > { %7847 = vmatpush.bf16.msrb.mxu1 %v11318_v57  ;;  %7860 = vmatpush.bf16.msrb.mxu2 %v11446_v54  ;;  %v7608_v52 = vpop.f32.mrf.mxu2  ;;  %v12806_v57 = vld [vmem:[#allocation39 + $0xa54] sm:$0xf0]  ;;  %v11381_v54 = vld [vmem:[#allocation39 + $0xb48] sm:$0xf]  ;;  %v7583_v62 = vadd.f32 %v7582_v20, %v7570_v51  ;;  %v11126_v40 = vor.u32 %v12774_v5, %v11125_v50  ;;  %v11846_v56 = vor.u32 %v12954_v29, %v11845_v43 }
0x18e0   : > { %v11254_v13 = vor.u32 %v12806_v57, %v11253_v48  ;;  %v11382_v15 = vor.u32 %v12838_v55, %v11381_v54  ;;  %v11349_v35 = vld [vmem:[#allocation39 + $0xb08] sm:$0xf]  ;;  %v12986_v5 = vld [vmem:[#allocation39 + $0xff4] sm:$0xf0] }
0x18e1   : > { %v7597_v58 = vpop.f32.mrf.mxu1  ;;  %v7596_v59 = vadd.f32 %v7595_v21, %v7583_v62  ;;  %v12798_v21 = vld [vmem:[#allocation39 + $0xa14] sm:$0xf0]  ;;  %v11973_v50 = vld [vmem:[#allocation39 + $0xfe8] sm:$0xf]  ;;  %v11350_v51 = vor.u32 %v12830_v27, %v11349_v35 }
0x18e2   : > { %7822 = vmatpush.bf16.msra.mxu3 %v11046_v3  ;;  %7835 = vmatpush.bf16.msrb.mxu0 %v11174_v12  ;;  %v10981_v3 = vld [vmem:[#allocation39 + $0x828] sm:$0xf]  ;;  %v12738_v12 = vld [vmem:[#allocation39 + $0x834] sm:$0xf0]  ;;  %v11222_v48 = vor.u32 %v12798_v21, %v11221_v34  ;;  %v11974_v62 = vor.u32 %v12986_v5, %v11973_v50 }
0x18e3   : > { %7848 = vmatpush.bf16.msrb.mxu1 %v11302_v7  ;;  %7861 = vmatpush.bf16.msrb.mxu2 %v11430_v16  ;;  %v11109_v7 = vld [vmem:[#allocation39 + $0x928] sm:$0xf]  ;;  %v12770_v16 = vld [vmem:[#allocation39 + $0x934] sm:$0xf0]  ;;  %v15514_v19 = vadd.f32 %v7608_v52, %v7596_v59  ;;  %v10982_v20 = vor.u32 %v12738_v12, %v10981_v3 }
0x18e4   : > { %v7571_v45 = vpop.f32.mrf.mxu3  ;;  %v11573_v54 = vld [vmem:[#allocation39 + $0xcc8] sm:$0xf]  ;;  %v12886_v55 = vld [vmem:[#allocation39 + $0xcd4] sm:$0xf0] }
0x18e5   : > { %v11701_v58 = vld [vmem:[#allocation39 + $0xdc8] sm:$0xf]  ;;  %v12950_v3 = vld [vmem:[#allocation39 + $0xed4] sm:$0xf0] }
0x18e6   : > { %7823 = vmatpush.bf16.msra.mxu3 %v11030_v22  ;;  %7836 = vmatpush.bf16.msrb.mxu0 %v11158_v63  ;;  %v11110_v22 = vor.u32 %v12770_v16, %v11109_v7  ;;  %v12734_v63 = vld [vmem:[#allocation39 + $0x814] sm:$0xf0]  ;;  %v11957_v12 = vld [vmem:[#allocation39 + $0xfc8] sm:$0xf] }
0x18e7   : > { %7849 = vmatpush.bf16.msrb.mxu1 %v11286_v28  ;;  %7862 = vmatpush.bf16.msrb.mxu2 %v11414_v32  ;;  %v11238_v28 = vor.u32 %v12802_v17, %v11237_v53  ;;  %v11366_v32 = vor.u32 %v12834_v30, %v11365_v18  ;;  %v7610_v36 = vpop.f32.mrf.mxu2  ;;  %v11557_v16 = vld [vmem:[#allocation39 + $0xca8] sm:$0xf]  ;;  %v12882_v53 = vld [vmem:[#allocation39 + $0xcb4] sm:$0xf0] }
0x18e8   : > { %v11685_v18 = vld [vmem:[#allocation39 + $0xda8] sm:$0xf]  ;;  %v12914_v30 = vld [vmem:[#allocation39 + $0xdb4] sm:$0xf0] }
0x18e9   : > { %v11669_v21 = vld [vmem:[#allocation39 + $0xd88] sm:$0xf]  ;;  %v12910_v35 = vld [vmem:[#allocation39 + $0xd94] sm:$0xf0] }
0x18ea   : > { %7824 = vmatpush.bf16.msra.mxu3 %v11014_v31  ;;  %7837 = vmatpush.bf16.msrb.mxu0 %v11142_v38  ;;  %v12890_v31 = vld [vmem:[#allocation39 + $0xcf4] sm:$0xf0]  ;;  %v11717_v38 = vld [vmem:[#allocation39 + $0xde8] sm:$0xf] }
0x18eb   : > { %7850 = vmatpush.bf16.msrb.mxu1 %v11270_v46  ;;  %7863 = vmatpush.bf16.msrb.mxu2 %v11398_v33  ;;  %v10966_v46 = vor.u32 %v12734_v63, %v10965_v4  ;;  %v11094_v33 = vor.u32 %v12766_v25, %v11093_v23  ;;  %v11590_v52 = vor.u32 %v12890_v31, %v11589_v44  ;;  %v11813_v4 = vld [vmem:[#allocation39 + $0xea8] sm:$0xf]  ;;  %v12978_v63 = vld [vmem:[#allocation39 + $0xfb4] sm:$0xf0] }
0x18ec   : > { %v11718_v57 = vor.u32 %v12922_v42, %v11717_v38  ;;  %v11558_v23 = vor.u32 %v12882_v53, %v11557_v16  ;;  %v11686_v25 = vor.u32 %v12914_v30, %v11685_v18  ;;  %v11797_v36 = vld [vmem:[#allocation39 + $0xe88] sm:$0xf]  ;;  %v12942_v27 = vld [vmem:[#allocation39 + $0xe94] sm:$0xf0] }
0x18ed   : > { %v11925_v44 = vld [vmem:[#allocation39 + $0xf88] sm:$0xf]  ;;  %v12974_v31 = vld [vmem:[#allocation39 + $0xf94] sm:$0xf0]  ;;  %v11798_v50 = vor.u32 %v12942_v27, %v11797_v36 }
0x18ee   : > { %7825 = vmatpush.bf16.msra.mxu3 %v10998_v24  ;;  %7838 = vmatpush.bf16.msrb.mxu0 %v11126_v40  ;;  %v12918_v24 = vld [vmem:[#allocation39 + $0xdd4] sm:$0xf0]  ;;  %v11829_v40 = vld [vmem:[#allocation39 + $0xec8] sm:$0xf]  ;;  %v11926_v5 = vor.u32 %v12974_v31, %v11925_v44 }
0x18ef   : > { %7851 = vmatpush.bf16.msrb.mxu1 %v11254_v13  ;;  %7864 = vmatpush.bf16.msrb.mxu2 %v11382_v15  ;;  %v12982_v13 = vld [vmem:[#allocation39 + $0xfd4] sm:$0xf0]  ;;  %v11574_v15 = vor.u32 %v12886_v55, %v11573_v54  ;;  %v11702_v7 = vor.u32 %v12918_v24, %v11701_v58  ;;  %v11830_v59 = vor.u32 %v12950_v3, %v11829_v40  ;;  %v11909_v54 = vld [vmem:[#allocation39 + $0xf68] sm:$0xf] }
0x18f0   : > { %v11958_v17 = vor.u32 %v12982_v13, %v11957_v12  ;;  %v12874_v29 = vld [vmem:[#allocation39 + $0xc74] sm:$0xf0]  ;;  %v11509_v58 = vld [vmem:[#allocation39 + $0xc48] sm:$0xf] }
0x18f1   : > { %v12970_v55 = vld [vmem:[#allocation39 + $0xf74] sm:$0xf0]  ;;  %v11637_v13 = vld [vmem:[#allocation39 + $0xd48] sm:$0xf] }
0x18f2   : > { %7826 = vmatpush.bf16.msra.mxu3 %v10982_v20  ;;  %7839 = vmatpush.bf16.msrb.mxu0 %v11110_v22  ;;  %v12946_v20 = vld [vmem:[#allocation39 + $0xeb4] sm:$0xf0]  ;;  %v11941_v22 = vld [vmem:[#allocation39 + $0xfa8] sm:$0xf]  ;;  %v11910_v3 = vor.u32 %v12970_v55, %v11909_v54  ;;  %v12504_v55 = vld [vmem:[#allocation39 + $0xec] sm:$0xf] }
0x18f3   : > { %7852 = vmatpush.bf16.msrb.mxu1 %v11238_v28  ;;  %7865 = vmatpush.bf16.msrb.mxu2 %v11366_v32  ;;  %v11541_v28 = vld [vmem:[#allocation39 + $0xc88] sm:$0xf]  ;;  %v12878_v32 = vld [vmem:[#allocation39 + $0xc94] sm:$0xf0]  ;;  %v11814_v45 = vor.u32 %v12946_v20, %v11813_v4  ;;  %v11942_v34 = vor.u32 %v12978_v63, %v11941_v22 }
0x18f4   : > { %v11542_v43 = vor.u32 %v12878_v32, %v11541_v28  ;;  %v12870_v24 = vld [vmem:[#allocation39 + $0xc54] sm:$0xf0]  ;;  %v11877_v36 = vld [vmem:[#allocation39 + $0xf28] sm:$0xf] }
0x18f5   : > { %v12966_v18 = vld [vmem:[#allocation39 + $0xf54] sm:$0xf0]  ;;  %v11510_v22 = vor.u32 %v12870_v24, %v11509_v58  ;;  %v11477_v44 = vld [vmem:[#allocation39 + $0xc08] sm:$0xf]  ;;  %v10183_v58 = vld [vmem:[#allocation39 + $0x1f8] sm:$0xf0] }
0x18f6   : > { %7827 = vmatpush.bf16.msra.mxu3 %v10966_v46  ;;  %7840 = vmatpush.bf16.msrb.mxu0 %v11094_v33  ;;  %v7634_v38 = vpop.f32.mrf.mxu0  ;;  %v11670_v46 = vor.u32 %v12910_v35, %v11669_v21  ;;  %v11525_v33 = vld [vmem:[#allocation39 + $0xc68] sm:$0xf]  ;;  %v12930_v35 = vld [vmem:[#allocation39 + $0xe34] sm:$0xf0]  ;;  %v12568_v24 = vld [vmem:[#allocation39 + $0x2ec] sm:$0xf] }
0x18f7   : > { %7853 = vmatpush.bf16.msrb.mxu1 %v11222_v48  ;;  %7866 = vmatpush.bf16.msrb.mxu2 %v11350_v51  ;;  %v11653_v48 = vld [vmem:[#allocation39 + $0xd68] sm:$0xf]  ;;  %v12906_v51 = vld [vmem:[#allocation39 + $0xd74] sm:$0xf0] }
0x18f8   : > { %v12962_v27 = vld [vmem:[#allocation39 + $0xf34] sm:$0xf0] }
0x18f9   : > { %7828 = vmatmul.bf16.vlgmr.msra.gmra.mxu3 %v15450_v39  ;;  %7841 = vmatmul.bf16.vlgmr.msrb.gmra.mxu0 %v15452_v41  ;;  %v7647_v42 = vpop.f32.mrf.mxu1  ;;  %v12958_v54 = vld [vmem:[#allocation39 + $0xf14] sm:$0xf0] }
0x18fa   : > { %7872 = vmatpush.bf16.msrb.mxu3 %v11590_v52  ;;  %7885 = vmatpush.bf16.msra.mxu0 %v11718_v57  ;;  %v11781_v52 = vld [vmem:[#allocation39 + $0xe68] sm:$0xf]  ;;  %v12938_v57 = vld [vmem:[#allocation39 + $0xe74] sm:$0xf0] }
0x18fb   : > { %7898 = vmatpush.bf16.msra.mxu1 %v11846_v56  ;;  %7911 = vmatpush.bf16.msra.mxu2 %v11974_v62  ;;  %v11526_v56 = vor.u32 %v12874_v29, %v11525_v33  ;;  %v11654_v62 = vor.u32 %v12906_v51, %v11653_v48  ;;  %v11782_v40 = vor.u32 %v12938_v57, %v11781_v52  ;;  %v11605_v33 = vld [vmem:[#allocation39 + $0xd08] sm:$0xf]  ;;  %v12894_v29 = vld [vmem:[#allocation39 + $0xd14] sm:$0xf0] }
0x18fc   : > { %7854 = vmatmul.bf16.vlgmr.msrb.gmra.mxu1 %v15454_v47  ;;  %7867 = vmatmul.bf16.vlgmr.msrb.gmra.mxu2 %v15456_v49  ;;  %v7621_v12 = vpop.f32.mrf.mxu3  ;;  %v11733_v51 = vld [vmem:[#allocation39 + $0xe08] sm:$0xf] }
0x18fd   : > { %v7622_v16 = vadd.f32 %v7621_v12, %v15514_v19  ;;  %v11749_v19 = vld [vmem:[#allocation39 + $0xe28] sm:$0xf]  ;;  %v10311_v12 = vld [vmem:[#allocation39 + $0x2f8] sm:$0xf0] }
0x18fe   : > { %7873 = vmatpush.bf16.msrb.mxu3 %v11574_v15  ;;  %7886 = vmatpush.bf16.msra.mxu0 %v11702_v7  ;;  %v12902_v15 = vld [vmem:[#allocation39 + $0xd54] sm:$0xf0]  ;;  %v11765_v7 = vld [vmem:[#allocation39 + $0xe48] sm:$0xf]  ;;  %v7636_v30 = vpop.f32.mrf.mxu0 }
0x18ff   : > { %7899 = vmatpush.bf16.msra.mxu1 %v11830_v59  ;;  %7912 = vmatpush.bf16.msra.mxu2 %v11958_v17  ;;  %v7660_v53 = vpop.f32.mrf.mxu2  ;;  %v12934_v59 = vld [vmem:[#allocation39 + $0xe54] sm:$0xf0]  ;;  %v11893_v17 = vld [vmem:[#allocation39 + $0xf48] sm:$0xf]  ;;  %v7635_v4 = vadd.f32 %v7634_v38, %v7622_v16  ;;  %v11638_v63 = vor.u32 %v12902_v15, %v11637_v13  ;;  %v12600_v13 = vld [vmem:[#allocation39 + $0x3ec] sm:$0xf]  ;;  %v10314_v30 = vor.u32 %v12568_v24, %v10311_v12 }
0x1900   : > { %v11766_v28 = vor.u32 %v12934_v59, %v11765_v7  ;;  %v11894_v32 = vor.u32 %v12966_v18, %v11893_v17  ;;  %v11861_v52 = vld [vmem:[#allocation39 + $0xf08] sm:$0xf]  ;;  %v10439_v15 = vld [vmem:[#allocation39 + $0x3f8] sm:$0xf0]  ;;  %v12500_v17 = vld [vmem:[#allocation39 + $0xcc] sm:$0xf] }
0x1901   : > { %v7649_v20 = vpop.f32.mrf.mxu1  ;;  %v7648_v21 = vadd.f32 %v7647_v42, %v7635_v4  ;;  %v12926_v42 = vld [vmem:[#allocation39 + $0xe14] sm:$0xf0]  ;;  %v11862_v16 = vor.u32 %v12958_v54, %v11861_v52  ;;  %v10039_v18 = vld [vmem:[#allocation39 + $0xd8] sm:$0xf0]  ;;  %v10442_v4 = vor.u32 %v12600_v13, %v10439_v15 }
0x1902   : > { %7874 = vmatpush.bf16.msrb.mxu3 %v11558_v23  ;;  %7887 = vmatpush.bf16.msra.mxu0 %v11686_v25  ;;  %v11493_v23 = vld [vmem:[#allocation39 + $0xc28] sm:$0xf]  ;;  %v12866_v25 = vld [vmem:[#allocation39 + $0xc34] sm:$0xf0]  ;;  %v11734_v7 = vor.u32 %v12926_v42, %v11733_v51  ;;  %v12532_v20 = vld [vmem:[#allocation39 + $0x1cc] sm:$0xf] }
0x1903   : > { %7900 = vmatpush.bf16.msra.mxu1 %v11814_v45  ;;  %7913 = vmatpush.bf16.msra.mxu2 %v11942_v34  ;;  %v11621_v45 = vld [vmem:[#allocation39 + $0xd28] sm:$0xf]  ;;  %v12898_v34 = vld [vmem:[#allocation39 + $0xd34] sm:$0xf0]  ;;  %v15521_v31 = vadd.f32 %v7660_v53, %v7648_v21  ;;  %v11494_v38 = vor.u32 %v12866_v25, %v11493_v23  ;;  %v10295_v23 = vld [vmem:[#allocation39 + $0x2d8] sm:$0xf0] }
0x1904   : > { %v7623_v48 = vpop.f32.mrf.mxu3  ;;  %v12596_v25 = vld [vmem:[#allocation39 + $0x3cc] sm:$0xf]  ;;  %v10135_v52 = vld [vmem:[#allocation39 + $0x198] sm:$0xf0] }
0x1905   : > { %v12524_v42 = vld [vmem:[#allocation39 + $0x18c] sm:$0xf]  ;;  %v10263_v54 = vld [vmem:[#allocation39 + $0x298] sm:$0xf0] }
0x1906   : > { %7875 = vmatpush.bf16.msrb.mxu3 %v11542_v43  ;;  %7888 = vmatpush.bf16.msra.mxu0 %v11670_v46  ;;  %v11622_v43 = vor.u32 %v12898_v34, %v11621_v45  ;;  %v12862_v46 = vld [vmem:[#allocation39 + $0xc14] sm:$0xf0]  ;;  %v12496_v34 = vld [vmem:[#allocation39 + $0xac] sm:$0xf]  ;;  %v9991_v12 = vld [vmem:[#allocation39 + $0x78] sm:$0xf0] }
0x1907   : > { %7901 = vmatpush.bf16.msra.mxu1 %v11798_v50  ;;  %7914 = vmatpush.bf16.msra.mxu2 %v11926_v5  ;;  %v11750_v50 = vor.u32 %v12930_v35, %v11749_v19  ;;  %v11878_v5 = vor.u32 %v12962_v27, %v11877_v36  ;;  %v7662_v57 = vpop.f32.mrf.mxu2  ;;  %v10023_v19 = vld [vmem:[#allocation39 + $0xb8] sm:$0xf0]  ;;  %v12528_v36 = vld [vmem:[#allocation39 + $0x1ac] sm:$0xf] }
0x1908   : > { %v10151_v27 = vld [vmem:[#allocation39 + $0x1b8] sm:$0xf0]  ;;  %v12556_v57 = vld [vmem:[#allocation39 + $0x28c] sm:$0xf] }
0x1909   : > { %v10266_v13 = vor.u32 %v12556_v57, %v10263_v54  ;;  %v12576_v57 = vld [vmem:[#allocation39 + $0x32c] sm:$0xf]  ;;  %v10343_v54 = vld [vmem:[#allocation39 + $0x338] sm:$0xf0] }
0x190a   : > { %7876 = vmatpush.bf16.msrb.mxu3 %v11526_v56  ;;  %7889 = vmatpush.bf16.msra.mxu0 %v11654_v62  ;;  %v10055_v56 = vld [vmem:[#allocation39 + $0xf8] sm:$0xf0]  ;;  %v12536_v62 = vld [vmem:[#allocation39 + $0x1ec] sm:$0xf] }
0x190b   : > { %7902 = vmatpush.bf16.msra.mxu1 %v11782_v40  ;;  %7915 = vmatpush.bf16.msra.mxu2 %v11910_v3  ;;  %v11478_v40 = vor.u32 %v12862_v46, %v11477_v44  ;;  %v11606_v3 = vor.u32 %v12894_v29, %v11605_v33  ;;  %v10058_v53 = vor.u32 %v12504_v55, %v10055_v56  ;;  %v12560_v44 = vld [vmem:[#allocation39 + $0x2ac] sm:$0xf]  ;;  %v10407_v46 = vld [vmem:[#allocation39 + $0x3b8] sm:$0xf0] }
0x190c   : > { %v10186_v59 = vor.u32 %v12536_v62, %v10183_v58  ;;  %v10026_v33 = vor.u32 %v12496_v34, %v10023_v19  ;;  %v10154_v29 = vor.u32 %v12528_v36, %v10151_v27  ;;  %v12588_v55 = vld [vmem:[#allocation39 + $0x38c] sm:$0xf]  ;;  %v10391_v56 = vld [vmem:[#allocation39 + $0x398] sm:$0xf0] }
0x190d   : > { %v10394_v15 = vor.u32 %v12588_v55, %v10391_v56  ;;  %v10359_v36 = vld [vmem:[#allocation39 + $0x358] sm:$0xf0]  ;;  %v12476_v55 = vld [vmem:[#allocation39 + $0xc] sm:$0xf] }
0x190e   : > { %7877 = vmatpush.bf16.msrb.mxu3 %v11510_v22  ;;  %7890 = vmatpush.bf16.msra.mxu0 %v11638_v63  ;;  %v10167_v22 = vld [vmem:[#allocation39 + $0x1d8] sm:$0xf0]  ;;  %v12564_v63 = vld [vmem:[#allocation39 + $0x2cc] sm:$0xf] }
0x190f   : > { %7903 = vmatpush.bf16.msra.mxu1 %v11766_v28  ;;  %7916 = vmatpush.bf16.msra.mxu2 %v11894_v32  ;;  %v10423_v28 = vld [vmem:[#allocation39 + $0x3d8] sm:$0xf0]  ;;  %v10042_v32 = vor.u32 %v12500_v17, %v10039_v18  ;;  %v10170_v45 = vor.u32 %v12532_v20, %v10167_v22  ;;  %v10298_v21 = vor.u32 %v12564_v63, %v10295_v23  ;;  %v12584_v17 = vld [vmem:[#allocation39 + $0x36c] sm:$0xf] }
0x1910   : > { %v10426_v35 = vor.u32 %v12596_v25, %v10423_v28  ;;  %v10375_v18 = vld [vmem:[#allocation39 + $0x378] sm:$0xf0]  ;;  %v12484_v20 = vld [vmem:[#allocation39 + $0x4c] sm:$0xf] }
0x1911   : > { %v9975_v22 = vld [vmem:[#allocation39 + $0x58] sm:$0xf0]  ;;  %v10378_v23 = vor.u32 %v12584_v17, %v10375_v18  ;;  %v12516_v28 = vld [vmem:[#allocation39 + $0x14c] sm:$0xf] }
0x1912   : > { %7878 = vmatpush.bf16.msrb.mxu3 %v11494_v38  ;;  %7891 = vmatpush.bf16.msra.mxu0 %v11622_v43  ;;  %v10279_v38 = vld [vmem:[#allocation39 + $0x2b8] sm:$0xf0]  ;;  %v12592_v43 = vld [vmem:[#allocation39 + $0x3ac] sm:$0xf] }
0x1913   : > { %7904 = vmatpush.bf16.msra.mxu1 %v11750_v50  ;;  %7917 = vmatpush.bf16.msra.mxu2 %v11878_v5  ;;  %v12492_v50 = vld [vmem:[#allocation39 + $0x8c] sm:$0xf]  ;;  %v10007_v5 = vld [vmem:[#allocation39 + $0x98] sm:$0xf0]  ;;  %v10282_v48 = vor.u32 %v12560_v44, %v10279_v38  ;;  %v10410_v51 = vor.u32 %v12592_v43, %v10407_v46  ;;  %v9978_v43 = vor.u32 %v12484_v20, %v9975_v22 }
0x1914   : > { %v10010_v24 = vor.u32 %v12492_v50, %v10007_v5  ;;  %v10327_v17 = vld [vmem:[#allocation39 + $0x318] sm:$0xf0]  ;;  %v12632_v18 = vld [vmem:[#allocation39 + $0x4ec] sm:$0xf] }
0x1915   : > { %v10695_v20 = vld [vmem:[#allocation39 + $0x5f8] sm:$0xf0]  ;;  %v12696_v22 = vld [vmem:[#allocation39 + $0x6ec] sm:$0xf] }
0x1916   : > { %7879 = vmatpush.bf16.msrb.mxu3 %v11478_v40  ;;  %7892 = vmatpush.bf16.msra.mxu0 %v11606_v3  ;;  %v7686_v62 = vpop.f32.mrf.mxu0  ;;  %v10138_v40 = vor.u32 %v12524_v42, %v10135_v52  ;;  %v12488_v3 = vld [vmem:[#allocation39 + $0x6c] sm:$0xf]  ;;  %v10215_v52 = vld [vmem:[#allocation39 + $0x238] sm:$0xf0] }
0x1917   : > { %7905 = vmatpush.bf16.msra.mxu1 %v11734_v7  ;;  %7918 = vmatpush.bf16.msra.mxu2 %v11862_v16  ;;  %v12520_v7 = vld [vmem:[#allocation39 + $0x16c] sm:$0xf]  ;;  %v10119_v16 = vld [vmem:[#allocation39 + $0x178] sm:$0xf0] }
0x1919   : > { %7880 = vmatmul.bf16.vlgmr.msrb.gmra.mxu3 %v15466_v60  ;;  %7893 = vmatmul.bf16.vlgmr.msra.gmra.mxu0 %v15468_v61  ;;  %v7699_v58 = vpop.f32.mrf.mxu1 }
0x191a   : > { %7924 = vmatpush.bf16.msra.mxu3 %v10058_v53  ;;  %7937 = vmatpush.bf16.msrb.mxu0 %v10186_v59  ;;  %v12552_v53 = vld [vmem:[#allocation39 + $0x26c] sm:$0xf]  ;;  %v10247_v59 = vld [vmem:[#allocation39 + $0x278] sm:$0xf0] }
0x191b   : > { %7950 = vmatpush.bf16.msrb.mxu1 %v10314_v30  ;;  %7963 = vmatpush.bf16.msrb.mxu2 %v10442_v4  ;;  %v9994_v30 = vor.u32 %v12488_v3, %v9991_v12  ;;  %v10122_v4 = vor.u32 %v12520_v7, %v10119_v16  ;;  %v10250_v63 = vor.u32 %v12552_v53, %v10247_v59  ;;  %v12508_v3 = vld [vmem:[#allocation39 + $0x10c] sm:$0xf]  ;;  %v10071_v12 = vld [vmem:[#allocation39 + $0x118] sm:$0xf0] }
0x191c   : > { %7906 = vmatmul.bf16.vlgmr.msra.gmra.mxu1 %v15470_v0  ;;  %7919 = vmatmul.bf16.vlgmr.msra.gmra.mxu2 %v15472_v26  ;;  %v7673_v25 = vpop.f32.mrf.mxu3  ;;  %v12540_v16 = vld [vmem:[#allocation39 + $0x20c] sm:$0xf] }
0x191d   : > { %v7674_v34 = vadd.f32 %v7673_v25, %v15521_v31  ;;  %v12544_v31 = vld [vmem:[#allocation39 + $0x22c] sm:$0xf]  ;;  %v10823_v25 = vld [vmem:[#allocation39 + $0x6f8] sm:$0xf0] }
0x191e   : > { %7925 = vmatpush.bf16.msra.mxu3 %v10042_v32  ;;  %7938 = vmatpush.bf16.msrb.mxu0 %v10170_v45  ;;  %v10103_v32 = vld [vmem:[#allocation39 + $0x158] sm:$0xf0]  ;;  %v12548_v45 = vld [vmem:[#allocation39 + $0x24c] sm:$0xf]  ;;  %v7688_v27 = vpop.f32.mrf.mxu0 }
0x191f   : > { %7951 = vmatpush.bf16.msrb.mxu1 %v10298_v21  ;;  %7964 = vmatpush.bf16.msrb.mxu2 %v10426_v35  ;;  %v7712_v19 = vpop.f32.mrf.mxu2  ;;  %v10231_v21 = vld [vmem:[#allocation39 + $0x258] sm:$0xf0]  ;;  %v12580_v35 = vld [vmem:[#allocation39 + $0x34c] sm:$0xf]  ;;  %v7687_v44 = vadd.f32 %v7686_v62, %v7674_v34  ;;  %v10106_v46 = vor.u32 %v12516_v28, %v10103_v32  ;;  %v10826_v27 = vor.u32 %v12696_v22, %v10823_v25 }
0x1920   : > { %v10234_v50 = vor.u32 %v12548_v45, %v10231_v21  ;;  %v10362_v5 = vor.u32 %v12580_v35, %v10359_v36  ;;  %v12572_v53 = vld [vmem:[#allocation39 + $0x30c] sm:$0xf]  ;;  %v10951_v32 = vld [vmem:[#allocation39 + $0x7f8] sm:$0xf0] }
0x1921   : > { %v7701_v38 = vpop.f32.mrf.mxu1  ;;  %v7700_v42 = vadd.f32 %v7699_v58, %v7687_v44  ;;  %v10199_v58 = vld [vmem:[#allocation39 + $0x218] sm:$0xf0]  ;;  %v12728_v28 = vld [vmem:[#allocation39 + $0x7ec] sm:$0xf]  ;;  %v10330_v34 = vor.u32 %v12572_v53, %v10327_v17 }
0x1922   : > { %7926 = vmatpush.bf16.msra.mxu3 %v10026_v33  ;;  %7939 = vmatpush.bf16.msrb.mxu0 %v10154_v29  ;;  %v12480_v33 = vld [vmem:[#allocation39 + $0x2c] sm:$0xf]  ;;  %v9959_v29 = vld [vmem:[#allocation39 + $0x38] sm:$0xf0]  ;;  %v10202_v45 = vor.u32 %v12540_v16, %v10199_v58  ;;  %v10954_v44 = vor.u32 %v12728_v28, %v10951_v32 }
0x1923   : > { %7952 = vmatpush.bf16.msrb.mxu1 %v10282_v48  ;;  %7965 = vmatpush.bf16.msrb.mxu2 %v10410_v51  ;;  %v12512_v48 = vld [vmem:[#allocation39 + $0x12c] sm:$0xf]  ;;  %v10087_v51 = vld [vmem:[#allocation39 + $0x138] sm:$0xf0]  ;;  %v15528_v56 = vadd.f32 %v7712_v19, %v7700_v42  ;;  %v9962_v62 = vor.u32 %v12480_v33, %v9959_v29 }
0x1924   : > { %v7675_v7 = vpop.f32.mrf.mxu3  ;;  %v12628_v35 = vld [vmem:[#allocation39 + $0x4cc] sm:$0xf]  ;;  %v10551_v36 = vld [vmem:[#allocation39 + $0x4d8] sm:$0xf0] }
0x1925   : > { %v12660_v38 = vld [vmem:[#allocation39 + $0x5cc] sm:$0xf]  ;;  %v10807_v33 = vld [vmem:[#allocation39 + $0x6d8] sm:$0xf0] }
0x1926   : > { %7927 = vmatpush.bf16.msra.mxu3 %v10010_v24  ;;  %7940 = vmatpush.bf16.msrb.mxu0 %v10138_v40  ;;  %v10090_v24 = vor.u32 %v12512_v48, %v10087_v51  ;;  %v9943_v40 = vld [vmem:[#allocation39 + $0x18] sm:$0xf0]  ;;  %v12724_v29 = vld [vmem:[#allocation39 + $0x7cc] sm:$0xf] }
0x1927   : > { %7953 = vmatpush.bf16.msrb.mxu1 %v10266_v13  ;;  %7966 = vmatpush.bf16.msrb.mxu2 %v10394_v15  ;;  %v10218_v13 = vor.u32 %v12544_v31, %v10215_v52  ;;  %v10346_v15 = vor.u32 %v12576_v57, %v10343_v54  ;;  %v7714_v59 = vpop.f32.mrf.mxu2  ;;  %v12624_v51 = vld [vmem:[#allocation39 + $0x4ac] sm:$0xf]  ;;  %v10535_v31 = vld [vmem:[#allocation39 + $0x4b8] sm:$0xf0] }
0x1928   : > { %v12656_v57 = vld [vmem:[#allocation39 + $0x5ac] sm:$0xf]  ;;  %v10663_v54 = vld [vmem:[#allocation39 + $0x5b8] sm:$0xf0] }
0x1929   : > { %v10647_v58 = vld [vmem:[#allocation39 + $0x598] sm:$0xf0]  ;;  %v12716_v59 = vld [vmem:[#allocation39 + $0x78c] sm:$0xf] }
0x192a   : > { %7928 = vmatpush.bf16.msra.mxu3 %v9994_v30  ;;  %7941 = vmatpush.bf16.msrb.mxu0 %v10122_v4  ;;  %v10567_v30 = vld [vmem:[#allocation39 + $0x4f8] sm:$0xf0]  ;;  %v12664_v4 = vld [vmem:[#allocation39 + $0x5ec] sm:$0xf] }
0x192b   : > { %7954 = vmatpush.bf16.msrb.mxu1 %v10250_v63  ;;  %7967 = vmatpush.bf16.msrb.mxu2 %v10378_v23  ;;  %v9946_v63 = vor.u32 %v12476_v55, %v9943_v40  ;;  %v10074_v23 = vor.u32 %v12508_v3, %v10071_v12  ;;  %v10570_v19 = vor.u32 %v12632_v18, %v10567_v30  ;;  %v12688_v55 = vld [vmem:[#allocation39 + $0x6ac] sm:$0xf]  ;;  %v10919_v40 = vld [vmem:[#allocation39 + $0x7b8] sm:$0xf0] }
0x192c   : > { %v10698_v21 = vor.u32 %v12664_v4, %v10695_v20  ;;  %v10538_v3 = vor.u32 %v12624_v51, %v10535_v31  ;;  %v10666_v12 = vor.u32 %v12656_v57, %v10663_v54  ;;  %v10775_v53 = vld [vmem:[#allocation39 + $0x698] sm:$0xf0]  ;;  %v12616_v4 = vld [vmem:[#allocation39 + $0x46c] sm:$0xf] }
0x192d   : > { %v10903_v17 = vld [vmem:[#allocation39 + $0x798] sm:$0xf0]  ;;  %v12648_v22 = vld [vmem:[#allocation39 + $0x56c] sm:$0xf] }
0x192e   : > { %7929 = vmatpush.bf16.msra.mxu3 %v9978_v43  ;;  %7942 = vmatpush.bf16.msrb.mxu0 %v10106_v46  ;;  %v10679_v43 = vld [vmem:[#allocation39 + $0x5d8] sm:$0xf0]  ;;  %v12692_v46 = vld [vmem:[#allocation39 + $0x6cc] sm:$0xf] }
0x192f   : > { %7955 = vmatpush.bf16.msrb.mxu1 %v10234_v50  ;;  %7968 = vmatpush.bf16.msrb.mxu2 %v10362_v5  ;;  %v10935_v50 = vld [vmem:[#allocation39 + $0x7d8] sm:$0xf0]  ;;  %v10554_v5 = vor.u32 %v12628_v35, %v10551_v36  ;;  %v10682_v48 = vor.u32 %v12660_v38, %v10679_v43  ;;  %v10810_v42 = vor.u32 %v12692_v46, %v10807_v33  ;;  %v12680_v28 = vld [vmem:[#allocation39 + $0x66c] sm:$0xf] }
0x1930   : > { %v10938_v52 = vor.u32 %v12724_v29, %v10935_v50  ;;  %v10503_v20 = vld [vmem:[#allocation39 + $0x478] sm:$0xf0]  ;;  %v12644_v33 = vld [vmem:[#allocation39 + $0x54c] sm:$0xf] }
0x1931   : > { %v10631_v25 = vld [vmem:[#allocation39 + $0x578] sm:$0xf0]  ;;  %v10506_v35 = vor.u32 %v12616_v4, %v10503_v20  ;;  %v12676_v50 = vld [vmem:[#allocation39 + $0x64c] sm:$0xf] }
0x1932   : > { %7930 = vmatpush.bf16.msra.mxu3 %v9962_v62  ;;  %7943 = vmatpush.bf16.msrb.mxu0 %v10090_v24  ;;  %v10791_v62 = vld [vmem:[#allocation39 + $0x6b8] sm:$0xf0]  ;;  %v12720_v24 = vld [vmem:[#allocation39 + $0x7ac] sm:$0xf]  ;;  %v10634_v36 = vor.u32 %v12648_v22, %v10631_v25 }
0x1933   : > { %7956 = vmatpush.bf16.msrb.mxu1 %v10218_v13  ;;  %7969 = vmatpush.bf16.msrb.mxu2 %v10346_v15  ;;  %v12620_v13 = vld [vmem:[#allocation39 + $0x48c] sm:$0xf]  ;;  %v10519_v15 = vld [vmem:[#allocation39 + $0x498] sm:$0xf0]  ;;  %v10794_v7 = vor.u32 %v12688_v55, %v10791_v62  ;;  %v10922_v16 = vor.u32 %v12720_v24, %v10919_v40 }
0x1934   : > { %v10759_v32 = vld [vmem:[#allocation39 + $0x678] sm:$0xf0]  ;;  %v12708_v31 = vld [vmem:[#allocation39 + $0x74c] sm:$0xf] }
0x1935   : > { %v10762_v38 = vor.u32 %v12680_v28, %v10759_v32  ;;  %v10615_v29 = vld [vmem:[#allocation39 + $0x558] sm:$0xf0]  ;;  %v12608_v24 = vld [vmem:[#allocation39 + $0x42c] sm:$0xf] }
0x1936   : > { %7931 = vmatpush.bf16.msra.mxu3 %v9946_v63  ;;  %7944 = vmatpush.bf16.msrb.mxu0 %v10074_v23  ;;  %v7738_v18 = vpop.f32.mrf.mxu0  ;;  %v10906_v23 = vor.u32 %v12716_v59, %v10903_v17  ;;  %v10743_v51 = vld [vmem:[#allocation39 + $0x658] sm:$0xf0]  ;;  %v10618_v62 = vor.u32 %v12644_v33, %v10615_v29  ;;  %v12700_v25 = vld [vmem:[#allocation39 + $0x70c] sm:$0xf] }
0x1937   : > { %7957 = vmatpush.bf16.msrb.mxu1 %v10202_v45  ;;  %7970 = vmatpush.bf16.msrb.mxu2 %v10330_v34  ;;  %v12712_v45 = vld [vmem:[#allocation39 + $0x76c] sm:$0xf]  ;;  %v10887_v34 = vld [vmem:[#allocation39 + $0x778] sm:$0xf0] }
0x1938   : > { %v10890_v43 = vor.u32 %v12712_v45, %v10887_v34  ;;  %v10471_v40 = vld [vmem:[#allocation39 + $0x438] sm:$0xf0]  ;;  %v12760_v45 = vld [vmem:[#allocation39 + $0x8ec] sm:$0xf] }
0x1939   : > { %7932 = vmatmul.bf16.vlgmr.msra.gmra.mxu3 %v15399_v8  ;;  %7945 = vmatmul.bf16.vlgmr.msrb.gmra.mxu0 %v15401_v9  ;;  %v12652_v8 = vld [vmem:[#allocation39 + $0x58c] sm:$0xf]  ;;  %v10474_v17 = vor.u32 %v12608_v24, %v10471_v40  ;;  %v10583_v4 = vld [vmem:[#allocation39 + $0x518] sm:$0xf0] }
0x193a   : > { %7976 = vmatpush.bf16.msrb.mxu3 %v10570_v19  ;;  %7989 = vmatpush.bf16.msra.mxu0 %v10698_v21  ;;  %v12684_v9 = vld [vmem:[#allocation39 + $0x68c] sm:$0xf]  ;;  %v10650_v30 = vor.u32 %v12652_v8, %v10647_v58  ;;  %v13459_v19 = vld [vmem:[#allocation40] sm:$0xf]  ;;  %v10727_v8 = vld [vmem:[#allocation39 + $0x638] sm:$0xf0] }
0x193b   : > { %8002 = vmatpush.bf16.msra.mxu1 %v10826_v27  ;;  %8015 = vmatpush.bf16.msra.mxu2 %v10954_v44  ;;  %v10778_v63 = vor.u32 %v12684_v9, %v10775_v53  ;;  %v7294_v21 = vperm.slane %v13459_v19, 2  ;;  %v12612_v27 = vld [vmem:[#allocation39 + $0x44c] sm:$0xf]  ;;  %v10487_v44 = vld [vmem:[#allocation39 + $0x458] sm:$0xf0] }
0x193c   : > { %7958 = vmatmul.bf16.vlgmr.msrb.gmra.mxu1 %v15403_v10  ;;  %7971 = vmatmul.bf16.vlgmr.msrb.gmra.mxu2 %v15405_v11  ;;  %v7751_v10 = vpop.f32.mrf.mxu1  ;;  %v10522_v11 = vor.u32 %v12620_v13, %v10519_v15  ;;  %v7725_v46 = vpop.f32.mrf.mxu3  ;;  %v10490_v55 = vor.u32 %v12612_v27, %v10487_v44  ;;  %v12640_v13 = vld [vmem:[#allocation39 + $0x52c] sm:$0xf]  ;;  %v10599_v15 = vld [vmem:[#allocation39 + $0x538] sm:$0xf0] }
0x193d   : > { %v12704_v58 = vld [vmem:[#allocation39 + $0x72c] sm:$0xf]  ;;  %v10855_v9 = vld [vmem:[#allocation39 + $0x738] sm:$0xf0] }
0x193e   : > { %7977 = vmatpush.bf16.msrb.mxu3 %v10554_v5  ;;  %7990 = vmatpush.bf16.msra.mxu0 %v10682_v48  ;;  %v7726_v5 = vadd.f32 %v7725_v46, %v7294_v21  ;;  %v12604_v53 = vld [vmem:[#allocation39 + $0x40c] sm:$0xf]  ;;  %v10858_v22 = vor.u32 %v12704_v58, %v10855_v9  ;;  %v10839_v32 = vld [vmem:[#allocation39 + $0x718] sm:$0xf0] }
0x193f   : > { %8003 = vmatpush.bf16.msra.mxu1 %v10810_v42  ;;  %8016 = vmatpush.bf16.msra.mxu2 %v10938_v52  ;;  %v7764_v48 = vpop.f32.mrf.mxu2  ;;  %v10871_v42 = vld [vmem:[#allocation39 + $0x758] sm:$0xf0]  ;;  %v7740_v52 = vpop.f32.mrf.mxu0  ;;  %v12792_v19 = vld [vmem:[#allocation39 + $0x9ec] sm:$0xf]  ;;  %v10842_v33 = vor.u32 %v12700_v25, %v10839_v32 }
0x1940   : > { %v7739_v57 = vadd.f32 %v7738_v18, %v7726_v5  ;;  %v10602_v18 = vor.u32 %v12640_v13, %v10599_v15  ;;  %v11079_v34 = vld [vmem:[#allocation39 + $0x8f8] sm:$0xf0]  ;;  %v12756_v5 = vld [vmem:[#allocation39 + $0x8cc] sm:$0xf] }
0x1941   : > { %v11207_v21 = vld [vmem:[#allocation39 + $0x9f8] sm:$0xf0]  ;;  %v11082_v29 = vor.u32 %v12760_v45, %v11079_v34  ;;  %v12848_v9 = vld [vmem:[#allocation39 + $0xbac] sm:$0xf] }
0x1942   : > { %7978 = vmatpush.bf16.msrb.mxu3 %v10538_v3  ;;  %7991 = vmatpush.bf16.msra.mxu0 %v10666_v12  ;;  %v10746_v3 = vor.u32 %v12676_v50, %v10743_v51  ;;  %v10874_v12 = vor.u32 %v12708_v31, %v10871_v42  ;;  %v11335_v44 = vld [vmem:[#allocation39 + $0xaf8] sm:$0xf0]  ;;  %v11210_v50 = vor.u32 %v12792_v19, %v11207_v21  ;;  %v12788_v42 = vld [vmem:[#allocation39 + $0x9cc] sm:$0xf] }
0x1943   : > { %8004 = vmatpush.bf16.msra.mxu1 %v10794_v7  ;;  %8017 = vmatpush.bf16.msra.mxu2 %v10922_v16  ;;  %v12672_v7 = vld [vmem:[#allocation39 + $0x62c] sm:$0xf]  ;;  %v7752_v16 = vadd.f32 %v7751_v10, %v7739_v57  ;;  %v10711_v10 = vld [vmem:[#allocation39 + $0x618] sm:$0xf0] }
0x1944   : > { %v7753_v54 = vpop.f32.mrf.mxu1  ;;  %v10730_v20 = vor.u32 %v12672_v7, %v10727_v8  ;;  %v11191_v52 = vld [vmem:[#allocation39 + $0x9d8] sm:$0xf0]  ;;  %v12820_v57 = vld [vmem:[#allocation39 + $0xacc] sm:$0xf] }
0x1945   : > { %v15534_v59 = vadd.f32 %v7764_v48, %v7752_v16  ;;  %v11063_v48 = vld [vmem:[#allocation39 + $0x8d8] sm:$0xf0]  ;;  %v11194_v40 = vor.u32 %v12788_v42, %v11191_v52  ;;  %v12784_v7 = vld [vmem:[#allocation39 + $0x9ac] sm:$0xf] }
0x1946   : > { %7979 = vmatpush.bf16.msrb.mxu3 %v10522_v11  ;;  %7992 = vmatpush.bf16.msra.mxu0 %v10650_v30  ;;  %v10455_v11 = vld [vmem:[#allocation39 + $0x418] sm:$0xf0]  ;;  %v12636_v30 = vld [vmem:[#allocation39 + $0x50c] sm:$0xf]  ;;  %v11066_v24 = vor.u32 %v12756_v5, %v11063_v48 }
0x1947   : > { %8005 = vmatpush.bf16.msra.mxu1 %v10778_v63  ;;  %8018 = vmatpush.bf16.msra.mxu2 %v10906_v23  ;;  %v7727_v63 = vpop.f32.mrf.mxu3  ;;  %v12668_v23 = vld [vmem:[#allocation39 + $0x60c] sm:$0xf]  ;;  %v7766_v28 = vpop.f32.mrf.mxu2  ;;  %v10586_v27 = vor.u32 %v12636_v30, %v10583_v4  ;;  %v11319_v54 = vld [vmem:[#allocation39 + $0xad8] sm:$0xf0] }
0x1948   : > { %v10714_v46 = vor.u32 %v12668_v23, %v10711_v10  ;;  %v11322_v13 = vor.u32 %v12820_v57, %v11319_v54  ;;  %v11175_v16 = vld [vmem:[#allocation39 + $0x9b8] sm:$0xf0]  ;;  %v12816_v8 = vld [vmem:[#allocation39 + $0xaac] sm:$0xf] }
0x1949   : > { %v11303_v58 = vld [vmem:[#allocation39 + $0xab8] sm:$0xf0]  ;;  %v12844_v23 = vld [vmem:[#allocation39 + $0xb8c] sm:$0xf] }
0x194a   : > { %7980 = vmatpush.bf16.msrb.mxu3 %v10506_v35  ;;  %7993 = vmatpush.bf16.msra.mxu0 %v10634_v36  ;;  %v12824_v35 = vld [vmem:[#allocation39 + $0xaec] sm:$0xf]  ;;  %v10458_v36 = vor.u32 %v12604_v53, %v10455_v11  ;;  %v11431_v53 = vld [vmem:[#allocation39 + $0xbb8] sm:$0xf0]  ;;  %v11306_v4 = vor.u32 %v12816_v8, %v11303_v58 }
0x194b   : > { %8006 = vmatpush.bf16.msra.mxu1 %v10762_v38  ;;  %8019 = vmatpush.bf16.msra.mxu2 %v10890_v43  ;;  %v12856_v38 = vld [vmem:[#allocation39 + $0xbec] sm:$0xf]  ;;  %v11463_v43 = vld [vmem:[#allocation39 + $0xbf8] sm:$0xf0]  ;;  %v11338_v51 = vor.u32 %v12824_v35, %v11335_v44 }
0x194c   : > { %v11466_v31 = vor.u32 %v12856_v38, %v11463_v43  ;;  %v12748_v11 = vld [vmem:[#allocation39 + $0x88c] sm:$0xf]  ;;  %v11031_v30 = vld [vmem:[#allocation39 + $0x898] sm:$0xf0] }
0x194d   : > { %v11287_v63 = vld [vmem:[#allocation39 + $0xa98] sm:$0xf0]  ;;  %v12744_v32 = vld [vmem:[#allocation39 + $0x86c] sm:$0xf] }
0x194e   : > { %7981 = vmatpush.bf16.msrb.mxu3 %v10490_v55  ;;  %7994 = vmatpush.bf16.msra.mxu0 %v10618_v62  ;;  %v12852_v55 = vld [vmem:[#allocation39 + $0xbcc] sm:$0xf]  ;;  %v11447_v62 = vld [vmem:[#allocation39 + $0xbd8] sm:$0xf0] }
0x194f   : > { %8007 = vmatpush.bf16.msra.mxu1 %v10746_v3  ;;  %8020 = vmatpush.bf16.msra.mxu2 %v10874_v12  ;;  %v12752_v3 = vld [vmem:[#allocation39 + $0x8ac] sm:$0xf]  ;;  %v11047_v12 = vld [vmem:[#allocation39 + $0x8b8] sm:$0xf0]  ;;  %v11450_v15 = vor.u32 %v12852_v55, %v11447_v62 }
0x1950   : > { %v11415_v10 = vld [vmem:[#allocation39 + $0xb98] sm:$0xf0]  ;;  %v12776_v21 = vld [vmem:[#allocation39 + $0x96c] sm:$0xf] }
0x1951   : > { %v11015_v45 = vld [vmem:[#allocation39 + $0x878] sm:$0xf0]  ;;  %v11418_v19 = vor.u32 %v12844_v23, %v11415_v10  ;;  %v12840_v44 = vld [vmem:[#allocation39 + $0xb6c] sm:$0xf] }
0x1952   : > { %7982 = vmatpush.bf16.msrb.mxu3 %v10474_v17  ;;  %7995 = vmatpush.bf16.msra.mxu0 %v10602_v18  ;;  %v11050_v17 = vor.u32 %v12752_v3, %v11047_v12  ;;  %v11178_v18 = vor.u32 %v12784_v7, %v11175_v16  ;;  %v11143_v35 = vld [vmem:[#allocation39 + $0x978] sm:$0xf0]  ;;  %v11018_v43 = vor.u32 %v12744_v32, %v11015_v45  ;;  %v12804_v42 = vld [vmem:[#allocation39 + $0xa4c] sm:$0xf] }
0x1953   : > { %8008 = vmatpush.bf16.msra.mxu1 %v10730_v20  ;;  %8021 = vmatpush.bf16.msra.mxu2 %v10858_v22  ;;  %v11434_v20 = vor.u32 %v12848_v9, %v11431_v53  ;;  %v11159_v22 = vld [vmem:[#allocation39 + $0x998] sm:$0xf0]  ;;  %v12836_v54 = vld [vmem:[#allocation39 + $0xb4c] sm:$0xf] }
0x1954   : > { %v11399_v38 = vld [vmem:[#allocation39 + $0xb78] sm:$0xf0]  ;;  %v12736_v12 = vld [vmem:[#allocation39 + $0x82c] sm:$0xf] }
0x1955   : > { %v11402_v5 = vor.u32 %v12840_v44, %v11399_v38  ;;  %v11255_v57 = vld [vmem:[#allocation39 + $0xa58] sm:$0xf0]  ;;  %v12768_v16 = vld [vmem:[#allocation39 + $0x92c] sm:$0xf] }
0x1956   : > { %7983 = vmatpush.bf16.msrb.mxu3 %v10458_v36  ;;  %7996 = vmatpush.bf16.msra.mxu0 %v10586_v27  ;;  %v15540_v25 = vpop.f32.mrf.mxu0  ;;  %v12808_v36 = vld [vmem:[#allocation39 + $0xa6c] sm:$0xf]  ;;  %v11271_v27 = vld [vmem:[#allocation39 + $0xa78] sm:$0xf0] }
0x1957   : > { %8009 = vmatpush.bf16.msra.mxu1 %v10714_v46  ;;  %8022 = vmatpush.bf16.msra.mxu2 %v10842_v33  ;;  %v11146_v46 = vor.u32 %v12776_v21, %v11143_v35  ;;  %v12740_v33 = vld [vmem:[#allocation39 + $0x84c] sm:$0xf]  ;;  %v11383_v55 = vld [vmem:[#allocation39 + $0xb58] sm:$0xf0] }
0x1958   : > { %v11386_v7 = vor.u32 %v12836_v54, %v11383_v55  ;;  %v11111_v8 = vld [vmem:[#allocation39 + $0x938] sm:$0xf0]  ;;  %v12800_v58 = vld [vmem:[#allocation39 + $0xa2c] sm:$0xf] }
0x1959   : > { %7984 = vmatmul.bf16.vlgmr.msrb.gmra.mxu3 %v15421_v2  ;;  %7997 = vmatmul.bf16.vlgmr.msra.gmra.mxu0 %v15423_v6  ;;  %v12780_v2 = vld [vmem:[#allocation39 + $0x98c] sm:$0xf]  ;;  %v11239_v9 = vld [vmem:[#allocation39 + $0xa38] sm:$0xf0] }
0x195a   : > { %8028 = vmatpush.bf16.msra.mxu3 %v11082_v29  ;;  %8041 = vmatpush.bf16.msrb.mxu0 %v11210_v50  ;;  %v12812_v6 = vld [vmem:[#allocation39 + $0xa8c] sm:$0xf]  ;;  %v11162_v28 = vor.u32 %v12780_v2, %v11159_v22  ;;  %v10999_v29 = vld [vmem:[#allocation39 + $0x858] sm:$0xf0]  ;;  %v11274_v50 = vor.u32 %v12808_v36, %v11271_v27  ;;  %v11242_v22 = vor.u32 %v12800_v58, %v11239_v9 }
0x195b   : > { %8054 = vmatpush.bf16.msrb.mxu1 %v11338_v51  ;;  %8067 = vmatpush.bf16.msrb.mxu2 %v11466_v31  ;;  %v11290_v34 = vor.u32 %v12812_v6, %v11287_v63  ;;  %v12772_v51 = vld [vmem:[#allocation39 + $0x94c] sm:$0xf]  ;;  %v11127_v31 = vld [vmem:[#allocation39 + $0x958] sm:$0xf0] }
0x195c   : > { %8010 = vmatmul.bf16.vlgmr.msra.gmra.mxu1 %v15425_v1  ;;  %8023 = vmatmul.bf16.vlgmr.msra.gmra.mxu2 %v15427_v14  ;;  %v15542_v1 = vpop.f32.mrf.mxu1  ;;  %v11034_v14 = vor.u32 %v12748_v11, %v11031_v30  ;;  %v15544_v48 = vpop.f32.mrf.mxu3  ;;  %v11130_v3 = vor.u32 %v12772_v51, %v11127_v31  ;;  %v12832_v53 = vld [vmem:[#allocation39 + $0xb2c] sm:$0xf]  ;;  %v11114_v30 = vor.u32 %v12768_v16, %v11111_v8  ;;  %v11095_v2 = vld [vmem:[#allocation39 + $0x918] sm:$0xf0] }
0x195d   : > { %v12796_v23 = vld [vmem:[#allocation39 + $0xa0c] sm:$0xf]  ;;  %v11223_v10 = vld [vmem:[#allocation39 + $0xa18] sm:$0xf0] }
0x195e   : > { %8029 = vmatpush.bf16.msra.mxu3 %v11066_v24  ;;  %8042 = vmatpush.bf16.msrb.mxu0 %v11194_v40  ;;  %v7792_v62 = vpop.f32.mrf.mxu0  ;;  %v11002_v40 = vor.u32 %v12740_v33, %v10999_v29  ;;  %v11351_v32 = vld [vmem:[#allocation39 + $0xb18] sm:$0xf0]  ;;  %v12888_v45 = vld [vmem:[#allocation39 + $0xcec] sm:$0xf] }
0x195f   : > { %8055 = vmatpush.bf16.msrb.mxu1 %v11322_v13  ;;  %8068 = vmatpush.bf16.msrb.mxu2 %v11450_v15  ;;  %v15546_v52 = vpop.f32.mrf.mxu2  ;;  %v10983_v13 = vld [vmem:[#allocation39 + $0x838] sm:$0xf0]  ;;  %v11258_v15 = vor.u32 %v12804_v42, %v11255_v57  ;;  %v12952_v35 = vld [vmem:[#allocation39 + $0xeec] sm:$0xf] }
0x1960   : > { %v10986_v11 = vor.u32 %v12736_v12, %v10983_v13  ;;  %v11719_v21 = vld [vmem:[#allocation39 + $0xdf8] sm:$0xf0]  ;;  %v12984_v38 = vld [vmem:[#allocation39 + $0xfec] sm:$0xf] }
0x1961   : > { %v11847_v44 = vld [vmem:[#allocation39 + $0xef8] sm:$0xf0]  ;;  %v12916_v57 = vld [vmem:[#allocation39 + $0xdcc] sm:$0xf] }
0x1962   : > { %8030 = vmatpush.bf16.msra.mxu3 %v11050_v17  ;;  %8043 = vmatpush.bf16.msrb.mxu0 %v11178_v18  ;;  %v11367_v17 = vld [vmem:[#allocation39 + $0xb38] sm:$0xf0]  ;;  %v12732_v18 = vld [vmem:[#allocation39 + $0x80c] sm:$0xf]  ;;  %v11850_v31 = vor.u32 %v12952_v35, %v11847_v44 }
0x1963   : > { %8056 = vmatpush.bf16.msrb.mxu1 %v11306_v4  ;;  %8069 = vmatpush.bf16.msrb.mxu2 %v11434_v20  ;;  %v10967_v4 = vld [vmem:[#allocation39 + $0x818] sm:$0xf0]  ;;  %v12764_v20 = vld [vmem:[#allocation39 + $0x90c] sm:$0xf]  ;;  %v11370_v6 = vor.u32 %v12832_v53, %v11367_v17 }
0x1964   : > { %v7805_v24 = vpop.f32.mrf.mxu1  ;;  %v7779_v63 = vpop.f32.mrf.mxu3  ;;  %v10970_v36 = vor.u32 %v12732_v18, %v10967_v4  ;;  %v11098_v27 = vor.u32 %v12764_v20, %v11095_v2  ;;  %v11575_v51 = vld [vmem:[#allocation39 + $0xcd8] sm:$0xf0]  ;;  %v12948_v55 = vld [vmem:[#allocation39 + $0xecc] sm:$0xf] }
0x1965   : > { %v11703_v54 = vld [vmem:[#allocation39 + $0xdd8] sm:$0xf0]  ;;  %v12980_v24 = vld [vmem:[#allocation39 + $0xfcc] sm:$0xf] }
0x1966   : > { %8031 = vmatpush.bf16.msra.mxu3 %v11034_v14  ;;  %8044 = vmatpush.bf16.msrb.mxu0 %v11162_v28  ;;  %v12828_v14 = vld [vmem:[#allocation39 + $0xb0c] sm:$0xf]  ;;  %v11831_v62 = vld [vmem:[#allocation39 + $0xed8] sm:$0xf0]  ;;  %v11706_v12 = vor.u32 %v12916_v57, %v11703_v54 }
0x1967   : > { %8057 = vmatpush.bf16.msrb.mxu1 %v11290_v34  ;;  %8070 = vmatpush.bf16.msrb.mxu2 %v11418_v19  ;;  %v7818_v28 = vpop.f32.mrf.mxu2  ;;  %v11591_v34 = vld [vmem:[#allocation39 + $0xcf8] sm:$0xf0]  ;;  %v12920_v19 = vld [vmem:[#allocation39 + $0xdec] sm:$0xf]  ;;  %v11354_v33 = vor.u32 %v12828_v14, %v11351_v32 }
0x1968   : > { %v11594_v29 = vor.u32 %v12888_v45, %v11591_v34  ;;  %v12880_v13 = vld [vmem:[#allocation39 + $0xcac] sm:$0xf]  ;;  %v11687_v58 = vld [vmem:[#allocation39 + $0xdb8] sm:$0xf0] }
0x1969   : > { %v12912_v8 = vld [vmem:[#allocation39 + $0xdac] sm:$0xf]  ;;  %v11815_v53 = vld [vmem:[#allocation39 + $0xeb8] sm:$0xf0] }
0x196a   : > { %8032 = vmatpush.bf16.msra.mxu3 %v11018_v43  ;;  %8045 = vmatpush.bf16.msrb.mxu0 %v11146_v46  ;;  %v11975_v43 = vld [vmem:[#allocation39 + $0xff8] sm:$0xf0]  ;;  %v11226_v46 = vor.u32 %v12796_v23, %v11223_v10  ;;  %v12944_v9 = vld [vmem:[#allocation39 + $0xeac] sm:$0xf] }
0x196b   : > { %8058 = vmatpush.bf16.msrb.mxu1 %v11274_v50  ;;  %8071 = vmatpush.bf16.msrb.mxu2 %v11402_v5  ;;  %v11722_v50 = vor.u32 %v12920_v19, %v11719_v21  ;;  %v12884_v5 = vld [vmem:[#allocation39 + $0xccc] sm:$0xf]  ;;  %v11978_v42 = vor.u32 %v12984_v38, %v11975_v43  ;;  %v11943_v18 = vld [vmem:[#allocation39 + $0xfb8] sm:$0xf0]  ;;  %v11818_v2 = vor.u32 %v12944_v9, %v11815_v53 }
0x196c   : > { %v12976_v17 = vld [vmem:[#allocation39 + $0xfac] sm:$0xf]  ;;  %v11543_v20 = vld [vmem:[#allocation39 + $0xc98] sm:$0xf0] }
0x196d   : > { %v12876_v4 = vld [vmem:[#allocation39 + $0xc8c] sm:$0xf]  ;;  %v11799_v63 = vld [vmem:[#allocation39 + $0xe98] sm:$0xf0] }
0x196e   : > { %8033 = vmatpush.bf16.msra.mxu3 %v11002_v40  ;;  %8046 = vmatpush.bf16.msrb.mxu0 %v11130_v3  ;;  %v11959_v40 = vld [vmem:[#allocation39 + $0xfd8] sm:$0xf0]  ;;  %v11578_v3 = vor.u32 %v12884_v5, %v11575_v51  ;;  %v12972_v23 = vld [vmem:[#allocation39 + $0xf8c] sm:$0xf] }
0x196f   : > { %8059 = vmatpush.bf16.msrb.mxu1 %v11258_v15  ;;  %8072 = vmatpush.bf16.msrb.mxu2 %v11386_v7  ;;  %v11559_v15 = vld [vmem:[#allocation39 + $0xcb8] sm:$0xf0]  ;;  %v11834_v7 = vor.u32 %v12948_v55, %v11831_v62  ;;  %v11962_v16 = vor.u32 %v12980_v24, %v11959_v40  ;;  %v12872_v32 = vld [vmem:[#allocation39 + $0xc6c] sm:$0xf] }
0x1970   : > { %v11927_v10 = vld [vmem:[#allocation39 + $0xf98] sm:$0xf0]  ;;  %v12904_v21 = vld [vmem:[#allocation39 + $0xd6c] sm:$0xf] }
0x1971   : > { %v11527_v45 = vld [vmem:[#allocation39 + $0xc78] sm:$0xf0]  ;;  %v11930_v19 = vor.u32 %v12972_v23, %v11927_v10  ;;  %v12968_v44 = vld [vmem:[#allocation39 + $0xf6c] sm:$0xf] }
0x1972   : > { %8034 = vmatpush.bf16.msra.mxu3 %v10986_v11  ;;  %8047 = vmatpush.bf16.msrb.mxu0 %v11114_v30  ;;  %v11562_v11 = vor.u32 %v12880_v13, %v11559_v15  ;;  %v11690_v30 = vor.u32 %v12912_v8, %v11687_v58  ;;  %v11655_v35 = vld [vmem:[#allocation39 + $0xd78] sm:$0xf0]  ;;  %v11530_v43 = vor.u32 %v12872_v32, %v11527_v45  ;;  %v12932_v57 = vld [vmem:[#allocation39 + $0xe4c] sm:$0xf]  ;;  %v12037_v45 = vld [vmem:[#allocation42 + $0x70] sm:$0xf] }
0x1973   : > { %8060 = vmatpush.bf16.msrb.mxu1 %v11242_v22  ;;  %8073 = vmatpush.bf16.msrb.mxu2 %v11370_v6  ;;  %v11946_v22 = vor.u32 %v12976_v17, %v11943_v18  ;;  %v11671_v6 = vld [vmem:[#allocation39 + $0xd98] sm:$0xf0]  ;;  %v12964_v62 = vld [vmem:[#allocation39 + $0xf4c] sm:$0xf] }
0x1974   : > { %v11911_v38 = vld [vmem:[#allocation39 + $0xf78] sm:$0xf0]  ;;  %v12896_v9 = vld [vmem:[#allocation39 + $0xd2c] sm:$0xf] }
0x1975   : > { %v11914_v5 = vor.u32 %v12968_v44, %v11911_v38  ;;  %v11767_v55 = vld [vmem:[#allocation39 + $0xe58] sm:$0xf0]  ;;  %v12928_v17 = vld [vmem:[#allocation39 + $0xe2c] sm:$0xf] }
0x1976   : > { %8035 = vmatpush.bf16.msra.mxu3 %v10970_v36  ;;  %8048 = vmatpush.bf16.msrb.mxu0 %v11098_v27  ;;  %v15552_v14 = vpop.f32.mrf.mxu0  ;;  %v12936_v36 = vld [vmem:[#allocation39 + $0xe6c] sm:$0xf]  ;;  %v11783_v27 = vld [vmem:[#allocation39 + $0xe78] sm:$0xf0]  ;;  %v11770_v8 = vor.u32 %v12932_v57, %v11767_v55 }
0x1977   : > { %8061 = vmatpush.bf16.msrb.mxu1 %v11226_v46  ;;  %8074 = vmatpush.bf16.msrb.mxu2 %v11354_v33  ;;  %v11658_v46 = vor.u32 %v12904_v21, %v11655_v35  ;;  %v12868_v33 = vld [vmem:[#allocation39 + $0xc4c] sm:$0xf]  ;;  %v11895_v24 = vld [vmem:[#allocation39 + $0xf58] sm:$0xf0] }
0x1978   : > { %v11898_v58 = vor.u32 %v12964_v62, %v11895_v24  ;;  %v11623_v53 = vld [vmem:[#allocation39 + $0xd38] sm:$0xf0]  ;;  %v12924_v23 = vld [vmem:[#allocation39 + $0xe0c] sm:$0xf] }
0x1979   : > { %8036 = vmatmul.bf16.vlgmr.msra.gmra.mxu3 %v15450_v39  ;;  %8049 = vmatmul.bf16.vlgmr.msrb.gmra.mxu0 %v15452_v41  ;;  %v12908_v39 = vld [vmem:[#allocation39 + $0xd8c] sm:$0xf]  ;;  %v11751_v18 = vld [vmem:[#allocation39 + $0xe38] sm:$0xf0] }
0x197a   : > { %8080 = vmatpush.bf16.msrb.mxu3 %v11594_v29  ;;  %8093 = vmatpush.bf16.msra.mxu0 %v11722_v50  ;;  %v12940_v41 = vld [vmem:[#allocation39 + $0xe8c] sm:$0xf]  ;;  %v11674_v28 = vor.u32 %v12908_v39, %v11671_v6  ;;  %v11511_v29 = vld [vmem:[#allocation39 + $0xc58] sm:$0xf0]  ;;  %v11786_v50 = vor.u32 %v12936_v36, %v11783_v27  ;;  %v11754_v39 = vor.u32 %v12928_v17, %v11751_v18  ;;  %v12165_v27 = vld [vmem:[#allocation42 + $0x170] sm:$0xf] }
0x197b   : > { %8106 = vmatpush.bf16.msra.mxu1 %v11850_v31  ;;  %8119 = vmatpush.bf16.msra.mxu2 %v11978_v42  ;;  %v11802_v34 = vor.u32 %v12940_v41, %v11799_v63  ;;  %v12900_v31 = vld [vmem:[#allocation39 + $0xd4c] sm:$0xf]  ;;  %v11639_v42 = vld [vmem:[#allocation39 + $0xd58] sm:$0xf0]  ;;  %v11514_v13 = vor.u32 %v12868_v33, %v11511_v29  ;;  %v12029_v29 = vld [vmem:[#allocation42 + $0x60] sm:$0xf] }
0x197c   : > { %8062 = vmatmul.bf16.vlgmr.msrb.gmra.mxu1 %v15454_v47  ;;  %8075 = vmatmul.bf16.vlgmr.msrb.gmra.mxu2 %v15456_v49  ;;  %v15554_v47 = vpop.f32.mrf.mxu1  ;;  %v11546_v49 = vor.u32 %v12876_v4, %v11543_v20  ;;  %v15556_v51 = vpop.f32.mrf.mxu3  ;;  %v11642_v15 = vor.u32 %v12900_v31, %v11639_v42  ;;  %v12860_v20 = vld [vmem:[#allocation39 + $0xc0c] sm:$0xf]  ;;  %v11607_v63 = vld [vmem:[#allocation39 + $0xd18] sm:$0xf0]  ;;  %v12093_v31 = vld [vmem:[#allocation42 + $0xe0] sm:$0xf] }
0x197d   : > { %v11735_v10 = vld [vmem:[#allocation39 + $0xe18] sm:$0xf0]  ;;  %v13016_v42 = vld [vmem:[#allocation42 + $0xe4] sm:$0xf0]  ;;  %v12077_v17 = vld [vmem:[#allocation42 + $0xc0] sm:$0xf] }
0x197e   : > { %8081 = vmatpush.bf16.msrb.mxu3 %v11578_v3  ;;  %8094 = vmatpush.bf16.msra.mxu0 %v11706_v12  ;;  %v7844_v40 = vpop.f32.mrf.mxu0  ;;  %v7778_v3 = vadd.f32 %v15544_v48, %v15534_v59  ;;  %v11626_v48 = vor.u32 %v12896_v9, %v11623_v53  ;;  %v11863_v32 = vld [vmem:[#allocation39 + $0xf18] sm:$0xf0]  ;;  %v11738_v38 = vor.u32 %v12924_v23, %v11735_v10  ;;  %v13032_v55 = vld [vmem:[#allocation42 + $0x164] sm:$0xf0]  ;;  %v12013_v9 = vld [vmem:[#allocation42 + $0x40] sm:$0xf] }
0x197f   : > { %8107 = vmatpush.bf16.msra.mxu1 %v11834_v7  ;;  %8120 = vmatpush.bf16.msra.mxu2 %v11962_v16  ;;  %v15558_v54 = vpop.f32.mrf.mxu2  ;;  %v12864_v7 = vld [vmem:[#allocation39 + $0xc2c] sm:$0xf]  ;;  %v11495_v16 = vld [vmem:[#allocation39 + $0xc38] sm:$0xf0]  ;;  %v12094_v40 = vor.u32 %v13016_v42, %v12093_v31 }
0x1980   : > { %v7791_v4 = vadd.f32 %v15540_v25, %v7778_v3  ;;  %v11498_v59 = vor.u32 %v12864_v7, %v11495_v16  ;;  %v13002_v25 = vld [vmem:[#allocation42 + $0x74] sm:$0xf0]  ;;  %v12021_v3 = vld [vmem:[#allocation42 + $0x50] sm:$0xf]  ;;  %v12996_v53 = vld [vmem:[#allocation42 + $0x44] sm:$0xf0] }
0x1981   : > { %v13034_v44 = vld [vmem:[#allocation42 + $0x174] sm:$0xf0]  ;;  %v12149_v7 = vld [vmem:[#allocation42 + $0x150] sm:$0xf]  ;;  %v13012_v18 = vld [vmem:[#allocation42 + $0xc4] sm:$0xf0] }
0x1982   : > { %8082 = vmatpush.bf16.msrb.mxu3 %v11562_v11  ;;  %8095 = vmatpush.bf16.msra.mxu0 %v11690_v30  ;;  %v12960_v11 = vld [vmem:[#allocation39 + $0xf2c] sm:$0xf]  ;;  %v11879_v30 = vld [vmem:[#allocation39 + $0xf38] sm:$0xf0]  ;;  %v7804_v21 = vadd.f32 %v15542_v1, %v7791_v4  ;;  %v12157_v1 = vld [vmem:[#allocation42 + $0x160] sm:$0xf]  ;;  %v12014_v4 = vor.u32 %v12996_v53, %v12013_v9 }
0x1983   : > { %8108 = vmatpush.bf16.msra.mxu1 %v11818_v2  ;;  %8121 = vmatpush.bf16.msra.mxu2 %v11946_v22  ;;  %v11479_v2 = vld [vmem:[#allocation39 + $0xc18] sm:$0xf0]  ;;  %v12892_v22 = vld [vmem:[#allocation39 + $0xd0c] sm:$0xf]  ;;  %v11882_v6 = vor.u32 %v12960_v11, %v11879_v30  ;;  %v12141_v11 = vld [vmem:[#allocation42 + $0x140] sm:$0xf] }
0x1984   : > { %v7857_v12 = vpop.f32.mrf.mxu1  ;;  %v7831_v41 = vpop.f32.mrf.mxu3  ;;  %v11482_v35 = vor.u32 %v12860_v20, %v11479_v2  ;;  %v11610_v36 = vor.u32 %v12892_v22, %v11607_v63  ;;  %v7817_v57 = vadd.f32 %v15546_v52, %v7804_v21  ;;  %v13014_v52 = vld [vmem:[#allocation42 + $0xd4] sm:$0xf0]  ;;  %v12069_v2 = vld [vmem:[#allocation42 + $0xb0] sm:$0xf]  ;;  %v13024_v21 = vld [vmem:[#allocation42 + $0x124] sm:$0xf0] }
0x1985   : > { %v12158_v12 = vor.u32 %v13032_v55, %v12157_v1  ;;  %v13030_v16 = vld [vmem:[#allocation42 + $0x154] sm:$0xf0]  ;;  %v11981_v55 = vld [vmem:[#allocation42] sm:$0xf]  ;;  %v12167_v9 = vld [vmem:[#allocation42 + $0x178] sm:$0xf0] }
0x1986   : > { %8083 = vmatpush.bf16.msrb.mxu3 %v11546_v49  ;;  %8096 = vmatpush.bf16.msra.mxu0 %v11674_v28  ;;  %v12956_v28 = vld [vmem:[#allocation39 + $0xf0c] sm:$0xf]  ;;  %v7830_v62 = vadd.f32 %v15556_v51, %v7817_v57  ;;  %v12994_v20 = vld [vmem:[#allocation42 + $0x34] sm:$0xf0] }
0x1987   : > { %8109 = vmatpush.bf16.msra.mxu1 %v11802_v34  ;;  %8122 = vmatpush.bf16.msra.mxu2 %v11930_v19  ;;  %v7870_v49 = vpop.f32.mrf.mxu2  ;;  %v12101_v34 = vld [vmem:[#allocation42 + $0xf0] sm:$0xf]  ;;  %v13018_v19 = vld [vmem:[#allocation42 + $0xf4] sm:$0xf0] }
0x1988   : > { %v12102_v33 = vor.u32 %v13018_v19, %v12101_v34  ;;  %v7843_v51 = vadd.f32 %v15552_v14, %v7830_v62  ;;  %v12078_v14 = vor.u32 %v13012_v18, %v12077_v17  ;;  %v13010_v22 = vld [vmem:[#allocation42 + $0xb4] sm:$0xf0]  ;;  %v12125_v19 = vld [vmem:[#allocation42 + $0x120] sm:$0xf]  ;;  %v12988_v62 = vld [vmem:[#allocation42 + $0x4] sm:$0xf0] }
0x1989   : > { %v12070_v23 = vor.u32 %v13010_v22, %v12069_v2  ;;  %v13022_v31 = vld [vmem:[#allocation42 + $0x114] sm:$0xf0]  ;;  %v11982_v53 = vor.u32 %v12988_v62, %v11981_v55  ;;  %v8132_v18 = vmax.f32 %v15500_v37, 0.0  ;;  %v12159_v2 = vld [vmem:[#allocation42 + $0x168] sm:$0xf0] }
0x198a   : > { %8084 = vmatpush.bf16.msrb.mxu3 %v11530_v43  ;;  %8097 = vmatpush.bf16.msra.mxu0 %v11658_v46  ;;  %v11866_v43 = vor.u32 %v12956_v28, %v11863_v32  ;;  %v12038_v46 = vor.u32 %v13002_v25, %v12037_v45  ;;  %v12992_v28 = vld [vmem:[#allocation42 + $0x24] sm:$0xf0]  ;;  %v12061_v32 = vld [vmem:[#allocation42 + $0xa0] sm:$0xf] }
0x198b   : > { %8110 = vmatpush.bf16.msra.mxu1 %v11786_v50  ;;  %8123 = vmatpush.bf16.msra.mxu2 %v11914_v5  ;;  %v12166_v50 = vor.u32 %v13034_v44, %v12165_v27  ;;  %v13000_v5 = vld [vmem:[#allocation42 + $0x64] sm:$0xf0] }
0x198c   : > { %v12030_v24 = vor.u32 %v13000_v5, %v12029_v29  ;;  %v13008_v45 = vld [vmem:[#allocation42 + $0xa4] sm:$0xf0]  ;;  %v13006_v29 = vld [vmem:[#allocation42 + $0x94] sm:$0xf0]  ;;  %v12117_v5 = vld [vmem:[#allocation42 + $0x110] sm:$0xf] }
0x198d   : > { %v12062_v44 = vor.u32 %v13008_v45, %v12061_v32 }
0x198e   : > { %8085 = vmatpush.bf16.msrb.mxu3 %v11514_v13  ;;  %8098 = vmatpush.bf16.msra.mxu0 %v11642_v15  ;;  %v12998_v13 = vld [vmem:[#allocation42 + $0x54] sm:$0xf0]  ;;  %v12085_v15 = vld [vmem:[#allocation42 + $0xd0] sm:$0xf] }
0x198f   : > { %8111 = vmatpush.bf16.msra.mxu1 %v11770_v8  ;;  %8124 = vmatpush.bf16.msra.mxu2 %v11898_v58  ;;  %v12022_v8 = vor.u32 %v12998_v13, %v12021_v3  ;;  %v12086_v58 = vor.u32 %v13014_v52, %v12085_v15  ;;  %v12109_v13 = vld [vmem:[#allocation42 + $0x100] sm:$0xf]  ;;  %v13020_v15 = vld [vmem:[#allocation42 + $0x104] sm:$0xf0] }
0x1992   : > { %8086 = vmatpush.bf16.msrb.mxu3 %v11498_v59  ;;  %8099 = vmatpush.bf16.msra.mxu0 %v11626_v48  ;;  %v12005_v59 = vld [vmem:[#allocation42 + $0x30] sm:$0xf] }
0x1993   : > { %8112 = vmatpush.bf16.msra.mxu1 %v11754_v39  ;;  %8125 = vmatpush.bf16.msra.mxu2 %v11882_v6  ;;  %v12133_v39 = vld [vmem:[#allocation42 + $0x130] sm:$0xf]  ;;  %v13026_v6 = vld [vmem:[#allocation42 + $0x134] sm:$0xf0]  ;;  %v12006_v63 = vor.u32 %v12994_v20, %v12005_v59  ;;  %v13015_v59 = vld [vmem:[#allocation42 + $0xe4] sm:$0xf] }
0x1994   : > { %v12134_v10 = vor.u32 %v13026_v6, %v12133_v39  ;;  %v13031_v20 = vld [vmem:[#allocation42 + $0x164] sm:$0xf]  ;;  %v15577_v39 = vpack.c.bf16 %v8132_v18, %v8132_v18  ;;  %v12989_v18 = vld [vmem:[#allocation42 + $0x14] sm:$0xf] }
0x1996   : > { %8087 = vmatpush.bf16.msrb.mxu3 %v11482_v35  ;;  %8100 = vmatpush.bf16.msra.mxu0 %v11610_v36  ;;  %v7894_v30 = vpop.f32.mrf.mxu0 }
0x1997   : > { %8113 = vmatpush.bf16.msra.mxu1 %v11738_v38  ;;  %8126 = vmatpush.bf16.msra.mxu2 %v11866_v43  ;;  %v11989_v38 = vld [vmem:[#allocation42 + $0x10] sm:$0xf]  ;;  %v12126_v43 = vor.u32 %v13024_v21, %v12125_v19  ;;  %v12015_v19 = vld [vmem:[#allocation42 + $0x48] sm:$0xf0]  ;;  %v13011_v21 = vld [vmem:[#allocation42 + $0xc4] sm:$0xf] }
0x1999   : > { %8088 = vmatmul.bf16.vlgmr.msrb.gmra.mxu3 %v15466_v60  ;;  %8101 = vmatmul.bf16.vlgmr.msra.gmra.mxu0 %v15468_v61  ;;  %v12150_v60 = vor.u32 %v13030_v16, %v12149_v7  ;;  %v13028_v61 = vld [vmem:[#allocation42 + $0x144] sm:$0xf0]  ;;  %v13001_v7 = vld [vmem:[#allocation42 + $0x74] sm:$0xf]  ;;  %v12039_v16 = vld [vmem:[#allocation42 + $0x78] sm:$0xf0] }
0x199a   : > { %8530 = vmatpush.bf16.msra.mxu3 %v12038_v46  ;;  %8543 = vmatpush.bf16.msrb.mxu0 %v12102_v33  ;;  %v12142_v48 = vor.u32 %v13028_v61, %v12141_v11  ;;  %v12990_v46 = vld [vmem:[#allocation42 + $0x14] sm:$0xf0]  ;;  %v12053_v33 = vld [vmem:[#allocation42 + $0x90] sm:$0xf]  ;;  %v8133_v11 = vmax.f32 %v15528_v56, 0.0  ;;  %v12110_v61 = vor.u32 %v13020_v15, %v12109_v13 }
0x199b   : > { %8556 = vmatpush.bf16.msrb.mxu1 %v12166_v50  ;;  %8127 = vmatmul.bf16.vlgmr.msra.gmra.mxu2 %v15472_v26  ;;  %v7907_v26 = vpop.f32.mrf.mxu1  ;;  %v11990_v57 = vor.u32 %v12990_v46, %v11989_v38  ;;  %v12054_v1 = vor.u32 %v13006_v29, %v12053_v33  ;;  %v12993_v33 = vld [vmem:[#allocation42 + $0x34] sm:$0xf]  ;;  %v12007_v29 = vld [vmem:[#allocation42 + $0x38] sm:$0xf0]  ;;  %v12063_v15 = vld [vmem:[#allocation42 + $0xa8] sm:$0xf0] }
0x199c   : > { %8114 = vmatmul.bf16.vlgmr.msra.gmra.mxu1 %v15470_v0  ;;  %v7856_v0 = vadd.f32 %v15554_v47, %v7843_v51  ;;  %v11997_v47 = vld [vmem:[#allocation42 + $0x20] sm:$0xf]  ;;  %v7881_v49 = vpop.f32.mrf.mxu3  ;;  %v13017_v51 = vld [vmem:[#allocation42 + $0xf4] sm:$0xf]  ;;  %v15579_v37 = vpack.c.bf16 %v8133_v11, %v8133_v11  ;;  %v12010_v55 = vor.u32 %v12993_v33, %v12007_v29  ;;  %v11991_v11 = vld [vmem:[#allocation42 + $0x18] sm:$0xf0] }
0x199d   : > { %v11998_v27 = vor.u32 %v12992_v28, %v11997_v47  ;;  %v13013_v47 = vld [vmem:[#allocation42 + $0xd4] sm:$0xf]  ;;  %v12151_v28 = vld [vmem:[#allocation42 + $0x158] sm:$0xf0]  ;;  %v13044_v33 = vld [vmem:[#allocation42 + $0x1c4] sm:$0xf0] }
0x199e   : > { %8531 = vmatpush.bf16.msra.mxu3 %v12030_v24  ;;  %8544 = vmatpush.bf16.msrb.mxu0 %v12094_v40  ;;  %v7869_v41 = vadd.f32 %v15558_v54, %v7856_v0  ;;  %v7896_v35 = vpop.f32.mrf.mxu0  ;;  %v12045_v24 = vld [vmem:[#allocation42 + $0x80] sm:$0xf]  ;;  %v12118_v40 = vor.u32 %v13022_v31, %v12117_v5  ;;  %v12071_v5 = vld [vmem:[#allocation42 + $0xb8] sm:$0xf0]  ;;  %v13025_v31 = vld [vmem:[#allocation42 + $0x134] sm:$0xf] }
0x199f   : > { %8557 = vmatpush.bf16.msrb.mxu1 %v12158_v12  ;;  %v7920_v34 = vpop.f32.mrf.mxu2  ;;  %v13004_v12 = vld [vmem:[#allocation42 + $0x84] sm:$0xf0]  ;;  %v12079_v35 = vld [vmem:[#allocation42 + $0xc8] sm:$0xf0]  ;;  %v12197_v29 = vld [vmem:[#allocation42 + $0x1b0] sm:$0xf] }
0x19a0   : > { %v7882_v25 = vadd.f32 %v7881_v49, %v7869_v41  ;;  %v12046_v17 = vor.u32 %v13004_v12, %v12045_v24  ;;  %v12162_v41 = vor.u32 %v13031_v20, %v12159_v2  ;;  %v13029_v49 = vld [vmem:[#allocation42 + $0x154] sm:$0xf]  ;;  %v13007_v12 = vld [vmem:[#allocation42 + $0xa4] sm:$0xf] }
0x19a1   : > { %v12987_v2 = vld [vmem:[#allocation42 + $0x4] sm:$0xf] }
0x19a2   : > { %8532 = vmatpush.bf16.msra.mxu3 %v12022_v8  ;;  %8545 = vmatpush.bf16.msrb.mxu0 %v12086_v58  ;;  %v7895_v36 = vadd.f32 %v7894_v30, %v7882_v25  ;;  %v12103_v8 = vld [vmem:[#allocation42 + $0xf8] sm:$0xf0]  ;;  %v13033_v58 = vld [vmem:[#allocation42 + $0x174] sm:$0xf]  ;;  %v12042_v30 = vor.u32 %v13001_v7, %v12039_v16  ;;  %v12154_v25 = vor.u32 %v13029_v49, %v12151_v28  ;;  %v12127_v7 = vld [vmem:[#allocation42 + $0x128] sm:$0xf0] }
0x19a3   : > { %8558 = vmatpush.bf16.msrb.mxu1 %v12150_v60  ;;  %v7909_v54 = vpop.f32.mrf.mxu1  ;;  %v12106_v0 = vor.u32 %v13017_v51, %v12103_v8 }
0x19a4   : > { %v7908_v50 = vadd.f32 %v7907_v26, %v7895_v36  ;;  %v7883_v3 = vpop.f32.mrf.mxu3  ;;  %v12170_v26 = vor.u32 %v13033_v58, %v12167_v9  ;;  %v13027_v36 = vld [vmem:[#allocation42 + $0x144] sm:$0xf]  ;;  %v12143_v54 = vld [vmem:[#allocation42 + $0x148] sm:$0xf0] }
0x19a5   : > { %v12146_v46 = vor.u32 %v13027_v36, %v12143_v54  ;;  %v11999_v3 = vld [vmem:[#allocation42 + $0x28] sm:$0xf0]  ;;  %v13048_v36 = vld [vmem:[#allocation42 + $0x1e4] sm:$0xf0] }
0x19a6   : > { %8533 = vmatpush.bf16.msra.mxu3 %v12014_v4  ;;  %8546 = vmatpush.bf16.msrb.mxu0 %v12078_v14  ;;  %v7921_v42 = vadd.f32 %v7920_v34, %v7908_v50  ;;  %v12999_v4 = vld [vmem:[#allocation42 + $0x64] sm:$0xf]  ;;  %v12031_v14 = vld [vmem:[#allocation42 + $0x68] sm:$0xf0]  ;;  %v13009_v50 = vld [vmem:[#allocation42 + $0xb4] sm:$0xf] }
0x19a7   : > { %8559 = vmatpush.bf16.msrb.mxu1 %v12142_v48  ;;  %v7922_v52 = vpop.f32.mrf.mxu2  ;;  %v12095_v48 = vld [vmem:[#allocation42 + $0xe8] sm:$0xf0]  ;;  %v12034_v56 = vor.u32 %v12999_v4, %v12031_v14  ;;  %v12995_v34 = vld [vmem:[#allocation42 + $0x44] sm:$0xf]  ;;  %v12074_v62 = vor.u32 %v13009_v50, %v12071_v5  ;;  %v11994_v14 = vor.u32 %v12989_v18, %v11991_v11 }
0x19a8   : > { %v8134_v60 = vmax.f32 %v7921_v42, 0.0  ;;  %v12098_v6 = vor.u32 %v13015_v59, %v12095_v48  ;;  %v12135_v42 = vld [vmem:[#allocation42 + $0x138] sm:$0xf0]  ;;  %v13023_v52 = vld [vmem:[#allocation42 + $0x124] sm:$0xf] }
0x19a9   : > { %v12138_v24 = vor.u32 %v13025_v31, %v12135_v42  ;;  %v13042_v31 = vld [vmem:[#allocation42 + $0x1b4] sm:$0xf0] }
0x19aa   : > { %8534 = vmatpush.bf16.msra.mxu3 %v12006_v63  ;;  %8547 = vmatpush.bf16.msrb.mxu0 %v12070_v23  ;;  %v15575_v22 = vpack.c.bf16 %v8134_v60, %v8134_v60  ;;  %v12997_v63 = vld [vmem:[#allocation42 + $0x54] sm:$0xf]  ;;  %v12023_v23 = vld [vmem:[#allocation42 + $0x58] sm:$0xf0] }
0x19ab   : > { %8560 = vmatpush.bf16.msrb.mxu1 %v12134_v10  ;;  %v12087_v10 = vld [vmem:[#allocation42 + $0xd8] sm:$0xf0]  ;;  %v12026_v32 = vor.u32 %v12997_v63, %v12023_v23  ;;  %v12047_v63 = vld [vmem:[#allocation42 + $0x88] sm:$0xf0]  ;;  %v13019_v23 = vld [vmem:[#allocation42 + $0x104] sm:$0xf] }
0x19ac   : > { %v12090_v45 = vor.u32 %v13013_v47, %v12087_v10  ;;  %v12111_v47 = vld [vmem:[#allocation42 + $0x108] sm:$0xf0] }
0x19ae   : > { %8535 = vmatpush.bf16.msra.mxu3 %v11998_v27  ;;  %8548 = vmatpush.bf16.msrb.mxu0 %v12062_v44  ;;  %v12018_v44 = vor.u32 %v12995_v34, %v12015_v19 }
0x19af   : > { %8561 = vmatpush.bf16.msrb.mxu1 %v12126_v43  ;;  %v12082_v43 = vor.u32 %v13011_v21, %v12079_v35  ;;  %v12221_v35 = vld [vmem:[#allocation42 + $0x1e0] sm:$0xf] }
0x19b2   : > { %8536 = vmatpush.bf16.msra.mxu3 %v11990_v57  ;;  %8549 = vmatpush.bf16.msrb.mxu0 %v12054_v1  ;;  %v13460_v57 = vld [vmem:[#allocation40] sm:$0xf] }
0x19b3   : > { %8562 = vmatpush.bf16.msrb.mxu1 %v12118_v40  ;;  %v7295_v1 = vperm.slane %v13460_v57, 3  ;;  %v12991_v40 = vld [vmem:[#allocation42 + $0x24] sm:$0xf]  ;;  %v12198_v57 = vor.u32 %v13042_v31, %v12197_v29 }
0x19b4   : > { %v12002_v58 = vor.u32 %v12991_v40, %v11999_v3  ;;  %v13038_v40 = vld [vmem:[#allocation42 + $0x194] sm:$0xf0] }
0x19b6   : > { %8537 = vmatpush.bf16.msra.mxu3 %v11982_v53  ;;  %8550 = vmatpush.bf16.msrb.mxu0 %v12046_v17  ;;  %v7946_v27 = vpop.f32.mrf.mxu0  ;;  %v12066_v53 = vor.u32 %v13007_v12, %v12063_v15  ;;  %v12130_v17 = vor.u32 %v13023_v52, %v12127_v7  ;;  %v12173_v12 = vld [vmem:[#allocation42 + $0x180] sm:$0xf]  ;;  %v13049_v15 = vld [vmem:[#allocation42 + $0x1f4] sm:$0xf]  ;;  %v12231_v7 = vld [vmem:[#allocation42 + $0x1f8] sm:$0xf0] }
0x19b7   : > { %8563 = vmatpush.bf16.msrb.mxu1 %v12110_v61  ;;  %v13005_v61 = vld [vmem:[#allocation42 + $0x94] sm:$0xf] }
0x19b9   : > { %8538 = vmatmul.bf16.vlgmr.msra.gmra.mxu3 %v15577_v39  ;;  %8551 = vmatmul.bf16.vlgmr.msrb.gmra.mxu0 %v15579_v37  ;;  %v7959_v38 = vpop.f32.mrf.mxu1 }
0x19ba   : > { %8582 = vmatpush.bf16.msrb.mxu3 %v12042_v30  ;;  %8595 = vmatpush.bf16.msra.mxu0 %v12106_v0  ;;  %v12055_v30 = vld [vmem:[#allocation42 + $0x98] sm:$0xf0]  ;;  %v13021_v0 = vld [vmem:[#allocation42 + $0x114] sm:$0xf] }
0x19bb   : > { %8608 = vmatpush.bf16.msra.mxu1 %v12170_v26  ;;  %v12119_v26 = vld [vmem:[#allocation42 + $0x118] sm:$0xf0]  ;;  %v12058_v48 = vor.u32 %v13005_v61, %v12055_v30  ;;  %v13045_v61 = vld [vmem:[#allocation42 + $0x1d4] sm:$0xf] }
0x19bc   : > { %8564 = vmatmul.bf16.vlgmr.msrb.gmra.mxu1 %v15575_v22  ;;  %v7933_v13 = vpop.f32.mrf.mxu3  ;;  %v12122_v20 = vor.u32 %v13021_v0, %v12119_v26  ;;  %v12215_v30 = vld [vmem:[#allocation42 + $0x1d8] sm:$0xf0] }
0x19bd   : > { %v7934_v16 = vadd.f32 %v7933_v13, %v7295_v1  ;;  %v12189_v1 = vld [vmem:[#allocation42 + $0x1a0] sm:$0xf]  ;;  %v13036_v13 = vld [vmem:[#allocation42 + $0x184] sm:$0xf0]  ;;  %v12218_v26 = vor.u32 %v13045_v61, %v12215_v30 }
0x19be   : > { %8583 = vmatpush.bf16.msrb.mxu3 %v12034_v56  ;;  %8596 = vmatpush.bf16.msra.mxu0 %v12098_v6  ;;  %v7948_v8 = vpop.f32.mrf.mxu0  ;;  %v11983_v56 = vld [vmem:[#allocation42 + $0x8] sm:$0xf0]  ;;  %v13003_v6 = vld [vmem:[#allocation42 + $0x84] sm:$0xf]  ;;  %v12174_v52 = vor.u32 %v13036_v13, %v12173_v12 }
0x19bf   : > { %8609 = vmatpush.bf16.msra.mxu1 %v12162_v41  ;;  %v7972_v51 = vpop.f32.mrf.mxu2  ;;  %v7947_v9 = vadd.f32 %v7946_v27, %v7934_v16  ;;  %v11986_v49 = vor.u32 %v12987_v2, %v11983_v56  ;;  %v12050_v28 = vor.u32 %v13003_v6, %v12047_v63  ;;  %v12222_v27 = vor.u32 %v13048_v36, %v12221_v35  ;;  %v12199_v63 = vld [vmem:[#allocation42 + $0x1b8] sm:$0xf0]  ;;  %v12175_v35 = vld [vmem:[#allocation42 + $0x188] sm:$0xf0] }
0x19c1   : > { %v7961_v60 = vpop.f32.mrf.mxu1  ;;  %v7960_v4 = vadd.f32 %v7959_v38, %v7947_v9  ;;  %v12223_v9 = vld [vmem:[#allocation42 + $0x1e8] sm:$0xf0] }
0x19c2   : > { %8584 = vmatpush.bf16.msrb.mxu3 %v12026_v32  ;;  %8597 = vmatpush.bf16.msra.mxu0 %v12090_v45  ;;  %v12114_v32 = vor.u32 %v13019_v23, %v12111_v47  ;;  %v12229_v45 = vld [vmem:[#allocation42 + $0x1f0] sm:$0xf]  ;;  %v13039_v23 = vld [vmem:[#allocation42 + $0x1a4] sm:$0xf] }
0x19c3   : > { %8610 = vmatpush.bf16.msra.mxu1 %v12154_v25  ;;  %v15584_v59 = vadd.f32 %v7972_v51, %v7960_v4  ;;  %v13050_v25 = vld [vmem:[#allocation42 + $0x1f4] sm:$0xf0]  ;;  %v12234_v51 = vor.u32 %v13049_v15, %v12231_v7 }
0x19c4   : > { %v7935_v41 = vpop.f32.mrf.mxu3  ;;  %v12230_v19 = vor.u32 %v13050_v25, %v12229_v45  ;;  %v13058_v15 = vld [vmem:[#allocation45 + $0x38] sm:$0xff] }
0x19c5   : > { %v13041_v41 = vld [vmem:[#allocation42 + $0x1b4] sm:$0xf]  ;;  %v13066_v7 = vld [vmem:[#allocation45 + $0x78] sm:$0xff] }
0x19c6   : > { %8585 = vmatpush.bf16.msrb.mxu3 %v12018_v44  ;;  %8598 = vmatpush.bf16.msra.mxu0 %v12082_v43  ;;  %v12202_v47 = vor.u32 %v13041_v41, %v12199_v63  ;;  %v13062_v41 = vld [vmem:[#allocation45 + $0x58] sm:$0xff]  ;;  %v13061_v63 = vld [vmem:[#allocation45 + $0x50] sm:$0xff] }
0x19c7   : > { %8611 = vmatpush.bf16.msra.mxu1 %v12146_v46  ;;  %v7974_v10 = vpop.f32.mrf.mxu2  ;;  %8569 = vmatpush.bf16.msrb.mxu2 %v12230_v19  ;;  %v13046_v46 = vld [vmem:[#allocation42 + $0x1d4] sm:$0xf0]  ;;  %v13035_v19 = vld [vmem:[#allocation42 + $0x184] sm:$0xf] }
0x19c8   : > { %v12191_v10 = vld [vmem:[#allocation42 + $0x1a8] sm:$0xf0]  ;;  %v12178_v36 = vor.u32 %v13035_v19, %v12175_v35  ;;  %v13071_v19 = vld [vmem:[%s15755_s4 + $0x20] sm:$0xff] }
0x19c9   : > { %v13079_v35 = vld [vmem:[%s15757_s17 + $0x20] sm:$0xff] }
0x19ca   : > { %8586 = vmatpush.bf16.msrb.mxu3 %v12010_v55  ;;  %8599 = vmatpush.bf16.msra.mxu0 %v12074_v62  ;;  %v13040_v55 = vld [vmem:[#allocation42 + $0x1a4] sm:$0xf0] }
0x19cb   : > { %8612 = vmatpush.bf16.msra.mxu1 %v12138_v24  ;;  %8570 = vmatpush.bf16.msrb.mxu2 %v12222_v27  ;;  %v12190_v62 = vor.u32 %v13040_v55, %v12189_v1  ;;  %v12181_v24 = vld [vmem:[#allocation42 + $0x190] sm:$0xf]  ;;  %v8204_v1 = vld [vmem:[#allocation43] sm:$0x3] }
0x19cc   : > { %v12182_v3 = vor.u32 %v13038_v40, %v12181_v24 }
0x19ce   : > { %8587 = vmatpush.bf16.msrb.mxu3 %v12002_v58  ;;  %8600 = vmatpush.bf16.msra.mxu0 %v12066_v53  ;;  %v13047_v58 = vld [vmem:[#allocation42 + $0x1e4] sm:$0xf] }
0x19cf   : > { %8613 = vmatpush.bf16.msra.mxu1 %v12130_v17  ;;  %v12226_v60 = vor.u32 %v13047_v58, %v12223_v9  ;;  %v13056_v58 = vld [vmem:[#allocation45 + $0x28] sm:$0xff]  ;;  %v13055_v9 = vld [vmem:[#allocation45 + $0x20] sm:$0xff] }
0x19d2   : > { %8588 = vmatpush.bf16.msrb.mxu3 %v11994_v14  ;;  %8601 = vmatpush.bf16.msra.mxu0 %v12058_v48  ;;  %v13043_v14 = vld [vmem:[#allocation42 + $0x1c4] sm:$0xf]  ;;  %v12207_v48 = vld [vmem:[#allocation42 + $0x1c8] sm:$0xf0] }
0x19d3   : > { %8614 = vmatpush.bf16.msra.mxu1 %v12122_v20  ;;  %v12210_v20 = vor.u32 %v13043_v14, %v12207_v48 }
0x19d6   : > { %8589 = vmatpush.bf16.msrb.mxu3 %v11986_v49  ;;  %8602 = vmatpush.bf16.msra.mxu0 %v12050_v28  ;;  %v7998_v34 = vpop.f32.mrf.mxu0  ;;  %v13037_v28 = vld [vmem:[#allocation42 + $0x194] sm:$0xf] }
0x19d7   : > { %8615 = vmatpush.bf16.msra.mxu1 %v12114_v32  ;;  %v12183_v32 = vld [vmem:[#allocation42 + $0x198] sm:$0xf0] }
0x19d8   : > { %v12186_v25 = vor.u32 %v13037_v28, %v12183_v32  ;;  %v13081_v28 = vld [vmem:[%s15757_s17 + $0x30] sm:$0xff]  ;;  %v13072_v32 = vld [vmem:[%s15755_s4 + $0x28] sm:$0xff] }
0x19d9   : > { %8590 = vmatmul.bf16.vlgmr.msrb.gmra.mxu3 %v15577_v39  ;;  %8603 = vmatmul.bf16.vlgmr.msra.gmra.mxu0 %v15579_v37  ;;  %v8011_v21 = vpop.f32.mrf.mxu1  ;;  %v12213_v39 = vld [vmem:[#allocation42 + $0x1d0] sm:$0xf] }
0x19da   : > { %8616 = vmatmul.bf16.vlgmr.msra.gmra.mxu1 %v15575_v22  ;;  %v12214_v37 = vor.u32 %v13046_v46, %v12213_v39  ;;  %v12205_v22 = vld [vmem:[#allocation42 + $0x1c0] sm:$0xf]  ;;  %8767 = vmatpush.bf16.msra.mxu3 %v13058_v15  ;;  %v8811_v15 = vld [vmem:[#allocation48] sm:$0x1] }
0x19db   : > { %v12206_v5 = vor.u32 %v13044_v33, %v12205_v22  ;;  %8780 = vmatpush.bf16.msrb.mxu0 %v13066_v7 }
0x19dc   : > { %v7985_v54 = vpop.f32.mrf.mxu3  ;;  %8571 = vmatpush.bf16.msrb.mxu2 %v12214_v37 }
0x19dd   : > { %v7986_v18 = vadd.f32 %v7985_v54, %v15584_v59  ;;  %v12194_v59 = vor.u32 %v13039_v23, %v12191_v10  ;;  %v13060_v23 = vld [vmem:[#allocation45 + $0x48] sm:$0xff]  ;;  %v13074_v10 = vld [vmem:[%s15755_s4 + $0x38] sm:$0xff] }
0x19de   : > { %v8000_v38 = vpop.f32.mrf.mxu0  ;;  %8860 = vmatpush.bf16.msrb.mxu1 %v13074_v10 }
0x19df   : > { %v15589_v44 = vpop.f32.mrf.mxu2  ;;  %v7999_v4 = vadd.f32 %v7998_v34, %v7986_v18 }
0x19e0   : > { %8572 = vmatpush.bf16.msrb.mxu2 %v12206_v5 }
0x19e1   : > { %v8013_v43 = vpop.f32.mrf.mxu1  ;;  %v8012_v6 = vadd.f32 %v8011_v21, %v7999_v4 }
0x19e3   : > { %v8025_v49 = vadd.f32 %v15589_v44, %v8012_v6  ;;  %v13063_v6 = vld [vmem:[#allocation45 + $0x60] sm:$0xff] }
0x19e4   : > { %v7987_v50 = vpop.f32.mrf.mxu3  ;;  %8573 = vmatpush.bf16.msrb.mxu2 %v12198_v57 }
0x19e7   : > { %v8026_v42 = vpop.f32.mrf.mxu2 }
0x19e8   : > { %8574 = vmatpush.bf16.msrb.mxu2 %v12190_v62  ;;  %v8526_v62 = vperm.slane %v8204_v1, 0 }
0x19ec   : > { %8575 = vmatpush.bf16.msrb.mxu2 %v12182_v3 }
0x19f0   : > { %8576 = vmatpush.bf16.msrb.mxu2 %v12174_v52 }
0x19f4   : > { %8621 = vmatpush.bf16.msra.mxu2 %v12234_v51 }
0x19f6   : > { %v8050_v16 = vpop.f32.mrf.mxu0 }
0x19f8   : > { %8622 = vmatpush.bf16.msra.mxu2 %v12226_v60  ;;  %v13054_v60 = vld [vmem:[#allocation45 + $0x18] sm:$0xff] }
0x19f9   : > { %v8063_v8 = vpop.f32.mrf.mxu1 }
0x19fc   : > { %v8037_v53 = vpop.f32.mrf.mxu3  ;;  %8623 = vmatpush.bf16.msra.mxu2 %v12218_v26 }
0x19fd   : > { %v8038_v45 = vadd.f32 %v8037_v53, %v8025_v49  ;;  %v13053_v53 = vld [vmem:[#allocation45 + $0x10] sm:$0xff] }
0x19fe   : > { %v8052_v11 = vpop.f32.mrf.mxu0  ;;  %v13073_v49 = vld [vmem:[%s15755_s4 + $0x30] sm:$0xff] }
0x19ff   : > { %v8076_v17 = vpop.f32.mrf.mxu2  ;;  %v8051_v34 = vadd.f32 %v8050_v16, %v8038_v45  ;;  %v13057_v16 = vld [vmem:[#allocation45 + $0x30] sm:$0xff]  ;;  %v8527_v11 = vperm.slane %v8204_v1, 1  ;;  %8861 = vmatpush.bf16.msrb.mxu1 %v13073_v49  ;;  %v13080_v45 = vld [vmem:[%s15757_s17 + $0x28] sm:$0xff] }
0x1a00   : > { %8624 = vmatpush.bf16.msra.mxu2 %v12210_v20  ;;  %8768 = vmatpush.bf16.msra.mxu3 %v13057_v16  ;;  %v13052_v20 = vld [vmem:[#allocation45 + $0x8] sm:$0xff] }
0x1a01   : > { %v8065_v0 = vpop.f32.mrf.mxu1  ;;  %v8064_v21 = vadd.f32 %v8063_v8, %v8051_v34  ;;  %v13065_v8 = vld [vmem:[#allocation45 + $0x70] sm:$0xff] }
0x1a02   : > { %8781 = vmatpush.bf16.msrb.mxu0 %v13065_v8 }
0x1a03   : > { %v8077_v38 = vadd.f32 %v8076_v17, %v8064_v21  ;;  %8862 = vmatpush.bf16.msrb.mxu1 %v13072_v32 }
0x1a04   : > { %v8039_v2 = vpop.f32.mrf.mxu3  ;;  %8625 = vmatpush.bf16.msra.mxu2 %v12202_v47  ;;  %8769 = vmatpush.bf16.msra.mxu3 %v13056_v58  ;;  %v13059_v47 = vld [vmem:[#allocation45 + $0x40] sm:$0xff] }
0x1a05   : > { %v13064_v2 = vld [vmem:[#allocation45 + $0x68] sm:$0xff] }
0x1a06   : > { %8782 = vmatpush.bf16.msrb.mxu0 %v13064_v2 }
0x1a07   : > { %v8078_v56 = vpop.f32.mrf.mxu2  ;;  %8863 = vmatpush.bf16.msrb.mxu1 %v13071_v19 }
0x1a08   : > { %8626 = vmatpush.bf16.msra.mxu2 %v12194_v59  ;;  %8770 = vmatpush.bf16.msra.mxu3 %v13055_v9  ;;  %v13051_v56 = vld [vmem:[#allocation45] sm:$0xff]  ;;  %v13082_v59 = vld [vmem:[%s15756_s28 + $0x38] sm:$0xff] }
0x1a0a   : > { %8783 = vmatpush.bf16.msrb.mxu0 %v13063_v6 }
0x1a0c   : > { %8627 = vmatpush.bf16.msra.mxu2 %v12186_v25  ;;  %8771 = vmatpush.bf16.msra.mxu3 %v13054_v60 }
0x1a0e   : > { %8784 = vmatpush.bf16.msrb.mxu0 %v13062_v41 }
0x1a10   : > { %8628 = vmatpush.bf16.msra.mxu2 %v12178_v36  ;;  %8772 = vmatpush.bf16.msra.mxu3 %v13053_v53 }
0x1a12   : > { %8785 = vmatpush.bf16.msrb.mxu0 %v13061_v63 }
0x1a14   : > { %8773 = vmatpush.bf16.msra.mxu3 %v13052_v20 }
0x1a16   : > { %v8102_v54 = vpop.f32.mrf.mxu0  ;;  %8786 = vmatpush.bf16.msrb.mxu0 %v13060_v23 }
0x1a18   : > { %8774 = vmatpush.bf16.msra.mxu3 %v13051_v56 }
0x1a19   : > { %v8115_v27 = vpop.f32.mrf.mxu1 }
0x1a1a   : > { %8787 = vmatpush.bf16.msrb.mxu0 %v13059_v47 }
0x1a1c   : > { %v8089_v43 = vpop.f32.mrf.mxu3 }
0x1a1d   : > { %v8090_v39 = vadd.f32 %v8089_v43, %v8077_v38 }
0x1a1e   : > { %v8128_v46 = vpop.f32.mrf.mxu2  ;;  %v8104_v44 = vpop.f32.mrf.mxu0 }
0x1a1f   : > { %v8103_v37 = vadd.f32 %v8102_v54, %v8090_v39  ;;  %v13078_v44 = vld [vmem:[%s15757_s17 + $0x18] sm:$0xff] }
0x1a21   : > { %v8117_v22 = vpop.f32.mrf.mxu1  ;;  %v8116_v33 = vadd.f32 %v8115_v27, %v8103_v37  ;;  %v13070_v37 = vld [vmem:[%s15755_s4 + $0x18] sm:$0xff] }
0x1a22   : > { %8864 = vmatpush.bf16.msrb.mxu1 %v13070_v37  ;;  %v13069_v22 = vld [vmem:[%s15755_s4 + $0x10] sm:$0xff] }
0x1a23   : > { %v8129_v29 = vadd.f32 %v8128_v46, %v8116_v33  ;;  %v13077_v33 = vld [vmem:[%s15757_s17 + $0x10] sm:$0xff] }
0x1a24   : > { %v8091_v50 = vpop.f32.mrf.mxu3 }
0x1a25   : > { %v8135_v5 = vmax.f32 %v8129_v29, 0.0  ;;  %v13068_v29 = vld [vmem:[%s15755_s4 + $0x8] sm:$0xff] }
0x1a26   : > { %v8130_v31 = vpop.f32.mrf.mxu2  ;;  %8865 = vmatpush.bf16.msrb.mxu1 %v13069_v22  ;;  %v13076_v50 = vld [vmem:[%s15757_s17 + $0x8] sm:$0xff] }
0x1a27   : > { %v8203_v42 = vpack.c.bf16 %v8135_v5, %v8135_v5  ;;  %v13067_v5 = vld [vmem:[%s15755_s4] sm:$0xff] }
0x1a28   : > { %v13075_v31 = vld [vmem:[%s15757_s17] sm:$0xff] }
0x1a29   : > { %8577 = vmatmul.bf16.vlgmr.msrb.gmra.mxu2 %v8203_v42 }
0x1a2a   : > { %8939 = vmatpush.bf16.msrb.mxu2 %v13082_v59  ;;  %8866 = vmatpush.bf16.msrb.mxu1 %v13068_v29 }
0x1a2e   : > { %8940 = vmatpush.bf16.msrb.mxu2 %v13081_v28  ;;  %8867 = vmatpush.bf16.msrb.mxu1 %v13067_v5 }
0x1a32   : > { %8941 = vmatpush.bf16.msrb.mxu2 %v13080_v45 }
0x1a36   : > { %v8552_v57 = vpop.f32.mrf.mxu0  ;;  %8942 = vmatpush.bf16.msrb.mxu2 %v13079_v35 }
0x1a39   : > { %v8565_v55 = vpop.f32.mrf.mxu1  ;;  %8629 = vmatmul.bf16.vlgmr.msra.gmra.mxu2 %v8203_v42 }
0x1a3a   : > { %8943 = vmatpush.bf16.msrb.mxu2 %v13078_v44 }
0x1a3c   : > { %v8539_v24 = vpop.f32.mrf.mxu3 }
0x1a3d   : > { %v8540_v40 = vadd.f32 %v8539_v24, %v8526_v62 }
0x1a3e   : > { %v8554_v3 = vpop.f32.mrf.mxu0  ;;  %8944 = vmatpush.bf16.msrb.mxu2 %v13077_v33 }
0x1a3f   : > { %v8553_v12 = vadd.f32 %v8552_v57, %v8540_v40  ;;  %v8670_v57 = vld [vmem:[#allocation46] sm:$0x1] }
0x1a41   : > { %v8567_v13 = vpop.f32.mrf.mxu1  ;;  %v8566_v52 = vadd.f32 %v8565_v55, %v8553_v12 }
0x1a42   : > { %8945 = vmatpush.bf16.msrb.mxu2 %v13076_v50 }
0x1a44   : > { %v8541_v51 = vpop.f32.mrf.mxu3 }
0x1a46   : > { %8946 = vmatpush.bf16.msrb.mxu2 %v13075_v31 }
0x1a56   : > { %v8604_v17 = vpop.f32.mrf.mxu0 }
0x1a57   : > { %v8617_v18 = vpop.f32.mrf.mxu1 }
0x1a5c   : > { %v8591_v61 = vpop.f32.mrf.mxu3 }
0x1a5d   : > { %v8592_v30 = vadd.f32 %v8591_v61, %v8527_v11 }
0x1a5e   : > { %v8606_v26 = vpop.f32.mrf.mxu0 }
0x1a5f   : > { %v8605_v0 = vadd.f32 %v8604_v17, %v8592_v30  ;;  %v8619_v4 = vpop.f32.mrf.mxu1 }
0x1a61   : > { %v8618_v14 = vadd.f32 %v8617_v18, %v8605_v0 }
0x1a64   : > { %v8593_v48 = vpop.f32.mrf.mxu3 }
0x1aac   : > { %v8578_v25 = vpop.f32.mrf.mxu2 }
0x1aad   : > { %v8579_v34 = vadd.f32 %v8578_v25, %v8566_v52  ;;  %v8890_v52 = vld [vmem:[#allocation49] sm:$0x1] }
0x1aaf   : > { %v8634_v36 = vmax.f32 %v8579_v34, 0.0 }
0x1ab1   : > { %v8668_v21 = vpack.c.bf16 %v8634_v36, %v8634_v36 }
0x1ab3   : > { %8775 = vmatmul.bf16.vlgmr.msra.gmra.mxu3 %v8668_v21 }
0x1ab4   : > { %v8580_v54 = vpop.f32.mrf.mxu2 }
0x1abc   : > { %v8630_v27 = vpop.f32.mrf.mxu2 }
0x1abd   : > { %v8631_v38 = vadd.f32 %v8630_v27, %v8618_v14 }
0x1abf   : > { %v8635_v43 = vmax.f32 %v8631_v38, 0.0 }
0x1ac1   : > { %v8669_v39 = vpack.c.bf16 %v8635_v43, %v8635_v43 }
0x1ac3   : > { %8788 = vmatmul.bf16.vlgmr.msrb.gmra.mxu0 %v8669_v39 }
0x1ac4   : > { %v8632_v46 = vpop.f32.mrf.mxu2 }
0x1b36   : > { %v8776_v42 = vpop.f32.mrf.mxu3 }
0x1b37   : > { %v8777_v55 = vadd.f32 %v8776_v42, %v8670_v57 }
0x1b3e   : > { %v8778_v1 = vpop.f32.mrf.mxu3 }
0x1b40   : > { %v8789_v62 = vpop.f32.mrf.mxu0 }
0x1b41   : > { %v8790_v24 = vadd.f32 %v8789_v62, %v8777_v55 }
0x1b43   : > { %v8793_v40 = vmax.f32 %v8790_v24, 0.0 }
0x1b45   : > { %v8810_v3 = vpack.c.bf16 %v8793_v40, %v8793_v40 }
0x1b47   : > { %8868 = vmatmul.bf16.vlgmr.msrb.gmra.mxu1 %v8810_v3  ;;  %8947 = vmatmul.bf16.vlgmr.msrb.gmra.mxu2 %v8810_v3 }
0x1b48   : > { %v8791_v12 = vpop.f32.mrf.mxu0 }
0x1bc4   : > { %v8869_v13 = vpop.f32.mrf.mxu1 }
0x1bc5   : > { %v8870_v7 = vadd.f32 %v8869_v13, %v8811_v15 }
0x1bc7   : > { %v8873_v58 = vmax.f32 %v8870_v7, 0.0 }
0x1bca   : > { %v8948_v16 = vpop.f32.mrf.mxu2 }
0x1bcb   : > { %v8949_v51 = vadd.f32 %v8948_v16, %v8890_v52 }
0x1bcc   : > { %v8871_v8 = vpop.f32.mrf.mxu1 }
0x1bcd   : > { %v8952_v9 = vmax.f32 %v8949_v51, 0.0 }
0x1bcf   : > { %v8953_v60 = vmax.f32 %v8873_v58, %v8952_v9 }
0x1bd1   : > { %v8954_v53 = vsub.f32 %v8873_v58, %v8953_v60  ;;  %v8957_v17 = vsub.f32 %v8952_v9, %v8953_v60 }
0x1bd2   : > { %v8950_v18 = vpop.f32.mrf.mxu2 }
0x1bd3   : > { %v8955_v11 = vmul.f32 1.442695, %v8954_v53  ;;  %v8958_v61 = vmul.f32 1.442695, %v8957_v17 }
0x1bd5   : > { %13453 = vpow2.f32 %v8955_v11 }
0x1bd6   : > { %13455 = vpow2.f32 %v8958_v61 }
0x1bdb   : > { %v13454_v30 = vpop.eup %13453 }
0x1bdc   : > { %v13456_v0 = vpop.eup %13455 }
0x1bdd   : > { %v8960_v26 = vadd.f32 %v13456_v0, %v13454_v30 }
0x1bdf   : > { %13457 = vrcp.f32 %v8960_v26 }
0x1be5   : > { %v13458_v4 = vpop.eup %13457 }
0x1be6   : > { %v8962_v14 = vmul.f32 %v13458_v4, %v13454_v30  ;;  %v8965_v48 = vmul.f32 %v13458_v4, %v13456_v0 }
0x1be8   : > { %8964 = vst.msk [vmem:[%s1692_s18] sm:$0x1] %vm8963_vm10, %v8962_v14 }
0x1be9   : > { %8966 = vst.msk [vmem:[%s1695_s6] sm:$0x1] %vm8963_vm10, %v8965_v48 }
0x1bea PF: > { %s15760_s2 = sld [smem:[#allocation100_spill]]  ;;  %s15762_s28 = smov %s14329_s0 }
0x1beb   : > { %s15761_s22 = sld [smem:[#allocation101_spill]]  ;;  %s15763_s0 = smov %s14333_s1 }
0x1bf0   : > { %p106_p5 = scmp.ge.s32.totalorder %s15760_s2, 4  }
0x1bf1   : > { %s15764_s1 = smov %s15761_s22 }
0x1bf2   :  { %108 = sbr.rel (!%p106_p5) target bundleno = 97 (0x61), region = 424 }
0x1bf7   :  { %8996 = vsyncpa [#allocation9], 1 }
0x1bf8   :  { %8998 = vsyncpa [#allocation9 + $0x1], 1 }
0x1bf9   :  { %8999 = vsyncpa [#allocation11], 1 }
0x1bfa   :  { %9000 = vsyncpa [#allocation14], 1 }
0x1bfb   :  { %9001 = vsyncpa [#allocation17], 1 }
0x1bfc   :  { %9002 = vsyncpa [#allocation20], 1 }
0x1bfd   :  { %9003 = vsyncpa [#allocation23], 1 }
0x1bfe   :  { %9004 = vsyncpa [#allocation26], 1 }
0x1bff   :  { %9005 = vsyncpa [#allocation29], 1 }
0x1c00   :  { %9006 = vsyncpa [#allocation32], 1 }
0x1c01   :  { %9007 = vsyncpa [#allocation35], 1 }
0x1c02   :  { %9008 = vsyncpa [#allocation38], 1 }
0x1c03   :  { %9009 = vsyncpa [#allocation41], 1 }
0x1c04   :  { %9010 = vsyncpa [#allocation44], 1 }
0x1c05   :  { %9011 = vsyncpa [#allocation47], 1 }
0x1c06   :  { %9012 = vsyncpa [#allocation50], 1 }

</bundles_post_ra>
